<compile_context>
chip_gen: v5e
topology: v5e:2x2
jax: 0.10.0
libtpu: 0.0.40
codegen_flags: <defaults>
</compile_context>

<pallas_src>
import functools
import itertools

import numpy as np
import jax
import jax.numpy as jnp
from jax.experimental import pallas as pl
from jax.experimental.pallas import tpu as pltpu


def _round_up(v, m):
    return (v + m - 1) // m * m


# --------------------------------------------------------------------------
# Octahedral group machinery (numpy, build time).
# TODO(synk): the original repo's `octahedral_transform` class is not
# available; the Cayley shift (g^{-1} h) and spatial kernel rotation
# W'(p) = W(g^{-1}(p - c) + c) are reconstructed from first principles and
# should be cross-checked against the original index conventions.
# --------------------------------------------------------------------------
def _octahedral_matrices(reflection):
    mats = []
    for perm in itertools.permutations(range(3)):
        for signs in itertools.product((1, -1), repeat=3):
            R = np.zeros((3, 3), dtype=np.int64)
            for r, (p, s) in enumerate(zip(perm, signs)):
                R[r, p] = s
            if reflection or int(round(np.linalg.det(R))) == 1:
                mats.append(R)
    return np.stack(mats, axis=0)  # (G, 3, 3)


def _group_tables(reflection, kernel_size):
    mats = _octahedral_matrices(reflection)
    G = mats.shape[0]
    key = {m.tobytes(): i for i, m in enumerate(mats)}

    # shifted_indices[g][h] = index of g^{-1} h
    shifted_indices = np.zeros((G, G), dtype=np.int64)
    for g in range(G):
        g_inv = mats[g].T  # orthogonal signed permutation
        for h in range(G):
            shifted_indices[g, h] = key[(g_inv @ mats[h]).astype(np.int64).tobytes()]

    # spatial rotation gather indices over the flattened k^3 kernel grid
    k = kernel_size
    c = (k - 1) / 2.0
    coords = np.stack(
        np.meshgrid(np.arange(k), np.arange(k), np.arange(k), indexing="ij"),
        axis=-1,
    ).reshape(-1, 3)  # (k^3, 3) in (d, h, w) order
    rot_idx = np.zeros((G, k ** 3), dtype=np.int64)
    for g in range(G):
        g_inv = mats[g].T
        src = (coords - c) @ g_inv.T + c
        src = np.rint(src).astype(np.int64)
        rot_idx[g] = src[:, 0] * k * k + src[:, 1] * k + src[:, 2]
    return shifted_indices, rot_idx


def _generate_filter_bank(weight, shifted_indices, rot_idx):
    """weight: (nb, O, I, G, k, k, k) -> filter bank (nb, O, G, I, G, k, k, k)."""
    nb, O, I, G, k, _, _ = weight.shape
    banks = []
    for g in range(G):
        sw = weight[:, :, :, shifted_indices[g]]                 # permute group axis
        swf = sw.reshape(nb, O, I, G, k ** 3)
        rw = swf[..., rot_idx[g]].reshape(nb, O, I, G, k, k, k)  # rotate kernel
        banks.append(rw)
    return jnp.stack(banks, axis=2)


# --------------------------------------------------------------------------
# Pallas kernel: one grid step computes Dt output depth rows for one batch n.
#
# refs = (x_0 .. x_{S-1}, w, b, out [, stage_0 .. stage_{k-1}])   S = Dt+k-1
#   x_j      : (Hp*Wop, k*CIN)       bf16 — D slab (d0 + j) of kw-folded input
#   w        : (k, k, k*CIN, COUTp)  bf16 — VMEM-resident filter bank
#   b        : (1, COUTp)            f32
#   out      : (Dt*Ho*Wop, COUTp)    bf16 — lane-dense output slab
#   stage_kh : (S*Ho*Wop, k*CIN)     bf16 — per-kh contiguous window copy
# --------------------------------------------------------------------------
def _gconv3d_kernel(*refs, k, wop, m, n_slabs, chunks, use_stage, activation):
    S = n_slabs
    x_refs = refs[:S]
    w_ref, b_ref, o_ref = refs[S], refs[S + 1], refs[S + 2]
    stage_refs = refs[S + 3:]
    coutp = o_ref.shape[-1]

    if use_stage:
        # Stage the (Dt+k-1)-slab window into k per-kh contiguous 2-D buffers:
        # stage_refs[kh] rows [j*m, (j+1)*m) == slab j rows [kh*Wop, kh*Wop+m).
        # Every (kd, kh) tap then feeds the MXU one contiguous LHS of cs*m rows,
        # amortizing the (k*CIN, COUTp) weight load (the MXU-fill win when
        # Ho*Wop is small).
        for kh in range(k):
            for j in range(S):
                stage_refs[kh][pl.ds(j * m, m), :] = \
                    x_refs[j][pl.ds(kh * wop, m), :]

    for (i0, cs, r0, rc) in chunks:
        acc = jnp.zeros((cs * rc, coutp), jnp.float32)
        for kd in range(k):                    # static unroll: k*k matmuls
            for kh in range(k):
                if cs > 1:
                    # cs consecutive slabs, contiguous rows (rc == m here).
                    lhs = stage_refs[kh][pl.ds((i0 + kd) * m, cs * m), :]
                else:
                    lhs = x_refs[i0 + kd][pl.ds(kh * wop + r0, rc), :]
                acc = acc + jnp.dot(lhs, w_ref[kd, kh],
                                    preferred_element_type=jnp.float32)

        res = acc + b_ref[...]                 # f32 epilogue
        if activation:                         # leaky_relu, slope 0.01
            res = jnp.where(res >= 0, res, 0.01 * res)
        res = res.astype(o_ref.dtype)
        for t in range(cs):
            o_ref[pl.ds((i0 + t) * m + r0, rc), :] = res[t * rc:(t + 1) * rc, :]


def _make_chunks(dt_tile, m, coutp):
    """Chunk the Dt*m output rows so every live f32 accumulator stays at or
    below ~128 KiB (half the vreg file) — avoids spills as M grows."""
    row_target = (128 * 1024) // (coutp * 4)
    row_target = max(64, min(256, (row_target // 16) * 16))
    chunks = []
    if m >= row_target:
        # large spatial slab: row-chunk within each D slab (cs == 1)
        for i in range(dt_tile):
            r0 = 0
            while r0 < m:
                rc = min(row_target, m - r0)
                chunks.append((i, 1, r0, rc))
                r0 += rc
    else:
        # small spatial slab: batch cs D slabs per matmul
        cs = max(1, min(dt_tile, row_target // m))
        while dt_tile % cs:
            cs -= 1
        for i0 in range(0, dt_tile, cs):
            chunks.append((i0, cs, 0, m))
    return chunks


def _gconv3d_pallas(x2, w2, b2, *, k, wop, m, dt_tile, activation):
    N, dp, hwp, c3 = x2.shape
    coutp = w2.shape[-1]
    do_pad = dp - (k - 1)
    assert do_pad % dt_tile == 0
    n_dt = do_pad // dt_tile
    S = dt_tile + k - 1

    chunks = _make_chunks(dt_tile, m, coutp)
    use_stage = any(cs > 1 for (_, cs, _, _) in chunks)

    kernel = functools.partial(
        _gconv3d_kernel, k=k, wop=wop, m=m, n_slabs=S, chunks=tuple(chunks),
        use_stage=use_stage, activation=activation)

    # Dt + k - 1 element-indexed single-slab specs express the overlapping D
    # window on the auto pipeline (D block = 1 -> block index == element index).
    x_specs = [
        pl.BlockSpec((None, None, hwp, c3),
                     lambda n, d, j=j: (n, d * dt_tile + j, 0, 0))
        for j in range(S)
    ]
    in_specs = x_specs + [
        pl.BlockSpec((k, k, c3, coutp), lambda n, d: (0, 0, 0, 0)),
        pl.BlockSpec((1, coutp), lambda n, d: (0, 0)),
    ]
    out_spec = pl.BlockSpec((None, None, dt_tile * m, coutp),
                            lambda n, d: (n, d, 0, 0))

    scratch = ([pltpu.VMEM((S * m, c3), jnp.bfloat16) for _ in range(k)]
               if use_stage else [])

    # Explicit VMEM limit: actual need + 2x margin, capped at 48 MiB so we
    # never claim all of v7x's 64 MiB physical VMEM.
    need = (S * 2 * hwp * c3 * 2              # double-buffered x slabs
            + 2 * k * k * c3 * coutp * 2      # weights (2 buffers)
            + 2 * coutp * 4                   # bias
            + 2 * dt_tile * m * coutp * 2     # double-buffered bf16 output
            + (k * S * m * c3 * 2 if use_stage else 0))
    vmem_limit = int(min(max(2 * need, 16 * 1024 * 1024), 48 * 1024 * 1024))

    return pl.pallas_call(
        kernel,
        out_shape=jax.ShapeDtypeStruct((N, n_dt, dt_tile * m, coutp),
                                       jnp.bfloat16),
        grid_spec=pltpu.PrefetchScalarGridSpec(
            num_scalar_prefetch=0,
            grid=(N, n_dt),
            in_specs=in_specs,
            out_specs=out_spec,
            scratch_shapes=scratch,
        ),
        compiler_params=pltpu.CompilerParams(
            dimension_semantics=("parallel", "parallel"),
            vmem_limit_bytes=vmem_limit,
        ),
    )(*([x2] * S), w2, b2)


# --------------------------------------------------------------------------
# Forward pass (mirrors Relaxed_Octahedral_GroupConv3d.forward).
# --------------------------------------------------------------------------
def relaxed_octahedral_gconv3d(
    x,
    weight,
    relaxed_weights,
    bias,
    *,
    reflection,
    stride=1,
    padding=1,
    upscale=False,
    activation=False,
    use_pallas=True,
):
    # TODO(synk): upscale=True (conv_transpose3d) path not implemented.
    assert not upscale
    assert stride == 1

    nb, O, I, G, k, _, _ = weight.shape
    shifted_indices, rot_idx = _group_tables(reflection, k)

    # -- parameter setup (plain JAX glue) -----------------------------------
    fb = _generate_filter_bank(weight, shifted_indices, rot_idx)
    rcw = jnp.einsum("ng,nogiqabc->ogiqabc", relaxed_weights, fb)
    COUT, CIN = O * G, I * G
    rcw = rcw.reshape(COUT, CIN, k, k, k)
    # PyTorch: bias.repeat(1, G).reshape(-1)  ->  bias[o*G + g] = b[o]
    bias_full = jnp.repeat(bias.reshape(-1), G)              # (COUT,)

    # -- input layout: NCDHW -> NDHWC, bf16 BEFORE pad/fold (HBM traffic) ----
    N = x.shape[0]
    D, H, W = x.shape[-3], x.shape[-2], x.shape[-1]
    x = x.reshape(N, CIN, D, H, W)
    x_ndhwc = jnp.transpose(x, (0, 2, 3, 4, 1)).astype(jnp.bfloat16)
    p = padding
    Do, Ho, Wo = D + 2 * p - k + 1, H + 2 * p - k + 1, W + 2 * p - k + 1
    assert Do > 0 and Ho > 0 and Wo > 0

    if use_pallas:
        COUTp = _round_up(COUT, 128)          # lane-dense output
        Wop = _round_up(Wo, 16)               # bf16 sublane-tile alignment
        m = Ho * Wop                          # rows of one output D slab
        # D-tile: give the MXU ~512 LHS rows per step even at tiny Ho*Wop.
        dt_tile = max(1, min(4, (512 + m - 1) // m, Do))
        Do_pad = _round_up(Do, dt_tile)
        Hp = H + 2 * p

        # pad spatially; extra back-pad on D (D-tiling) and right-pad on W
        # (sublane alignment) — the extra output rows/cols are sliced off.
        x_pad = jnp.pad(
            x_ndhwc,
            ((0, 0), (p, p + (Do_pad - Do)), (p, p),
             (p, p + (Wop - Wo)), (0, 0)))
        Dp_pad = Do_pad + k - 1

        # fold the kw taps into the channel axis: (N, Dp, Hp*Wop, k*CIN)
        x2 = jnp.concatenate(
            [x_pad[:, :, :, kw:kw + Wop, :] for kw in range(k)], axis=-1)
        x2 = x2.reshape(N, Dp_pad, Hp * Wop, k * CIN)

        # weights: (COUT, CIN, kd, kh, kw) -> (kd, kh, kw*CIN, COUTp), bf16
        w2 = jnp.transpose(rcw, (2, 3, 4, 1, 0)).reshape(k, k, k * CIN, COUT)
        w2 = jnp.pad(w2, ((0, 0), (0, 0), (0, 0), (0, COUTp - COUT)))
        w2 = w2.astype(jnp.bfloat16)
        b2 = jnp.pad(bias_full, (0, COUTp - COUT)).reshape(1, COUTp)
        b2 = b2.astype(jnp.float32)

        out = _gconv3d_pallas(x2, w2, b2, k=k, wop=Wop, m=m, dt_tile=dt_tile,
                              activation=activation)
        # single fused reshape / slice / transpose epilogue (bf16 -> f32 once)
        out = out.reshape(N, Do_pad, Ho, Wop, COUTp)[:, :Do, :, :Wo, :COUT]
        out = out.reshape(N, Do, Ho, Wo, O, G).astype(jnp.float32)
    else:
        # pure-XLA reference path (sanity check in __main__); uses the same
        # bf16-rounded operands so the comparison isolates the kernel math.
        w_dhwio = jnp.transpose(rcw, (2, 3, 4, 1, 0)).astype(jnp.bfloat16)
        out = jax.lax.conv_general_dilated(
            x_ndhwc, w_dhwio,
            window_strides=(1, 1, 1), padding=[(p, p)] * 3,
            dimension_numbers=("NDHWC", "DHWIO", "NDHWC"),
            preferred_element_type=jnp.float32,
        )
        out = out + bias_full.reshape(1, 1, 1, 1, COUT)
        if activation:
            out = jnp.where(out >= 0, out, 0.01 * out)
        out = out.reshape(N, Do, Ho, Wo, O, G)

    # back to the PyTorch module's output layout: (N, O, G, D, H, W)
    return jnp.transpose(out, (0, 4, 5, 1, 2, 3))


# --------------------------------------------------------------------------
if __name__ == "__main__":
    key = jax.random.PRNGKey(0)
    k1, k2, k3 = jax.random.split(key, 3)

    # small, module-consistent shapes
    N, I, O, nb, ksz = 2, 2, 2, 2, 3
    reflection = False
    G = 48 if reflection else 24
    D = H = W = 8

    # deterministic parameter init (kaiming-uniform-like weight, ones for
    # relaxed_weights, normal bias) — mirrors the module's __init__.
    fan_in = O * I * G * ksz ** 3
    bound = float(np.sqrt(6.0 / fan_in))
    weight = jax.random.uniform(
        k1, (nb, O, I, G, ksz, ksz, ksz), jnp.float32, -bound, bound
    )
    relaxed_weights = jnp.ones((nb, G), jnp.float32)
    bias = jax.random.normal(k2, (O, 1), jnp.float32)
    x = jax.random.normal(k3, (N, I, G, D, H, W), jnp.float32)

    out = relaxed_octahedral_gconv3d(
        x, weight, relaxed_weights, bias,
        reflection=reflection, stride=1, padding=1,
        upscale=False, activation=False, use_pallas=True,
    )
    out = jax.block_until_ready(out)
    assert out.shape == (N, O, G, D, H, W), out.shape

    # sanity check against the pure-XLA conv reference (same bf16 operands,
    # f32 accumulation; kernel output is additionally bf16-rounded).
    ref = relaxed_octahedral_gconv3d(
        x, weight, relaxed_weights, bias,
        reflection=reflection, stride=1, padding=1,
        upscale=False, activation=False, use_pallas=False,
    )
    ref = jax.block_until_ready(ref)
    np.testing.assert_allclose(np.asarray(out), np.asarray(ref),
                               rtol=1e-2, atol=1e-2)

    print("KERNEL_OK")
</pallas_src>

<mosaic_0001>
module attributes {stable_mosaic.version = 11 : i64} {
  func.func @_gconv3d_kernel(%arg0: i32, %arg1: i32, %arg2: memref<1x1x160x144xbf16, #tpu.memory_space<vmem>>, %arg3: memref<1x1x160x144xbf16, #tpu.memory_space<vmem>>, %arg4: memref<1x1x160x144xbf16, #tpu.memory_space<vmem>>, %arg5: memref<1x1x160x144xbf16, #tpu.memory_space<vmem>>, %arg6: memref<1x1x160x144xbf16, #tpu.memory_space<vmem>>, %arg7: memref<1x1x160x144xbf16, #tpu.memory_space<vmem>>, %arg8: memref<3x3x144x128xbf16, #tpu.memory_space<vmem>>, %arg9: memref<1x128xf32, #tpu.memory_space<vmem>>, %arg10: memref<1x1x512x128xbf16, #tpu.memory_space<vmem>>, %arg11: memref<768x144xbf16, #tpu.memory_space<vmem>>, %arg12: memref<768x144xbf16, #tpu.memory_space<vmem>>, %arg13: memref<768x144xbf16, #tpu.memory_space<vmem>>) attributes {dimension_semantics = [#tpu.dimension_semantics<parallel>, #tpu.dimension_semantics<parallel>], iteration_bounds = array<i64: 2, 2>, scalar_prefetch = 0 : i64, scratch_operands = 3 : i64, tpu.core_type = #tpu.core_type<tc>, window_params = [{transform_indices = @transform_0, window_bounds = array<i64: 1, 1, 160, 144>}, {transform_indices = @transform_1, window_bounds = array<i64: 1, 1, 160, 144>}, {transform_indices = @transform_2, window_bounds = array<i64: 1, 1, 160, 144>}, {transform_indices = @transform_3, window_bounds = array<i64: 1, 1, 160, 144>}, {transform_indices = @transform_4, window_bounds = array<i64: 1, 1, 160, 144>}, {transform_indices = @transform_5, window_bounds = array<i64: 1, 1, 160, 144>}, {pipeline_mode = #tpu.pipeline_mode<synchronous>, transform_indices = @transform_6, window_bounds = array<i64: 3, 3, 144, 128>}, {pipeline_mode = #tpu.pipeline_mode<synchronous>, transform_indices = @transform_7, window_bounds = array<i64: 1, 128>}, {transform_indices = @transform_8, window_bounds = array<i64: 1, 1, 512, 128>}]} {
    %c0 = arith.constant 0 : index
    %c0_0 = arith.constant 0 : index
    %c0_1 = arith.constant 0 : index
    %c0_2 = arith.constant 0 : index
    %0 = vector.load %arg2[%c0, %c0_0, %c0_1, %c0_2] : memref<1x1x160x144xbf16, #tpu.memory_space<vmem>>, vector<1x1x128x144xbf16>
    %1 = vector.shape_cast %0 : vector<1x1x128x144xbf16> to vector<128x144xbf16>
    %c0_3 = arith.constant 0 : index
    %c0_4 = arith.constant 0 : index
    %2 = vector.load %arg11[%c0_3, %c0_4] : memref<768x144xbf16, #tpu.memory_space<vmem>>, vector<128x144xbf16>
    tpu.vector_store %arg11[%c0_3, %c0_4], %1 {strides = array<i32>} : memref<768x144xbf16, #tpu.memory_space<vmem>>, vector<128x144xbf16>,
    %c0_5 = arith.constant 0 : index
    %c0_6 = arith.constant 0 : index
    %c0_7 = arith.constant 0 : index
    %c0_8 = arith.constant 0 : index
    %3 = vector.load %arg3[%c0_5, %c0_6, %c0_7, %c0_8] : memref<1x1x160x144xbf16, #tpu.memory_space<vmem>>, vector<1x1x128x144xbf16>
    %4 = vector.shape_cast %3 : vector<1x1x128x144xbf16> to vector<128x144xbf16>
    %c128 = arith.constant 128 : index
    %c0_9 = arith.constant 0 : index
    %5 = vector.load %arg11[%c128, %c0_9] : memref<768x144xbf16, #tpu.memory_space<vmem>>, vector<128x144xbf16>
    tpu.vector_store %arg11[%c128, %c0_9], %4 {strides = array<i32>} : memref<768x144xbf16, #tpu.memory_space<vmem>>, vector<128x144xbf16>,
    %c0_10 = arith.constant 0 : index
    %c0_11 = arith.constant 0 : index
    %c0_12 = arith.constant 0 : index
    %c0_13 = arith.constant 0 : index
    %6 = vector.load %arg4[%c0_10, %c0_11, %c0_12, %c0_13] : memref<1x1x160x144xbf16, #tpu.memory_space<vmem>>, vector<1x1x128x144xbf16>
    %7 = vector.shape_cast %6 : vector<1x1x128x144xbf16> to vector<128x144xbf16>
    %c256 = arith.constant 256 : index
    %c0_14 = arith.constant 0 : index
    %8 = vector.load %arg11[%c256, %c0_14] : memref<768x144xbf16, #tpu.memory_space<vmem>>, vector<128x144xbf16>
    tpu.vector_store %arg11[%c256, %c0_14], %7 {strides = array<i32>} : memref<768x144xbf16, #tpu.memory_space<vmem>>, vector<128x144xbf16>,
    %c0_15 = arith.constant 0 : index
    %c0_16 = arith.constant 0 : index
    %c0_17 = arith.constant 0 : index
    %c0_18 = arith.constant 0 : index
    %9 = vector.load %arg5[%c0_15, %c0_16, %c0_17, %c0_18] : memref<1x1x160x144xbf16, #tpu.memory_space<vmem>>, vector<1x1x128x144xbf16>
    %10 = vector.shape_cast %9 : vector<1x1x128x144xbf16> to vector<128x144xbf16>
    %c384 = arith.constant 384 : index
    %c0_19 = arith.constant 0 : index
    %11 = vector.load %arg11[%c384, %c0_19] : memref<768x144xbf16, #tpu.memory_space<vmem>>, vector<128x144xbf16>
    tpu.vector_store %arg11[%c384, %c0_19], %10 {strides = array<i32>} : memref<768x144xbf16, #tpu.memory_space<vmem>>, vector<128x144xbf16>,
    %c0_20 = arith.constant 0 : index
    %c0_21 = arith.constant 0 : index
    %c0_22 = arith.constant 0 : index
    %c0_23 = arith.constant 0 : index
    %12 = vector.load %arg6[%c0_20, %c0_21, %c0_22, %c0_23] : memref<1x1x160x144xbf16, #tpu.memory_space<vmem>>, vector<1x1x128x144xbf16>
    %13 = vector.shape_cast %12 : vector<1x1x128x144xbf16> to vector<128x144xbf16>
    %c512 = arith.constant 512 : index
    %c0_24 = arith.constant 0 : index
    %14 = vector.load %arg11[%c512, %c0_24] : memref<768x144xbf16, #tpu.memory_space<vmem>>, vector<128x144xbf16>
    tpu.vector_store %arg11[%c512, %c0_24], %13 {strides = array<i32>} : memref<768x144xbf16, #tpu.memory_space<vmem>>, vector<128x144xbf16>,
    %c0_25 = arith.constant 0 : index
    %c0_26 = arith.constant 0 : index
    %c0_27 = arith.constant 0 : index
    %c0_28 = arith.constant 0 : index
    %15 = vector.load %arg7[%c0_25, %c0_26, %c0_27, %c0_28] : memref<1x1x160x144xbf16, #tpu.memory_space<vmem>>, vector<1x1x128x144xbf16>
    %16 = vector.shape_cast %15 : vector<1x1x128x144xbf16> to vector<128x144xbf16>
    %c640 = arith.constant 640 : index
    %c0_29 = arith.constant 0 : index
    %17 = vector.load %arg11[%c640, %c0_29] : memref<768x144xbf16, #tpu.memory_space<vmem>>, vector<128x144xbf16>
    tpu.vector_store %arg11[%c640, %c0_29], %16 {strides = array<i32>} : memref<768x144xbf16, #tpu.memory_space<vmem>>, vector<128x144xbf16>,
    %c0_30 = arith.constant 0 : index
    %c0_31 = arith.constant 0 : index
    %c16 = arith.constant 16 : index
    %c0_32 = arith.constant 0 : index
    %18 = vector.load %arg2[%c0_30, %c0_31, %c16, %c0_32] : memref<1x1x160x144xbf16, #tpu.memory_space<vmem>>, vector<1x1x128x144xbf16>
    %19 = vector.shape_cast %18 : vector<1x1x128x144xbf16> to vector<128x144xbf16>
    %c0_33 = arith.constant 0 : index
    %c0_34 = arith.constant 0 : index
    %20 = vector.load %arg12[%c0_33, %c0_34] : memref<768x144xbf16, #tpu.memory_space<vmem>>, vector<128x144xbf16>
    tpu.vector_store %arg12[%c0_33, %c0_34], %19 {strides = array<i32>} : memref<768x144xbf16, #tpu.memory_space<vmem>>, vector<128x144xbf16>,
    %c0_35 = arith.constant 0 : index
    %c0_36 = arith.constant 0 : index
    %c16_37 = arith.constant 16 : index
    %c0_38 = arith.constant 0 : index
    %21 = vector.load %arg3[%c0_35, %c0_36, %c16_37, %c0_38] : memref<1x1x160x144xbf16, #tpu.memory_space<vmem>>, vector<1x1x128x144xbf16>
    %22 = vector.shape_cast %21 : vector<1x1x128x144xbf16> to vector<128x144xbf16>
    %c128_39 = arith.constant 128 : index
    %c0_40 = arith.constant 0 : index
    %23 = vector.load %arg12[%c128_39, %c0_40] : memref<768x144xbf16, #tpu.memory_space<vmem>>, vector<128x144xbf16>
    tpu.vector_store %arg12[%c128_39, %c0_40], %22 {strides = array<i32>} : memref<768x144xbf16, #tpu.memory_space<vmem>>, vector<128x144xbf16>,
    %c0_41 = arith.constant 0 : index
    %c0_42 = arith.constant 0 : index
    %c16_43 = arith.constant 16 : index
    %c0_44 = arith.constant 0 : index
    %24 = vector.load %arg4[%c0_41, %c0_42, %c16_43, %c0_44] : memref<1x1x160x144xbf16, #tpu.memory_space<vmem>>, vector<1x1x128x144xbf16>
    %25 = vector.shape_cast %24 : vector<1x1x128x144xbf16> to vector<128x144xbf16>
    %c256_45 = arith.constant 256 : index
    %c0_46 = arith.constant 0 : index
    %26 = vector.load %arg12[%c256_45, %c0_46] : memref<768x144xbf16, #tpu.memory_space<vmem>>, vector<128x144xbf16>
    tpu.vector_store %arg12[%c256_45, %c0_46], %25 {strides = array<i32>} : memref<768x144xbf16, #tpu.memory_space<vmem>>, vector<128x144xbf16>,
    %c0_47 = arith.constant 0 : index
    %c0_48 = arith.constant 0 : index
    %c16_49 = arith.constant 16 : index
    %c0_50 = arith.constant 0 : index
    %27 = vector.load %arg5[%c0_47, %c0_48, %c16_49, %c0_50] : memref<1x1x160x144xbf16, #tpu.memory_space<vmem>>, vector<1x1x128x144xbf16>
    %28 = vector.shape_cast %27 : vector<1x1x128x144xbf16> to vector<128x144xbf16>
    %c384_51 = arith.constant 384 : index
    %c0_52 = arith.constant 0 : index
    %29 = vector.load %arg12[%c384_51, %c0_52] : memref<768x144xbf16, #tpu.memory_space<vmem>>, vector<128x144xbf16>
    tpu.vector_store %arg12[%c384_51, %c0_52], %28 {strides = array<i32>} : memref<768x144xbf16, #tpu.memory_space<vmem>>, vector<128x144xbf16>,
    %c0_53 = arith.constant 0 : index
    %c0_54 = arith.constant 0 : index
    %c16_55 = arith.constant 16 : index
    %c0_56 = arith.constant 0 : index
    %30 = vector.load %arg6[%c0_53, %c0_54, %c16_55, %c0_56] : memref<1x1x160x144xbf16, #tpu.memory_space<vmem>>, vector<1x1x128x144xbf16>
    %31 = vector.shape_cast %30 : vector<1x1x128x144xbf16> to vector<128x144xbf16>
    %c512_57 = arith.constant 512 : index
    %c0_58 = arith.constant 0 : index
    %32 = vector.load %arg12[%c512_57, %c0_58] : memref<768x144xbf16, #tpu.memory_space<vmem>>, vector<128x144xbf16>
    tpu.vector_store %arg12[%c512_57, %c0_58], %31 {strides = array<i32>} : memref<768x144xbf16, #tpu.memory_space<vmem>>, vector<128x144xbf16>,
    %c0_59 = arith.constant 0 : index
    %c0_60 = arith.constant 0 : index
    %c16_61 = arith.constant 16 : index
    %c0_62 = arith.constant 0 : index
    %33 = vector.load %arg7[%c0_59, %c0_60, %c16_61, %c0_62] : memref<1x1x160x144xbf16, #tpu.memory_space<vmem>>, vector<1x1x128x144xbf16>
    %34 = vector.shape_cast %33 : vector<1x1x128x144xbf16> to vector<128x144xbf16>
    %c640_63 = arith.constant 640 : index
    %c0_64 = arith.constant 0 : index
    %35 = vector.load %arg12[%c640_63, %c0_64] : memref<768x144xbf16, #tpu.memory_space<vmem>>, vector<128x144xbf16>
    tpu.vector_store %arg12[%c640_63, %c0_64], %34 {strides = array<i32>} : memref<768x144xbf16, #tpu.memory_space<vmem>>, vector<128x144xbf16>,
    %c0_65 = arith.constant 0 : index
    %c0_66 = arith.constant 0 : index
    %c32 = arith.constant 32 : index
    %c0_67 = arith.constant 0 : index
    %36 = vector.load %arg2[%c0_65, %c0_66, %c32, %c0_67] : memref<1x1x160x144xbf16, #tpu.memory_space<vmem>>, vector<1x1x128x144xbf16>
    %37 = vector.shape_cast %36 : vector<1x1x128x144xbf16> to vector<128x144xbf16>
    %c0_68 = arith.constant 0 : index
    %c0_69 = arith.constant 0 : index
    %38 = vector.load %arg13[%c0_68, %c0_69] : memref<768x144xbf16, #tpu.memory_space<vmem>>, vector<128x144xbf16>
    tpu.vector_store %arg13[%c0_68, %c0_69], %37 {strides = array<i32>} : memref<768x144xbf16, #tpu.memory_space<vmem>>, vector<128x144xbf16>,
    %c0_70 = arith.constant 0 : index
    %c0_71 = arith.constant 0 : index
    %c32_72 = arith.constant 32 : index
    %c0_73 = arith.constant 0 : index
    %39 = vector.load %arg3[%c0_70, %c0_71, %c32_72, %c0_73] : memref<1x1x160x144xbf16, #tpu.memory_space<vmem>>, vector<1x1x128x144xbf16>
    %40 = vector.shape_cast %39 : vector<1x1x128x144xbf16> to vector<128x144xbf16>
    %c128_74 = arith.constant 128 : index
    %c0_75 = arith.constant 0 : index
    %41 = vector.load %arg13[%c128_74, %c0_75] : memref<768x144xbf16, #tpu.memory_space<vmem>>, vector<128x144xbf16>
    tpu.vector_store %arg13[%c128_74, %c0_75], %40 {strides = array<i32>} : memref<768x144xbf16, #tpu.memory_space<vmem>>, vector<128x144xbf16>,
    %c0_76 = arith.constant 0 : index
    %c0_77 = arith.constant 0 : index
    %c32_78 = arith.constant 32 : index
    %c0_79 = arith.constant 0 : index
    %42 = vector.load %arg4[%c0_76, %c0_77, %c32_78, %c0_79] : memref<1x1x160x144xbf16, #tpu.memory_space<vmem>>, vector<1x1x128x144xbf16>
    %43 = vector.shape_cast %42 : vector<1x1x128x144xbf16> to vector<128x144xbf16>
    %c256_80 = arith.constant 256 : index
    %c0_81 = arith.constant 0 : index
    %44 = vector.load %arg13[%c256_80, %c0_81] : memref<768x144xbf16, #tpu.memory_space<vmem>>, vector<128x144xbf16>
    tpu.vector_store %arg13[%c256_80, %c0_81], %43 {strides = array<i32>} : memref<768x144xbf16, #tpu.memory_space<vmem>>, vector<128x144xbf16>,
    %c0_82 = arith.constant 0 : index
    %c0_83 = arith.constant 0 : index
    %c32_84 = arith.constant 32 : index
    %c0_85 = arith.constant 0 : index
    %45 = vector.load %arg5[%c0_82, %c0_83, %c32_84, %c0_85] : memref<1x1x160x144xbf16, #tpu.memory_space<vmem>>, vector<1x1x128x144xbf16>
    %46 = vector.shape_cast %45 : vector<1x1x128x144xbf16> to vector<128x144xbf16>
    %c384_86 = arith.constant 384 : index
    %c0_87 = arith.constant 0 : index
    %47 = vector.load %arg13[%c384_86, %c0_87] : memref<768x144xbf16, #tpu.memory_space<vmem>>, vector<128x144xbf16>
    tpu.vector_store %arg13[%c384_86, %c0_87], %46 {strides = array<i32>} : memref<768x144xbf16, #tpu.memory_space<vmem>>, vector<128x144xbf16>,
    %c0_88 = arith.constant 0 : index
    %c0_89 = arith.constant 0 : index
    %c32_90 = arith.constant 32 : index
    %c0_91 = arith.constant 0 : index
    %48 = vector.load %arg6[%c0_88, %c0_89, %c32_90, %c0_91] : memref<1x1x160x144xbf16, #tpu.memory_space<vmem>>, vector<1x1x128x144xbf16>
    %49 = vector.shape_cast %48 : vector<1x1x128x144xbf16> to vector<128x144xbf16>
    %c512_92 = arith.constant 512 : index
    %c0_93 = arith.constant 0 : index
    %50 = vector.load %arg13[%c512_92, %c0_93] : memref<768x144xbf16, #tpu.memory_space<vmem>>, vector<128x144xbf16>
    tpu.vector_store %arg13[%c512_92, %c0_93], %49 {strides = array<i32>} : memref<768x144xbf16, #tpu.memory_space<vmem>>, vector<128x144xbf16>,
    %c0_94 = arith.constant 0 : index
    %c0_95 = arith.constant 0 : index
    %c32_96 = arith.constant 32 : index
    %c0_97 = arith.constant 0 : index
    %51 = vector.load %arg7[%c0_94, %c0_95, %c32_96, %c0_97] : memref<1x1x160x144xbf16, #tpu.memory_space<vmem>>, vector<1x1x128x144xbf16>
    %52 = vector.shape_cast %51 : vector<1x1x128x144xbf16> to vector<128x144xbf16>
    %c640_98 = arith.constant 640 : index
    %c0_99 = arith.constant 0 : index
    %53 = vector.load %arg13[%c640_98, %c0_99] : memref<768x144xbf16, #tpu.memory_space<vmem>>, vector<128x144xbf16>
    tpu.vector_store %arg13[%c640_98, %c0_99], %52 {strides = array<i32>} : memref<768x144xbf16, #tpu.memory_space<vmem>>, vector<128x144xbf16>,
    %cst = arith.constant 0.000000e+00 : f32
    %54 = vector.broadcast %cst : f32 to vector<256x128xf32>
    %c0_100 = arith.constant 0 : index
    %c0_101 = arith.constant 0 : index
    %55 = vector.load %arg11[%c0_100, %c0_101] : memref<768x144xbf16, #tpu.memory_space<vmem>>, vector<256x144xbf16>
    %c0_102 = arith.constant 0 : index
    %c0_103 = arith.constant 0 : index
    %c0_104 = arith.constant 0 : index
    %c0_105 = arith.constant 0 : index
    %56 = vector.load %arg8[%c0_102, %c0_103, %c0_104, %c0_105] : memref<3x3x144x128xbf16, #tpu.memory_space<vmem>>, vector<1x1x144x128xbf16>
    %57 = vector.shape_cast %56 : vector<1x1x144x128xbf16> to vector<144x128xbf16>
    %cst_106 = arith.constant dense<0.000000e+00> : vector<256x128xf32>
    %58 = tpu.matmul %55, %57, %cst_106 {dimension_numbers = #tpu.dot_dimension_numbers<[1], [0], [0], [1], [0, 0, 1, 1], [], []>} : vector<256x144xbf16>, vector<144x128xbf16>, vector<256x128xf32> -> vector<256x128xf32>
    %59 = arith.addf %54, %58 : vector<256x128xf32>
    %c0_107 = arith.constant 0 : index
    %c0_108 = arith.constant 0 : index
    %60 = vector.load %arg12[%c0_107, %c0_108] : memref<768x144xbf16, #tpu.memory_space<vmem>>, vector<256x144xbf16>
    %c0_109 = arith.constant 0 : index
    %c1 = arith.constant 1 : index
    %c0_110 = arith.constant 0 : index
    %c0_111 = arith.constant 0 : index
    %61 = vector.load %arg8[%c0_109, %c1, %c0_110, %c0_111] : memref<3x3x144x128xbf16, #tpu.memory_space<vmem>>, vector<1x1x144x128xbf16>
    %62 = vector.shape_cast %61 : vector<1x1x144x128xbf16> to vector<144x128xbf16>
    %cst_112 = arith.constant dense<0.000000e+00> : vector<256x128xf32>
    %63 = tpu.matmul %60, %62, %cst_112 {dimension_numbers = #tpu.dot_dimension_numbers<[1], [0], [0], [1], [0, 0, 1, 1], [], []>} : vector<256x144xbf16>, vector<144x128xbf16>, vector<256x128xf32> -> vector<256x128xf32>
    %64 = arith.addf %59, %63 : vector<256x128xf32>
    %c0_113 = arith.constant 0 : index
    %c0_114 = arith.constant 0 : index
    %65 = vector.load %arg13[%c0_113, %c0_114] : memref<768x144xbf16, #tpu.memory_space<vmem>>, vector<256x144xbf16>
    %c0_115 = arith.constant 0 : index
    %c2 = arith.constant 2 : index
    %c0_116 = arith.constant 0 : index
    %c0_117 = arith.constant 0 : index
    %66 = vector.load %arg8[%c0_115, %c2, %c0_116, %c0_117] : memref<3x3x144x128xbf16, #tpu.memory_space<vmem>>, vector<1x1x144x128xbf16>
    %67 = vector.shape_cast %66 : vector<1x1x144x128xbf16> to vector<144x128xbf16>
    %cst_118 = arith.constant dense<0.000000e+00> : vector<256x128xf32>
    %68 = tpu.matmul %65, %67, %cst_118 {dimension_numbers = #tpu.dot_dimension_numbers<[1], [0], [0], [1], [0, 0, 1, 1], [], []>} : vector<256x144xbf16>, vector<144x128xbf16>, vector<256x128xf32> -> vector<256x128xf32>
    %69 = arith.addf %64, %68 : vector<256x128xf32>
    %c128_119 = arith.constant 128 : index
    %c0_120 = arith.constant 0 : index
    %70 = vector.load %arg11[%c128_119, %c0_120] : memref<768x144xbf16, #tpu.memory_space<vmem>>, vector<256x144xbf16>
    %c1_121 = arith.constant 1 : index
    %c0_122 = arith.constant 0 : index
    %c0_123 = arith.constant 0 : index
    %c0_124 = arith.constant 0 : index
    %71 = vector.load %arg8[%c1_121, %c0_122, %c0_123, %c0_124] : memref<3x3x144x128xbf16, #tpu.memory_space<vmem>>, vector<1x1x144x128xbf16>
    %72 = vector.shape_cast %71 : vector<1x1x144x128xbf16> to vector<144x128xbf16>
    %cst_125 = arith.constant dense<0.000000e+00> : vector<256x128xf32>
    %73 = tpu.matmul %70, %72, %cst_125 {dimension_numbers = #tpu.dot_dimension_numbers<[1], [0], [0], [1], [0, 0, 1, 1], [], []>} : vector<256x144xbf16>, vector<144x128xbf16>, vector<256x128xf32> -> vector<256x128xf32>
    %74 = arith.addf %69, %73 : vector<256x128xf32>
    %c128_126 = arith.constant 128 : index
    %c0_127 = arith.constant 0 : index
    %75 = vector.load %arg12[%c128_126, %c0_127] : memref<768x144xbf16, #tpu.memory_space<vmem>>, vector<256x144xbf16>
    %c1_128 = arith.constant 1 : index
    %c1_129 = arith.constant 1 : index
    %c0_130 = arith.constant 0 : index
    %c0_131 = arith.constant 0 : index
    %76 = vector.load %arg8[%c1_128, %c1_129, %c0_130, %c0_131] : memref<3x3x144x128xbf16, #tpu.memory_space<vmem>>, vector<1x1x144x128xbf16>
    %77 = vector.shape_cast %76 : vector<1x1x144x128xbf16> to vector<144x128xbf16>
    %cst_132 = arith.constant dense<0.000000e+00> : vector<256x128xf32>
    %78 = tpu.matmul %75, %77, %cst_132 {dimension_numbers = #tpu.dot_dimension_numbers<[1], [0], [0], [1], [0, 0, 1, 1], [], []>} : vector<256x144xbf16>, vector<144x128xbf16>, vector<256x128xf32> -> vector<256x128xf32>
    %79 = arith.addf %74, %78 : vector<256x128xf32>
    %c128_133 = arith.constant 128 : index
    %c0_134 = arith.constant 0 : index
    %80 = vector.load %arg13[%c128_133, %c0_134] : memref<768x144xbf16, #tpu.memory_space<vmem>>, vector<256x144xbf16>
    %c1_135 = arith.constant 1 : index
    %c2_136 = arith.constant 2 : index
    %c0_137 = arith.constant 0 : index
    %c0_138 = arith.constant 0 : index
    %81 = vector.load %arg8[%c1_135, %c2_136, %c0_137, %c0_138] : memref<3x3x144x128xbf16, #tpu.memory_space<vmem>>, vector<1x1x144x128xbf16>
    %82 = vector.shape_cast %81 : vector<1x1x144x128xbf16> to vector<144x128xbf16>
    %cst_139 = arith.constant dense<0.000000e+00> : vector<256x128xf32>
    %83 = tpu.matmul %80, %82, %cst_139 {dimension_numbers = #tpu.dot_dimension_numbers<[1], [0], [0], [1], [0, 0, 1, 1], [], []>} : vector<256x144xbf16>, vector<144x128xbf16>, vector<256x128xf32> -> vector<256x128xf32>
    %84 = arith.addf %79, %83 : vector<256x128xf32>
    %c256_140 = arith.constant 256 : index
    %c0_141 = arith.constant 0 : index
    %85 = vector.load %arg11[%c256_140, %c0_141] : memref<768x144xbf16, #tpu.memory_space<vmem>>, vector<256x144xbf16>
    %c2_142 = arith.constant 2 : index
    %c0_143 = arith.constant 0 : index
    %c0_144 = arith.constant 0 : index
    %c0_145 = arith.constant 0 : index
    %86 = vector.load %arg8[%c2_142, %c0_143, %c0_144, %c0_145] : memref<3x3x144x128xbf16, #tpu.memory_space<vmem>>, vector<1x1x144x128xbf16>
    %87 = vector.shape_cast %86 : vector<1x1x144x128xbf16> to vector<144x128xbf16>
    %cst_146 = arith.constant dense<0.000000e+00> : vector<256x128xf32>
    %88 = tpu.matmul %85, %87, %cst_146 {dimension_numbers = #tpu.dot_dimension_numbers<[1], [0], [0], [1], [0, 0, 1, 1], [], []>} : vector<256x144xbf16>, vector<144x128xbf16>, vector<256x128xf32> -> vector<256x128xf32>
    %89 = arith.addf %84, %88 : vector<256x128xf32>
    %c256_147 = arith.constant 256 : index
    %c0_148 = arith.constant 0 : index
    %90 = vector.load %arg12[%c256_147, %c0_148] : memref<768x144xbf16, #tpu.memory_space<vmem>>, vector<256x144xbf16>
    %c2_149 = arith.constant 2 : index
    %c1_150 = arith.constant 1 : index
    %c0_151 = arith.constant 0 : index
    %c0_152 = arith.constant 0 : index
    %91 = vector.load %arg8[%c2_149, %c1_150, %c0_151, %c0_152] : memref<3x3x144x128xbf16, #tpu.memory_space<vmem>>, vector<1x1x144x128xbf16>
    %92 = vector.shape_cast %91 : vector<1x1x144x128xbf16> to vector<144x128xbf16>
    %cst_153 = arith.constant dense<0.000000e+00> : vector<256x128xf32>
    %93 = tpu.matmul %90, %92, %cst_153 {dimension_numbers = #tpu.dot_dimension_numbers<[1], [0], [0], [1], [0, 0, 1, 1], [], []>} : vector<256x144xbf16>, vector<144x128xbf16>, vector<256x128xf32> -> vector<256x128xf32>
    %94 = arith.addf %89, %93 : vector<256x128xf32>
    %c256_154 = arith.constant 256 : index
    %c0_155 = arith.constant 0 : index
    %95 = vector.load %arg13[%c256_154, %c0_155] : memref<768x144xbf16, #tpu.memory_space<vmem>>, vector<256x144xbf16>
    %c2_156 = arith.constant 2 : index
    %c2_157 = arith.constant 2 : index
    %c0_158 = arith.constant 0 : index
    %c0_159 = arith.constant 0 : index
    %96 = vector.load %arg8[%c2_156, %c2_157, %c0_158, %c0_159] : memref<3x3x144x128xbf16, #tpu.memory_space<vmem>>, vector<1x1x144x128xbf16>
    %97 = vector.shape_cast %96 : vector<1x1x144x128xbf16> to vector<144x128xbf16>
    %cst_160 = arith.constant dense<0.000000e+00> : vector<256x128xf32>
    %98 = tpu.matmul %95, %97, %cst_160 {dimension_numbers = #tpu.dot_dimension_numbers<[1], [0], [0], [1], [0, 0, 1, 1], [], []>} : vector<256x144xbf16>, vector<144x128xbf16>, vector<256x128xf32> -> vector<256x128xf32>
    %99 = arith.addf %94, %98 : vector<256x128xf32>
    %c0_161 = arith.constant 0 : index
    %c0_162 = arith.constant 0 : index
    %100 = vector.load %arg9[%c0_161, %c0_162] : memref<1x128xf32, #tpu.memory_space<vmem>>, vector<1x128xf32>
    %101 = vector.broadcast %100 : vector<1x128xf32> to vector<256x128xf32>
    %102 = arith.addf %99, %101 : vector<256x128xf32>
    %103 = arith.truncf %102 : vector<256x128xf32> to vector<256x128xbf16>
    %104 = vector.extract_strided_slice %103 {offsets = [0, 0], sizes = [128, 128], strides = [1, 1]} : vector<256x128xbf16> to vector<128x128xbf16>
    %c0_163 = arith.constant 0 : index
    %c0_164 = arith.constant 0 : index
    %c0_165 = arith.constant 0 : index
    %c0_166 = arith.constant 0 : index
    %105 = vector.load %arg10[%c0_163, %c0_164, %c0_165, %c0_166] : memref<1x1x512x128xbf16, #tpu.memory_space<vmem>>, vector<1x1x128x128xbf16>
    %106 = vector.shape_cast %105 : vector<1x1x128x128xbf16> to vector<128x128xbf16>
    %107 = vector.shape_cast %104 : vector<128x128xbf16> to vector<1x1x128x128xbf16>
    tpu.vector_store %arg10[%c0_163, %c0_164, %c0_165, %c0_166], %107 {strides = array<i32>} : memref<1x1x512x128xbf16, #tpu.memory_space<vmem>>, vector<1x1x128x128xbf16>,
    %108 = vector.extract_strided_slice %103 {offsets = [128, 0], sizes = [128, 128], strides = [1, 1]} : vector<256x128xbf16> to vector<128x128xbf16>
    %c0_167 = arith.constant 0 : index
    %c0_168 = arith.constant 0 : index
    %c128_169 = arith.constant 128 : index
    %c0_170 = arith.constant 0 : index
    %109 = vector.load %arg10[%c0_167, %c0_168, %c128_169, %c0_170] : memref<1x1x512x128xbf16, #tpu.memory_space<vmem>>, vector<1x1x128x128xbf16>
    %110 = vector.shape_cast %109 : vector<1x1x128x128xbf16> to vector<128x128xbf16>
    %111 = vector.shape_cast %108 : vector<128x128xbf16> to vector<1x1x128x128xbf16>
    tpu.vector_store %arg10[%c0_167, %c0_168, %c128_169, %c0_170], %111 {strides = array<i32>} : memref<1x1x512x128xbf16, #tpu.memory_space<vmem>>, vector<1x1x128x128xbf16>,
    %cst_171 = arith.constant 0.000000e+00 : f32
    %112 = vector.broadcast %cst_171 : f32 to vector<256x128xf32>
    %c256_172 = arith.constant 256 : index
    %c0_173 = arith.constant 0 : index
    %113 = vector.load %arg11[%c256_172, %c0_173] : memref<768x144xbf16, #tpu.memory_space<vmem>>, vector<256x144xbf16>
    %c0_174 = arith.constant 0 : index
    %c0_175 = arith.constant 0 : index
    %c0_176 = arith.constant 0 : index
    %c0_177 = arith.constant 0 : index
    %114 = vector.load %arg8[%c0_174, %c0_175, %c0_176, %c0_177] : memref<3x3x144x128xbf16, #tpu.memory_space<vmem>>, vector<1x1x144x128xbf16>
    %115 = vector.shape_cast %114 : vector<1x1x144x128xbf16> to vector<144x128xbf16>
    %cst_178 = arith.constant dense<0.000000e+00> : vector<256x128xf32>
    %116 = tpu.matmul %113, %115, %cst_178 {dimension_numbers = #tpu.dot_dimension_numbers<[1], [0], [0], [1], [0, 0, 1, 1], [], []>} : vector<256x144xbf16>, vector<144x128xbf16>, vector<256x128xf32> -> vector<256x128xf32>
    %117 = arith.addf %112, %116 : vector<256x128xf32>
    %c256_179 = arith.constant 256 : index
    %c0_180 = arith.constant 0 : index
    %118 = vector.load %arg12[%c256_179, %c0_180] : memref<768x144xbf16, #tpu.memory_space<vmem>>, vector<256x144xbf16>
    %c0_181 = arith.constant 0 : index
    %c1_182 = arith.constant 1 : index
    %c0_183 = arith.constant 0 : index
    %c0_184 = arith.constant 0 : index
    %119 = vector.load %arg8[%c0_181, %c1_182, %c0_183, %c0_184] : memref<3x3x144x128xbf16, #tpu.memory_space<vmem>>, vector<1x1x144x128xbf16>
    %120 = vector.shape_cast %119 : vector<1x1x144x128xbf16> to vector<144x128xbf16>
    %cst_185 = arith.constant dense<0.000000e+00> : vector<256x128xf32>
    %121 = tpu.matmul %118, %120, %cst_185 {dimension_numbers = #tpu.dot_dimension_numbers<[1], [0], [0], [1], [0, 0, 1, 1], [], []>} : vector<256x144xbf16>, vector<144x128xbf16>, vector<256x128xf32> -> vector<256x128xf32>
    %122 = arith.addf %117, %121 : vector<256x128xf32>
    %c256_186 = arith.constant 256 : index
    %c0_187 = arith.constant 0 : index
    %123 = vector.load %arg13[%c256_186, %c0_187] : memref<768x144xbf16, #tpu.memory_space<vmem>>, vector<256x144xbf16>
    %c0_188 = arith.constant 0 : index
    %c2_189 = arith.constant 2 : index
    %c0_190 = arith.constant 0 : index
    %c0_191 = arith.constant 0 : index
    %124 = vector.load %arg8[%c0_188, %c2_189, %c0_190, %c0_191] : memref<3x3x144x128xbf16, #tpu.memory_space<vmem>>, vector<1x1x144x128xbf16>
    %125 = vector.shape_cast %124 : vector<1x1x144x128xbf16> to vector<144x128xbf16>
    %cst_192 = arith.constant dense<0.000000e+00> : vector<256x128xf32>
    %126 = tpu.matmul %123, %125, %cst_192 {dimension_numbers = #tpu.dot_dimension_numbers<[1], [0], [0], [1], [0, 0, 1, 1], [], []>} : vector<256x144xbf16>, vector<144x128xbf16>, vector<256x128xf32> -> vector<256x128xf32>
    %127 = arith.addf %122, %126 : vector<256x128xf32>
    %c384_193 = arith.constant 384 : index
    %c0_194 = arith.constant 0 : index
    %128 = vector.load %arg11[%c384_193, %c0_194] : memref<768x144xbf16, #tpu.memory_space<vmem>>, vector<256x144xbf16>
    %c1_195 = arith.constant 1 : index
    %c0_196 = arith.constant 0 : index
    %c0_197 = arith.constant 0 : index
    %c0_198 = arith.constant 0 : index
    %129 = vector.load %arg8[%c1_195, %c0_196, %c0_197, %c0_198] : memref<3x3x144x128xbf16, #tpu.memory_space<vmem>>, vector<1x1x144x128xbf16>
    %130 = vector.shape_cast %129 : vector<1x1x144x128xbf16> to vector<144x128xbf16>
    %cst_199 = arith.constant dense<0.000000e+00> : vector<256x128xf32>
    %131 = tpu.matmul %128, %130, %cst_199 {dimension_numbers = #tpu.dot_dimension_numbers<[1], [0], [0], [1], [0, 0, 1, 1], [], []>} : vector<256x144xbf16>, vector<144x128xbf16>, vector<256x128xf32> -> vector<256x128xf32>
    %132 = arith.addf %127, %131 : vector<256x128xf32>
    %c384_200 = arith.constant 384 : index
    %c0_201 = arith.constant 0 : index
    %133 = vector.load %arg12[%c384_200, %c0_201] : memref<768x144xbf16, #tpu.memory_space<vmem>>, vector<256x144xbf16>
    %c1_202 = arith.constant 1 : index
    %c1_203 = arith.constant 1 : index
    %c0_204 = arith.constant 0 : index
    %c0_205 = arith.constant 0 : index
    %134 = vector.load %arg8[%c1_202, %c1_203, %c0_204, %c0_205] : memref<3x3x144x128xbf16, #tpu.memory_space<vmem>>, vector<1x1x144x128xbf16>
    %135 = vector.shape_cast %134 : vector<1x1x144x128xbf16> to vector<144x128xbf16>
    %cst_206 = arith.constant dense<0.000000e+00> : vector<256x128xf32>
    %136 = tpu.matmul %133, %135, %cst_206 {dimension_numbers = #tpu.dot_dimension_numbers<[1], [0], [0], [1], [0, 0, 1, 1], [], []>} : vector<256x144xbf16>, vector<144x128xbf16>, vector<256x128xf32> -> vector<256x128xf32>
    %137 = arith.addf %132, %136 : vector<256x128xf32>
    %c384_207 = arith.constant 384 : index
    %c0_208 = arith.constant 0 : index
    %138 = vector.load %arg13[%c384_207, %c0_208] : memref<768x144xbf16, #tpu.memory_space<vmem>>, vector<256x144xbf16>
    %c1_209 = arith.constant 1 : index
    %c2_210 = arith.constant 2 : index
    %c0_211 = arith.constant 0 : index
    %c0_212 = arith.constant 0 : index
    %139 = vector.load %arg8[%c1_209, %c2_210, %c0_211, %c0_212] : memref<3x3x144x128xbf16, #tpu.memory_space<vmem>>, vector<1x1x144x128xbf16>
    %140 = vector.shape_cast %139 : vector<1x1x144x128xbf16> to vector<144x128xbf16>
    %cst_213 = arith.constant dense<0.000000e+00> : vector<256x128xf32>
    %141 = tpu.matmul %138, %140, %cst_213 {dimension_numbers = #tpu.dot_dimension_numbers<[1], [0], [0], [1], [0, 0, 1, 1], [], []>} : vector<256x144xbf16>, vector<144x128xbf16>, vector<256x128xf32> -> vector<256x128xf32>
    %142 = arith.addf %137, %141 : vector<256x128xf32>
    %c512_214 = arith.constant 512 : index
    %c0_215 = arith.constant 0 : index
    %143 = vector.load %arg11[%c512_214, %c0_215] : memref<768x144xbf16, #tpu.memory_space<vmem>>, vector<256x144xbf16>
    %c2_216 = arith.constant 2 : index
    %c0_217 = arith.constant 0 : index
    %c0_218 = arith.constant 0 : index
    %c0_219 = arith.constant 0 : index
    %144 = vector.load %arg8[%c2_216, %c0_217, %c0_218, %c0_219] : memref<3x3x144x128xbf16, #tpu.memory_space<vmem>>, vector<1x1x144x128xbf16>
    %145 = vector.shape_cast %144 : vector<1x1x144x128xbf16> to vector<144x128xbf16>
    %cst_220 = arith.constant dense<0.000000e+00> : vector<256x128xf32>
    %146 = tpu.matmul %143, %145, %cst_220 {dimension_numbers = #tpu.dot_dimension_numbers<[1], [0], [0], [1], [0, 0, 1, 1], [], []>} : vector<256x144xbf16>, vector<144x128xbf16>, vector<256x128xf32> -> vector<256x128xf32>
    %147 = arith.addf %142, %146 : vector<256x128xf32>
    %c512_221 = arith.constant 512 : index
    %c0_222 = arith.constant 0 : index
    %148 = vector.load %arg12[%c512_221, %c0_222] : memref<768x144xbf16, #tpu.memory_space<vmem>>, vector<256x144xbf16>
    %c2_223 = arith.constant 2 : index
    %c1_224 = arith.constant 1 : index
    %c0_225 = arith.constant 0 : index
    %c0_226 = arith.constant 0 : index
    %149 = vector.load %arg8[%c2_223, %c1_224, %c0_225, %c0_226] : memref<3x3x144x128xbf16, #tpu.memory_space<vmem>>, vector<1x1x144x128xbf16>
    %150 = vector.shape_cast %149 : vector<1x1x144x128xbf16> to vector<144x128xbf16>
    %cst_227 = arith.constant dense<0.000000e+00> : vector<256x128xf32>
    %151 = tpu.matmul %148, %150, %cst_227 {dimension_numbers = #tpu.dot_dimension_numbers<[1], [0], [0], [1], [0, 0, 1, 1], [], []>} : vector<256x144xbf16>, vector<144x128xbf16>, vector<256x128xf32> -> vector<256x128xf32>
    %152 = arith.addf %147, %151 : vector<256x128xf32>
    %c512_228 = arith.constant 512 : index
    %c0_229 = arith.constant 0 : index
    %153 = vector.load %arg13[%c512_228, %c0_229] : memref<768x144xbf16, #tpu.memory_space<vmem>>, vector<256x144xbf16>
    %c2_230 = arith.constant 2 : index
    %c2_231 = arith.constant 2 : index
    %c0_232 = arith.constant 0 : index
    %c0_233 = arith.constant 0 : index
    %154 = vector.load %arg8[%c2_230, %c2_231, %c0_232, %c0_233] : memref<3x3x144x128xbf16, #tpu.memory_space<vmem>>, vector<1x1x144x128xbf16>
    %155 = vector.shape_cast %154 : vector<1x1x144x128xbf16> to vector<144x128xbf16>
    %cst_234 = arith.constant dense<0.000000e+00> : vector<256x128xf32>
    %156 = tpu.matmul %153, %155, %cst_234 {dimension_numbers = #tpu.dot_dimension_numbers<[1], [0], [0], [1], [0, 0, 1, 1], [], []>} : vector<256x144xbf16>, vector<144x128xbf16>, vector<256x128xf32> -> vector<256x128xf32>
    %157 = arith.addf %152, %156 : vector<256x128xf32>
    %c0_235 = arith.constant 0 : index
    %c0_236 = arith.constant 0 : index
    %158 = vector.load %arg9[%c0_235, %c0_236] : memref<1x128xf32, #tpu.memory_space<vmem>>, vector<1x128xf32>
    %159 = vector.broadcast %158 : vector<1x128xf32> to vector<256x128xf32>
    %160 = arith.addf %157, %159 : vector<256x128xf32>
    %161 = arith.truncf %160 : vector<256x128xf32> to vector<256x128xbf16>
    %162 = vector.extract_strided_slice %161 {offsets = [0, 0], sizes = [128, 128], strides = [1, 1]} : vector<256x128xbf16> to vector<128x128xbf16>
    %c0_237 = arith.constant 0 : index
    %c0_238 = arith.constant 0 : index
    %c256_239 = arith.constant 256 : index
    %c0_240 = arith.constant 0 : index
    %163 = vector.load %arg10[%c0_237, %c0_238, %c256_239, %c0_240] : memref<1x1x512x128xbf16, #tpu.memory_space<vmem>>, vector<1x1x128x128xbf16>
    %164 = vector.shape_cast %163 : vector<1x1x128x128xbf16> to vector<128x128xbf16>
    %165 = vector.shape_cast %162 : vector<128x128xbf16> to vector<1x1x128x128xbf16>
    tpu.vector_store %arg10[%c0_237, %c0_238, %c256_239, %c0_240], %165 {strides = array<i32>} : memref<1x1x512x128xbf16, #tpu.memory_space<vmem>>, vector<1x1x128x128xbf16>,
    %166 = vector.extract_strided_slice %161 {offsets = [128, 0], sizes = [128, 128], strides = [1, 1]} : vector<256x128xbf16> to vector<128x128xbf16>
    %c0_241 = arith.constant 0 : index
    %c0_242 = arith.constant 0 : index
    %c384_243 = arith.constant 384 : index
    %c0_244 = arith.constant 0 : index
    %167 = vector.load %arg10[%c0_241, %c0_242, %c384_243, %c0_244] : memref<1x1x512x128xbf16, #tpu.memory_space<vmem>>, vector<1x1x128x128xbf16>
    %168 = vector.shape_cast %167 : vector<1x1x128x128xbf16> to vector<128x128xbf16>
    %169 = vector.shape_cast %166 : vector<128x128xbf16> to vector<1x1x128x128xbf16>
    tpu.vector_store %arg10[%c0_241, %c0_242, %c384_243, %c0_244], %169 {strides = array<i32>} : memref<1x1x512x128xbf16, #tpu.memory_space<vmem>>, vector<1x1x128x128xbf16>,
    return
  }
  func.func @transform_0(%arg0: i32, %arg1: i32) -> (i32, i32, i32, i32) {
    %c4_i32 = arith.constant 4 : i32
    %0 = arith.muli %arg1, %c4_i32 : i32
    %c0_i32 = arith.constant 0 : i32
    %1 = arith.addi %0, %c0_i32 : i32
    %c0_i32_0 = arith.constant 0 : i32
    %c0_i32_1 = arith.constant 0 : i32
    %c0_i32_2 = arith.constant 0 : i32
    return %arg0, %1, %c0_i32_0, %c0_i32_1 : i32, i32, i32, i32
  }
  func.func @transform_1(%arg0: i32, %arg1: i32) -> (i32, i32, i32, i32) {
    %c4_i32 = arith.constant 4 : i32
    %0 = arith.muli %arg1, %c4_i32 : i32
    %c1_i32 = arith.constant 1 : i32
    %1 = arith.addi %0, %c1_i32 : i32
    %c0_i32 = arith.constant 0 : i32
    %c0_i32_0 = arith.constant 0 : i32
    %c0_i32_1 = arith.constant 0 : i32
    return %arg0, %1, %c0_i32, %c0_i32_0 : i32, i32, i32, i32
  }
  func.func @transform_2(%arg0: i32, %arg1: i32) -> (i32, i32, i32, i32) {
    %c4_i32 = arith.constant 4 : i32
    %0 = arith.muli %arg1, %c4_i32 : i32
    %c2_i32 = arith.constant 2 : i32
    %1 = arith.addi %0, %c2_i32 : i32
    %c0_i32 = arith.constant 0 : i32
    %c0_i32_0 = arith.constant 0 : i32
    %c0_i32_1 = arith.constant 0 : i32
    return %arg0, %1, %c0_i32, %c0_i32_0 : i32, i32, i32, i32
  }
  func.func @transform_3(%arg0: i32, %arg1: i32) -> (i32, i32, i32, i32) {
    %c4_i32 = arith.constant 4 : i32
    %0 = arith.muli %arg1, %c4_i32 : i32
    %c3_i32 = arith.constant 3 : i32
    %1 = arith.addi %0, %c3_i32 : i32
    %c0_i32 = arith.constant 0 : i32
    %c0_i32_0 = arith.constant 0 : i32
    %c0_i32_1 = arith.constant 0 : i32
    return %arg0, %1, %c0_i32, %c0_i32_0 : i32, i32, i32, i32
  }
  func.func @transform_4(%arg0: i32, %arg1: i32) -> (i32, i32, i32, i32) {
    %c4_i32 = arith.constant 4 : i32
    %0 = arith.muli %arg1, %c4_i32 : i32
    %c4_i32_0 = arith.constant 4 : i32
    %1 = arith.addi %0, %c4_i32_0 : i32
    %c0_i32 = arith.constant 0 : i32
    %c0_i32_1 = arith.constant 0 : i32
    %c0_i32_2 = arith.constant 0 : i32
    return %arg0, %1, %c0_i32, %c0_i32_1 : i32, i32, i32, i32
  }
  func.func @transform_5(%arg0: i32, %arg1: i32) -> (i32, i32, i32, i32) {
    %c4_i32 = arith.constant 4 : i32
    %0 = arith.muli %arg1, %c4_i32 : i32
    %c5_i32 = arith.constant 5 : i32
    %1 = arith.addi %0, %c5_i32 : i32
    %c0_i32 = arith.constant 0 : i32
    %c0_i32_0 = arith.constant 0 : i32
    %c0_i32_1 = arith.constant 0 : i32
    return %arg0, %1, %c0_i32, %c0_i32_0 : i32, i32, i32, i32
  }
  func.func @transform_6(%arg0: i32, %arg1: i32) -> (i32, i32, i32, i32) {
    %c0_i32 = arith.constant 0 : i32
    %c0_i32_0 = arith.constant 0 : i32
    %c0_i32_1 = arith.constant 0 : i32
    %c0_i32_2 = arith.constant 0 : i32
    %c0_i32_3 = arith.constant 0 : i32
    return %c0_i32, %c0_i32_0, %c0_i32_1, %c0_i32_2 : i32, i32, i32, i32
  }
  func.func @transform_7(%arg0: i32, %arg1: i32) -> (i32, i32) {
    %c0_i32 = arith.constant 0 : i32
    %c0_i32_0 = arith.constant 0 : i32
    %c0_i32_1 = arith.constant 0 : i32
    return %c0_i32, %c0_i32_0 : i32, i32
  }
  func.func @transform_8(%arg0: i32, %arg1: i32) -> (i32, i32, i32, i32) {
    %c0_i32 = arith.constant 0 : i32
    %c0_i32_0 = arith.constant 0 : i32
    %c0_i32_1 = arith.constant 0 : i32
    return %arg0, %arg1, %c0_i32, %c0_i32_0 : i32, i32, i32, i32
  }
}

</mosaic_0001>

<bundles_post_ra>
// kernel: tpu_custom_call.1
= control target key start
LH: loop header
LB: loop body
LE: loop exit
PB: predicated region body
PF: predicated region fallthrough
CT: control target
= control target key end

     0   :  { %13 = vsyncpa [#allocation6], 0  ;;  %s17878_s0 = inlined_call_operand.vmem [shape: bf16[2,10,160,144], index: 0, kind: input, shape index: {}]   ;;  %s17879_s1 = inlined_call_operand.vmem [shape: bf16[2,10,160,144], index: 1, kind: input, shape index: {}]   ;;  %s17880_s2 = inlined_call_operand.vmem [shape: bf16[2,10,160,144], index: 2, kind: input, shape index: {}]   ;;  %s17881_s3 = inlined_call_operand.vmem [shape: bf16[2,10,160,144], index: 3, kind: input, shape index: {}]   ;;  %s17882_s4 = inlined_call_operand.vmem [shape: bf16[2,10,160,144], index: 4, kind: input, shape index: {}]   ;;  %s17883_s5 = inlined_call_operand.vmem [shape: bf16[2,10,160,144], index: 5, kind: input, shape index: {}]   ;;  %s17884_s6 = inlined_call_operand.vmem [shape: bf16[3,3,144,128], index: 6, kind: input, shape index: {}]   ;;  %s17885_s7 = inlined_call_operand.vmem [shape: f32[1,128], index: 7, kind: input, shape index: {}]   ;;  %s17886_s8 = inlined_call_operand.hbm [shape: bf16[2,2,512,128], index: 8, kind: output, shape index: {}]  }
   0x1   :  { %15 = vsyncpa [#allocation6 + $0x1], 0  ;;  %s15275_s27 = smov 0   ;;  %s15277_s28 = smov 0  }
   0x2   :  { %s15279_s29 = smov 0   ;;  %s15281_s30 = smov 0  }
   0x3   :  { %s15283_s9 = smov 0   ;;  %s15285_s10 = smov 0  }
   0x4   :  { %s15287_s11 = smov 0   ;;  %s15289_s12 = smov 0  }
   0x5 LB: > { %17891 = sst [smem:[#allocation8_spill]] %s15218_s10  ;;  %s10556_s13 = sadd.s32 4294967295, %s15226_s12   ;;  %s15226_s12 = sphi %s15289_s12, %s21_s12   ;;  %s15222_s11 = sphi %s15287_s11, %s17902_s11   ;;  %s15218_s10 = sphi %s15285_s10, %s17901_s10   ;;  %s15214_s9 = sphi %s15283_s9, %s17900_s9   ;;  %s15210_s30 = sphi %s15281_s30, %s17899_s30   ;;  %s15206_s29 = sphi %s15279_s29, %s17905_s29   ;;  %s15202_s28 = sphi %s15277_s28, %s17904_s28   ;;  %s15198_s27 = sphi %s15275_s27, %s17903_s27  }
   0x6   : > { %17892 = sst [smem:[#allocation9_spill]] %s15222_s11  ;;  %s10557_s14 = sadd.s32 4294967294, %s15226_s12  }
   0x7   : > { %s30_s15 = sadd.s32 1, %s15218_s10  ;;  %s33_s16 = sadd.s32 1, %s15222_s11 }
   0x8   : > { %p31_p0 = scmp.ge.s32.totalorder %s30_s15, 2  ;;  %p284_p1 = scmp.ne.s32.totalorder %s15206_s29, %s15202_s28 }
   0x9   : > { %p285_p2 = scmp.eq.s32.totalorder %s10556_s13, 3  ;;  %p290_p5 = scmp.ne.s32.totalorder %s15202_s28, %s15198_s27 }
   0xa   : > { %s17907_s15 = smov (%p31_p0, %s30_s15), 0  ;;  %s17909_s16 = smov (!%p31_p0, %s33_s16), %s15222_s11 }
   0xb   : > { %17893 = sst [smem:[#allocation10_spill]] %s17907_s15  ;;  %s270_s17 = ssub.s32 %s15218_s10, %s17907_s15 }
   0xc   : > { %p15326_p3 = por %p285_p2, %p284_p1  ;;  %p35_p4 = scmp.ge.s32.totalorder %s17909_s16, 2 }
   0xd   : > { %p291_p6 = scmp.eq.s32.totalorder %s10557_s14, 3  ;;  %p10572_p7 = scmp.ge.s32.totalorder %s15226_s12, 1 }
   0xe   : > { %s17911_s16 = smov (%p35_p4, %s17909_s16), 0  ;;  %p409_p9 = scmp.lt.s32.totalorder %s15226_s12, 5 }
   0xf   : > { %17895 = sst [smem:[#allocation11_spill]] %s17911_s16  ;;  %p15335_p8 = por %p291_p6, %p290_p5 }
  0x10   : > { %s269_s20 = ssub.s32 %s15222_s11, %s17911_s16  ;;  %s274_s21 = sadd.s32 1, %s15206_s29 }
  0x11   : > { %s271_s22 = sor.u32 %s270_s17, %s269_s20  ;;  %p410_p10 = pnand %p10572_p7, %p409_p9 }
  0x12   : > { %p272_p11 = scmp.eq.s32.totalorder %s271_s22, 0  ;;  %s15353_s14 = sshll.u32 (!%p410_p10), %s15210_s30, 2 }
  0x13   : > { %413 = sbr.rel (%p410_p10) target bundleno = 2496 (0x9c0), region = 52  ;;  %p504_p12 = scmp.lt.s32.totalorder (!%p410_p10), %s15214_s9, 1 }
  0x14   : > { %s15344_s23 = scalar_select %p272_p11, %s15206_s29, %s274_s21  }
  0x15   : > { %p506_p13 = scmp.lt.s32.totalorder (!%p410_p10), %s15353_s14, 9  ;;  %s515_s16 = sadd.s32 (!%p410_p10), 1, %s15353_s14 }
  0x16   : > { %p518_p0 = scmp.lt.s32.totalorder (!%p410_p10), %s515_s16, 9  ;;  %s528_s20 = sadd.s32 (!%p410_p10), 2, %s15353_s14 }
  0x17   : > { %p531_p1 = scmp.lt.s32.totalorder (!%p410_p10), %s528_s20, 9 }
  0x18   : > { %v14200_v0 = vld [vmem:[%s17884_s6 + $0x80] sm:$0xff]  ;;  %v14159_v1 = vld [vmem:[%s17884_s6 + $0x38] sm:$0xff]  ;;  %v14158_v3 = vld [vmem:[%s17884_s6 + $0x30] sm:$0xff]  ;;  %s505_s26 = scalar_select %p504_p12, %s15214_s9, 1  ;;  %vm596_vm0 = vcmask 1043456   ;;  %vm597_vm1 = vcmask 130052  }
  0x19   : > { %1507 = vmatpush.bf16.msra.mxu0 %v14200_v0  ;;  %1931 = vmatpush.bf16.msra.mxu2 %v14159_v1  ;;  %v14199_v2 = vld [vmem:[%s17884_s6 + $0x78] sm:$0xff]  ;;  %v14201_v4 = vld [vmem:[%s17884_s6 + $0x88] sm:$0xff]  ;;  %v14160_v5 = vld [vmem:[%s17884_s6 + $0x40] sm:$0xff]  ;;  %s507_s15 = scalar_select %p506_p13, %s15353_s14, 9  ;;  %vm1458_vm3 = vcmask 130048  }
  0x1a   : > { %1603 = vmatpush.bf16.msra.mxu1 %v14201_v4  ;;  %s15371_s11 = smul.u32 400, %s505_s26  ;;  %2027 = vmatpush.bf16.msra.mxu3 %v14160_v5  ;;  %v14198_v6 = vld [vmem:[%s17884_s6 + $0x70] sm:$0xff]  ;;  %v14157_v7 = vld [vmem:[%s17884_s6 + $0x28] sm:$0xff]  ;;  %vm15383_vm2 = vmor %vm597_vm1, %vm596_vm0  ;;  %s17913_s16 = smov (!%p518_p0, %s515_s16), 9 }
  0x1b   : > { %s15049_s17 = smul.u32 40, %s507_s15  ;;  %v14242_v8 = vld [vmem:[%s17884_s6 + $0xd0] sm:$0xff]  ;;  %v14241_v10 = vld [vmem:[%s17884_s6 + $0xc8] sm:$0xff]  ;;  %v14156_v12 = vld [vmem:[%s17884_s6 + $0x20] sm:$0xff]  ;;  %s17915_s20 = smov (!%p531_p1, %s528_s20), 9 }
  0x1c   : > { %v14197_v11 = vld [vmem:[%s17884_s6 + $0x68] sm:$0xff]  ;;  %v14196_v19 = vld [vmem:[%s17884_s6 + $0x60] sm:$0xff]  ;;  %v14155_v20 = vld [vmem:[%s17884_s6 + $0x18] sm:$0xff] }
  0x1d   : > { %1508 = vmatpush.bf16.msra.mxu0 %v14199_v2  ;;  %1932 = vmatpush.bf16.msra.mxu2 %v14158_v3  ;;  %s510_s26 = sadd.s32 %s15371_s11, %s15049_s17  ;;  %v14195_v24 = vld [vmem:[%s17884_s6 + $0x58] sm:$0xff]  ;;  %v14154_v26 = vld [vmem:[%s17884_s6 + $0x10] sm:$0xff]  ;;  %v14153_v32 = vld [vmem:[%s17884_s6 + $0x8] sm:$0xff]  ;;  %s15051_s17 = smul.u32 40, %s17913_s16 }
  0x1e   : > { %s10575_s13 = sshll.u32 %s510_s26, 2  ;;  %2502 = vmatpush.bf16.msrb.mxu3 %v14242_v8  ;;  %2406 = vmatpush.bf16.msrb.mxu1 %v14241_v10  ;;  %v14194_v31 = vld [vmem:[%s17884_s6 + $0x50] sm:$0xff]  ;;  %v14193_v33 = vld [vmem:[%s17884_s6 + $0x48] sm:$0xff]  ;;  %v14152_v34 = vld [vmem:[%s17884_s6] sm:$0xff] }
  0x1f   : > { %s15399_s25 = scalar_lea.vmem %s17878_s0, %s10575_s13  ;;  %v14282_v39 = vld [vmem:[%s17884_s6 + $0x110] sm:$0xff]  ;;  %v14283_v40 = vld [vmem:[%s17884_s6 + $0x118] sm:$0xff]  ;;  %v14240_v51 = vld [vmem:[%s17884_s6 + $0xc0] sm:$0xff]  ;;  %s522_s10 = sadd.s32 %s15051_s17, %s15371_s11 }
  0x20   : > { %v775_v13 = vld [vmem:[%s15399_s25 + $0x10] sm:$0xff]  ;;  %v776_v14 = vld [vmem:[%s15399_s25 + $0x18] sm:$0xff]  ;;  %v580_v15 = vld [vmem:[%s15399_s25] sm:$0xff]  ;;  %s10577_s26 = sshll.u32 %s522_s10, 2  ;;  %s15052_s17 = smul.u32 40, %s17915_s20 }
  0x21   : > { %1509 = vmatpush.bf16.msra.mxu0 %v14198_v6  ;;  %1933 = vmatpush.bf16.msra.mxu2 %v14157_v7  ;;  %791 = vst.msk [vmem:[#allocation3] sm:$0xff] %vm15383_vm2, %v775_v13  ;;  %v581_v16 = vld [vmem:[%s15399_s25 + $0x8] sm:$0xff]  ;;  %v777_v17 = vld [vmem:[%s15399_s25 + $0x20] sm:$0xff]  ;;  %v779_v21 = vld [vmem:[%s15399_s25 + $0x30] sm:$0xff]  ;;  %s15548_s16 = scalar_lea.vmem %s17879_s1, %s10577_s26 }
  0x22   : > { %792 = vst.msk [vmem:[#allocation3 + $0x8] sm:$0xff] %vm15383_vm2, %v776_v14  ;;  %v778_v18 = vld [vmem:[%s15399_s25 + $0x28] sm:$0xff]  ;;  %v780_v22 = vld [vmem:[%s15399_s25 + $0x38] sm:$0xff]  ;;  %v781_v42 = vld [vmem:[%s15399_s25 + $0x40] sm:$0xff]  ;;  %2407 = vmatpush.bf16.msrb.mxu1 %v14240_v51  ;;  %s535_s10 = sadd.s32 %s15052_s17, %s15371_s11  ;;  %s554_s17 = sadd.s32 4, %s15353_s14 }
  0x23   : > { %599 = vst.msk [vmem:[#allocation2] sm:$0xff] %vm15383_vm2, %v580_v15  ;;  %v782_v43 = vld [vmem:[%s15399_s25 + $0x48] sm:$0xff]  ;;  %v783_v58 = vld [vmem:[%s15399_s25 + $0x50] sm:$0xff]  ;;  %v784_v59 = vld [vmem:[%s15399_s25 + $0x58] sm:$0xff]  ;;  %s10579_s26 = sshll.u32 %s535_s10, 2  ;;  %p557_p4 = scmp.lt.s32.totalorder %s554_s17, 9 }
  0x24   : > { %600 = vst.msk [vmem:[#allocation2 + $0x8] sm:$0xff] %vm15383_vm2, %v581_v16  ;;  %v14281_v52 = vld [vmem:[%s17884_s6 + $0x108] sm:$0xff]  ;;  %v785_v8 = vld [vmem:[%s15399_s25 + $0x60] sm:$0xff]  ;;  %s15829_s20 = scalar_lea.vmem %s17880_s2, %s10579_s26  ;;  %s541_s26 = sadd.s32 3, %s15353_s14 }
  0x25   : > { %1510 = vmatpush.bf16.msra.mxu0 %v14197_v11  ;;  %1934 = vmatpush.bf16.msra.mxu2 %v14156_v12  ;;  %793 = vst.msk [vmem:[#allocation3 + $0x10] sm:$0xff] %vm15383_vm2, %v777_v17  ;;  %v786_v10 = vld [vmem:[%s15399_s25 + $0x68] sm:$0xff]  ;;  %p544_p2 = scmp.lt.s32.totalorder %s541_s26, 9  ;;  %s17919_s17 = smov (!%p557_p4, %s554_s17), 9 }
  0x26   : > { %794 = vst.msk [vmem:[#allocation3 + $0x18] sm:$0xff] %vm15383_vm2, %v778_v18  ;;  %s15054_s10 = smul.u32 40, %s17919_s17 }
  0x27   : > { %601 = vst.msk [vmem:[#allocation2 + $0x10] sm:$0xff] %vm15383_vm2, %v775_v13  ;;  %s17917_s26 = smov (!%p544_p2, %s541_s26), 9 }
  0x28   : > { %v14161_v23 = vld [vmem:[#allocation3 + $0x4] sm:$0xf]  ;;  %602 = vst.msk [vmem:[#allocation2 + $0x18] sm:$0xff] %vm15383_vm2, %v776_v14  ;;  %v10606_v35 = vld [vmem:[#allocation3] sm:$0xf]  ;;  %s15053_s13 = smul.u32 40, %s17917_s26 }
  0x29   : > { %1511 = vmatpush.bf16.msra.mxu0 %v14196_v19  ;;  %1935 = vmatpush.bf16.msra.mxu2 %v14155_v20  ;;  %v10608_v25 = vld [vmem:[#allocation3 + $0x8] sm:$0xf0]  ;;  %795 = vst.msk [vmem:[#allocation3 + $0x20] sm:$0xff] %vm15383_vm2, %v779_v21  ;;  %v14162_v36 = vld [vmem:[#allocation3 + $0x4] sm:$0xf0]  ;;  %v14280_v19 = vld [vmem:[%s17884_s6 + $0x100] sm:$0xff] }
  0x2a   : > { %v10611_v27 = vor.u32 %v14161_v23, %v10608_v25  ;;  %v14120_v28 = vld [vmem:[#allocation2 + $0x4] sm:$0xf]  ;;  %796 = vst.msk [vmem:[#allocation3 + $0x28] sm:$0xff] %vm15383_vm2, %v780_v22  ;;  %v10786_v37 = vld [vmem:[#allocation2] sm:$0xf]  ;;  %v10607_v41 = vor.u32 %v14162_v36, %v10606_v35  ;;  %v787_v25 = vld [vmem:[%s15399_s25 + $0x70] sm:$0xff]  ;;  %s548_s15 = sadd.s32 %s15053_s13, %s15371_s11  ;;  %s561_s13 = sadd.s32 %s15054_s10, %s15371_s11 }
  0x2b   : > { %v10788_v29 = vld [vmem:[#allocation2 + $0x8] sm:$0xf0]  ;;  %603 = vst.msk [vmem:[#allocation2 + $0x20] sm:$0xff] %vm15383_vm2, %v777_v17  ;;  %v14121_v38 = vld [vmem:[#allocation2 + $0x4] sm:$0xf0]  ;;  %s500_s26 = sand.u32 1, %s15202_s28  }
  0x2c   : > { %10768 = vmatmul.msk.bf16.vlgmr.msra.gmra.mxu1 %vm1458_vm3, %v10611_v27  ;;  %v10791_v30 = vor.u32 %v14120_v28, %v10788_v29  ;;  %604 = vst.msk [vmem:[#allocation2 + $0x28] sm:$0xff] %vm15383_vm2, %v778_v18  ;;  %v10787_v44 = vor.u32 %v14121_v38, %v10786_v37  ;;  %v14163_v45 = vld [vmem:[#allocation3 + $0x14] sm:$0xf]  ;;  %v10614_v53 = vld [vmem:[#allocation3 + $0x10] sm:$0xf]  ;;  %v14239_v18 = vld [vmem:[%s17884_s6 + $0xb8] sm:$0xff] }
  0x2d   : > { %1512 = vmatpush.bf16.msra.mxu0 %v14195_v24  ;;  %1936 = vmatpush.bf16.msra.mxu2 %v14154_v26  ;;  %605 = vst.msk [vmem:[#allocation2 + $0x30] sm:$0xff] %vm15383_vm2, %v779_v21  ;;  %v10616_v46 = vld [vmem:[#allocation3 + $0x18] sm:$0xf0]  ;;  %v14164_v54 = vld [vmem:[#allocation3 + $0x14] sm:$0xf0]  ;;  %s10349_s21 = scalar_lea.sflag [#allocation6], %s500_s26 }
  0x2e   : > { %10948 = vmatmul.msk.bf16.vlgmr.msra.gmra.mxu3 %vm1458_vm3, %v10791_v30  ;;  %606 = vst.msk [vmem:[#allocation2 + $0x38] sm:$0xff] %vm15383_vm2, %v780_v22  ;;  %v14122_v47 = vld [vmem:[#allocation2 + $0x14] sm:$0xf]  ;;  %v10619_v49 = vor.u32 %v14163_v45, %v10616_v46  ;;  %v10794_v55 = vld [vmem:[#allocation2 + $0x10] sm:$0xf]  ;;  %v10615_v57 = vor.u32 %v14164_v54, %v10614_v53  ;;  %2408 = vmatpush.bf16.msrb.mxu1 %v14239_v18  ;;  %v788_v26 = vld [vmem:[%s15399_s25 + $0x78] sm:$0xff] }
  0x2f   : > { %797 = vst.msk [vmem:[#allocation3 + $0x30] sm:$0xff] %vm15383_vm2, %v781_v42  ;;  %v10796_v48 = vld [vmem:[#allocation2 + $0x18] sm:$0xf0]  ;;  %v14123_v56 = vld [vmem:[#allocation2 + $0x14] sm:$0xf0] }
  0x30   : > { %798 = vst.msk [vmem:[#allocation3 + $0x38] sm:$0xff] %vm15383_vm2, %v782_v43  ;;  %v10799_v50 = vor.u32 %v14122_v47, %v10796_v48  ;;  %v10795_v60 = vor.u32 %v14123_v56, %v10794_v55  ;;  %v14165_v61 = vld [vmem:[#allocation3 + $0x24] sm:$0xf]  ;;  %v10622_v3 = vld [vmem:[#allocation3 + $0x20] sm:$0xf]  ;;  %v14238_v48 = vld [vmem:[%s17884_s6 + $0xb0] sm:$0xff] }
  0x31   : > { %1513 = vmatpush.bf16.msra.mxu0 %v14194_v31  ;;  %1937 = vmatpush.bf16.msra.mxu2 %v14153_v32  ;;  %607 = vst.msk [vmem:[#allocation2 + $0x40] sm:$0xff] %vm15383_vm2, %v781_v42  ;;  %v10624_v62 = vld [vmem:[#allocation3 + $0x28] sm:$0xf0]  ;;  %v14166_v4 = vld [vmem:[#allocation3 + $0x24] sm:$0xf0]  ;;  %v807_v55 = vld [vmem:[%s15548_s16 + $0x10] sm:$0xff] }
  0x32   : > { %608 = vst.msk [vmem:[#allocation2 + $0x48] sm:$0xff] %vm15383_vm2, %v782_v43  ;;  %v14124_v63 = vld [vmem:[#allocation2 + $0x24] sm:$0xf]  ;;  %v10627_v1 = vor.u32 %v14165_v61, %v10624_v62  ;;  %v10802_v5 = vld [vmem:[#allocation2 + $0x20] sm:$0xf]  ;;  %v10623_v7 = vor.u32 %v14166_v4, %v10622_v3  ;;  %2409 = vmatpush.bf16.msrb.mxu1 %v14238_v48  ;;  %v808_v56 = vld [vmem:[%s15548_s16 + $0x18] sm:$0xff] }
  0x33   : > { %799 = vst.msk [vmem:[#allocation3 + $0x40] sm:$0xff] %vm15383_vm2, %v783_v58  ;;  %v10804_v0 = vld [vmem:[#allocation2 + $0x28] sm:$0xf0]  ;;  %v14125_v6 = vld [vmem:[#allocation2 + $0x24] sm:$0xf0] }
  0x34   : > { %800 = vst.msk [vmem:[#allocation3 + $0x48] sm:$0xff] %vm15383_vm2, %v784_v59  ;;  %v10807_v2 = vor.u32 %v14124_v63, %v10804_v0  ;;  %v10803_v11 = vor.u32 %v14125_v6, %v10802_v5  ;;  %v14126_v14 = vld [vmem:[#allocation2 + $0x34] sm:$0xf]  ;;  %v10810_v22 = vld [vmem:[#allocation2 + $0x30] sm:$0xf] }
  0x35   : > { %1514 = vmatpush.bf16.msra.mxu0 %v14193_v33  ;;  %1938 = vmatpush.bf16.msra.mxu2 %v14152_v34  ;;  %609 = vst.msk [vmem:[#allocation2 + $0x50] sm:$0xff] %vm15383_vm2, %v783_v58  ;;  %v10812_v15 = vld [vmem:[#allocation2 + $0x38] sm:$0xf0]  ;;  %v14127_v23 = vld [vmem:[#allocation2 + $0x34] sm:$0xf0] }
  0x36   : > { %610 = vst.msk [vmem:[#allocation2 + $0x58] sm:$0xff] %vm15383_vm2, %v784_v59  ;;  %v14167_v12 = vld [vmem:[#allocation3 + $0x34] sm:$0xf]  ;;  %v10815_v17 = vor.u32 %v14126_v14, %v10812_v15  ;;  %v10630_v20 = vld [vmem:[#allocation3 + $0x30] sm:$0xf]  ;;  %v10811_v27 = vor.u32 %v14127_v23, %v10810_v22  ;;  %v616_v59 = vld [vmem:[%s15548_s16 + $0x8] sm:$0xff] }
  0x37   : > { %801 = vst.msk [vmem:[#allocation3 + $0x50] sm:$0xff] %vm15383_vm2, %v785_v8  ;;  %v10632_v13 = vld [vmem:[#allocation3 + $0x38] sm:$0xf0]  ;;  %v14168_v21 = vld [vmem:[#allocation3 + $0x34] sm:$0xf0]  ;;  %v14278_v22 = vld [vmem:[%s17884_s6 + $0xf0] sm:$0xff] }
  0x38   : > { %1515 = vmatmul.bf16.vlgmr.msra.gmra.mxu0 %v10607_v41  ;;  %1939 = vmatmul.bf16.vlgmr.msra.gmra.mxu2 %v10787_v44  ;;  %802 = vst.msk [vmem:[#allocation3 + $0x58] sm:$0xff] %vm15383_vm2, %v786_v10  ;;  %v10635_v16 = vor.u32 %v14167_v12, %v10632_v13  ;;  %v10631_v24 = vor.u32 %v14168_v21, %v10630_v20  ;;  %v14128_v30 = vld [vmem:[#allocation2 + $0x44] sm:$0xf]  ;;  %v10818_v36 = vld [vmem:[#allocation2 + $0x40] sm:$0xf] }
  0x39   : > { %2913 = vmatpush.bf16.msrb.mxu0 %v14282_v39  ;;  %3009 = vmatpush.bf16.msrb.mxu2 %v14283_v40  ;;  %611 = vst.msk [vmem:[#allocation2 + $0x60] sm:$0xff] %vm15383_vm2, %v785_v8  ;;  %v10820_v31 = vld [vmem:[#allocation2 + $0x48] sm:$0xf0]  ;;  %v14129_v37 = vld [vmem:[#allocation2 + $0x44] sm:$0xf0]  ;;  %v789_v39 = vld [vmem:[%s15399_s25 + $0x80] sm:$0xff] }
  0x3a   : > { %612 = vst.msk [vmem:[#allocation2 + $0x68] sm:$0xff] %vm15383_vm2, %v786_v10  ;;  %v14169_v28 = vld [vmem:[#allocation3 + $0x44] sm:$0xf]  ;;  %v10823_v33 = vor.u32 %v14128_v30, %v10820_v31  ;;  %v10638_v34 = vld [vmem:[#allocation3 + $0x40] sm:$0xf]  ;;  %v790_v40 = vld [vmem:[%s15399_s25 + $0x88] sm:$0xff]  ;;  %v10819_v41 = vor.u32 %v14129_v37, %v10818_v36 }
  0x3b   : > { %803 = vst.msk [vmem:[#allocation3 + $0x60] sm:$0xff] %vm15383_vm2, %v787_v25  ;;  %v10640_v29 = vld [vmem:[#allocation3 + $0x48] sm:$0xf0]  ;;  %v14170_v35 = vld [vmem:[#allocation3 + $0x44] sm:$0xf0] }
  0x3c   : > { %10769 = vmatmul.msk.bf16.gmra.mxu1 %vm1458_vm3, %v10619_v49  ;;  %804 = vst.msk [vmem:[#allocation3 + $0x68] sm:$0xff] %vm15383_vm2, %v788_v26  ;;  %v10643_v32 = vor.u32 %v14169_v28, %v10640_v29  ;;  %v10639_v38 = vor.u32 %v14170_v35, %v10638_v34  ;;  %v14130_v44 = vld [vmem:[#allocation2 + $0x54] sm:$0xf]  ;;  %v14279_v49 = vld [vmem:[%s17884_s6 + $0xf8] sm:$0xff]  ;;  %v810_v8 = vld [vmem:[%s15548_s16 + $0x28] sm:$0xff] }
  0x3d   : > { %2914 = vmatpush.bf16.msrb.mxu0 %v14281_v52  ;;  %613 = vst.msk [vmem:[#allocation2 + $0x70] sm:$0xff] %vm15383_vm2, %v787_v25  ;;  %v10828_v45 = vld [vmem:[#allocation2 + $0x58] sm:$0xf0]  ;;  %v10826_v52 = vld [vmem:[#allocation2 + $0x50] sm:$0xf] }
  0x3e   : > { %10949 = vmatmul.msk.bf16.gmra.mxu3 %vm1458_vm3, %v10799_v50  ;;  %614 = vst.msk [vmem:[#allocation2 + $0x78] sm:$0xff] %vm15383_vm2, %v788_v26  ;;  %v14171_v42 = vld [vmem:[#allocation3 + $0x54] sm:$0xf]  ;;  %v10831_v47 = vor.u32 %v14130_v44, %v10828_v45  ;;  %v10646_v50 = vld [vmem:[#allocation3 + $0x50] sm:$0xf]  ;;  %v812_v25 = vld [vmem:[%s15548_s16 + $0x38] sm:$0xff] }
  0x3f   : > { %805 = vst.msk [vmem:[#allocation3 + $0x70] sm:$0xff] %vm15383_vm2, %v789_v39  ;;  %v10648_v43 = vld [vmem:[#allocation3 + $0x58] sm:$0xf0]  ;;  %v14172_v51 = vld [vmem:[#allocation3 + $0x54] sm:$0xf0] }
  0x40   : > { %806 = vst.msk [vmem:[#allocation3 + $0x78] sm:$0xff] %vm15383_vm2, %v790_v40  ;;  %v10651_v46 = vor.u32 %v14171_v42, %v10648_v43  ;;  %v14131_v53 = vld [vmem:[#allocation2 + $0x54] sm:$0xf0]  ;;  %v10647_v54 = vor.u32 %v14172_v51, %v10646_v50  ;;  %v14132_v62 = vld [vmem:[#allocation2 + $0x64] sm:$0xf]  ;;  %v814_v42 = vld [vmem:[%s15548_s16 + $0x48] sm:$0xff] }
  0x41   : > { %2915 = vmatpush.bf16.msrb.mxu0 %v14280_v19  ;;  %v10827_v58 = vor.u32 %v14131_v53, %v10826_v52  ;;  %823 = vst.msk [vmem:[#allocation3 + $0x80] sm:$0xff] %vm15383_vm2, %v807_v55  ;;  %v10836_v63 = vld [vmem:[#allocation2 + $0x68] sm:$0xf0]  ;;  %v10834_v4 = vld [vmem:[#allocation2 + $0x60] sm:$0xf] }
  0x42   : > { %824 = vst.msk [vmem:[#allocation3 + $0x88] sm:$0xff] %vm15383_vm2, %v808_v56  ;;  %v14133_v5 = vld [vmem:[#allocation2 + $0x64] sm:$0xf0] }
  0x43   : > { %v10656_v61 = vld [vmem:[#allocation3 + $0x68] sm:$0xf0]  ;;  %632 = vst.msk [vmem:[#allocation2 + $0x88] sm:$0xff] %vm15383_vm2, %v616_v59  ;;  %v14174_v3 = vld [vmem:[#allocation3 + $0x64] sm:$0xf0]  ;;  %v10835_v10 = vor.u32 %v14133_v5, %v10834_v4  ;;  %v14236_v59 = vld [vmem:[%s17884_s6 + $0xa0] sm:$0xff] }
  0x44   : > { %633 = vst.msk [vmem:[#allocation2 + $0x90] sm:$0xff] %vm15383_vm2, %v807_v55  ;;  %v14134_v13 = vld [vmem:[#allocation2 + $0x74] sm:$0xf]  ;;  %v10842_v20 = vld [vmem:[#allocation2 + $0x70] sm:$0xf] }
  0x45   : > { %2916 = vmatpush.bf16.msrb.mxu0 %v14279_v49  ;;  %634 = vst.msk [vmem:[#allocation2 + $0x98] sm:$0xff] %vm15383_vm2, %v808_v56  ;;  %v10844_v14 = vld [vmem:[#allocation2 + $0x78] sm:$0xf0]  ;;  %v14135_v21 = vld [vmem:[#allocation2 + $0x74] sm:$0xf0]  ;;  %v815_v5 = vld [vmem:[%s15548_s16 + $0x50] sm:$0xff] }
  0x46   : > { %826 = vst.msk [vmem:[#allocation3 + $0x98] sm:$0xff] %vm15383_vm2, %v810_v8  ;;  %v10662_v18 = vld [vmem:[#allocation3 + $0x70] sm:$0xf]  ;;  %v10843_v26 = vor.u32 %v14135_v21, %v10842_v20 }
  0x47   : > { %v10664_v12 = vld [vmem:[#allocation3 + $0x78] sm:$0xf0]  ;;  %636 = vst.msk [vmem:[#allocation2 + $0xa8] sm:$0xff] %vm15383_vm2, %v810_v8  ;;  %v14176_v19 = vld [vmem:[#allocation3 + $0x74] sm:$0xf0] }
  0x48   : > { %1520 = vmatmul.bf16.gmra.mxu0 %v10615_v57  ;;  %1944 = vmatmul.bf16.gmra.mxu2 %v10795_v60  ;;  %v615_v57 = vld [vmem:[%s15548_s16] sm:$0xff]  ;;  %v10663_v23 = vor.u32 %v14176_v19, %v10662_v18  ;;  %828 = vst.msk [vmem:[#allocation3 + $0xa8] sm:$0xff] %vm15383_vm2, %v812_v25 }
  0x49   : > { %v14173_v60 = vld [vmem:[#allocation3 + $0x64] sm:$0xf]  ;;  %631 = vst.msk [vmem:[#allocation2 + $0x80] sm:$0xff] %vm15383_vm2, %v615_v57  ;;  %2917 = vmatpush.bf16.msrb.mxu0 %v14278_v22  ;;  %v10672_v28 = vld [vmem:[#allocation3 + $0x88] sm:$0xf0] }
  0x4a   : > { %v10659_v0 = vor.u32 %v14173_v60, %v10656_v61  ;;  %v10852_v30 = vld [vmem:[#allocation2 + $0x88] sm:$0xf0]  ;;  %638 = vst.msk [vmem:[#allocation2 + $0xb8] sm:$0xff] %vm15383_vm2, %v812_v25  ;;  %v10670_v34 = vld [vmem:[#allocation3 + $0x80] sm:$0xf] }
  0x4b   : > { %v14178_v35 = vld [vmem:[#allocation3 + $0x84] sm:$0xf0]  ;;  %830 = vst.msk [vmem:[#allocation3 + $0xb8] sm:$0xff] %vm15383_vm2, %v814_v42  ;;  %v14138_v48 = vld [vmem:[#allocation2 + $0x94] sm:$0xf] }
  0x4c   : > { %10770 = vmatmul.msk.bf16.gmra.mxu1 %vm1458_vm3, %v10627_v1  ;;  %v10839_v1 = vor.u32 %v14132_v62, %v10836_v63  ;;  %v14137_v39 = vld [vmem:[#allocation2 + $0x84] sm:$0xf0]  ;;  %v10671_v40 = vor.u32 %v14178_v35, %v10670_v34  ;;  %v10860_v49 = vld [vmem:[#allocation2 + $0x98] sm:$0xf0]  ;;  %640 = vst.msk [vmem:[#allocation2 + $0xc8] sm:$0xff] %vm15383_vm2, %v814_v42  ;;  %v817_v34 = vld [vmem:[%s15548_s16 + $0x60] sm:$0xff] }
  0x4d   : > { %v10863_v53 = vor.u32 %v14138_v48, %v10860_v49  ;;  %v14180_v61 = vld [vmem:[#allocation3 + $0x94] sm:$0xf0]  ;;  %831 = vst.msk [vmem:[#allocation3 + $0xc0] sm:$0xff] %vm15383_vm2, %v815_v5  ;;  %v818_v35 = vld [vmem:[%s15548_s16 + $0x68] sm:$0xff] }
  0x4e   : > { %10950 = vmatmul.msk.bf16.gmra.mxu3 %vm1458_vm3, %v10807_v2  ;;  %v10654_v2 = vld [vmem:[#allocation3 + $0x60] sm:$0xf]  ;;  %641 = vst.msk [vmem:[#allocation2 + $0xd0] sm:$0xff] %vm15383_vm2, %v815_v5 }
  0x4f   : > { %v10655_v6 = vor.u32 %v14174_v3, %v10654_v2  ;;  %v14277_v2 = vld [vmem:[%s17884_s6 + $0xe8] sm:$0xff]  ;;  %833 = vst.msk [vmem:[#allocation3 + $0xd0] sm:$0xff] %vm15383_vm2, %v817_v34 }
  0x50   : > { %v14136_v29 = vld [vmem:[#allocation2 + $0x84] sm:$0xf]  ;;  %2918 = vmatpush.bf16.msrb.mxu0 %v14277_v2  ;;  %834 = vst.msk [vmem:[#allocation3 + $0xd8] sm:$0xff] %vm15383_vm2, %v818_v35  ;;  %v820_v2 = vld [vmem:[%s15548_s16 + $0x78] sm:$0xff] }
  0x51   : > { %643 = vst.msk [vmem:[#allocation2 + $0xe0] sm:$0xff] %vm15383_vm2, %v817_v34 }
  0x52   : > { %644 = vst.msk [vmem:[#allocation2 + $0xe8] sm:$0xff] %vm15383_vm2, %v818_v35 }
  0x53   : > { %836 = vst.msk [vmem:[#allocation3 + $0xe8] sm:$0xff] %vm15383_vm2, %v820_v2 }
  0x54   : > { %646 = vst.msk [vmem:[#allocation2 + $0xf8] sm:$0xff] %vm15383_vm2, %v820_v2  ;;  %v968_v2 = vld [vmem:[%s15399_s25 + $0x28] sm:$0xff] }
  0x55   : > { %984 = vst.msk [vmem:[#allocation4 + $0x8] sm:$0xff] %vm15383_vm2, %v968_v2 }
  0x58   : > { %1525 = vmatmul.bf16.gmra.mxu0 %v10623_v7  ;;  %1949 = vmatmul.bf16.gmra.mxu2 %v10803_v11  ;;  %v809_v7 = vld [vmem:[%s15548_s16 + $0x20] sm:$0xff]  ;;  %v14175_v11 = vld [vmem:[#allocation3 + $0x74] sm:$0xf] }
  0x59   : > { %825 = vst.msk [vmem:[#allocation3 + $0x90] sm:$0xff] %vm15383_vm2, %v809_v7  ;;  %v10667_v15 = vor.u32 %v14175_v11, %v10664_v12 }
  0x5a   : > { %635 = vst.msk [vmem:[#allocation2 + $0xa0] sm:$0xff] %vm15383_vm2, %v809_v7 }
  0x5c   : > { %10771 = vmatmul.msk.bf16.gmra.mxu1 %vm1458_vm3, %v10635_v16  ;;  %v10847_v16 = vor.u32 %v14134_v13, %v10844_v14  ;;  %v10688_v13 = vld [vmem:[#allocation3 + $0xa8] sm:$0xf0] }
  0x5e   : > { %10951 = vmatmul.msk.bf16.gmra.mxu3 %vm1458_vm3, %v10815_v17  ;;  %v14237_v17 = vld [vmem:[%s17884_s6 + $0xa8] sm:$0xff] }
  0x5f   : > { %2410 = vmatpush.bf16.msrb.mxu1 %v14237_v17 }
  0x60   : > { %v10678_v60 = vld [vmem:[#allocation3 + $0x90] sm:$0xf] }
  0x61   : > { %v10679_v4 = vor.u32 %v14180_v61, %v10678_v60  ;;  %v14143_v61 = vld [vmem:[#allocation2 + $0xb4] sm:$0xf0] }
  0x63   : > { %2411 = vmatpush.bf16.msrb.mxu1 %v14236_v59 }
  0x68   : > { %1530 = vmatmul.bf16.gmra.mxu0 %v10631_v24  ;;  %1954 = vmatmul.bf16.gmra.mxu2 %v10811_v27  ;;  %v811_v24 = vld [vmem:[%s15548_s16 + $0x30] sm:$0xff]  ;;  %v14177_v27 = vld [vmem:[#allocation3 + $0x84] sm:$0xf] }
  0x69   : > { %827 = vst.msk [vmem:[#allocation3 + $0xa0] sm:$0xff] %vm15383_vm2, %v811_v24  ;;  %v10675_v31 = vor.u32 %v14177_v27, %v10672_v28  ;;  %v14182_v27 = vld [vmem:[#allocation3 + $0xa4] sm:$0xf0] }
  0x6a   : > { %637 = vst.msk [vmem:[#allocation2 + $0xb0] sm:$0xff] %vm15383_vm2, %v811_v24 }
  0x6c   : > { %10772 = vmatmul.msk.bf16.gmra.mxu1 %vm1458_vm3, %v10643_v32 }
  0x6e   : > { %10952 = vmatmul.msk.bf16.gmra.mxu3 %vm1458_vm3, %v10823_v33  ;;  %v10855_v33 = vor.u32 %v14136_v29, %v10852_v30  ;;  %v10866_v30 = vld [vmem:[#allocation2 + $0xa0] sm:$0xf] }
  0x70   : > { %v14181_v12 = vld [vmem:[#allocation3 + $0xa4] sm:$0xf] }
  0x71   : > { %v10691_v17 = vor.u32 %v14181_v12, %v10688_v13  ;;  %v10874_v60 = vld [vmem:[#allocation2 + $0xb0] sm:$0xf]  ;;  %v10884_v12 = vld [vmem:[#allocation2 + $0xc8] sm:$0xf0] }
  0x72   : > { %v10875_v5 = vor.u32 %v14143_v61, %v10874_v60  ;;  %v10890_v60 = vld [vmem:[#allocation2 + $0xd0] sm:$0xf] }
  0x78   : > { %1535 = vmatmul.bf16.gmra.mxu0 %v10639_v38  ;;  %1959 = vmatmul.bf16.gmra.mxu2 %v10819_v41  ;;  %v10850_v38 = vld [vmem:[#allocation2 + $0x80] sm:$0xf] }
  0x79   : > { %v813_v41 = vld [vmem:[%s15548_s16 + $0x40] sm:$0xff]  ;;  %v10851_v44 = vor.u32 %v14137_v39, %v10850_v38 }
  0x7a   : > { %829 = vst.msk [vmem:[#allocation3 + $0xb0] sm:$0xff] %vm15383_vm2, %v813_v41 }
  0x7b   : > { %639 = vst.msk [vmem:[#allocation2 + $0xc0] sm:$0xff] %vm15383_vm2, %v813_v41  ;;  %v10696_v41 = vld [vmem:[#allocation3 + $0xb8] sm:$0xf0] }
  0x7c   : > { %10773 = vmatmul.msk.bf16.gmra.mxu1 %vm1458_vm3, %v10651_v46  ;;  %v14179_v46 = vld [vmem:[#allocation3 + $0x94] sm:$0xf] }
  0x7e   : > { %10953 = vmatmul.msk.bf16.gmra.mxu3 %vm1458_vm3, %v10831_v47  ;;  %v10680_v47 = vld [vmem:[#allocation3 + $0x98] sm:$0xf0] }
  0x7f   : > { %v10683_v50 = vor.u32 %v14179_v46, %v10680_v47 }
  0x88   : > { %1540 = vmatmul.bf16.gmra.mxu0 %v10647_v54  ;;  %1964 = vmatmul.bf16.gmra.mxu2 %v10827_v58 }
  0x8c   : > { %10774 = vmatmul.msk.bf16.gmra.mxu1 %vm1458_vm3, %v10659_v0  ;;  %v10858_v0 = vld [vmem:[#allocation2 + $0x90] sm:$0xf] }
  0x8e   : > { %10954 = vmatmul.msk.bf16.gmra.mxu3 %vm1458_vm3, %v10839_v1  ;;  %v14139_v1 = vld [vmem:[#allocation2 + $0x94] sm:$0xf0] }
  0x98   : > { %1545 = vmatmul.bf16.gmra.mxu0 %v10655_v6  ;;  %1969 = vmatmul.bf16.gmra.mxu2 %v10835_v10  ;;  %v816_v6 = vld [vmem:[%s15548_s16 + $0x58] sm:$0xff]  ;;  %v10859_v10 = vor.u32 %v14139_v1, %v10858_v0  ;;  %v819_v1 = vld [vmem:[%s15548_s16 + $0x70] sm:$0xff] }
  0x99   : > { %832 = vst.msk [vmem:[#allocation3 + $0xc8] sm:$0xff] %vm15383_vm2, %v816_v6 }
  0x9a   : > { %642 = vst.msk [vmem:[#allocation2 + $0xd8] sm:$0xff] %vm15383_vm2, %v816_v6 }
  0x9b   : > { %835 = vst.msk [vmem:[#allocation3 + $0xe0] sm:$0xff] %vm15383_vm2, %v819_v1 }
  0x9c   : > { %10775 = vmatmul.msk.bf16.gmra.mxu1 %vm1458_vm3, %v10667_v15  ;;  %v14140_v15 = vld [vmem:[#allocation2 + $0xa4] sm:$0xf]  ;;  %645 = vst.msk [vmem:[#allocation2 + $0xf0] sm:$0xff] %vm15383_vm2, %v819_v1 }
  0x9d   : > { %v967_v1 = vld [vmem:[%s15399_s25 + $0x20] sm:$0xff] }
  0x9e   : > { %10955 = vmatmul.msk.bf16.gmra.mxu3 %vm1458_vm3, %v10847_v16  ;;  %v10868_v16 = vld [vmem:[#allocation2 + $0xa8] sm:$0xf0]  ;;  %983 = vst.msk [vmem:[#allocation4] sm:$0xff] %vm15383_vm2, %v967_v1 }
  0x9f   : > { %v10871_v20 = vor.u32 %v14140_v15, %v10868_v16 }
  0xa1   : > { %v14147_v61 = vld [vmem:[#allocation2 + $0xd4] sm:$0xf0] }
  0xa3   : > { %v10906_v2 = vld [vmem:[#allocation2 + $0xf0] sm:$0xf] }
  0xa8   : > { %1550 = vmatmul.bf16.gmra.mxu0 %v10663_v23  ;;  %1974 = vmatmul.bf16.gmra.mxu2 %v10843_v26  ;;  %v10686_v26 = vld [vmem:[#allocation3 + $0xa0] sm:$0xf] }
  0xa9   : > { %v1605_v32 = vpop.f32.mrf.mxu1 }
  0xac   : > { %10776 = vmatmul.msk.bf16.gmra.mxu1 %vm1458_vm3, %v10675_v31  ;;  %v14141_v31 = vld [vmem:[#allocation2 + $0xa4] sm:$0xf0] }
  0xad   : > { %v10867_v38 = vor.u32 %v14141_v31, %v10866_v30 }
  0xae   : > { %10956 = vmatmul.msk.bf16.gmra.mxu3 %vm1458_vm3, %v10855_v33  ;;  %v10687_v33 = vor.u32 %v14182_v27, %v10686_v26 }
  0xb1   : > { %v2029_v36 = vpop.f32.mrf.mxu3  ;;  %v1607_v37 = vpop.f32.mrf.mxu1 }
  0xb5   : > { %v1516_v43 = vpop.f32.mrf.mxu0 }
  0xb6   : > { %v1606_v45 = vadd.f32 %v1605_v32, %v1516_v43  ;;  %v14142_v43 = vld [vmem:[#allocation2 + $0xb4] sm:$0xf] }
  0xb8   : > { %1555 = vmatmul.bf16.gmra.mxu0 %v10671_v40  ;;  %1979 = vmatmul.bf16.gmra.mxu2 %v10851_v44  ;;  %v14183_v40 = vld [vmem:[#allocation3 + $0xb4] sm:$0xf]  ;;  %v10876_v44 = vld [vmem:[#allocation2 + $0xb8] sm:$0xf0] }
  0xb9   : > { %v2031_v51 = vpop.f32.mrf.mxu3  ;;  %v1610_v52 = vpop.f32.mrf.mxu1  ;;  %v10879_v48 = vor.u32 %v14142_v43, %v10876_v44  ;;  %v10892_v43 = vld [vmem:[#allocation2 + $0xd8] sm:$0xf0] }
  0xbb   : > { %v1940_v54 = vpop.f32.mrf.mxu2 }
  0xbc   : > { %10777 = vmatmul.msk.bf16.gmra.mxu1 %vm1458_vm3, %v10683_v50  ;;  %v1941_v55 = vadd.f32 %v1940_v54, %v1606_v45  ;;  %v10699_v45 = vor.u32 %v14183_v40, %v10696_v41  ;;  %v14235_v54 = vld [vmem:[%s17884_s6 + $0x98] sm:$0xff]  ;;  %v14146_v41 = vld [vmem:[#allocation2 + $0xd4] sm:$0xf] }
  0xbd   : > { %v1518_v56 = vpop.f32.mrf.mxu0  ;;  %2412 = vmatpush.bf16.msrb.mxu1 %v14235_v54  ;;  %v14234_v54 = vld [vmem:[%s17884_s6 + $0x90] sm:$0xff] }
  0xbe   : > { %v1608_v57 = vadd.f32 %v1607_v37, %v1518_v56  ;;  %v15609_v58 = vadd.f32 %v2029_v36, %v1941_v55  ;;  %10957 = vmatmul.msk.bf16.gmra.mxu3 %vm1458_vm3, %v10863_v53  ;;  %v10694_v55 = vld [vmem:[#allocation3 + $0xb0] sm:$0xf]  ;;  %v14184_v56 = vld [vmem:[#allocation3 + $0xb4] sm:$0xf0] }
  0xbf   : > { %v10695_v0 = vor.u32 %v14184_v56, %v10694_v55  ;;  %v10710_v55 = vld [vmem:[#allocation3 + $0xd0] sm:$0xf]  ;;  %v14188_v56 = vld [vmem:[#allocation3 + $0xd4] sm:$0xf0] }
  0xc1   : > { %v2034_v62 = vpop.f32.mrf.mxu3  ;;  %v1612_v63 = vpop.f32.mrf.mxu1  ;;  %2413 = vmatpush.bf16.msrb.mxu1 %v14234_v54 }
  0xc3   : > { %v1942_v3 = vpop.f32.mrf.mxu2 }
  0xc4   : > { %v1943_v7 = vadd.f32 %v1942_v3, %v1608_v57 }
  0xc5   : > { %v1521_v8 = vpop.f32.mrf.mxu0 }
  0xc6   : > { %v1611_v11 = vadd.f32 %v1610_v52, %v1521_v8  ;;  %v15624_v14 = vadd.f32 %v2031_v51, %v1943_v7  ;;  %v14185_v7 = vld [vmem:[#allocation3 + $0xc4] sm:$0xf]  ;;  %v10704_v8 = vld [vmem:[#allocation3 + $0xc8] sm:$0xf0] }
  0xc7   : > { %v10707_v13 = vor.u32 %v14185_v7, %v10704_v8  ;;  %v14189_v7 = vld [vmem:[#allocation3 + $0xe4] sm:$0xf]  ;;  %v10720_v8 = vld [vmem:[#allocation3 + $0xe8] sm:$0xf0] }
  0xc8   : > { %1560 = vmatmul.bf16.gmra.mxu0 %v10679_v4  ;;  %1984 = vmatmul.bf16.gmra.mxu2 %v10859_v10 }
  0xc9   : > { %v2036_v18 = vpop.f32.mrf.mxu3  ;;  %v1615_v19 = vpop.f32.mrf.mxu1 }
  0xcb   : > { %v1945_v21 = vpop.f32.mrf.mxu2 }
  0xcc   : > { %10778 = vmatmul.msk.bf16.gmra.mxu1 %vm1458_vm3, %v10691_v17  ;;  %v1946_v22 = vadd.f32 %v1945_v21, %v1611_v11  ;;  %v14144_v11 = vld [vmem:[#allocation2 + $0xc4] sm:$0xf] }
  0xcd   : > { %v1523_v23 = vpop.f32.mrf.mxu0  ;;  %v10887_v17 = vor.u32 %v14144_v11, %v10884_v12  ;;  %v14148_v12 = vld [vmem:[#allocation2 + $0xe4] sm:$0xf] }
  0xce   : > { %v1613_v24 = vadd.f32 %v1612_v63, %v1523_v23  ;;  %v15631_v25 = vadd.f32 %v2034_v62, %v1946_v22  ;;  %10958 = vmatmul.msk.bf16.gmra.mxu3 %vm1458_vm3, %v10871_v20  ;;  %v14276_v62 = vld [vmem:[%s17884_s6 + $0xe0] sm:$0xff] }
  0xcf   : > { %2919 = vmatpush.bf16.msrb.mxu0 %v14276_v62  ;;  %v10702_v23 = vld [vmem:[#allocation3 + $0xc0] sm:$0xf]  ;;  %v14275_v62 = vld [vmem:[%s17884_s6 + $0xd8] sm:$0xff] }
  0xd1   : > { %v2039_v28 = vpop.f32.mrf.mxu3  ;;  %v1617_v29 = vpop.f32.mrf.mxu1 }
  0xd3   : > { %v1947_v32 = vpop.f32.mrf.mxu2  ;;  %2920 = vmatpush.bf16.msrb.mxu0 %v14275_v62 }
  0xd4   : > { %v1948_v36 = vadd.f32 %v1947_v32, %v1613_v24  ;;  %v14186_v24 = vld [vmem:[#allocation3 + $0xc4] sm:$0xf0]  ;;  %v821_v32 = vld [vmem:[%s15548_s16 + $0x80] sm:$0xff] }
  0xd5   : > { %v1526_v37 = vpop.f32.mrf.mxu0  ;;  %v10703_v31 = vor.u32 %v14186_v24, %v10702_v23  ;;  %837 = vst.msk [vmem:[#allocation3 + $0xf0] sm:$0xff] %vm15383_vm2, %v821_v32 }
  0xd6   : > { %v1616_v39 = vadd.f32 %v1615_v19, %v1526_v37  ;;  %v15640_v42 = vadd.f32 %v2036_v18, %v1948_v36 }
  0xd8   : > { %1565 = vmatmul.bf16.gmra.mxu0 %v10687_v33  ;;  %1989 = vmatmul.bf16.gmra.mxu2 %v10867_v38  ;;  %v822_v33 = vld [vmem:[%s15548_s16 + $0x88] sm:$0xff]  ;;  %v14187_v38 = vld [vmem:[#allocation3 + $0xd4] sm:$0xf] }
  0xd9   : > { %v2041_v46 = vpop.f32.mrf.mxu3  ;;  %v1620_v47 = vpop.f32.mrf.mxu1  ;;  %838 = vst.msk [vmem:[#allocation3 + $0xf8] sm:$0xff] %vm15383_vm2, %v822_v33 }
  0xdb   : > { %v1950_v49 = vpop.f32.mrf.mxu2 }
  0xdc   : > { %10779 = vmatmul.msk.bf16.gmra.mxu1 %vm1458_vm3, %v10699_v45  ;;  %v1951_v50 = vadd.f32 %v1950_v49, %v1616_v39  ;;  %v10712_v39 = vld [vmem:[#allocation3 + $0xd8] sm:$0xf0]  ;;  %v10726_v62 = vld [vmem:[#allocation3 + $0xf0] sm:$0xf] }
  0xdd   : > { %v1528_v51 = vpop.f32.mrf.mxu0  ;;  %v10715_v44 = vor.u32 %v14187_v38, %v10712_v39 }
  0xde   : > { %v1618_v52 = vadd.f32 %v1617_v29, %v1528_v51  ;;  %v15647_v53 = vadd.f32 %v2039_v28, %v1951_v50  ;;  %10959 = vmatmul.msk.bf16.gmra.mxu3 %vm1458_vm3, %v10879_v48  ;;  %v10882_v28 = vld [vmem:[#allocation2 + $0xc0] sm:$0xf]  ;;  %v14145_v29 = vld [vmem:[#allocation2 + $0xc4] sm:$0xf0] }
  0xdf   : > { %v10883_v36 = vor.u32 %v14145_v29, %v10882_v28 }
  0xe1   : > { %v2044_v57 = vpop.f32.mrf.mxu3  ;;  %v1622_v59 = vpop.f32.mrf.mxu1 }
  0xe3   : > { %v1952_v63 = vpop.f32.mrf.mxu2 }
  0xe4   : > { %v1953_v3 = vadd.f32 %v1952_v63, %v1618_v52 }
  0xe5   : > { %v1531_v4 = vpop.f32.mrf.mxu0 }
  0xe6   : > { %v1621_v6 = vadd.f32 %v1620_v47, %v1531_v4  ;;  %v15662_v10 = vadd.f32 %v2041_v46, %v1953_v3  ;;  %v10895_v47 = vor.u32 %v14146_v41, %v10892_v43  ;;  %v14191_v41 = vld [vmem:[#allocation3 + $0xf4] sm:$0xf]  ;;  %v10728_v43 = vld [vmem:[#allocation3 + $0xf8] sm:$0xf0] }
  0xe8   : > { %1570 = vmatmul.bf16.gmra.mxu0 %v10695_v0  ;;  %1994 = vmatmul.bf16.gmra.mxu2 %v10875_v5  ;;  %v10711_v0 = vor.u32 %v14188_v56, %v10710_v55  ;;  %v10891_v5 = vor.u32 %v14147_v61, %v10890_v60  ;;  %v14323_v61 = vld [vmem:[%s17884_s6 + $0x158] sm:$0xff] }
  0xe9   : > { %v2046_v15 = vpop.f32.mrf.mxu3  ;;  %v1625_v16 = vpop.f32.mrf.mxu1  ;;  %3420 = vmatpush.bf16.msra.mxu1 %v14323_v61 }
  0xeb   : > { %v1955_v18 = vpop.f32.mrf.mxu2 }
  0xec   : > { %10780 = vmatmul.msk.bf16.gmra.mxu1 %vm1458_vm3, %v10707_v13  ;;  %v1956_v19 = vadd.f32 %v1955_v18, %v1621_v6  ;;  %v10900_v13 = vld [vmem:[#allocation2 + $0xe8] sm:$0xf0] }
  0xed   : > { %v1533_v20 = vpop.f32.mrf.mxu0  ;;  %v10903_v18 = vor.u32 %v14148_v12, %v10900_v13 }
  0xee   : > { %v1623_v21 = vadd.f32 %v1622_v59, %v1533_v20  ;;  %v15669_v22 = vadd.f32 %v2044_v57, %v1956_v19  ;;  %10960 = vmatmul.msk.bf16.gmra.mxu3 %vm1458_vm3, %v10887_v17 }
  0xf1   : > { %v2049_v26 = vpop.f32.mrf.mxu3  ;;  %v1627_v27 = vpop.f32.mrf.mxu1 }
  0xf3   : > { %v1957_v30 = vpop.f32.mrf.mxu2 }
  0xf4   : > { %v1958_v34 = vadd.f32 %v1957_v30, %v1623_v21  ;;  %v10898_v30 = vld [vmem:[#allocation2 + $0xe0] sm:$0xf] }
  0xf5   : > { %v1536_v35 = vpop.f32.mrf.mxu0 }
  0xf6   : > { %v1626_v37 = vadd.f32 %v1625_v16, %v1536_v35  ;;  %v15678_v40 = vadd.f32 %v2046_v15, %v1958_v34  ;;  %v10723_v15 = vor.u32 %v14189_v7, %v10720_v8  ;;  %v969_v34 = vld [vmem:[%s15399_s25 + $0x30] sm:$0xff]  ;;  %v970_v35 = vld [vmem:[%s15399_s25 + $0x38] sm:$0xff]  ;;  %v971_v7 = vld [vmem:[%s15399_s25 + $0x40] sm:$0xff] }
  0xf7   : > { %985 = vst.msk [vmem:[#allocation4 + $0x10] sm:$0xff] %vm15383_vm2, %v969_v34  ;;  %v972_v8 = vld [vmem:[%s15399_s25 + $0x48] sm:$0xff]  ;;  %v11182_v34 = vld [vmem:[#allocation2 + $0x80] sm:$0xf] }
  0xf8   : > { %1575 = vmatmul.bf16.gmra.mxu0 %v10703_v31  ;;  %1999 = vmatmul.bf16.gmra.mxu2 %v10883_v36  ;;  %v14149_v31 = vld [vmem:[#allocation2 + $0xe4] sm:$0xf0]  ;;  %986 = vst.msk [vmem:[#allocation4 + $0x18] sm:$0xff] %vm15383_vm2, %v970_v35 }
  0xf9   : > { %v2051_v45 = vpop.f32.mrf.mxu3  ;;  %v1630_v46 = vpop.f32.mrf.mxu1  ;;  %v10899_v38 = vor.u32 %v14149_v31, %v10898_v30  ;;  %987 = vst.msk [vmem:[#allocation4 + $0x20] sm:$0xff] %vm15383_vm2, %v971_v7  ;;  %v14244_v35 = vld [vmem:[#allocation2 + $0x84] sm:$0xf0]  ;;  %v14246_v7 = vld [vmem:[#allocation2 + $0x94] sm:$0xf0] }
  0xfa   : > { %988 = vst.msk [vmem:[#allocation4 + $0x28] sm:$0xff] %vm15383_vm2, %v972_v8 }
  0xfb   : > { %v1960_v48 = vpop.f32.mrf.mxu2 }
  0xfc   : > { %10781 = vmatmul.msk.bf16.gmra.mxu1 %vm1458_vm3, %v10715_v44  ;;  %v1961_v49 = vadd.f32 %v1960_v48, %v1626_v37 }
  0xfd   : > { %v1538_v50 = vpop.f32.mrf.mxu0 }
  0xfe   : > { %v1628_v51 = vadd.f32 %v1627_v27, %v1538_v50  ;;  %v15681_v52 = vadd.f32 %v2049_v26, %v1961_v49  ;;  %10961 = vmatmul.msk.bf16.gmra.mxu3 %vm1458_vm3, %v10895_v47  ;;  %v10718_v26 = vld [vmem:[#allocation3 + $0xe0] sm:$0xf]  ;;  %v14190_v27 = vld [vmem:[#allocation3 + $0xe4] sm:$0xf0]  ;;  %v10731_v47 = vor.u32 %v14191_v41, %v10728_v43  ;;  %v11183_v43 = vor.u32 %v14244_v35, %v11182_v34 }
  0xff   : > { %v10719_v33 = vor.u32 %v14190_v27, %v10718_v26  ;;  %v14324_v50 = vld [vmem:[%s17884_s6 + $0x160] sm:$0xff] }
 0x100   : > { %3516 = vmatpush.bf16.msra.mxu3 %v14324_v50 }
 0x101   : > { %v2054_v57 = vpop.f32.mrf.mxu3  ;;  %v1632_v59 = vpop.f32.mrf.mxu1  ;;  %v11002_v34 = vld [vmem:[#allocation4 + $0x28] sm:$0xf0] }
 0x103   : > { %v1962_v63 = vpop.f32.mrf.mxu2 }
 0x104   : > { %v1963_v3 = vadd.f32 %v1962_v63, %v1628_v51  ;;  %v14365_v51 = vld [vmem:[%s17884_s6 + $0x1a8] sm:$0xff]  ;;  %v14192_v63 = vld [vmem:[#allocation3 + $0xf4] sm:$0xf0] }
 0x105   : > { %v1541_v4 = vpop.f32.mrf.mxu0  ;;  %4023 = vmatpush.bf16.msra.mxu2 %v14365_v51  ;;  %v10992_v51 = vld [vmem:[#allocation4 + $0x10] sm:$0xf] }
 0x106   : > { %v1631_v6 = vadd.f32 %v1630_v46, %v1541_v4  ;;  %v15696_v11 = vadd.f32 %v2051_v45, %v1963_v3  ;;  %v14150_v45 = vld [vmem:[#allocation2 + $0xf4] sm:$0xf]  ;;  %v10908_v46 = vld [vmem:[#allocation2 + $0xf8] sm:$0xf0]  ;;  %v14151_v3 = vld [vmem:[#allocation2 + $0xf4] sm:$0xf0] }
 0x107   : > { %v10911_v54 = vor.u32 %v14150_v45, %v10908_v46  ;;  %v14364_v4 = vld [vmem:[%s17884_s6 + $0x1a0] sm:$0xff]  ;;  %v973_v45 = vld [vmem:[%s15399_s25 + $0x50] sm:$0xff]  ;;  %v974_v46 = vld [vmem:[%s15399_s25 + $0x58] sm:$0xff] }
 0x108   : > { %1580 = vmatmul.bf16.gmra.mxu0 %v10711_v0  ;;  %2004 = vmatmul.bf16.gmra.mxu2 %v10891_v5  ;;  %989 = vst.msk [vmem:[#allocation4 + $0x30] sm:$0xff] %vm15383_vm2, %v973_v45 }
 0x109   : > { %v2056_v16 = vpop.f32.mrf.mxu3  ;;  %v1635_v17 = vpop.f32.mrf.mxu1  ;;  %3927 = vmatpush.bf16.msra.mxu0 %v14364_v4  ;;  %990 = vst.msk [vmem:[#allocation4 + $0x38] sm:$0xff] %vm15383_vm2, %v974_v46 }
 0x10b   : > { %v1965_v19 = vpop.f32.mrf.mxu2 }
 0x10c   : > { %10782 = vmatmul.msk.bf16.gmra.mxu1 %vm1458_vm3, %v10723_v15  ;;  %v1966_v20 = vadd.f32 %v1965_v19, %v1631_v6  ;;  %v10727_v6 = vor.u32 %v14192_v63, %v10726_v62  ;;  %v10907_v15 = vor.u32 %v14151_v3, %v10906_v2 }
 0x10d   : > { %v1543_v21 = vpop.f32.mrf.mxu0 }
 0x10e   : > { %v1633_v23 = vadd.f32 %v1632_v59, %v1543_v21  ;;  %v15699_v24 = vadd.f32 %v2054_v57, %v1966_v20  ;;  %10962 = vmatmul.msk.bf16.gmra.mxu3 %vm1458_vm3, %v10903_v18  ;;  %v14203_v18 = vld [vmem:[#allocation4 + $0x4] sm:$0xf0]  ;;  %v14202_v20 = vld [vmem:[#allocation4 + $0x4] sm:$0xf]  ;;  %v10986_v21 = vld [vmem:[#allocation4 + $0x8] sm:$0xf0] }
 0x111   : > { %v2059_v28 = vpop.f32.mrf.mxu3  ;;  %v1637_v29 = vpop.f32.mrf.mxu1 }
 0x113   : > { %v1967_v32 = vpop.f32.mrf.mxu2 }
 0x114   : > { %v1968_v36 = vadd.f32 %v1967_v32, %v1633_v23 }
 0x115   : > { %v1546_v37 = vpop.f32.mrf.mxu0 }
 0x116   : > { %v1636_v39 = vadd.f32 %v1635_v17, %v1546_v37  ;;  %v15708_v44 = vadd.f32 %v2056_v16, %v1968_v36  ;;  %v10984_v17 = vld [vmem:[#allocation4] sm:$0xf] }
 0x117   : > { %v10985_v23 = vor.u32 %v14203_v18, %v10984_v17 }
 0x118   : > { %1585 = vmatmul.bf16.gmra.mxu0 %v10719_v33  ;;  %2009 = vmatmul.bf16.gmra.mxu2 %v10899_v38  ;;  %v14243_v38 = vld [vmem:[#allocation2 + $0x84] sm:$0xf] }
 0x119   : > { %v2061_v48 = vpop.f32.mrf.mxu3  ;;  %v1640_v49 = vpop.f32.mrf.mxu1 }
 0x11b   : > { %v1970_v55 = vpop.f32.mrf.mxu2 }
 0x11c   : > { %10783 = vmatmul.msk.bf16.gmra.mxu1 %vm1458_vm3, %v10731_v47  ;;  %v1971_v56 = vadd.f32 %v1970_v55, %v1636_v39  ;;  %v11184_v39 = vld [vmem:[#allocation2 + $0x88] sm:$0xf0] }
 0x11d   : > { %v1548_v57 = vpop.f32.mrf.mxu0 }
 0x11e   : > { %v1638_v59 = vadd.f32 %v1637_v29, %v1548_v57  ;;  %v15717_v60 = vadd.f32 %v2059_v28, %v1971_v56  ;;  %10963 = vmatmul.msk.bf16.gmra.mxu3 %vm1458_vm3, %v10911_v54  ;;  %v10989_v28 = vor.u32 %v14202_v20, %v10986_v21  ;;  %v14205_v54 = vld [vmem:[#allocation4 + $0x14] sm:$0xf0]  ;;  %v14204_v56 = vld [vmem:[#allocation4 + $0x14] sm:$0xf]  ;;  %v10994_v57 = vld [vmem:[#allocation4 + $0x18] sm:$0xf0] }
 0x11f   : > { %v10997_v63 = vor.u32 %v14204_v56, %v10994_v57  ;;  %v975_v20 = vld [vmem:[%s15399_s25 + $0x60] sm:$0xff]  ;;  %v976_v21 = vld [vmem:[%s15399_s25 + $0x68] sm:$0xff] }
 0x120   : > { %991 = vst.msk [vmem:[#allocation4 + $0x40] sm:$0xff] %vm15383_vm2, %v975_v20 }
 0x121   : > { %v2064_v0 = vpop.f32.mrf.mxu3  ;;  %v1642_v1 = vpop.f32.mrf.mxu1  ;;  %992 = vst.msk [vmem:[#allocation4 + $0x48] sm:$0xff] %vm15383_vm2, %v976_v21 }
 0x123   : > { %v1972_v5 = vpop.f32.mrf.mxu2 }
 0x124   : > { %v1973_v12 = vadd.f32 %v1972_v5, %v1638_v59  ;;  %v10993_v59 = vor.u32 %v14205_v54, %v10992_v51  ;;  %v14322_v5 = vld [vmem:[%s17884_s6 + $0x150] sm:$0xff]  ;;  %v14247_v51 = vld [vmem:[#allocation2 + $0xa4] sm:$0xf]  ;;  %v11200_v54 = vld [vmem:[#allocation2 + $0xa8] sm:$0xf0] }
 0x125   : > { %v1551_v13 = vpop.f32.mrf.mxu0  ;;  %3421 = vmatpush.bf16.msra.mxu1 %v14322_v5 }
 0x126   : > { %v1641_v16 = vadd.f32 %v1640_v49, %v1551_v13  ;;  %v15732_v19 = vadd.f32 %v2061_v48, %v1973_v12  ;;  %v11187_v49 = vor.u32 %v14243_v38, %v11184_v39  ;;  %v14245_v13 = vld [vmem:[#allocation2 + $0x94] sm:$0xf] }
 0x128   : > { %1590 = vmatmul.bf16.gmra.mxu0 %v10727_v6  ;;  %2014 = vmatmul.bf16.gmra.mxu2 %v10907_v15  ;;  %v11190_v6 = vld [vmem:[#allocation2 + $0x90] sm:$0xf]  ;;  %v11192_v15 = vld [vmem:[#allocation2 + $0x98] sm:$0xf0] }
 0x129   : > { %v2066_v26 = vpop.f32.mrf.mxu3  ;;  %v1645_v27 = vpop.f32.mrf.mxu1  ;;  %v11191_v18 = vor.u32 %v14246_v7, %v11190_v6  ;;  %v14208_v6 = vld [vmem:[#allocation4 + $0x34] sm:$0xf]  ;;  %v11010_v7 = vld [vmem:[#allocation4 + $0x38] sm:$0xf0] }
 0x12b   : > { %v1975_v29 = vpop.f32.mrf.mxu2 }
 0x12c   : > { %v1976_v30 = vadd.f32 %v1975_v29, %v1641_v16  ;;  %2414 = vmatmul.bf16.vlgmr.msrb.gmra.mxu1 %v10985_v23  ;;  %v14363_v16 = vld [vmem:[%s17884_s6 + $0x198] sm:$0xff]  ;;  %v11000_v29 = vld [vmem:[#allocation4 + $0x20] sm:$0xf] }
 0x12d   : > { %v1553_v31 = vpop.f32.mrf.mxu0  ;;  %3928 = vmatpush.bf16.msra.mxu0 %v14363_v16 }
 0x12e   : > { %v1643_v32 = vadd.f32 %v1642_v1, %v1553_v31  ;;  %v15734_v33 = vadd.f32 %v2064_v0, %v1976_v30  ;;  %11146 = vmatmul.msk.bf16.vlgmr.msrb.gmra.mxu3 %vm1458_vm3, %v10989_v28  ;;  %v14207_v30 = vld [vmem:[#allocation4 + $0x24] sm:$0xf0] }
 0x12f   : > { %v11001_v35 = vor.u32 %v14207_v30, %v11000_v29  ;;  %v14249_v30 = vld [vmem:[#allocation2 + $0xb4] sm:$0xf] }
 0x131   : > { %v2069_v36 = vpop.f32.mrf.mxu3  ;;  %v1647_v37 = vpop.f32.mrf.mxu1 }
 0x133   : > { %v1977_v41 = vpop.f32.mrf.mxu2 }
 0x134   : > { %v1978_v47 = vadd.f32 %v1977_v41, %v1643_v32  ;;  %v14206_v32 = vld [vmem:[#allocation4 + $0x24] sm:$0xf] }
 0x135   : > { %v1556_v48 = vpop.f32.mrf.mxu0  ;;  %v11005_v38 = vor.u32 %v14206_v32, %v11002_v34  ;;  %v11208_v32 = vld [vmem:[#allocation2 + $0xb8] sm:$0xf0]  ;;  %v14362_v34 = vld [vmem:[%s17884_s6 + $0x190] sm:$0xff] }
 0x136   : > { %v1646_v50 = vadd.f32 %v1645_v27, %v1556_v48  ;;  %v15743_v55 = vadd.f32 %v2066_v26, %v1978_v47  ;;  %v11195_v27 = vor.u32 %v14245_v13, %v11192_v15  ;;  %v11198_v47 = vld [vmem:[#allocation2 + $0xa0] sm:$0xf]  ;;  %v14248_v48 = vld [vmem:[#allocation2 + $0xa4] sm:$0xf0]  ;;  %v11013_v15 = vor.u32 %v14208_v6, %v11010_v7  ;;  %3929 = vmatpush.bf16.msra.mxu0 %v14362_v34 }
 0x137   : > { %v11199_v57 = vor.u32 %v14248_v48, %v11198_v47  ;;  %v11016_v47 = vld [vmem:[#allocation4 + $0x40] sm:$0xf]  ;;  %v14211_v48 = vld [vmem:[#allocation4 + $0x44] sm:$0xf0] }
 0x138   : > { %2921 = vmatmul.bf16.vlgmr.msrb.gmra.mxu0 %v11183_v43  ;;  %11344 = vmatmul.msk.bf16.vlgmr.msrb.gmra.mxu2 %vm1458_vm3, %v11187_v49 }
 0x139   : > { %v2071_v61 = vpop.f32.mrf.mxu3  ;;  %v1650_v62 = vpop.f32.mrf.mxu1 }
 0x13b   : > { %v1980_v0 = vpop.f32.mrf.mxu2 }
 0x13c   : > { %v1981_v1 = vadd.f32 %v1980_v0, %v1646_v50  ;;  %2419 = vmatmul.bf16.gmra.mxu1 %v10993_v59  ;;  %v977_v59 = vld [vmem:[%s15399_s25 + $0x70] sm:$0xff]  ;;  %v11203_v0 = vor.u32 %v14247_v51, %v11200_v54  ;;  %v11018_v51 = vld [vmem:[#allocation4 + $0x48] sm:$0xf0]  ;;  %v11017_v54 = vor.u32 %v14211_v48, %v11016_v47  ;;  %v14320_v47 = vld [vmem:[%s17884_s6 + $0x140] sm:$0xff] }
 0x13d   : > { %v1558_v2 = vpop.f32.mrf.mxu0  ;;  %993 = vst.msk [vmem:[#allocation4 + $0x50] sm:$0xff] %vm15383_vm2, %v977_v59  ;;  %v11222_v48 = vld [vmem:[#allocation2 + $0xd0] sm:$0xf] }
 0x13e   : > { %v1648_v3 = vadd.f32 %v1647_v37, %v1558_v2  ;;  %v15746_v4 = vadd.f32 %v2069_v36, %v1981_v1  ;;  %11147 = vmatmul.msk.bf16.gmra.mxu3 %vm1458_vm3, %v10997_v63  ;;  %v11008_v2 = vld [vmem:[#allocation4 + $0x30] sm:$0xf] }
 0x141   : > { %v2074_v8 = vpop.f32.mrf.mxu3  ;;  %v1652_v12 = vpop.f32.mrf.mxu1 }
 0x143   : > { %v1982_v17 = vpop.f32.mrf.mxu2 }
 0x144   : > { %v1983_v23 = vadd.f32 %v1982_v17, %v1648_v3  ;;  %v14209_v3 = vld [vmem:[#allocation4 + $0x34] sm:$0xf0] }
 0x145   : > { %v1561_v26 = vpop.f32.mrf.mxu0 }
 0x146   : > { %v1651_v28 = vadd.f32 %v1650_v62, %v1561_v26  ;;  %v15761_v31 = vadd.f32 %v2071_v61, %v1983_v23  ;;  %v978_v61 = vld [vmem:[%s15399_s25 + $0x78] sm:$0xff]  ;;  %v14321_v23 = vld [vmem:[%s17884_s6 + $0x148] sm:$0xff]  ;;  %v11206_v26 = vld [vmem:[#allocation2 + $0xb0] sm:$0xf] }
 0x147   : > { %994 = vst.msk [vmem:[#allocation4 + $0x58] sm:$0xff] %vm15383_vm2, %v978_v61  ;;  %3422 = vmatpush.bf16.msra.mxu1 %v14321_v23 }
 0x148   : > { %2926 = vmatmul.bf16.gmra.mxu0 %v11191_v18  ;;  %11345 = vmatmul.msk.bf16.gmra.mxu2 %vm1458_vm3, %v11195_v27  ;;  %v14250_v27 = vld [vmem:[#allocation2 + $0xb4] sm:$0xf0] }
 0x149   : > { %v2076_v36 = vpop.f32.mrf.mxu3  ;;  %v1655_v37 = vpop.f32.mrf.mxu1 }
 0x14b   : > { %v1985_v39 = vpop.f32.mrf.mxu2  ;;  %3423 = vmatpush.bf16.msra.mxu1 %v14320_v47 }
 0x14c   : > { %v1986_v41 = vadd.f32 %v1985_v39, %v1651_v28  ;;  %2424 = vmatmul.bf16.gmra.mxu1 %v11001_v35 }
 0x14d   : > { %v1563_v43 = vpop.f32.mrf.mxu0 }
 0x14e   : > { %v1653_v45 = vadd.f32 %v1652_v12, %v1563_v43  ;;  %v15764_v46 = vadd.f32 %v2074_v8, %v1986_v41  ;;  %11148 = vmatmul.msk.bf16.gmra.mxu3 %vm1458_vm3, %v11005_v38  ;;  %v11009_v8 = vor.u32 %v14209_v3, %v11008_v2  ;;  %v980_v38 = vld [vmem:[%s15399_s25 + $0x88] sm:$0xff]  ;;  %v11211_v43 = vor.u32 %v14249_v30, %v11208_v32  ;;  %v11214_v2 = vld [vmem:[#allocation2 + $0xc0] sm:$0xf]  ;;  %v14212_v30 = vld [vmem:[#allocation4 + $0x54] sm:$0xf] }
 0x14f   : > { %996 = vst.msk [vmem:[#allocation4 + $0x68] sm:$0xff] %vm15383_vm2, %v980_v38  ;;  %v14252_v3 = vld [vmem:[#allocation2 + $0xc4] sm:$0xf0]  ;;  %v11026_v32 = vld [vmem:[#allocation4 + $0x58] sm:$0xf0] }
 0x151   : > { %v2079_v49 = vpop.f32.mrf.mxu3  ;;  %v1657_v50 = vpop.f32.mrf.mxu1 }
 0x153   : > { %v1987_v56 = vpop.f32.mrf.mxu2 }
 0x154   : > { %v1988_v62 = vadd.f32 %v1987_v56, %v1653_v45 }
 0x155   : > { %v1566_v63 = vpop.f32.mrf.mxu0 }
 0x156   : > { %v1656_v1 = vadd.f32 %v1655_v37, %v1566_v63  ;;  %v15773_v5 = vadd.f32 %v2076_v36, %v1988_v62  ;;  %v11207_v36 = vor.u32 %v14250_v27, %v11206_v26  ;;  %v979_v37 = vld [vmem:[%s15399_s25 + $0x80] sm:$0xff]  ;;  %v11024_v27 = vld [vmem:[#allocation4 + $0x50] sm:$0xf] }
 0x157   : > { %995 = vst.msk [vmem:[#allocation4 + $0x60] sm:$0xff] %vm15383_vm2, %v979_v37  ;;  %v11029_v37 = vor.u32 %v14212_v30, %v11026_v32 }
 0x158   : > { %2931 = vmatmul.bf16.gmra.mxu0 %v11199_v57  ;;  %11346 = vmatmul.msk.bf16.gmra.mxu2 %vm1458_vm3, %v11203_v0 }
 0x159   : > { %v2081_v12 = vpop.f32.mrf.mxu3  ;;  %v1660_v13 = vpop.f32.mrf.mxu1 }
 0x15b   : > { %v1990_v16 = vpop.f32.mrf.mxu2 }
 0x15c   : > { %v1991_v17 = vadd.f32 %v1990_v16, %v1656_v1  ;;  %2429 = vmatmul.bf16.gmra.mxu1 %v11009_v8  ;;  %v14251_v8 = vld [vmem:[#allocation2 + $0xc4] sm:$0xf]  ;;  %v981_v16 = vld [vmem:[%s15399_s25 + $0x90] sm:$0xff] }
 0x15d   : > { %v1568_v18 = vpop.f32.mrf.mxu0  ;;  %997 = vst.msk [vmem:[#allocation4 + $0x70] sm:$0xff] %vm15383_vm2, %v981_v16  ;;  %v11034_v16 = vld [vmem:[#allocation4 + $0x68] sm:$0xf0] }
 0x15e   : > { %v1658_v20 = vadd.f32 %v1657_v50, %v1568_v18  ;;  %v15776_v21 = vadd.f32 %v2079_v49, %v1991_v17  ;;  %11149 = vmatmul.msk.bf16.gmra.mxu3 %vm1458_vm3, %v11013_v15  ;;  %v14210_v50 = vld [vmem:[#allocation4 + $0x44] sm:$0xf]  ;;  %v11215_v15 = vor.u32 %v14252_v3, %v11214_v2  ;;  %v982_v17 = vld [vmem:[%s15399_s25 + $0x98] sm:$0xff]  ;;  %s10581_s25 = sshll.u32 %s548_s15, 2  ;;  %s10583_s15 = sshll.u32 %s561_s13, 2 }
 0x15f   : > { %v11021_v59 = vor.u32 %v14210_v50, %v11018_v51  ;;  %998 = vst.msk [vmem:[#allocation4 + $0x78] sm:$0xff] %vm15383_vm2, %v982_v17  ;;  %v14254_v50 = vld [vmem:[#allocation2 + $0xd4] sm:$0xf0]  ;;  %s16360_s24 = scalar_lea.vmem %s17881_s3, %s10581_s25  ;;  %s10573_s25 = sshll.u32 %s500_s26, 8 }
 0x160   : > { %s567_s13 = sadd.s32 5, %s15353_s14 }
 0x161   : > { %v2084_v28 = vpop.f32.mrf.mxu3  ;;  %v1662_v29 = vpop.f32.mrf.mxu1  ;;  %p570_p5 = scmp.lt.s32.totalorder %s567_s13, 9 }
 0x163   : > { %v1992_v35 = vpop.f32.mrf.mxu2  ;;  %s17921_s13 = smov (!%p570_p5, %s567_s13), 9 }
 0x164   : > { %v1993_v39 = vadd.f32 %v1992_v35, %v1658_v20 }
 0x165   : > { %v1571_v41 = vpop.f32.mrf.mxu0 }
 0x166   : > { %v1661_v45 = vadd.f32 %v1660_v13, %v1571_v41  ;;  %v15791_v49 = vadd.f32 %v2081_v12, %v1993_v39  ;;  %v11216_v12 = vld [vmem:[#allocation2 + $0xc8] sm:$0xf0] }
 0x167   : > { %v11219_v23 = vor.u32 %v14251_v8, %v11216_v12  ;;  %v11032_v8 = vld [vmem:[#allocation4 + $0x60] sm:$0xf]  ;;  %v14215_v12 = vld [vmem:[#allocation4 + $0x64] sm:$0xf0] }
 0x168   : > { %2936 = vmatmul.bf16.gmra.mxu0 %v11207_v36  ;;  %11347 = vmatmul.msk.bf16.gmra.mxu2 %vm1458_vm3, %v11211_v43  ;;  %v11033_v17 = vor.u32 %v14215_v12, %v11032_v8 }
 0x169   : > { %v2086_v56 = vpop.f32.mrf.mxu3  ;;  %v1665_v57 = vpop.f32.mrf.mxu1 }
 0x16b   : > { %v1995_v61 = vpop.f32.mrf.mxu2 }
 0x16c   : > { %v1996_v62 = vadd.f32 %v1995_v61, %v1661_v45  ;;  %2434 = vmatmul.bf16.gmra.mxu1 %v11017_v54 }
 0x16d   : > { %v1573_v63 = vpop.f32.mrf.mxu0 }
 0x16e   : > { %v1663_v0 = vadd.f32 %v1662_v29, %v1573_v63  ;;  %v15794_v1 = vadd.f32 %v2084_v28, %v1996_v62  ;;  %11150 = vmatmul.msk.bf16.gmra.mxu3 %vm1458_vm3, %v11021_v59  ;;  %v14213_v28 = vld [vmem:[#allocation4 + $0x54] sm:$0xf0]  ;;  %v14361_v59 = vld [vmem:[%s17884_s6 + $0x188] sm:$0xff]  ;;  %v11223_v62 = vor.u32 %v14254_v50, %v11222_v48  ;;  %v999_v63 = vld [vmem:[%s15548_s16 + $0x20] sm:$0xff] }
 0x16f   : > { %v11025_v34 = vor.u32 %v14213_v28, %v11024_v27  ;;  %3930 = vmatpush.bf16.msra.mxu0 %v14361_v59  ;;  %1015 = vst.msk [vmem:[#allocation4 + $0x80] sm:$0xff] %vm15383_vm2, %v999_v63  ;;  %v1001_v50 = vld [vmem:[%s15548_s16 + $0x30] sm:$0xff] }
 0x170   : > { %1017 = vst.msk [vmem:[#allocation4 + $0x90] sm:$0xff] %vm15383_vm2, %v1001_v50  ;;  %v14360_v50 = vld [vmem:[%s17884_s6 + $0x180] sm:$0xff] }
 0x171   : > { %v2089_v6 = vpop.f32.mrf.mxu3  ;;  %v1667_v7 = vpop.f32.mrf.mxu1 }
 0x173   : > { %v1997_v13 = vpop.f32.mrf.mxu2  ;;  %3931 = vmatpush.bf16.msra.mxu0 %v14360_v50 }
 0x174   : > { %v1998_v18 = vadd.f32 %v1997_v13, %v1663_v0  ;;  %v1000_v0 = vld [vmem:[%s15548_s16 + $0x28] sm:$0xff] }
 0x175   : > { %v1576_v20 = vpop.f32.mrf.mxu0  ;;  %1016 = vst.msk [vmem:[#allocation4 + $0x88] sm:$0xff] %vm15383_vm2, %v1000_v0  ;;  %v14216_v0 = vld [vmem:[#allocation4 + $0x74] sm:$0xf] }
 0x176   : > { %v1666_v26 = vadd.f32 %v1665_v57, %v1576_v20  ;;  %v15803_v29 = vadd.f32 %v2086_v56, %v1998_v18  ;;  %v14253_v56 = vld [vmem:[#allocation2 + $0xd4] sm:$0xf]  ;;  %v11224_v57 = vld [vmem:[#allocation2 + $0xd8] sm:$0xf0] }
 0x178   : > { %2941 = vmatmul.bf16.gmra.mxu0 %v11215_v15  ;;  %11348 = vmatmul.msk.bf16.gmra.mxu2 %vm1458_vm3, %v11219_v23  ;;  %v14214_v15 = vld [vmem:[#allocation4 + $0x64] sm:$0xf] }
 0x179   : > { %v2091_v35 = vpop.f32.mrf.mxu3  ;;  %v1670_v36 = vpop.f32.mrf.mxu1  ;;  %v11037_v23 = vor.u32 %v14214_v15, %v11034_v16 }
 0x17b   : > { %v2000_v38 = vpop.f32.mrf.mxu2 }
 0x17c   : > { %v2001_v39 = vadd.f32 %v2000_v38, %v1666_v26  ;;  %2439 = vmatmul.bf16.gmra.mxu1 %v11025_v34  ;;  %v647_v34 = vld [vmem:[%s15829_s20] sm:$0xff] }
 0x17d   : > { %v1578_v41 = vpop.f32.mrf.mxu0  ;;  %663 = vst.msk [vmem:[#allocation2 + $0x100] sm:$0xff] %vm15383_vm2, %v647_v34 }
 0x17e   : > { %v1668_v43 = vadd.f32 %v1667_v7, %v1578_v41  ;;  %v15807_v45 = vadd.f32 %v2089_v6, %v2001_v39  ;;  %11151 = vmatmul.msk.bf16.gmra.mxu3 %vm1458_vm3, %v11029_v37  ;;  %v11227_v6 = vor.u32 %v14253_v56, %v11224_v57  ;;  %v14256_v37 = vld [vmem:[#allocation2 + $0xe4] sm:$0xf0]  ;;  %v14255_v41 = vld [vmem:[#allocation2 + $0xe4] sm:$0xf] }
 0x181   : > { %v2094_v51 = vpop.f32.mrf.mxu3  ;;  %v1672_v54 = vpop.f32.mrf.mxu1 }
 0x183   : > { %v2002_v61 = vpop.f32.mrf.mxu2 }
 0x184   : > { %v2003_v2 = vadd.f32 %v2002_v61, %v1668_v43  ;;  %v11232_v43 = vld [vmem:[#allocation2 + $0xe8] sm:$0xf0]  ;;  %v11040_v61 = vld [vmem:[#allocation4 + $0x70] sm:$0xf] }
 0x185   : > { %v1581_v3 = vpop.f32.mrf.mxu0  ;;  %v11235_v57 = vor.u32 %v14255_v41, %v11232_v43  ;;  %v1004_v41 = vld [vmem:[%s15548_s16 + $0x48] sm:$0xff] }
 0x186   : > { %v1671_v7 = vadd.f32 %v1670_v36, %v1581_v3  ;;  %v15822_v13 = vadd.f32 %v2091_v35, %v2003_v2  ;;  %v648_v35 = vld [vmem:[%s15829_s20 + $0x8] sm:$0xff]  ;;  %v11230_v36 = vld [vmem:[#allocation2 + $0xe0] sm:$0xf]  ;;  %v11042_v2 = vld [vmem:[#allocation4 + $0x78] sm:$0xf0]  ;;  %1020 = vst.msk [vmem:[#allocation4 + $0xa8] sm:$0xff] %vm15383_vm2, %v1004_v41 }
 0x187   : > { %664 = vst.msk [vmem:[#allocation2 + $0x108] sm:$0xff] %vm15383_vm2, %v648_v35  ;;  %v11231_v48 = vor.u32 %v14256_v37, %v11230_v36  ;;  %v11045_v8 = vor.u32 %v14216_v0, %v11042_v2  ;;  %v14257_v35 = vld [vmem:[#allocation2 + $0xf4] sm:$0xf]  ;;  %v11240_v36 = vld [vmem:[#allocation2 + $0xf8] sm:$0xf0] }
 0x188   : > { %2946 = vmatmul.bf16.gmra.mxu0 %v11223_v62  ;;  %11349 = vmatmul.msk.bf16.gmra.mxu2 %vm1458_vm3, %v11227_v6  ;;  %v14217_v62 = vld [vmem:[#allocation4 + $0x74] sm:$0xf0] }
 0x189   : > { %v2096_v18 = vpop.f32.mrf.mxu3  ;;  %v1675_v20 = vpop.f32.mrf.mxu1  ;;  %v11041_v3 = vor.u32 %v14217_v62, %v11040_v61  ;;  %v11050_v61 = vld [vmem:[#allocation4 + $0x88] sm:$0xf0] }
 0x18b   : > { %v2005_v26 = vpop.f32.mrf.mxu2 }
 0x18c   : > { %v2006_v27 = vadd.f32 %v2005_v26, %v1671_v7  ;;  %2444 = vmatmul.bf16.gmra.mxu1 %v11033_v17  ;;  %v650_v26 = vld [vmem:[%s15829_s20 + $0x18] sm:$0xff] }
 0x18d   : > { %v1583_v28 = vpop.f32.mrf.mxu0  ;;  %666 = vst.msk [vmem:[#allocation2 + $0x118] sm:$0xff] %vm15383_vm2, %v650_v26 }
 0x18e   : > { %v1673_v30 = vadd.f32 %v1672_v54, %v1583_v28  ;;  %v15831_v32 = vadd.f32 %v2094_v51, %v2006_v27  ;;  %11152 = vmatmul.msk.bf16.gmra.mxu3 %vm1458_vm3, %v11037_v23  ;;  %v1002_v51 = vld [vmem:[%s15548_s16 + $0x38] sm:$0xff]  ;;  %v649_v23 = vld [vmem:[%s15829_s20 + $0x10] sm:$0xff] }
 0x18f   : > { %1018 = vst.msk [vmem:[#allocation4 + $0x98] sm:$0xff] %vm15383_vm2, %v1002_v51  ;;  %v11238_v27 = vld [vmem:[#allocation2 + $0xf0] sm:$0xf]  ;;  %v14258_v28 = vld [vmem:[#allocation2 + $0xf4] sm:$0xf0] }
 0x190   : > { %665 = vst.msk [vmem:[#allocation2 + $0x110] sm:$0xff] %vm15383_vm2, %v649_v23  ;;  %v14260_v23 = vld [vmem:[#allocation2 + $0x104] sm:$0xf0] }
 0x191   : > { %v2099_v38 = vpop.f32.mrf.mxu3  ;;  %v1677_v39 = vpop.f32.mrf.mxu1 }
 0x193   : > { %v2007_v47 = vpop.f32.mrf.mxu2 }
 0x194   : > { %v2008_v54 = vadd.f32 %v2007_v47, %v1673_v30 }
 0x195   : > { %v1586_v56 = vpop.f32.mrf.mxu0 }
 0x196   : > { %v1676_v59 = vadd.f32 %v1675_v20, %v1586_v56  ;;  %v15846_v63 = vadd.f32 %v2096_v18, %v2008_v54  ;;  %v14319_v18 = vld [vmem:[%s17884_s6 + $0x138] sm:$0xff]  ;;  %v11048_v54 = vld [vmem:[#allocation4 + $0x80] sm:$0xf]  ;;  %v14219_v56 = vld [vmem:[#allocation4 + $0x84] sm:$0xf0] }
 0x197   : > { %3424 = vmatpush.bf16.msra.mxu1 %v14319_v18  ;;  %v11049_v62 = vor.u32 %v14219_v56, %v11048_v54  ;;  %v11246_v18 = vld [vmem:[#allocation2 + $0x100] sm:$0xf]  ;;  %v14221_v50 = vld [vmem:[#allocation4 + $0x94] sm:$0xf0]  ;;  %v14220_v54 = vld [vmem:[#allocation4 + $0x94] sm:$0xf] }
 0x198   : > { %2951 = vmatmul.bf16.gmra.mxu0 %v11231_v48  ;;  %11350 = vmatmul.msk.bf16.gmra.mxu2 %vm1458_vm3, %v11235_v57  ;;  %v11243_v48 = vor.u32 %v14257_v35, %v11240_v36  ;;  %v11248_v35 = vld [vmem:[#allocation2 + $0x108] sm:$0xf0]  ;;  %v11247_v36 = vor.u32 %v14260_v23, %v11246_v18  ;;  %v11058_v56 = vld [vmem:[#allocation4 + $0x98] sm:$0xf0]  ;;  %v11254_v18 = vld [vmem:[#allocation2 + $0x110] sm:$0xf] }
 0x199   : > { %v2101_v6 = vpop.f32.mrf.mxu3  ;;  %v1680_v7 = vpop.f32.mrf.mxu1  ;;  %v14262_v23 = vld [vmem:[#allocation2 + $0x114] sm:$0xf0] }
 0x19b   : > { %v2010_v12 = vpop.f32.mrf.mxu2 }
 0x19c   : > { %v2011_v15 = vadd.f32 %v2010_v12, %v1676_v59  ;;  %2449 = vmatmul.bf16.gmra.mxu1 %v11041_v3  ;;  %v14218_v59 = vld [vmem:[#allocation4 + $0x84] sm:$0xf] }
 0x19d   : > { %v1588_v16 = vpop.f32.mrf.mxu0  ;;  %v11053_v3 = vor.u32 %v14218_v59, %v11050_v61 }
 0x19e   : > { %v1678_v17 = vadd.f32 %v1677_v39, %v1588_v16  ;;  %v15849_v20 = vadd.f32 %v2099_v38, %v2011_v15  ;;  %11153 = vmatmul.msk.bf16.gmra.mxu3 %vm1458_vm3, %v11045_v8  ;;  %v11239_v38 = vor.u32 %v14258_v28, %v11238_v27  ;;  %v1003_v39 = vld [vmem:[%s15548_s16 + $0x40] sm:$0xff] }
 0x19f   : > { %1019 = vst.msk [vmem:[#allocation4 + $0xa0] sm:$0xff] %vm15383_vm2, %v1003_v39  ;;  %v651_v16 = vld [vmem:[%s15829_s20 + $0x20] sm:$0xff] }
 0x1a0   : > { %667 = vst.msk [vmem:[#allocation2 + $0x120] sm:$0xff] %vm15383_vm2, %v651_v16  ;;  %v14259_v28 = vld [vmem:[#allocation2 + $0x104] sm:$0xf]  ;;  %v653_v16 = vld [vmem:[%s15829_s20 + $0x30] sm:$0xff] }
 0x1a1   : > { %v2104_v30 = vpop.f32.mrf.mxu3  ;;  %v1682_v34 = vpop.f32.mrf.mxu1  ;;  %669 = vst.msk [vmem:[#allocation2 + $0x130] sm:$0xff] %vm15383_vm2, %v653_v16  ;;  %v655_v16 = vld [vmem:[%s15829_s20 + $0x40] sm:$0xff] }
 0x1a2   : > { %671 = vst.msk [vmem:[#allocation2 + $0x140] sm:$0xff] %vm15383_vm2, %v655_v16  ;;  %v657_v16 = vld [vmem:[%s15829_s20 + $0x50] sm:$0xff] }
 0x1a3   : > { %v2012_v37 = vpop.f32.mrf.mxu2  ;;  %673 = vst.msk [vmem:[#allocation2 + $0x150] sm:$0xff] %vm15383_vm2, %v657_v16  ;;  %v659_v16 = vld [vmem:[%s15829_s20 + $0x60] sm:$0xff] }
 0x1a4   : > { %v2013_v43 = vadd.f32 %v2012_v37, %v1678_v17  ;;  %v652_v17 = vld [vmem:[%s15829_s20 + $0x28] sm:$0xff]  ;;  %v1005_v37 = vld [vmem:[%s15548_s16 + $0x50] sm:$0xff]  ;;  %675 = vst.msk [vmem:[#allocation2 + $0x160] sm:$0xff] %vm15383_vm2, %v659_v16 }
 0x1a5   : > { %v1591_v47 = vpop.f32.mrf.mxu0  ;;  %668 = vst.msk [vmem:[#allocation2 + $0x128] sm:$0xff] %vm15383_vm2, %v652_v17  ;;  %v654_v17 = vld [vmem:[%s15829_s20 + $0x38] sm:$0xff]  ;;  %v661_v16 = vld [vmem:[%s15829_s20 + $0x70] sm:$0xff] }
 0x1a6   : > { %v1681_v51 = vadd.f32 %v1680_v7, %v1591_v47  ;;  %v15870_v57 = vadd.f32 %v2101_v6, %v2013_v43  ;;  %v11251_v47 = vor.u32 %v14259_v28, %v11248_v35  ;;  %1021 = vst.msk [vmem:[#allocation4 + $0xb0] sm:$0xff] %vm15383_vm2, %v1005_v37  ;;  %v11256_v28 = vld [vmem:[#allocation2 + $0x118] sm:$0xf0]  ;;  %v1008_v37 = vld [vmem:[%s15548_s16 + $0x68] sm:$0xff] }
 0x1a7   : > { %670 = vst.msk [vmem:[#allocation2 + $0x138] sm:$0xff] %vm15383_vm2, %v654_v17  ;;  %v656_v17 = vld [vmem:[%s15829_s20 + $0x48] sm:$0xff] }
 0x1a8   : > { %2956 = vmatmul.bf16.gmra.mxu0 %v11239_v38  ;;  %11351 = vmatmul.msk.bf16.gmra.mxu2 %vm1458_vm3, %v11243_v48  ;;  %v1006_v38 = vld [vmem:[%s15548_s16 + $0x58] sm:$0xff]  ;;  %v11056_v48 = vld [vmem:[#allocation4 + $0x90] sm:$0xf]  ;;  %1024 = vst.msk [vmem:[#allocation4 + $0xc8] sm:$0xff] %vm15383_vm2, %v1008_v37 }
 0x1a9   : > { %v2106_v0 = vpop.f32.mrf.mxu3  ;;  %v2415_v2 = vpop.f32.mrf.mxu1  ;;  %1022 = vst.msk [vmem:[#allocation4 + $0xb8] sm:$0xff] %vm15383_vm2, %v1006_v38 }
 0x1aa   : > { %672 = vst.msk [vmem:[#allocation2 + $0x148] sm:$0xff] %vm15383_vm2, %v656_v17  ;;  %v658_v17 = vld [vmem:[%s15829_s20 + $0x58] sm:$0xff] }
 0x1ab   : > { %v2015_v7 = vpop.f32.mrf.mxu2  ;;  %674 = vst.msk [vmem:[#allocation2 + $0x158] sm:$0xff] %vm15383_vm2, %v658_v17  ;;  %v660_v17 = vld [vmem:[%s15829_s20 + $0x68] sm:$0xff] }
 0x1ac   : > { %v2016_v8 = vadd.f32 %v2015_v7, %v1681_v51  ;;  %2454 = vmatmul.bf16.gmra.mxu1 %v11049_v62  ;;  %676 = vst.msk [vmem:[#allocation2 + $0x168] sm:$0xff] %vm15383_vm2, %v660_v17  ;;  %v662_v17 = vld [vmem:[%s15829_s20 + $0x78] sm:$0xff] }
 0x1ad   : > { %v1593_v12 = vpop.f32.mrf.mxu0  ;;  %677 = vst.msk [vmem:[#allocation2 + $0x170] sm:$0xff] %vm15383_vm2, %v661_v16 }
 0x1ae   : > { %v1683_v15 = vadd.f32 %v1682_v34, %v1593_v12  ;;  %v15873_v6 = vadd.f32 %v2104_v30, %v2016_v8  ;;  %11154 = vmatmul.msk.bf16.gmra.mxu3 %vm1458_vm3, %v11053_v3  ;;  %678 = vst.msk [vmem:[#allocation2 + $0x178] sm:$0xff] %vm15383_vm2, %v662_v17 }
 0x1b1   : > { %v2504_v26 = vpop.f32.mrf.mxu3  ;;  %v2417_v27 = vpop.f32.mrf.mxu1 }
 0x1b2   : > { %v2505_v34 = vadd.f32 %v2504_v26, %v2415_v2  ;;  %v11061_v2 = vor.u32 %v14220_v54, %v11058_v56  ;;  %v11066_v56 = vld [vmem:[#allocation4 + $0xa8] sm:$0xf0] }
 0x1b3   : > { %v2017_v30 = vpop.f32.mrf.mxu2 }
 0x1b4   : > { %v2584_v39 = vadd.f32 %v2505_v34, %v15609_v58  ;;  %v2018_v41 = vadd.f32 %v2017_v30, %v1683_v15  ;;  %v11057_v58 = vor.u32 %v14221_v50, %v11056_v48  ;;  %v14318_v15 = vld [vmem:[%s17884_s6 + $0x130] sm:$0xff]  ;;  %v11255_v30 = vor.u32 %v14262_v23, %v11254_v18  ;;  %v11064_v48 = vld [vmem:[#allocation4 + $0xa0] sm:$0xf]  ;;  %v14223_v50 = vld [vmem:[#allocation4 + $0xa4] sm:$0xf0] }
 0x1b5   : > { %v2922_v43 = vpop.f32.mrf.mxu0  ;;  %3425 = vmatpush.bf16.msra.mxu1 %v14318_v15  ;;  %v11262_v18 = vld [vmem:[#allocation2 + $0x120] sm:$0xf]  ;;  %v14264_v23 = vld [vmem:[#allocation2 + $0x124] sm:$0xf0] }
 0x1b6   : > { %v15889_v51 = vadd.f32 %v2106_v0, %v2018_v41 }
 0x1b8   : > { %2961 = vmatmul.bf16.gmra.mxu0 %v11247_v36  ;;  %11352 = vmatmul.msk.bf16.gmra.mxu2 %vm1458_vm3, %v11251_v47  ;;  %v1007_v36 = vld [vmem:[%s15548_s16 + $0x60] sm:$0xff]  ;;  %v14359_v47 = vld [vmem:[%s17884_s6 + $0x178] sm:$0xff] }
 0x1b9   : > { %v2506_v59 = vpop.f32.mrf.mxu3  ;;  %v2420_v61 = vpop.f32.mrf.mxu1  ;;  %1023 = vst.msk [vmem:[#allocation4 + $0xc0] sm:$0xff] %vm15383_vm2, %v1007_v36  ;;  %3932 = vmatpush.bf16.msra.mxu0 %v14359_v47  ;;  %v1010_v36 = vld [vmem:[%s15548_s16 + $0x78] sm:$0xff] }
 0x1ba   : > { %v2507_v62 = vadd.f32 %v2506_v59, %v2417_v27  ;;  %v14261_v27 = vld [vmem:[#allocation2 + $0x114] sm:$0xf]  ;;  %v14225_v47 = vld [vmem:[#allocation4 + $0xb4] sm:$0xf0]  ;;  %1026 = vst.msk [vmem:[#allocation4 + $0xd8] sm:$0xff] %vm15383_vm2, %v1010_v36 }
 0x1bb   : > { %v3011_v3 = vpop.f32.mrf.mxu2 }
 0x1bc   : > { %v2585_v7 = vadd.f32 %v2507_v62, %v15624_v14  ;;  %2459 = vmatmul.bf16.gmra.mxu1 %v11057_v58  ;;  %v3012_v8 = vadd.f32 %v3011_v3, %v2922_v43  ;;  %v11259_v43 = vor.u32 %v14261_v27, %v11256_v28  ;;  %v11065_v58 = vor.u32 %v14223_v50, %v11064_v48  ;;  %v14263_v27 = vld [vmem:[#allocation2 + $0x124] sm:$0xf]  ;;  %v14224_v50 = vld [vmem:[#allocation4 + $0xb4] sm:$0xf] }
 0x1bd   : > { %v2924_v12 = vpop.f32.mrf.mxu0 }
 0x1be   : > { %11155 = vmatmul.msk.bf16.gmra.mxu3 %vm1458_vm3, %v11061_v2  ;;  %v15894_v0 = vadd.f32 %v3012_v8, %v2584_v39 }
 0x1c1   : > { %v2509_v14 = vpop.f32.mrf.mxu3  ;;  %v2422_v26 = vpop.f32.mrf.mxu1 }
 0x1c2   : > { %v2510_v35 = vadd.f32 %v2509_v14, %v2420_v61 }
 0x1c3   : > { %v3013_v34 = vpop.f32.mrf.mxu2 }
 0x1c4   : > { %v2586_v38 = vadd.f32 %v2510_v35, %v15631_v25  ;;  %v3014_v39 = vadd.f32 %v3013_v34, %v2924_v12  ;;  %v14222_v25 = vld [vmem:[#allocation4 + $0xa4] sm:$0xf]  ;;  %v11263_v34 = vor.u32 %v14264_v23, %v11262_v18  ;;  %v11270_v18 = vld [vmem:[#allocation2 + $0x130] sm:$0xf]  ;;  %v14266_v23 = vld [vmem:[#allocation2 + $0x134] sm:$0xf0] }
 0x1c5   : > { %v2927_v41 = vpop.f32.mrf.mxu0  ;;  %v11069_v2 = vor.u32 %v14222_v25, %v11066_v56  ;;  %v11074_v25 = vld [vmem:[#allocation4 + $0xb8] sm:$0xf0] }
 0x1c6   : > { %v15915_v54 = vadd.f32 %v3014_v39, %v2585_v7 }
 0x1c8   : > { %2966 = vmatmul.bf16.gmra.mxu0 %v11255_v30  ;;  %11353 = vmatmul.msk.bf16.gmra.mxu2 %vm1458_vm3, %v11259_v43  ;;  %v1009_v30 = vld [vmem:[%s15548_s16 + $0x70] sm:$0xff] }
 0x1c9   : > { %v2511_v59 = vpop.f32.mrf.mxu3  ;;  %v2425_v61 = vpop.f32.mrf.mxu1  ;;  %1025 = vst.msk [vmem:[#allocation4 + $0xd0] sm:$0xff] %vm15383_vm2, %v1009_v30  ;;  %v11072_v43 = vld [vmem:[#allocation4 + $0xb0] sm:$0xf]  ;;  %v1012_v30 = vld [vmem:[%s15548_s16 + $0x88] sm:$0xff] }
 0x1ca   : > { %v2512_v62 = vadd.f32 %v2511_v59, %v2422_v26  ;;  %1028 = vst.msk [vmem:[#allocation4 + $0xe8] sm:$0xff] %vm15383_vm2, %v1012_v30 }
 0x1cb   : > { %v3016_v3 = vpop.f32.mrf.mxu2 }
 0x1cc   : > { %v2587_v8 = vadd.f32 %v2512_v62, %v15640_v42  ;;  %2464 = vmatmul.bf16.gmra.mxu1 %v11065_v58  ;;  %v3017_v12 = vadd.f32 %v3016_v3, %v2927_v41  ;;  %v11264_v42 = vld [vmem:[#allocation2 + $0x128] sm:$0xf0] }
 0x1cd   : > { %v2929_v7 = vpop.f32.mrf.mxu0  ;;  %v11267_v41 = vor.u32 %v14263_v27, %v11264_v42  ;;  %v11272_v27 = vld [vmem:[#allocation2 + $0x138] sm:$0xf0] }
 0x1ce   : > { %11156 = vmatmul.msk.bf16.gmra.mxu3 %vm1458_vm3, %v11069_v2  ;;  %v15920_v15 = vadd.f32 %v3017_v12, %v2586_v38 }
 0x1d1   : > { %v2514_v14 = vpop.f32.mrf.mxu3  ;;  %v2427_v26 = vpop.f32.mrf.mxu1 }
 0x1d2   : > { %v2515_v28 = vadd.f32 %v2514_v14, %v2425_v61  ;;  %v11077_v61 = vor.u32 %v14224_v50, %v11074_v25  ;;  %v11082_v25 = vld [vmem:[#allocation4 + $0xc8] sm:$0xf0] }
 0x1d3   : > { %v3018_v35 = vpop.f32.mrf.mxu2 }
 0x1d4   : > { %v2588_v37 = vadd.f32 %v2515_v28, %v15647_v53  ;;  %v3019_v38 = vadd.f32 %v3018_v35, %v2929_v7  ;;  %v11073_v53 = vor.u32 %v14225_v47, %v11072_v43  ;;  %v14317_v7 = vld [vmem:[%s17884_s6 + $0x128] sm:$0xff]  ;;  %v11271_v35 = vor.u32 %v14266_v23, %v11270_v18  ;;  %v11080_v43 = vld [vmem:[#allocation4 + $0xc0] sm:$0xf] }
 0x1d5   : > { %v2932_v39 = vpop.f32.mrf.mxu0  ;;  %3426 = vmatpush.bf16.msra.mxu1 %v14317_v7  ;;  %v14227_v47 = vld [vmem:[#allocation4 + $0xc4] sm:$0xf0]  ;;  %v11278_v18 = vld [vmem:[#allocation2 + $0x140] sm:$0xf] }
 0x1d6   : > { %v15935_v48 = vadd.f32 %v3019_v38, %v2587_v8  ;;  %v14268_v23 = vld [vmem:[#allocation2 + $0x144] sm:$0xf0] }
 0x1d8   : > { %2971 = vmatmul.bf16.gmra.mxu0 %v11263_v34  ;;  %11354 = vmatmul.msk.bf16.gmra.mxu2 %vm1458_vm3, %v11267_v41  ;;  %v1011_v34 = vld [vmem:[%s15548_s16 + $0x80] sm:$0xff]  ;;  %v14358_v41 = vld [vmem:[%s17884_s6 + $0x170] sm:$0xff] }
 0x1d9   : > { %v2516_v56 = vpop.f32.mrf.mxu3  ;;  %v2430_v58 = vpop.f32.mrf.mxu1  ;;  %1027 = vst.msk [vmem:[#allocation4 + $0xe0] sm:$0xff] %vm15383_vm2, %v1011_v34  ;;  %3933 = vmatpush.bf16.msra.mxu0 %v14358_v41  ;;  %v1014_v34 = vld [vmem:[%s15548_s16 + $0x98] sm:$0xff] }
 0x1da   : > { %v2517_v59 = vadd.f32 %v2516_v56, %v2427_v26  ;;  %v14265_v26 = vld [vmem:[#allocation2 + $0x134] sm:$0xf]  ;;  %v14229_v41 = vld [vmem:[#allocation4 + $0xd4] sm:$0xf0]  ;;  %1030 = vst.msk [vmem:[#allocation4 + $0xf8] sm:$0xff] %vm15383_vm2, %v1014_v34 }
 0x1db   : > { %v3021_v62 = vpop.f32.mrf.mxu2 }
 0x1dc   : > { %v2589_v2 = vadd.f32 %v2517_v59, %v15662_v10  ;;  %2469 = vmatmul.bf16.gmra.mxu1 %v11073_v53  ;;  %v3022_v3 = vadd.f32 %v3021_v62, %v2932_v39  ;;  %v11275_v39 = vor.u32 %v14265_v26, %v11272_v27  ;;  %v11081_v53 = vor.u32 %v14227_v47, %v11080_v43  ;;  %v14267_v26 = vld [vmem:[#allocation2 + $0x144] sm:$0xf]  ;;  %v14228_v47 = vld [vmem:[#allocation4 + $0xd4] sm:$0xf] }
 0x1dd   : > { %v2934_v12 = vpop.f32.mrf.mxu0 }
 0x1de   : > { %11157 = vmatmul.msk.bf16.gmra.mxu3 %vm1458_vm3, %v11077_v61  ;;  %v15940_v8 = vadd.f32 %v3022_v3, %v2588_v37 }
 0x1e1   : > { %v2519_v10 = vpop.f32.mrf.mxu3  ;;  %v2432_v14 = vpop.f32.mrf.mxu1 }
 0x1e2   : > { %v2520_v42 = vadd.f32 %v2519_v10, %v2430_v58 }
 0x1e3   : > { %v3023_v28 = vpop.f32.mrf.mxu2 }
 0x1e4   : > { %v2590_v36 = vadd.f32 %v2520_v42, %v15669_v22  ;;  %v3024_v37 = vadd.f32 %v3023_v28, %v2934_v12  ;;  %v14226_v22 = vld [vmem:[#allocation4 + $0xc4] sm:$0xf]  ;;  %v11279_v28 = vor.u32 %v14268_v23, %v11278_v18  ;;  %v11286_v18 = vld [vmem:[#allocation2 + $0x150] sm:$0xf]  ;;  %v14270_v23 = vld [vmem:[#allocation2 + $0x154] sm:$0xf0] }
 0x1e5   : > { %v2937_v38 = vpop.f32.mrf.mxu0  ;;  %v11085_v61 = vor.u32 %v14226_v22, %v11082_v25  ;;  %v11090_v22 = vld [vmem:[#allocation4 + $0xd8] sm:$0xf0] }
 0x1e6   : > { %v15961_v50 = vadd.f32 %v3024_v37, %v2589_v2 }
 0x1e8   : > { %2976 = vmatmul.bf16.gmra.mxu0 %v11271_v35  ;;  %11355 = vmatmul.msk.bf16.gmra.mxu2 %vm1458_vm3, %v11275_v39  ;;  %v1013_v35 = vld [vmem:[%s15548_s16 + $0x90] sm:$0xff]  ;;  %s17101_s16 = scalar_lea.vmem %s17882_s4, %s10583_s15 }
 0x1e9   : > { %v2521_v56 = vpop.f32.mrf.mxu3  ;;  %v2435_v58 = vpop.f32.mrf.mxu1  ;;  %1029 = vst.msk [vmem:[#allocation4 + $0xf0] sm:$0xff] %vm15383_vm2, %v1013_v35  ;;  %v11088_v39 = vld [vmem:[#allocation4 + $0xd0] sm:$0xf] }
 0x1ea   : > { %v2522_v59 = vadd.f32 %v2521_v56, %v2432_v14 }
 0x1eb   : > { %v3026_v62 = vpop.f32.mrf.mxu2 }
 0x1ec   : > { %v2591_v3 = vadd.f32 %v2522_v59, %v15678_v40  ;;  %2474 = vmatmul.bf16.gmra.mxu1 %v11081_v53  ;;  %v3027_v12 = vadd.f32 %v3026_v62, %v2937_v38  ;;  %v11280_v40 = vld [vmem:[#allocation2 + $0x148] sm:$0xf0] }
 0x1ed   : > { %v2939_v2 = vpop.f32.mrf.mxu0  ;;  %v11283_v38 = vor.u32 %v14267_v26, %v11280_v40  ;;  %v11288_v26 = vld [vmem:[#allocation2 + $0x158] sm:$0xf0] }
 0x1ee   : > { %11158 = vmatmul.msk.bf16.gmra.mxu3 %vm1458_vm3, %v11085_v61  ;;  %v15966_v7 = vadd.f32 %v3027_v12, %v2590_v36 }
 0x1f1   : > { %v2524_v10 = vpop.f32.mrf.mxu3  ;;  %v2437_v14 = vpop.f32.mrf.mxu1 }
 0x1f2   : > { %v2525_v27 = vadd.f32 %v2524_v10, %v2435_v58  ;;  %v11093_v58 = vor.u32 %v14228_v47, %v11090_v22  ;;  %v11098_v47 = vld [vmem:[#allocation4 + $0xe8] sm:$0xf0] }
 0x1f3   : > { %v3028_v42 = vpop.f32.mrf.mxu2 }
 0x1f4   : > { %v2592_v30 = vadd.f32 %v2525_v27, %v15681_v52  ;;  %v3029_v36 = vadd.f32 %v3028_v42, %v2939_v2  ;;  %v11089_v52 = vor.u32 %v14229_v41, %v11088_v39  ;;  %v14316_v2 = vld [vmem:[%s17884_s6 + $0x120] sm:$0xff]  ;;  %v11287_v42 = vor.u32 %v14270_v23, %v11286_v18  ;;  %v11296_v23 = vld [vmem:[#allocation2 + $0x168] sm:$0xf0] }
 0x1f5   : > { %v2942_v37 = vpop.f32.mrf.mxu0  ;;  %3427 = vmatpush.bf16.msra.mxu1 %v14316_v2  ;;  %v14230_v41 = vld [vmem:[#allocation4 + $0xe4] sm:$0xf]  ;;  %v14272_v2 = vld [vmem:[#allocation2 + $0x164] sm:$0xf0] }
 0x1f6   : > { %v15981_v43 = vadd.f32 %v3029_v36, %v2591_v3  ;;  %v14357_v36 = vld [vmem:[%s17884_s6 + $0x168] sm:$0xff]  ;;  %v14271_v18 = vld [vmem:[#allocation2 + $0x164] sm:$0xf] }
 0x1f7   : > { %3934 = vmatpush.bf16.msra.mxu0 %v14357_v36 }
 0x1f8   : > { %2981 = vmatmul.bf16.gmra.mxu0 %v11279_v28  ;;  %11356 = vmatmul.msk.bf16.gmra.mxu2 %vm1458_vm3, %v11283_v38  ;;  %v14231_v38 = vld [vmem:[#allocation4 + $0xe4] sm:$0xf0] }
 0x1f9   : > { %v2526_v25 = vpop.f32.mrf.mxu3  ;;  %v2440_v53 = vpop.f32.mrf.mxu1 }
 0x1fa   : > { %v2527_v56 = vadd.f32 %v2526_v25, %v2437_v14  ;;  %v14269_v14 = vld [vmem:[#allocation2 + $0x154] sm:$0xf] }
 0x1fb   : > { %v3031_v59 = vpop.f32.mrf.mxu2 }
 0x1fc   : > { %v2593_v61 = vadd.f32 %v2527_v56, %v15696_v11  ;;  %2479 = vmatmul.bf16.gmra.mxu1 %v11089_v52  ;;  %v3032_v62 = vadd.f32 %v3031_v59, %v2942_v37  ;;  %v11096_v37 = vld [vmem:[#allocation4 + $0xe0] sm:$0xf] }
 0x1fd   : > { %v2944_v12 = vpop.f32.mrf.mxu0  ;;  %v11097_v22 = vor.u32 %v14231_v38, %v11096_v37 }
 0x1fe   : > { %11159 = vmatmul.msk.bf16.gmra.mxu3 %vm1458_vm3, %v11093_v58  ;;  %v15986_v3 = vadd.f32 %v3032_v62, %v2592_v30  ;;  %v11291_v30 = vor.u32 %v14269_v14, %v11288_v26 }
 0x201   : > { %v2529_v11 = vpop.f32.mrf.mxu3  ;;  %v2442_v10 = vpop.f32.mrf.mxu1 }
 0x202   : > { %v2530_v40 = vadd.f32 %v2529_v11, %v2440_v53  ;;  %v11101_v53 = vor.u32 %v14230_v41, %v11098_v47 }
 0x203   : > { %v3033_v27 = vpop.f32.mrf.mxu2 }
 0x204   : > { %v2594_v28 = vadd.f32 %v2530_v40, %v15699_v24  ;;  %v3034_v35 = vadd.f32 %v3033_v27, %v2944_v12  ;;  %v11294_v12 = vld [vmem:[#allocation2 + $0x160] sm:$0xf]  ;;  %v11299_v27 = vor.u32 %v14271_v18, %v11296_v23 }
 0x205   : > { %v2947_v34 = vpop.f32.mrf.mxu0 }
 0x206   : > { %v16001_v39 = vadd.f32 %v3034_v35, %v2593_v61  ;;  %v14233_v35 = vld [vmem:[#allocation4 + $0xf4] sm:$0xf0] }
 0x208   : > { %2986 = vmatmul.bf16.gmra.mxu0 %v11287_v42  ;;  %11357 = vmatmul.msk.bf16.gmra.mxu2 %vm1458_vm3, %v11291_v30  ;;  %v11104_v42 = vld [vmem:[#allocation4 + $0xf0] sm:$0xf]  ;;  %v11106_v30 = vld [vmem:[#allocation4 + $0xf8] sm:$0xf0] }
 0x209   : > { %v2531_v52 = vpop.f32.mrf.mxu3  ;;  %v2445_v24 = vpop.f32.mrf.mxu1  ;;  %v11105_v36 = vor.u32 %v14233_v35, %v11104_v42  ;;  %v14284_v35 = vld [vmem:[#allocation3 + $0x84] sm:$0xf] }
 0x20a   : > { %v2532_v25 = vadd.f32 %v2531_v52, %v2442_v10  ;;  %v11295_v10 = vor.u32 %v14272_v2, %v11294_v12  ;;  %v14273_v2 = vld [vmem:[#allocation2 + $0x174] sm:$0xf] }
 0x20b   : > { %v3036_v56 = vpop.f32.mrf.mxu2 }
 0x20c   : > { %v2595_v58 = vadd.f32 %v2532_v25, %v15708_v44  ;;  %2484 = vmatmul.bf16.gmra.mxu1 %v11097_v22  ;;  %v3037_v59 = vadd.f32 %v3036_v56, %v2947_v34  ;;  %v14406_v25 = vld [vmem:[%s17884_s6 + $0x1f0] sm:$0xff] }
 0x20d   : > { %v2949_v62 = vpop.f32.mrf.mxu0  ;;  %4530 = vmatpush.bf16.msrb.mxu3 %v14406_v25  ;;  %v14326_v25 = vld [vmem:[#allocation4 + $0x84] sm:$0xf0] }
 0x20e   : > { %11160 = vmatmul.msk.bf16.gmra.mxu3 %vm1458_vm3, %v11101_v53  ;;  %v16006_v61 = vadd.f32 %v3037_v59, %v2594_v28  ;;  %v14232_v28 = vld [vmem:[#allocation4 + $0xf4] sm:$0xf]  ;;  %v14447_v53 = vld [vmem:[%s17884_s6 + $0x238] sm:$0xff] }
 0x20f   : > { %v11109_v47 = vor.u32 %v14232_v28, %v11106_v30  ;;  %5037 = vmatpush.bf16.msrb.mxu2 %v14447_v53  ;;  %v14274_v59 = vld [vmem:[#allocation2 + $0x174] sm:$0xf0]  ;;  %v11382_v28 = vld [vmem:[#allocation3 + $0x88] sm:$0xf0] }
 0x211   : > { %v2534_v16 = vpop.f32.mrf.mxu3  ;;  %v2447_v17 = vpop.f32.mrf.mxu1 }
 0x212   : > { %v2535_v11 = vadd.f32 %v2534_v16, %v2445_v24  ;;  %v11304_v16 = vld [vmem:[#allocation2 + $0x178] sm:$0xf0] }
 0x213   : > { %v3038_v14 = vpop.f32.mrf.mxu2 }
 0x214   : > { %v2596_v26 = vadd.f32 %v2535_v11, %v15717_v60  ;;  %v3039_v40 = vadd.f32 %v3038_v14, %v2949_v62 }
 0x215   : > { %v2952_v44 = vpop.f32.mrf.mxu0 }
 0x216   : > { %v16009_v34 = vadd.f32 %v3039_v40, %v2595_v58  ;;  %v11302_v58 = vld [vmem:[#allocation2 + $0x170] sm:$0xf] }
 0x217   : > { %v11303_v23 = vor.u32 %v14274_v59, %v11302_v58  ;;  %v14446_v40 = vld [vmem:[%s17884_s6 + $0x230] sm:$0xff]  ;;  %v14325_v58 = vld [vmem:[#allocation4 + $0x84] sm:$0xf]  ;;  %v11580_v59 = vld [vmem:[#allocation4 + $0x88] sm:$0xf0] }
 0x218   : > { %2991 = vmatmul.bf16.gmra.mxu0 %v11295_v10  ;;  %11358 = vmatmul.msk.bf16.gmra.mxu2 %vm1458_vm3, %v11299_v27  ;;  %v14285_v27 = vld [vmem:[#allocation3 + $0x84] sm:$0xf0] }
 0x219   : > { %v2536_v37 = vpop.f32.mrf.mxu3  ;;  %v2450_v38 = vpop.f32.mrf.mxu1  ;;  %4941 = vmatpush.bf16.msrb.mxu0 %v14446_v40 }
 0x21a   : > { %v2537_v41 = vadd.f32 %v2536_v37, %v2447_v17 }
 0x21b   : > { %v3041_v22 = vpop.f32.mrf.mxu2 }
 0x21c   : > { %v2597_v60 = vadd.f32 %v2537_v41, %v15732_v19  ;;  %2489 = vmatmul.bf16.gmra.mxu1 %v11105_v36  ;;  %v3042_v52 = vadd.f32 %v3041_v22, %v2952_v44  ;;  %v14405_v19 = vld [vmem:[%s17884_s6 + $0x1e8] sm:$0xff]  ;;  %v11380_v44 = vld [vmem:[#allocation3 + $0x80] sm:$0xf] }
 0x21d   : > { %v2954_v24 = vpop.f32.mrf.mxu0  ;;  %4434 = vmatpush.bf16.msrb.mxu1 %v14405_v19  ;;  %v11381_v30 = vor.u32 %v14285_v27, %v11380_v44 }
 0x21e   : > { %11161 = vmatmul.msk.bf16.gmra.mxu3 %vm1458_vm3, %v11109_v47  ;;  %v16020_v56 = vadd.f32 %v3042_v52, %v2596_v26  ;;  %v11307_v26 = vor.u32 %v14273_v2, %v11304_v16 }
 0x221   : > { %v2539_v62 = vpop.f32.mrf.mxu3  ;;  %v2452_v12 = vpop.f32.mrf.mxu1 }
 0x222   : > { %v2540_v17 = vadd.f32 %v2539_v62, %v2450_v38  ;;  %v11385_v38 = vor.u32 %v14284_v35, %v11382_v28 }
 0x223   : > { %v3043_v18 = vpop.f32.mrf.mxu2 }
 0x224   : > { %v2598_v11 = vadd.f32 %v2540_v17, %v15734_v33  ;;  %v3044_v14 = vadd.f32 %v3043_v18, %v2954_v24  ;;  %v11583_v18 = vor.u32 %v14325_v58, %v11580_v59 }
 0x225   : > { %v2957_v10 = vpop.f32.mrf.mxu0 }
 0x226   : > { %v16029_v42 = vadd.f32 %v3044_v14, %v2597_v60  ;;  %v11578_v60 = vld [vmem:[#allocation4 + $0x80] sm:$0xf]  ;;  %v14287_v14 = vld [vmem:[#allocation3 + $0x94] sm:$0xf0] }
 0x228   : > { %2996 = vmatmul.bf16.gmra.mxu0 %v11303_v23  ;;  %11359 = vmatmul.msk.bf16.gmra.mxu2 %vm1458_vm3, %v11307_v26  ;;  %v11388_v23 = vld [vmem:[#allocation3 + $0x90] sm:$0xf]  ;;  %v11390_v26 = vld [vmem:[#allocation3 + $0x98] sm:$0xf0] }
 0x229   : > { %v2541_v36 = vpop.f32.mrf.mxu3  ;;  %v2455_v33 = vpop.f32.mrf.mxu1  ;;  %v11389_v40 = vor.u32 %v14287_v14, %v11388_v23  ;;  %v11398_v23 = vld [vmem:[#allocation3 + $0xa8] sm:$0xf0] }
 0x22a   : > { %v2542_v37 = vadd.f32 %v2541_v36, %v2452_v12  ;;  %v11579_v12 = vor.u32 %v14326_v25, %v11578_v60  ;;  %v14327_v60 = vld [vmem:[#allocation4 + $0x94] sm:$0xf]  ;;  %v11588_v25 = vld [vmem:[#allocation4 + $0x98] sm:$0xf0] }
 0x22b   : > { %v3046_v41 = vpop.f32.mrf.mxu2 }
 0x22c   : > { %v2599_v47 = vadd.f32 %v2542_v37, %v15743_v55  ;;  %v3047_v22 = vadd.f32 %v3046_v41, %v2957_v10  ;;  %3428 = vmatmul.bf16.vlgmr.msra.gmra.mxu1 %v11381_v30  ;;  %v14286_v10 = vld [vmem:[#allocation3 + $0x94] sm:$0xf]  ;;  %v11586_v41 = vld [vmem:[#allocation4 + $0x90] sm:$0xf] }
 0x22d   : > { %v2959_v52 = vpop.f32.mrf.mxu0  ;;  %v11393_v28 = vor.u32 %v14286_v10, %v11390_v26 }
 0x22e   : > { %v16033_v24 = vadd.f32 %v3047_v22, %v2598_v11  ;;  %11542 = vmatmul.msk.bf16.vlgmr.msra.gmra.mxu3 %vm1458_vm3, %v11385_v38  ;;  %v14404_v38 = vld [vmem:[%s17884_s6 + $0x1e0] sm:$0xff] }
 0x22f   : > { %4435 = vmatpush.bf16.msrb.mxu1 %v14404_v38 }
 0x231   : > { %v2544_v53 = vpop.f32.mrf.mxu3  ;;  %v2457_v19 = vpop.f32.mrf.mxu1 }
 0x232   : > { %v2545_v62 = vadd.f32 %v2544_v53, %v2455_v33 }
 0x233   : > { %v3048_v2 = vpop.f32.mrf.mxu2 }
 0x234   : > { %v2600_v16 = vadd.f32 %v2545_v62, %v15746_v4  ;;  %v3049_v17 = vadd.f32 %v3048_v2, %v2959_v52  ;;  %v11591_v2 = vor.u32 %v14327_v60, %v11588_v25 }
 0x235   : > { %v2962_v55 = vpop.f32.mrf.mxu0 }
 0x236   : > { %v16037_v11 = vadd.f32 %v3049_v17, %v2599_v47  ;;  %v14328_v47 = vld [vmem:[#allocation4 + $0x94] sm:$0xf0]  ;;  %v14289_v17 = vld [vmem:[#allocation3 + $0xa4] sm:$0xf0] }
 0x238   : > { %3935 = vmatmul.bf16.vlgmr.msra.gmra.mxu0 %v11579_v12  ;;  %11740 = vmatmul.msk.bf16.vlgmr.msra.gmra.mxu2 %vm1458_vm3, %v11583_v18  ;;  %v14445_v12 = vld [vmem:[%s17884_s6 + $0x228] sm:$0xff]  ;;  %v14288_v18 = vld [vmem:[#allocation3 + $0xa4] sm:$0xf] }
 0x239   : > { %v2546_v44 = vpop.f32.mrf.mxu3  ;;  %v2460_v27 = vpop.f32.mrf.mxu1  ;;  %4942 = vmatpush.bf16.msrb.mxu0 %v14445_v12 }
 0x23a   : > { %v2547_v35 = vadd.f32 %v2546_v44, %v2457_v19  ;;  %v11587_v19 = vor.u32 %v14328_v47, %v11586_v41  ;;  %v14329_v41 = vld [vmem:[#allocation4 + $0xa4] sm:$0xf]  ;;  %v11596_v47 = vld [vmem:[#allocation4 + $0xa8] sm:$0xf0] }
 0x23b   : > { %v3051_v30 = vpop.f32.mrf.mxu2 }
 0x23c   : > { %v2601_v4 = vadd.f32 %v2547_v35, %v15761_v31  ;;  %v3052_v36 = vadd.f32 %v3051_v30, %v2962_v55  ;;  %3433 = vmatmul.bf16.gmra.mxu1 %v11389_v40  ;;  %v11401_v40 = vor.u32 %v14288_v18, %v11398_v23 }
 0x23d   : > { %v2964_v33 = vpop.f32.mrf.mxu0 }
 0x23e   : > { %v16041_v37 = vadd.f32 %v3052_v36, %v2600_v16  ;;  %11543 = vmatmul.msk.bf16.gmra.mxu3 %vm1458_vm3, %v11393_v28  ;;  %v11396_v16 = vld [vmem:[#allocation3 + $0xa0] sm:$0xf]  ;;  %v14330_v36 = vld [vmem:[#allocation4 + $0xa4] sm:$0xf0] }
 0x23f   : > { %v11397_v14 = vor.u32 %v14289_v17, %v11396_v16 }
 0x241   : > { %v2549_v22 = vpop.f32.mrf.mxu3  ;;  %v2462_v52 = vpop.f32.mrf.mxu1 }
 0x242   : > { %v2550_v53 = vadd.f32 %v2549_v22, %v2460_v27 }
 0x243   : > { %v3053_v31 = vpop.f32.mrf.mxu2 }
 0x244   : > { %v2602_v58 = vadd.f32 %v2550_v53, %v15764_v46  ;;  %v3054_v59 = vadd.f32 %v3053_v31, %v2964_v33  ;;  %v11599_v31 = vor.u32 %v14329_v41, %v11596_v47 }
 0x245   : > { %v2967_v62 = vpop.f32.mrf.mxu0 }
 0x246   : > { %v16051_v55 = vadd.f32 %v3054_v59, %v2601_v4  ;;  %v11594_v4 = vld [vmem:[#allocation4 + $0xa0] sm:$0xf]  ;;  %v14291_v59 = vld [vmem:[#allocation3 + $0xb4] sm:$0xf0] }
 0x248   : > { %3940 = vmatmul.bf16.gmra.mxu0 %v11587_v19  ;;  %11741 = vmatmul.msk.bf16.gmra.mxu2 %vm1458_vm3, %v11591_v2  ;;  %v11404_v19 = vld [vmem:[#allocation3 + $0xb0] sm:$0xf]  ;;  %v11406_v2 = vld [vmem:[#allocation3 + $0xb8] sm:$0xf0] }
 0x249   : > { %v2551_v10 = vpop.f32.mrf.mxu3  ;;  %v2465_v46 = vpop.f32.mrf.mxu1  ;;  %v11405_v12 = vor.u32 %v14291_v59, %v11404_v19  ;;  %v11414_v19 = vld [vmem:[#allocation3 + $0xc8] sm:$0xf0] }
 0x24a   : > { %v2552_v26 = vadd.f32 %v2551_v10, %v2462_v52  ;;  %v11595_v52 = vor.u32 %v14330_v36, %v11594_v4  ;;  %v14331_v4 = vld [vmem:[#allocation4 + $0xb4] sm:$0xf]  ;;  %v11604_v36 = vld [vmem:[#allocation4 + $0xb8] sm:$0xf0] }
 0x24b   : > { %v3056_v44 = vpop.f32.mrf.mxu2 }
 0x24c   : > { %v2603_v27 = vadd.f32 %v2552_v26, %v15773_v5  ;;  %v3057_v35 = vadd.f32 %v3056_v44, %v2967_v62  ;;  %3438 = vmatmul.bf16.gmra.mxu1 %v11397_v14  ;;  %v14290_v62 = vld [vmem:[#allocation3 + $0xb4] sm:$0xf]  ;;  %v11602_v44 = vld [vmem:[#allocation4 + $0xb0] sm:$0xf] }
 0x24d   : > { %v2969_v28 = vpop.f32.mrf.mxu0  ;;  %v11409_v23 = vor.u32 %v14290_v62, %v11406_v2 }
 0x24e   : > { %v16055_v30 = vadd.f32 %v3057_v35, %v2602_v58  ;;  %11544 = vmatmul.msk.bf16.gmra.mxu3 %vm1458_vm3, %v11401_v40  ;;  %v14403_v40 = vld [vmem:[%s17884_s6 + $0x1d8] sm:$0xff] }
 0x24f   : > { %4436 = vmatpush.bf16.msrb.mxu1 %v14403_v40 }
 0x251   : > { %v2554_v33 = vpop.f32.mrf.mxu3  ;;  %v2467_v38 = vpop.f32.mrf.mxu1 }
 0x252   : > { %v2555_v22 = vadd.f32 %v2554_v33, %v2465_v46 }
 0x253   : > { %v3058_v60 = vpop.f32.mrf.mxu2 }
 0x254   : > { %v2604_v25 = vadd.f32 %v2555_v22, %v15776_v21  ;;  %v3059_v53 = vadd.f32 %v3058_v60, %v2969_v28  ;;  %v11607_v60 = vor.u32 %v14331_v4, %v11604_v36 }
 0x255   : > { %v2972_v5 = vpop.f32.mrf.mxu0 }
 0x256   : > { %v16059_v58 = vadd.f32 %v3059_v53, %v2603_v27  ;;  %v14332_v27 = vld [vmem:[#allocation4 + $0xb4] sm:$0xf0]  ;;  %v14293_v53 = vld [vmem:[#allocation3 + $0xc4] sm:$0xf0] }
 0x258   : > { %3945 = vmatmul.bf16.gmra.mxu0 %v11595_v52  ;;  %11742 = vmatmul.msk.bf16.gmra.mxu2 %vm1458_vm3, %v11599_v31  ;;  %v14444_v52 = vld [vmem:[%s17884_s6 + $0x220] sm:$0xff] }
 0x259   : > { %v2556_v16 = vpop.f32.mrf.mxu3  ;;  %v2470_v17 = vpop.f32.mrf.mxu1  ;;  %4943 = vmatpush.bf16.msrb.mxu0 %v14444_v52  ;;  %v14292_v31 = vld [vmem:[#allocation3 + $0xc4] sm:$0xf] }
 0x25a   : > { %v2557_v18 = vadd.f32 %v2556_v16, %v2467_v38  ;;  %v11603_v38 = vor.u32 %v14332_v27, %v11602_v44  ;;  %v14333_v44 = vld [vmem:[#allocation4 + $0xc4] sm:$0xf]  ;;  %v11612_v27 = vld [vmem:[#allocation4 + $0xc8] sm:$0xf0] }
 0x25b   : > { %v3061_v14 = vpop.f32.mrf.mxu2 }
 0x25c   : > { %v2605_v21 = vadd.f32 %v2557_v18, %v15791_v49  ;;  %v3062_v10 = vadd.f32 %v3061_v14, %v2972_v5  ;;  %3443 = vmatmul.bf16.gmra.mxu1 %v11405_v12  ;;  %v11417_v12 = vor.u32 %v14292_v31, %v11414_v19 }
 0x25d   : > { %v2974_v46 = vpop.f32.mrf.mxu0 }
 0x25e   : > { %v16063_v26 = vadd.f32 %v3062_v10, %v2604_v25  ;;  %11545 = vmatmul.msk.bf16.gmra.mxu3 %vm1458_vm3, %v11409_v23  ;;  %v11412_v25 = vld [vmem:[#allocation3 + $0xc0] sm:$0xf]  ;;  %v14334_v10 = vld [vmem:[#allocation4 + $0xc4] sm:$0xf0] }
 0x25f   : > { %v11413_v59 = vor.u32 %v14293_v53, %v11412_v25 }
 0x261   : > { %v2559_v35 = vpop.f32.mrf.mxu3  ;;  %v2472_v28 = vpop.f32.mrf.mxu1 }
 0x262   : > { %v2560_v33 = vadd.f32 %v2559_v35, %v2470_v17 }
 0x263   : > { %v3063_v49 = vpop.f32.mrf.mxu2 }
 0x264   : > { %v2606_v41 = vadd.f32 %v2560_v33, %v15794_v1  ;;  %v3064_v47 = vadd.f32 %v3063_v49, %v2974_v46  ;;  %v11615_v49 = vor.u32 %v14333_v44, %v11612_v27  ;;  %v839_v44 = vld [vmem:[%s15829_s20 + $0x10] sm:$0xff]  ;;  %v840_v27 = vld [vmem:[%s15829_s20 + $0x18] sm:$0xff] }
 0x265   : > { %v2977_v22 = vpop.f32.mrf.mxu0  ;;  %855 = vst.msk [vmem:[#allocation3 + $0x100] sm:$0xff] %vm15383_vm2, %v839_v44 }
 0x266   : > { %v16073_v5 = vadd.f32 %v3064_v47, %v2605_v21  ;;  %v11610_v21 = vld [vmem:[#allocation4 + $0xc0] sm:$0xf]  ;;  %v14295_v47 = vld [vmem:[#allocation3 + $0xd4] sm:$0xf0]  ;;  %856 = vst.msk [vmem:[#allocation3 + $0x108] sm:$0xff] %vm15383_vm2, %v840_v27 }
 0x268   : > { %3950 = vmatmul.bf16.gmra.mxu0 %v11603_v38  ;;  %11743 = vmatmul.msk.bf16.gmra.mxu2 %vm1458_vm3, %v11607_v60  ;;  %v11420_v38 = vld [vmem:[#allocation3 + $0xd0] sm:$0xf]  ;;  %v11422_v60 = vld [vmem:[#allocation3 + $0xd8] sm:$0xf0] }
 0x269   : > { %v2561_v62 = vpop.f32.mrf.mxu3  ;;  %v2475_v1 = vpop.f32.mrf.mxu1  ;;  %v11421_v52 = vor.u32 %v14295_v47, %v11420_v38  ;;  %v11430_v47 = vld [vmem:[#allocation3 + $0xe8] sm:$0xf0] }
 0x26a   : > { %v2562_v2 = vadd.f32 %v2561_v62, %v2472_v28  ;;  %v11611_v28 = vor.u32 %v14334_v10, %v11610_v21  ;;  %v14335_v21 = vld [vmem:[#allocation4 + $0xd4] sm:$0xf] }
 0x26b   : > { %v3066_v16 = vpop.f32.mrf.mxu2 }
 0x26c   : > { %v2607_v17 = vadd.f32 %v2562_v2, %v15803_v29  ;;  %v3067_v18 = vadd.f32 %v3066_v16, %v2977_v22  ;;  %3448 = vmatmul.bf16.gmra.mxu1 %v11413_v59  ;;  %v14294_v22 = vld [vmem:[#allocation3 + $0xd4] sm:$0xf]  ;;  %v11618_v16 = vld [vmem:[#allocation4 + $0xd0] sm:$0xf] }
 0x26d   : > { %v2979_v23 = vpop.f32.mrf.mxu0  ;;  %v11425_v19 = vor.u32 %v14294_v22, %v11422_v60 }
 0x26e   : > { %v16077_v14 = vadd.f32 %v3067_v18, %v2606_v41  ;;  %11546 = vmatmul.msk.bf16.gmra.mxu3 %vm1458_vm3, %v11417_v12  ;;  %v14402_v12 = vld [vmem:[%s17884_s6 + $0x1d0] sm:$0xff] }
 0x26f   : > { %4437 = vmatpush.bf16.msrb.mxu1 %v14402_v12  ;;  %v1032_v12 = vld [vmem:[%s15829_s20 + $0x28] sm:$0xff] }
 0x270   : > { %1048 = vst.msk [vmem:[#allocation4 + $0x108] sm:$0xff] %vm15383_vm2, %v1032_v12 }
 0x271   : > { %v2564_v46 = vpop.f32.mrf.mxu3  ;;  %v2477_v40 = vpop.f32.mrf.mxu1  ;;  %858 = vst.msk [vmem:[#allocation3 + $0x118] sm:$0xff] %vm15383_vm2, %v1032_v12  ;;  %v14340_v12 = vld [vmem:[#allocation4 + $0xf4] sm:$0xf0] }
 0x272   : > { %v2565_v35 = vadd.f32 %v2564_v46, %v2475_v1 }
 0x273   : > { %v3068_v4 = vpop.f32.mrf.mxu2 }
 0x274   : > { %v2608_v36 = vadd.f32 %v2565_v35, %v15807_v45  ;;  %v3069_v33 = vadd.f32 %v3068_v4, %v2979_v23 }
 0x275   : > { %v2982_v29 = vpop.f32.mrf.mxu0 }
 0x276   : > { %v16081_v41 = vadd.f32 %v3069_v33, %v2607_v17  ;;  %v14336_v17 = vld [vmem:[#allocation4 + $0xd4] sm:$0xf0] }
 0x277   : > { %v14443_v33 = vld [vmem:[%s17884_s6 + $0x218] sm:$0xff] }
 0x278   : > { %3955 = vmatmul.bf16.gmra.mxu0 %v11611_v28  ;;  %11744 = vmatmul.msk.bf16.gmra.mxu2 %vm1458_vm3, %v11615_v49  ;;  %v14297_v49 = vld [vmem:[#allocation3 + $0xe4] sm:$0xf0] }
 0x279   : > { %v2566_v25 = vpop.f32.mrf.mxu3  ;;  %v2480_v53 = vpop.f32.mrf.mxu1  ;;  %4944 = vmatpush.bf16.msrb.mxu0 %v14443_v33  ;;  %v14298_v33 = vld [vmem:[#allocation3 + $0xf4] sm:$0xf] }
 0x27a   : > { %v2567_v31 = vadd.f32 %v2566_v25, %v2477_v40  ;;  %v11619_v40 = vor.u32 %v14336_v17, %v11618_v16  ;;  %v11626_v16 = vld [vmem:[#allocation4 + $0xe0] sm:$0xf]  ;;  %v14338_v17 = vld [vmem:[#allocation4 + $0xe4] sm:$0xf0] }
 0x27b   : > { %v3071_v59 = vpop.f32.mrf.mxu2 }
 0x27c   : > { %v2609_v45 = vadd.f32 %v2567_v31, %v15822_v13  ;;  %v3072_v62 = vadd.f32 %v3071_v59, %v2982_v29  ;;  %3453 = vmatmul.bf16.gmra.mxu1 %v11421_v52  ;;  %v11620_v13 = vld [vmem:[#allocation4 + $0xd8] sm:$0xf0]  ;;  %v11428_v29 = vld [vmem:[#allocation3 + $0xe0] sm:$0xf] }
 0x27d   : > { %v2984_v1 = vpop.f32.mrf.mxu0  ;;  %v11429_v22 = vor.u32 %v14297_v49, %v11428_v29  ;;  %v11438_v29 = vld [vmem:[#allocation3 + $0xf8] sm:$0xf0] }
 0x27e   : > { %v16085_v2 = vadd.f32 %v3072_v62, %v2608_v36  ;;  %11547 = vmatmul.msk.bf16.gmra.mxu3 %vm1458_vm3, %v11425_v19  ;;  %v11623_v36 = vor.u32 %v14335_v21, %v11620_v13  ;;  %v14337_v21 = vld [vmem:[#allocation4 + $0xe4] sm:$0xf]  ;;  %v11628_v13 = vld [vmem:[#allocation4 + $0xe8] sm:$0xf0] }
 0x281   : > { %v2569_v18 = vpop.f32.mrf.mxu3  ;;  %v2482_v23 = vpop.f32.mrf.mxu1 }
 0x282   : > { %v2570_v10 = vadd.f32 %v2569_v18, %v2480_v53 }
 0x283   : > { %v3073_v46 = vpop.f32.mrf.mxu2 }
 0x284   : > { %v2610_v35 = vadd.f32 %v2570_v10, %v15831_v32  ;;  %v3074_v4 = vadd.f32 %v3073_v46, %v2984_v1  ;;  %v14296_v32 = vld [vmem:[#allocation3 + $0xe4] sm:$0xf]  ;;  %v11627_v46 = vor.u32 %v14338_v17, %v11626_v16  ;;  %v14339_v17 = vld [vmem:[#allocation4 + $0xf4] sm:$0xf] }
 0x285   : > { %v2987_v28 = vpop.f32.mrf.mxu0  ;;  %v11433_v53 = vor.u32 %v14296_v32, %v11430_v47  ;;  %v1031_v1 = vld [vmem:[%s15829_s20 + $0x20] sm:$0xff] }
 0x286   : > { %v16101_v38 = vadd.f32 %v3074_v4, %v2609_v45  ;;  %1047 = vst.msk [vmem:[#allocation4 + $0x100] sm:$0xff] %vm15383_vm2, %v1031_v1  ;;  %v11436_v4 = vld [vmem:[#allocation3 + $0xf0] sm:$0xf] }
 0x287   : > { %857 = vst.msk [vmem:[#allocation3 + $0x110] sm:$0xff] %vm15383_vm2, %v1031_v1  ;;  %v11634_v1 = vld [vmem:[#allocation4 + $0xf0] sm:$0xf] }
 0x288   : > { %3960 = vmatmul.bf16.gmra.mxu0 %v11619_v40  ;;  %11745 = vmatmul.msk.bf16.gmra.mxu2 %vm1458_vm3, %v11623_v36 }
 0x289   : > { %v2571_v60 = vpop.f32.mrf.mxu3  ;;  %v2485_v52 = vpop.f32.mrf.mxu1 }
 0x28a   : > { %v2572_v25 = vadd.f32 %v2571_v60, %v2482_v23  ;;  %v11441_v60 = vor.u32 %v14298_v33, %v11438_v29  ;;  %v11446_v33 = vld [vmem:[#allocation3 + $0x108] sm:$0xf0] }
 0x28b   : > { %v3076_v31 = vpop.f32.mrf.mxu2 }
 0x28c   : > { %v2611_v19 = vadd.f32 %v2572_v25, %v15846_v63  ;;  %v3077_v59 = vadd.f32 %v3076_v31, %v2987_v28  ;;  %3458 = vmatmul.bf16.gmra.mxu1 %v11429_v22  ;;  %v14299_v28 = vld [vmem:[#allocation3 + $0xf4] sm:$0xf0] }
 0x28d   : > { %v2989_v45 = vpop.f32.mrf.mxu0  ;;  %v11437_v49 = vor.u32 %v14299_v28, %v11436_v4  ;;  %v14300_v28 = vld [vmem:[#allocation3 + $0x104] sm:$0xf] }
 0x28e   : > { %v16105_v62 = vadd.f32 %v3077_v59, %v2610_v35  ;;  %11548 = vmatmul.msk.bf16.gmra.mxu3 %vm1458_vm3, %v11433_v53  ;;  %v11631_v35 = vor.u32 %v14337_v21, %v11628_v13  ;;  %v1033_v59 = vld [vmem:[%s15829_s20 + $0x30] sm:$0xff]  ;;  %v11635_v13 = vor.u32 %v14340_v12, %v11634_v1 }
 0x28f   : > { %1049 = vst.msk [vmem:[#allocation4 + $0x110] sm:$0xff] %vm15383_vm2, %v1033_v59 }
 0x290   : > { %859 = vst.msk [vmem:[#allocation3 + $0x120] sm:$0xff] %vm15383_vm2, %v1033_v59  ;;  %v11642_v59 = vld [vmem:[#allocation4 + $0x100] sm:$0xf] }
 0x291   : > { %v2574_v18 = vpop.f32.mrf.mxu3  ;;  %v2487_v23 = vpop.f32.mrf.mxu1 }
 0x292   : > { %v2575_v63 = vadd.f32 %v2574_v18, %v2485_v52  ;;  %v11636_v18 = vld [vmem:[#allocation4 + $0xf8] sm:$0xf0] }
 0x293   : > { %v3078_v10 = vpop.f32.mrf.mxu2 }
 0x294   : > { %v2612_v40 = vadd.f32 %v2575_v63, %v15849_v20  ;;  %v3079_v44 = vadd.f32 %v3078_v10, %v2989_v45  ;;  %v1034_v45 = vld [vmem:[%s15829_s20 + $0x38] sm:$0xff] }
 0x295   : > { %v2992_v27 = vpop.f32.mrf.mxu0  ;;  %1050 = vst.msk [vmem:[#allocation4 + $0x118] sm:$0xff] %vm15383_vm2, %v1034_v45 }
 0x296   : > { %v16119_v36 = vadd.f32 %v3079_v44, %v2611_v19  ;;  %v14401_v19 = vld [vmem:[%s17884_s6 + $0x1c8] sm:$0xff]  ;;  %860 = vst.msk [vmem:[#allocation3 + $0x128] sm:$0xff] %vm15383_vm2, %v1034_v45  ;;  %v14442_v44 = vld [vmem:[%s17884_s6 + $0x210] sm:$0xff] }
 0x297   : > { %4438 = vmatpush.bf16.msrb.mxu1 %v14401_v19  ;;  %4945 = vmatpush.bf16.msrb.mxu0 %v14442_v44  ;;  %v1036_v19 = vld [vmem:[%s15829_s20 + $0x48] sm:$0xff]  ;;  %v14302_v44 = vld [vmem:[#allocation3 + $0x114] sm:$0xf] }
 0x298   : > { %3965 = vmatmul.bf16.gmra.mxu0 %v11627_v46  ;;  %11746 = vmatmul.msk.bf16.gmra.mxu2 %vm1458_vm3, %v11631_v35  ;;  %v14301_v35 = vld [vmem:[#allocation3 + $0x104] sm:$0xf0]  ;;  %1052 = vst.msk [vmem:[#allocation4 + $0x128] sm:$0xff] %vm15383_vm2, %v1036_v19 }
 0x299   : > { %v2576_v32 = vpop.f32.mrf.mxu3  ;;  %v2490_v47 = vpop.f32.mrf.mxu1  ;;  %v14342_v45 = vld [vmem:[#allocation4 + $0x104] sm:$0xf0]  ;;  %862 = vst.msk [vmem:[#allocation3 + $0x138] sm:$0xff] %vm15383_vm2, %v1036_v19 }
 0x29a   : > { %v2577_v22 = vadd.f32 %v2576_v32, %v2487_v23 }
 0x29b   : > { %v3081_v20 = vpop.f32.mrf.mxu2 }
 0x29c   : > { %v2613_v52 = vadd.f32 %v2577_v22, %v15870_v57  ;;  %v3082_v25 = vadd.f32 %v3081_v20, %v2992_v27  ;;  %3463 = vmatmul.bf16.gmra.mxu1 %v11437_v49  ;;  %v11444_v27 = vld [vmem:[#allocation3 + $0x100] sm:$0xf]  ;;  %v14344_v19 = vld [vmem:[#allocation4 + $0x114] sm:$0xf0] }
 0x29d   : > { %v2994_v53 = vpop.f32.mrf.mxu0 }
 0x29e   : > { %v16123_v31 = vadd.f32 %v3082_v25, %v2612_v40  ;;  %11549 = vmatmul.msk.bf16.gmra.mxu3 %vm1458_vm3, %v11441_v60  ;;  %v11639_v40 = vor.u32 %v14339_v17, %v11636_v18  ;;  %v11643_v18 = vor.u32 %v14342_v45, %v11642_v59  ;;  %v14343_v45 = vld [vmem:[#allocation4 + $0x114] sm:$0xf] }
 0x2a1   : > { %v2579_v57 = vpop.f32.mrf.mxu3  ;;  %v2492_v16 = vpop.f32.mrf.mxu1 }
 0x2a2   : > { %v2580_v23 = vadd.f32 %v2579_v57, %v2490_v47  ;;  %v11449_v47 = vor.u32 %v14300_v28, %v11446_v33  ;;  %v14341_v57 = vld [vmem:[#allocation4 + $0x104] sm:$0xf] }
 0x2a3   : > { %v3083_v21 = vpop.f32.mrf.mxu2 }
 0x2a4   : > { %v2614_v63 = vadd.f32 %v2580_v23, %v15873_v6  ;;  %v3084_v10 = vadd.f32 %v3083_v21, %v2994_v53  ;;  %v11445_v6 = vor.u32 %v14301_v35, %v11444_v27  ;;  %v1035_v53 = vld [vmem:[%s15829_s20 + $0x40] sm:$0xff]  ;;  %v11454_v27 = vld [vmem:[#allocation3 + $0x118] sm:$0xf0] }
 0x2a5   : > { %v2997_v46 = vpop.f32.mrf.mxu0  ;;  %1051 = vst.msk [vmem:[#allocation4 + $0x120] sm:$0xff] %vm15383_vm2, %v1035_v53 }
 0x2a6   : > { %v16143_v4 = vadd.f32 %v3084_v10, %v2613_v52  ;;  %861 = vst.msk [vmem:[#allocation3 + $0x130] sm:$0xff] %vm15383_vm2, %v1035_v53  ;;  %v11452_v10 = vld [vmem:[#allocation3 + $0x110] sm:$0xf] }
 0x2a7   : > { %v11650_v53 = vld [vmem:[#allocation4 + $0x110] sm:$0xf] }
 0x2a8   : > { %3970 = vmatmul.bf16.gmra.mxu0 %v11635_v13  ;;  %11747 = vmatmul.msk.bf16.gmra.mxu2 %vm1458_vm3, %v11639_v40 }
 0x2a9   : > { %v2581_v29 = vpop.f32.mrf.mxu3  ;;  %v3429_v49 = vpop.f32.mrf.mxu1 }
 0x2aa   : > { %v2582_v32 = vadd.f32 %v2581_v29, %v2492_v16  ;;  %v11644_v16 = vld [vmem:[#allocation4 + $0x108] sm:$0xf0]  ;;  %v11457_v29 = vor.u32 %v14302_v44, %v11454_v27 }
 0x2ab   : > { %v3086_v22 = vpop.f32.mrf.mxu2  ;;  %v11462_v44 = vld [vmem:[#allocation3 + $0x128] sm:$0xf0] }
 0x2ac   : > { %v2615_v60 = vadd.f32 %v2582_v32, %v15889_v51  ;;  %v3087_v20 = vadd.f32 %v3086_v22, %v2997_v46  ;;  %3468 = vmatmul.bf16.gmra.mxu1 %v11445_v6  ;;  %v14303_v46 = vld [vmem:[#allocation3 + $0x114] sm:$0xf0] }
 0x2ad   : > { %v2999_v52 = vpop.f32.mrf.mxu0  ;;  %v11453_v35 = vor.u32 %v14303_v46, %v11452_v10  ;;  %v14304_v46 = vld [vmem:[#allocation3 + $0x124] sm:$0xf] }
 0x2ae   : > { %v16147_v25 = vadd.f32 %v3087_v20, %v2614_v63  ;;  %11550 = vmatmul.msk.bf16.gmra.mxu3 %vm1458_vm3, %v11449_v47  ;;  %v11647_v63 = vor.u32 %v14341_v57, %v11644_v16  ;;  %v1037_v20 = vld [vmem:[%s15829_s20 + $0x50] sm:$0xff]  ;;  %v11651_v16 = vor.u32 %v14344_v19, %v11650_v53 }
 0x2af   : > { %1053 = vst.msk [vmem:[#allocation4 + $0x130] sm:$0xff] %vm15383_vm2, %v1037_v20 }
 0x2b0   : > { %863 = vst.msk [vmem:[#allocation3 + $0x140] sm:$0xff] %vm15383_vm2, %v1037_v20  ;;  %v11658_v20 = vld [vmem:[#allocation4 + $0x120] sm:$0xf] }
 0x2b1   : > { %v3518_v1 = vpop.f32.mrf.mxu3  ;;  %v3431_v12 = vpop.f32.mrf.mxu1 }
 0x2b2   : > { %v3519_v51 = vadd.f32 %v3518_v1, %v3429_v49  ;;  %v11652_v1 = vld [vmem:[#allocation4 + $0x118] sm:$0xf0] }
 0x2b3   : > { %v3088_v17 = vpop.f32.mrf.mxu2 }
 0x2b4   : > { %v3598_v23 = vadd.f32 %v3519_v51, %v15894_v0  ;;  %v3089_v21 = vadd.f32 %v3088_v17, %v2999_v52  ;;  %v1038_v52 = vld [vmem:[%s15829_s20 + $0x58] sm:$0xff] }
 0x2b5   : > { %v3936_v13 = vpop.f32.mrf.mxu0  ;;  %1054 = vst.msk [vmem:[#allocation4 + $0x138] sm:$0xff] %vm15383_vm2, %v1038_v52 }
 0x2b6   : > { %v16161_v40 = vadd.f32 %v3089_v21, %v2615_v60  ;;  %v14400_v60 = vld [vmem:[%s17884_s6 + $0x1c0] sm:$0xff]  ;;  %864 = vst.msk [vmem:[#allocation3 + $0x148] sm:$0xff] %vm15383_vm2, %v1038_v52  ;;  %v14441_v21 = vld [vmem:[%s17884_s6 + $0x208] sm:$0xff] }
 0x2b7   : > { %4439 = vmatpush.bf16.msrb.mxu1 %v14400_v60  ;;  %4946 = vmatpush.bf16.msrb.mxu0 %v14441_v21  ;;  %v1040_v60 = vld [vmem:[%s15829_s20 + $0x68] sm:$0xff]  ;;  %v14306_v21 = vld [vmem:[#allocation3 + $0x134] sm:$0xf] }
 0x2b8   : > { %3975 = vmatmul.bf16.gmra.mxu0 %v11643_v18  ;;  %11748 = vmatmul.msk.bf16.gmra.mxu2 %vm1458_vm3, %v11647_v63  ;;  %v14305_v63 = vld [vmem:[#allocation3 + $0x124] sm:$0xf0]  ;;  %1056 = vst.msk [vmem:[#allocation4 + $0x148] sm:$0xff] %vm15383_vm2, %v1040_v60 }
 0x2b9   : > { %v3520_v28 = vpop.f32.mrf.mxu3  ;;  %v3434_v33 = vpop.f32.mrf.mxu1  ;;  %v14346_v52 = vld [vmem:[#allocation4 + $0x124] sm:$0xf0]  ;;  %866 = vst.msk [vmem:[#allocation3 + $0x158] sm:$0xff] %vm15383_vm2, %v1040_v60 }
 0x2ba   : > { %v3521_v6 = vadd.f32 %v3520_v28, %v3431_v12 }
 0x2bb   : > { %v4025_v0 = vpop.f32.mrf.mxu2 }
 0x2bc   : > { %v3599_v49 = vadd.f32 %v3521_v6, %v15915_v54  ;;  %3473 = vmatmul.bf16.gmra.mxu1 %v11453_v35  ;;  %v4026_v32 = vadd.f32 %v4025_v0, %v3936_v13  ;;  %v11460_v13 = vld [vmem:[#allocation3 + $0x120] sm:$0xf]  ;;  %v14348_v60 = vld [vmem:[#allocation4 + $0x134] sm:$0xf0] }
 0x2bd   : > { %v3938_v47 = vpop.f32.mrf.mxu0 }
 0x2be   : > { %11551 = vmatmul.msk.bf16.gmra.mxu3 %vm1458_vm3, %v11457_v29  ;;  %v16166_v22 = vadd.f32 %v4026_v32, %v3598_v23  ;;  %v11655_v23 = vor.u32 %v14343_v45, %v11652_v1  ;;  %v11659_v1 = vor.u32 %v14346_v52, %v11658_v20  ;;  %v14347_v52 = vld [vmem:[#allocation4 + $0x134] sm:$0xf] }
 0x2c1   : > { %v3523_v54 = vpop.f32.mrf.mxu3  ;;  %v3436_v59 = vpop.f32.mrf.mxu1 }
 0x2c2   : > { %v3524_v12 = vadd.f32 %v3523_v54, %v3434_v33  ;;  %v11465_v33 = vor.u32 %v14304_v46, %v11462_v44  ;;  %v14345_v54 = vld [vmem:[#allocation4 + $0x124] sm:$0xf] }
 0x2c3   : > { %v4027_v57 = vpop.f32.mrf.mxu2 }
 0x2c4   : > { %v3600_v51 = vadd.f32 %v3524_v12, %v15920_v15  ;;  %v4028_v17 = vadd.f32 %v4027_v57, %v3938_v47  ;;  %v11461_v15 = vor.u32 %v14305_v63, %v11460_v13  ;;  %v1039_v47 = vld [vmem:[%s15829_s20 + $0x60] sm:$0xff]  ;;  %v11470_v13 = vld [vmem:[#allocation3 + $0x138] sm:$0xf0] }
 0x2c5   : > { %v3941_v18 = vpop.f32.mrf.mxu0  ;;  %1055 = vst.msk [vmem:[#allocation4 + $0x140] sm:$0xff] %vm15383_vm2, %v1039_v47 }
 0x2c6   : > { %v16185_v10 = vadd.f32 %v4028_v17, %v3599_v49  ;;  %865 = vst.msk [vmem:[#allocation3 + $0x150] sm:$0xff] %vm15383_vm2, %v1039_v47  ;;  %v11468_v17 = vld [vmem:[#allocation3 + $0x130] sm:$0xf] }
 0x2c7   : > { %v11666_v47 = vld [vmem:[#allocation4 + $0x130] sm:$0xf] }
 0x2c8   : > { %3980 = vmatmul.bf16.gmra.mxu0 %v11651_v16  ;;  %11749 = vmatmul.msk.bf16.gmra.mxu2 %vm1458_vm3, %v11655_v23 }
 0x2c9   : > { %v3525_v27 = vpop.f32.mrf.mxu3  ;;  %v3439_v35 = vpop.f32.mrf.mxu1 }
 0x2ca   : > { %v3526_v28 = vadd.f32 %v3525_v27, %v3436_v59  ;;  %v11660_v59 = vld [vmem:[#allocation4 + $0x128] sm:$0xf0]  ;;  %v11473_v27 = vor.u32 %v14306_v21, %v11470_v13 }
 0x2cb   : > { %v4030_v6 = vpop.f32.mrf.mxu2  ;;  %v11478_v21 = vld [vmem:[#allocation3 + $0x148] sm:$0xf0] }
 0x2cc   : > { %v3601_v29 = vadd.f32 %v3526_v28, %v15935_v48  ;;  %3478 = vmatmul.bf16.gmra.mxu1 %v11461_v15  ;;  %v4031_v0 = vadd.f32 %v4030_v6, %v3941_v18  ;;  %v14307_v18 = vld [vmem:[#allocation3 + $0x134] sm:$0xf0] }
 0x2cd   : > { %v3943_v49 = vpop.f32.mrf.mxu0  ;;  %v11469_v63 = vor.u32 %v14307_v18, %v11468_v17  ;;  %v14308_v18 = vld [vmem:[#allocation3 + $0x144] sm:$0xf] }
 0x2ce   : > { %11552 = vmatmul.msk.bf16.gmra.mxu3 %vm1458_vm3, %v11465_v33  ;;  %v16190_v32 = vadd.f32 %v4031_v0, %v3600_v51  ;;  %v11663_v51 = vor.u32 %v14345_v54, %v11660_v59  ;;  %v1041_v0 = vld [vmem:[%s15829_s20 + $0x70] sm:$0xff]  ;;  %v11667_v59 = vor.u32 %v14348_v60, %v11666_v47 }
 0x2cf   : > { %1057 = vst.msk [vmem:[#allocation4 + $0x150] sm:$0xff] %vm15383_vm2, %v1041_v0 }
 0x2d0   : > { %867 = vst.msk [vmem:[#allocation3 + $0x160] sm:$0xff] %vm15383_vm2, %v1041_v0  ;;  %v11674_v0 = vld [vmem:[#allocation4 + $0x140] sm:$0xf] }
 0x2d1   : > { %v3528_v53 = vpop.f32.mrf.mxu3  ;;  %v3441_v19 = vpop.f32.mrf.mxu1 }
 0x2d2   : > { %v3529_v48 = vadd.f32 %v3528_v53, %v3439_v35  ;;  %v11668_v53 = vld [vmem:[#allocation4 + $0x138] sm:$0xf0] }
 0x2d3   : > { %v4032_v45 = vpop.f32.mrf.mxu2 }
 0x2d4   : > { %v3602_v12 = vadd.f32 %v3529_v48, %v15940_v8  ;;  %v4033_v57 = vadd.f32 %v4032_v45, %v3943_v49  ;;  %v1042_v49 = vld [vmem:[%s15829_s20 + $0x78] sm:$0xff] }
 0x2d5   : > { %v3946_v16 = vpop.f32.mrf.mxu0  ;;  %1058 = vst.msk [vmem:[#allocation4 + $0x158] sm:$0xff] %vm15383_vm2, %v1042_v49 }
 0x2d6   : > { %v16203_v23 = vadd.f32 %v4033_v57, %v3601_v29  ;;  %v14399_v29 = vld [vmem:[%s17884_s6 + $0x1b8] sm:$0xff]  ;;  %868 = vst.msk [vmem:[#allocation3 + $0x168] sm:$0xff] %vm15383_vm2, %v1042_v49  ;;  %v14440_v57 = vld [vmem:[%s17884_s6 + $0x200] sm:$0xff]  ;;  %v14350_v49 = vld [vmem:[#allocation4 + $0x144] sm:$0xf0] }
 0x2d7   : > { %4440 = vmatpush.bf16.msrb.mxu1 %v14399_v29  ;;  %4947 = vmatpush.bf16.msrb.mxu0 %v14440_v57  ;;  %v1044_v29 = vld [vmem:[%s15829_s20 + $0x88] sm:$0xff]  ;;  %v14310_v57 = vld [vmem:[#allocation3 + $0x154] sm:$0xf] }
 0x2d8   : > { %3985 = vmatmul.bf16.gmra.mxu0 %v11659_v1  ;;  %11750 = vmatmul.msk.bf16.gmra.mxu2 %vm1458_vm3, %v11663_v51  ;;  %v14309_v51 = vld [vmem:[#allocation3 + $0x144] sm:$0xf0]  ;;  %1060 = vst.msk [vmem:[#allocation4 + $0x168] sm:$0xff] %vm15383_vm2, %v1044_v29 }
 0x2d9   : > { %v3530_v46 = vpop.f32.mrf.mxu3  ;;  %v3444_v44 = vpop.f32.mrf.mxu1  ;;  %870 = vst.msk [vmem:[#allocation3 + $0x178] sm:$0xff] %vm15383_vm2, %v1044_v29 }
 0x2da   : > { %v3531_v15 = vadd.f32 %v3530_v46, %v3441_v19 }
 0x2db   : > { %v4035_v8 = vpop.f32.mrf.mxu2 }
 0x2dc   : > { %v3603_v35 = vadd.f32 %v3531_v15, %v15961_v50  ;;  %3483 = vmatmul.bf16.gmra.mxu1 %v11469_v63  ;;  %v4036_v28 = vadd.f32 %v4035_v8, %v3946_v16  ;;  %v11476_v16 = vld [vmem:[#allocation3 + $0x140] sm:$0xf]  ;;  %v14352_v29 = vld [vmem:[#allocation4 + $0x154] sm:$0xf0] }
 0x2dd   : > { %v3948_v33 = vpop.f32.mrf.mxu0 }
 0x2de   : > { %11553 = vmatmul.msk.bf16.gmra.mxu3 %vm1458_vm3, %v11473_v27  ;;  %v16208_v6 = vadd.f32 %v4036_v28, %v3602_v12  ;;  %v11671_v12 = vor.u32 %v14347_v52, %v11668_v53  ;;  %v11675_v53 = vor.u32 %v14350_v49, %v11674_v0  ;;  %v14351_v49 = vld [vmem:[#allocation4 + $0x154] sm:$0xf] }
 0x2e1   : > { %v3533_v50 = vpop.f32.mrf.mxu3  ;;  %v3446_v20 = vpop.f32.mrf.mxu1 }
 0x2e2   : > { %v3534_v19 = vadd.f32 %v3533_v50, %v3444_v44  ;;  %v11481_v44 = vor.u32 %v14308_v18, %v11478_v21  ;;  %v14349_v50 = vld [vmem:[#allocation4 + $0x144] sm:$0xf] }
 0x2e3   : > { %v4037_v54 = vpop.f32.mrf.mxu2 }
 0x2e4   : > { %v3604_v48 = vadd.f32 %v3534_v19, %v15966_v7  ;;  %v4038_v45 = vadd.f32 %v4037_v54, %v3948_v33  ;;  %v11477_v7 = vor.u32 %v14309_v51, %v11476_v16  ;;  %v1043_v33 = vld [vmem:[%s15829_s20 + $0x80] sm:$0xff]  ;;  %v11486_v16 = vld [vmem:[#allocation3 + $0x158] sm:$0xf0] }
 0x2e5   : > { %v3951_v1 = vpop.f32.mrf.mxu0  ;;  %1059 = vst.msk [vmem:[#allocation4 + $0x160] sm:$0xff] %vm15383_vm2, %v1043_v33 }
 0x2e6   : > { %v16227_v17 = vadd.f32 %v4038_v45, %v3603_v35  ;;  %869 = vst.msk [vmem:[#allocation3 + $0x170] sm:$0xff] %vm15383_vm2, %v1043_v33  ;;  %v11484_v45 = vld [vmem:[#allocation3 + $0x150] sm:$0xf] }
 0x2e7   : > { %v11682_v33 = vld [vmem:[#allocation4 + $0x150] sm:$0xf] }
 0x2e8   : > { %3990 = vmatmul.bf16.gmra.mxu0 %v11667_v59  ;;  %11751 = vmatmul.msk.bf16.gmra.mxu2 %vm1458_vm3, %v11671_v12 }
 0x2e9   : > { %v3535_v13 = vpop.f32.mrf.mxu3  ;;  %v3449_v63 = vpop.f32.mrf.mxu1 }
 0x2ea   : > { %v3536_v46 = vadd.f32 %v3535_v13, %v3446_v20  ;;  %v11676_v20 = vld [vmem:[#allocation4 + $0x148] sm:$0xf0]  ;;  %v11489_v13 = vor.u32 %v14310_v57, %v11486_v16 }
 0x2eb   : > { %v4040_v15 = vpop.f32.mrf.mxu2  ;;  %v11494_v57 = vld [vmem:[#allocation3 + $0x168] sm:$0xf0] }
 0x2ec   : > { %v3605_v27 = vadd.f32 %v3536_v46, %v15981_v43  ;;  %3488 = vmatmul.bf16.gmra.mxu1 %v11477_v7  ;;  %v4041_v8 = vadd.f32 %v4040_v15, %v3951_v1  ;;  %v14311_v1 = vld [vmem:[#allocation3 + $0x154] sm:$0xf0] }
 0x2ed   : > { %v3953_v35 = vpop.f32.mrf.mxu0  ;;  %v11485_v51 = vor.u32 %v14311_v1, %v11484_v45  ;;  %v14312_v1 = vld [vmem:[#allocation3 + $0x164] sm:$0xf] }
 0x2ee   : > { %11554 = vmatmul.msk.bf16.gmra.mxu3 %vm1458_vm3, %v11481_v44  ;;  %v16232_v28 = vadd.f32 %v4041_v8, %v3604_v48  ;;  %v11679_v48 = vor.u32 %v14349_v50, %v11676_v20  ;;  %v1045_v8 = vld [vmem:[%s15829_s20 + $0x90] sm:$0xff]  ;;  %v11683_v20 = vor.u32 %v14352_v29, %v11682_v33  ;;  %v14353_v33 = vld [vmem:[#allocation4 + $0x164] sm:$0xf]  ;;  %v11692_v29 = vld [vmem:[#allocation4 + $0x168] sm:$0xf0] }
 0x2ef   : > { %1061 = vst.msk [vmem:[#allocation4 + $0x170] sm:$0xff] %vm15383_vm2, %v1045_v8 }
 0x2f1   : > { %v3538_v47 = vpop.f32.mrf.mxu3  ;;  %v3451_v60 = vpop.f32.mrf.mxu1 }
 0x2f2   : > { %v3539_v43 = vadd.f32 %v3538_v47, %v3449_v63  ;;  %v11684_v47 = vld [vmem:[#allocation4 + $0x158] sm:$0xf0] }
 0x2f3   : > { %v4042_v52 = vpop.f32.mrf.mxu2 }
 0x2f4   : > { %v3606_v19 = vadd.f32 %v3539_v43, %v15986_v3  ;;  %v4043_v54 = vadd.f32 %v4042_v52, %v3953_v35  ;;  %v1046_v35 = vld [vmem:[%s15829_s20 + $0x98] sm:$0xff]  ;;  %s16701_s20 = scalar_lea.vmem [#allocation5], %s10573_s25  ;;  %s15055_s25 = smul.u32 40, %s17921_s13 }
 0x2f5   : > { %v3956_v59 = vpop.f32.mrf.mxu0  ;;  %1062 = vst.msk [vmem:[#allocation4 + $0x178] sm:$0xff] %vm15383_vm2, %v1046_v35  ;;  %s14116_s13 = sshll.u32 %s15214_s9, 7  ;;  %s10363_s9 = sshll.u32 %s16701_s20, 4  ;;  %s10364_s9 = int_to_ptr.vmem [resolvable:$true] %s10363_s9 }
 0x2f6   : > { %v16245_v12 = vadd.f32 %v4043_v54, %v3605_v27  ;;  %v14398_v27 = vld [vmem:[%s17884_s6 + $0x1b0] sm:$0xff]  ;;  %v14439_v54 = vld [vmem:[%s17884_s6 + $0x1f8] sm:$0xff]  ;;  %s574_s22 = sadd.s32 %s15055_s25, %s15371_s11 }
 0x2f7   : > { %4441 = vmatpush.bf16.msrb.mxu1 %v14398_v27  ;;  %4948 = vmatpush.bf16.msrb.mxu0 %v14439_v54  ;;  %v14354_v27 = vld [vmem:[#allocation4 + $0x164] sm:$0xf0]  ;;  %s10585_s17 = sshll.u32 %s574_s22, 2 }
 0x2f8   : > { %3995 = vmatmul.bf16.gmra.mxu0 %v11675_v53  ;;  %11752 = vmatmul.msk.bf16.gmra.mxu2 %vm1458_vm3, %v11679_v48  ;;  %v14313_v48 = vld [vmem:[#allocation3 + $0x164] sm:$0xf0]  ;;  %s17385_s11 = scalar_lea.vmem %s17883_s5, %s10585_s17 }
 0x2f9   : > { %v3540_v18 = vpop.f32.mrf.mxu3  ;;  %v3454_v21 = vpop.f32.mrf.mxu1 }
 0x2fa   : > { %v3541_v7 = vadd.f32 %v3540_v18, %v3451_v60 }
 0x2fb   : > { %v4045_v3 = vpop.f32.mrf.mxu2 }
 0x2fc   : > { %v3607_v63 = vadd.f32 %v3541_v7, %v16001_v39  ;;  %3493 = vmatmul.bf16.gmra.mxu1 %v11485_v51  ;;  %v4046_v46 = vadd.f32 %v4045_v3, %v3956_v59  ;;  %v11492_v59 = vld [vmem:[#allocation3 + $0x160] sm:$0xf] }
 0x2fd   : > { %v3958_v44 = vpop.f32.mrf.mxu0  ;;  %v11493_v16 = vor.u32 %v14313_v48, %v11492_v59 }
 0x2fe   : > { %11555 = vmatmul.msk.bf16.gmra.mxu3 %vm1458_vm3, %v11489_v13  ;;  %v16250_v15 = vadd.f32 %v4046_v46, %v3606_v19  ;;  %v11687_v19 = vor.u32 %v14351_v49, %v11684_v47 }
 0x301   : > { %v3543_v39 = vpop.f32.mrf.mxu3  ;;  %v3456_v0 = vpop.f32.mrf.mxu1 }
 0x302   : > { %v3544_v60 = vadd.f32 %v3543_v39, %v3454_v21  ;;  %v11497_v21 = vor.u32 %v14312_v1, %v11494_v57 }
 0x303   : > { %v4047_v50 = vpop.f32.mrf.mxu2 }
 0x304   : > { %v3608_v43 = vadd.f32 %v3544_v60, %v16006_v61  ;;  %v4048_v52 = vadd.f32 %v4047_v50, %v3958_v44  ;;  %v11690_v44 = vld [vmem:[#allocation4 + $0x160] sm:$0xf]  ;;  %v11695_v50 = vor.u32 %v14353_v33, %v11692_v29 }
 0x305   : > { %v3961_v53 = vpop.f32.mrf.mxu0 }
 0x306   : > { %v16265_v45 = vadd.f32 %v4048_v52, %v3607_v63  ;;  %v14315_v52 = vld [vmem:[#allocation3 + $0x174] sm:$0xf0] }
 0x308   : > { %4000 = vmatmul.bf16.gmra.mxu0 %v11683_v20  ;;  %11753 = vmatmul.msk.bf16.gmra.mxu2 %vm1458_vm3, %v11687_v19  ;;  %v11500_v20 = vld [vmem:[#allocation3 + $0x170] sm:$0xf]  ;;  %v11502_v19 = vld [vmem:[#allocation3 + $0x178] sm:$0xf0] }
 0x309   : > { %v3545_v51 = vpop.f32.mrf.mxu3  ;;  %v3459_v61 = vpop.f32.mrf.mxu1  ;;  %v11501_v54 = vor.u32 %v14315_v52, %v11500_v20  ;;  %v14366_v52 = vld [vmem:[#allocation2 + $0x104] sm:$0xf] }
 0x30a   : > { %v3546_v18 = vadd.f32 %v3545_v51, %v3456_v0  ;;  %v11691_v0 = vor.u32 %v14354_v27, %v11690_v44  ;;  %v14355_v27 = vld [vmem:[#allocation4 + $0x174] sm:$0xf] }
 0x30b   : > { %v4050_v7 = vpop.f32.mrf.mxu2 }
 0x30c   : > { %v3609_v13 = vadd.f32 %v3546_v18, %v16009_v34  ;;  %3498 = vmatmul.bf16.gmra.mxu1 %v11493_v16  ;;  %v4051_v3 = vadd.f32 %v4050_v7, %v3961_v53  ;;  %v14488_v18 = vld [vmem:[%s17884_s6 + $0x280] sm:$0xff] }
 0x30d   : > { %v3963_v46 = vpop.f32.mrf.mxu0  ;;  %5544 = vmatpush.bf16.msra.mxu3 %v14488_v18  ;;  %v14408_v18 = vld [vmem:[#allocation3 + $0x104] sm:$0xf0] }
 0x30e   : > { %11556 = vmatmul.msk.bf16.gmra.mxu3 %vm1458_vm3, %v11497_v21  ;;  %v16270_v63 = vadd.f32 %v4051_v3, %v3608_v43  ;;  %v14314_v43 = vld [vmem:[#allocation3 + $0x174] sm:$0xf]  ;;  %v14570_v21 = vld [vmem:[%s17884_s6 + $0x88] sm:$0xff]  ;;  %v14356_v3 = vld [vmem:[#allocation4 + $0x174] sm:$0xf0] }
 0x30f   : > { %v11505_v57 = vor.u32 %v14314_v43, %v11502_v19  ;;  %6200 = vmatpush.bf16.msra.mxu2 %v14570_v21  ;;  %v11778_v43 = vld [vmem:[#allocation2 + $0x108] sm:$0xf0] }
 0x311   : > { %v3548_v8 = vpop.f32.mrf.mxu3  ;;  %v3461_v35 = vpop.f32.mrf.mxu1 }
 0x312   : > { %v3549_v39 = vadd.f32 %v3548_v8, %v3459_v61  ;;  %v11700_v8 = vld [vmem:[#allocation4 + $0x178] sm:$0xf0] }
 0x313   : > { %v4052_v49 = vpop.f32.mrf.mxu2 }
 0x314   : > { %v3610_v47 = vadd.f32 %v3549_v39, %v16020_v56  ;;  %v4053_v60 = vadd.f32 %v4052_v49, %v3963_v46 }
 0x315   : > { %v3966_v34 = vpop.f32.mrf.mxu0 }
 0x316   : > { %v16273_v53 = vadd.f32 %v4053_v60, %v3609_v13  ;;  %v11698_v13 = vld [vmem:[#allocation4 + $0x170] sm:$0xf]  ;;  %v14569_v60 = vld [vmem:[%s17884_s6 + $0x80] sm:$0xff] }
 0x317   : > { %v11699_v29 = vor.u32 %v14356_v3, %v11698_v13  ;;  %6104 = vmatpush.bf16.msra.mxu0 %v14569_v60  ;;  %v14407_v13 = vld [vmem:[#allocation3 + $0x104] sm:$0xf]  ;;  %v11976_v3 = vld [vmem:[#allocation3 + $0x108] sm:$0xf0] }
 0x318   : > { %4005 = vmatmul.bf16.gmra.mxu0 %v11691_v0  ;;  %11754 = vmatmul.msk.bf16.gmra.mxu2 %vm1458_vm3, %v11695_v50  ;;  %v14367_v50 = vld [vmem:[#allocation2 + $0x104] sm:$0xf0] }
 0x319   : > { %v3550_v59 = vpop.f32.mrf.mxu3  ;;  %v3464_v48 = vpop.f32.mrf.mxu1 }
 0x31a   : > { %v3551_v1 = vadd.f32 %v3550_v59, %v3461_v35 }
 0x31b   : > { %v4055_v16 = vpop.f32.mrf.mxu2 }
 0x31c   : > { %v3611_v56 = vadd.f32 %v3551_v1, %v16029_v42  ;;  %3503 = vmatmul.bf16.gmra.mxu1 %v11501_v54  ;;  %v4056_v51 = vadd.f32 %v4055_v16, %v3966_v34  ;;  %v14487_v42 = vld [vmem:[%s17884_s6 + $0x278] sm:$0xff]  ;;  %v11776_v34 = vld [vmem:[#allocation2 + $0x100] sm:$0xf] }
 0x31d   : > { %v3968_v61 = vpop.f32.mrf.mxu0  ;;  %5448 = vmatpush.bf16.msra.mxu1 %v14487_v42  ;;  %v11777_v19 = vor.u32 %v14367_v50, %v11776_v34 }
 0x31e   : > { %11557 = vmatmul.msk.bf16.gmra.mxu3 %vm1458_vm3, %v11505_v57  ;;  %v16284_v7 = vadd.f32 %v4056_v51, %v3610_v47  ;;  %v11703_v47 = vor.u32 %v14355_v27, %v11700_v8 }
 0x321   : > { %v3553_v46 = vpop.f32.mrf.mxu3  ;;  %v3466_v44 = vpop.f32.mrf.mxu1 }
 0x322   : > { %v3554_v35 = vadd.f32 %v3553_v46, %v3464_v48  ;;  %v11781_v48 = vor.u32 %v14366_v52, %v11778_v43 }
 0x323   : > { %v4057_v33 = vpop.f32.mrf.mxu2 }
 0x324   : > { %v3612_v39 = vadd.f32 %v3554_v35, %v16033_v24  ;;  %v4058_v49 = vadd.f32 %v4057_v33, %v3968_v61  ;;  %v11979_v33 = vor.u32 %v14407_v13, %v11976_v3 }
 0x325   : > { %v3971_v0 = vpop.f32.mrf.mxu0 }
 0x326   : > { %v16293_v20 = vadd.f32 %v4058_v49, %v3611_v56  ;;  %v11974_v56 = vld [vmem:[#allocation3 + $0x100] sm:$0xf]  ;;  %v14369_v49 = vld [vmem:[#allocation2 + $0x114] sm:$0xf0] }
 0x328   : > { %4010 = vmatmul.bf16.gmra.mxu0 %v11699_v29  ;;  %11755 = vmatmul.msk.bf16.gmra.mxu2 %vm1458_vm3, %v11703_v47  ;;  %v11784_v29 = vld [vmem:[#allocation2 + $0x110] sm:$0xf]  ;;  %v11786_v47 = vld [vmem:[#allocation2 + $0x118] sm:$0xf0] }
 0x329   : > { %v3555_v54 = vpop.f32.mrf.mxu3  ;;  %v3469_v24 = vpop.f32.mrf.mxu1  ;;  %v11785_v60 = vor.u32 %v14369_v49, %v11784_v29  ;;  %v11794_v29 = vld [vmem:[#allocation2 + $0x128] sm:$0xf0] }
 0x32a   : > { %v3556_v59 = vadd.f32 %v3555_v54, %v3466_v44  ;;  %v11975_v44 = vor.u32 %v14408_v18, %v11974_v56  ;;  %v14409_v56 = vld [vmem:[#allocation3 + $0x114] sm:$0xf]  ;;  %v11984_v18 = vld [vmem:[#allocation3 + $0x118] sm:$0xf0] }
 0x32b   : > { %v4060_v1 = vpop.f32.mrf.mxu2 }
 0x32c   : > { %v3613_v57 = vadd.f32 %v3556_v59, %v16037_v11  ;;  %v4061_v16 = vadd.f32 %v4060_v1, %v3971_v0  ;;  %4442 = vmatmul.bf16.vlgmr.msrb.gmra.mxu1 %v11777_v19  ;;  %v14368_v0 = vld [vmem:[#allocation2 + $0x114] sm:$0xf]  ;;  %v11982_v1 = vld [vmem:[#allocation3 + $0x110] sm:$0xf] }
 0x32d   : > { %v3973_v51 = vpop.f32.mrf.mxu0  ;;  %v11789_v43 = vor.u32 %v14368_v0, %v11786_v47 }
 0x32e   : > { %v16297_v61 = vadd.f32 %v4061_v16, %v3612_v39  ;;  %11938 = vmatmul.msk.bf16.vlgmr.msrb.gmra.mxu3 %vm1458_vm3, %v11781_v48  ;;  %v14486_v48 = vld [vmem:[%s17884_s6 + $0x270] sm:$0xff] }
 0x32f   : > { %5449 = vmatpush.bf16.msra.mxu1 %v14486_v48 }
 0x331   : > { %v3558_v21 = vpop.f32.mrf.mxu3  ;;  %v3471_v42 = vpop.f32.mrf.mxu1 }
 0x332   : > { %v3559_v46 = vadd.f32 %v3558_v21, %v3469_v24 }
 0x333   : > { %v4062_v27 = vpop.f32.mrf.mxu2 }
 0x334   : > { %v3614_v8 = vadd.f32 %v3559_v46, %v16041_v37  ;;  %v4063_v35 = vadd.f32 %v4062_v27, %v3973_v51  ;;  %v11987_v27 = vor.u32 %v14409_v56, %v11984_v18 }
 0x335   : > { %v3976_v11 = vpop.f32.mrf.mxu0 }
 0x336   : > { %v16301_v39 = vadd.f32 %v4063_v35, %v3613_v57  ;;  %v14410_v57 = vld [vmem:[#allocation3 + $0x114] sm:$0xf0]  ;;  %v14371_v35 = vld [vmem:[#allocation2 + $0x124] sm:$0xf0] }
 0x338   : > { %4949 = vmatmul.bf16.vlgmr.msrb.gmra.mxu0 %v11975_v44  ;;  %12136 = vmatmul.msk.bf16.vlgmr.msrb.gmra.mxu2 %vm1458_vm3, %v11979_v33  ;;  %v14568_v44 = vld [vmem:[%s17884_s6 + $0x78] sm:$0xff]  ;;  %v14370_v33 = vld [vmem:[#allocation2 + $0x124] sm:$0xf] }
 0x339   : > { %v3560_v34 = vpop.f32.mrf.mxu3  ;;  %v3474_v50 = vpop.f32.mrf.mxu1  ;;  %6105 = vmatpush.bf16.msra.mxu0 %v14568_v44 }
 0x33a   : > { %v3561_v52 = vadd.f32 %v3560_v34, %v3471_v42  ;;  %v11983_v42 = vor.u32 %v14410_v57, %v11982_v1  ;;  %v14411_v1 = vld [vmem:[#allocation3 + $0x124] sm:$0xf]  ;;  %v11992_v57 = vld [vmem:[#allocation3 + $0x128] sm:$0xf0] }
 0x33b   : > { %v4065_v19 = vpop.f32.mrf.mxu2 }
 0x33c   : > { %v3615_v37 = vadd.f32 %v3561_v52, %v16051_v55  ;;  %v4066_v54 = vadd.f32 %v4065_v19, %v3976_v11  ;;  %4447 = vmatmul.bf16.gmra.mxu1 %v11785_v60  ;;  %v11797_v60 = vor.u32 %v14370_v33, %v11794_v29 }
 0x33d   : > { %v3978_v24 = vpop.f32.mrf.mxu0 }
 0x33e   : > { %v16305_v59 = vadd.f32 %v4066_v54, %v3614_v8  ;;  %11939 = vmatmul.msk.bf16.gmra.mxu3 %vm1458_vm3, %v11789_v43  ;;  %v11792_v8 = vld [vmem:[#allocation2 + $0x120] sm:$0xf]  ;;  %v14412_v54 = vld [vmem:[#allocation3 + $0x124] sm:$0xf0] }
 0x33f   : > { %v11793_v49 = vor.u32 %v14371_v35, %v11792_v8 }
 0x341   : > { %v3563_v16 = vpop.f32.mrf.mxu3  ;;  %v3476_v51 = vpop.f32.mrf.mxu1 }
 0x342   : > { %v3564_v21 = vadd.f32 %v3563_v16, %v3474_v50 }
 0x343   : > { %v4067_v55 = vpop.f32.mrf.mxu2 }
 0x344   : > { %v3616_v13 = vadd.f32 %v3564_v21, %v16055_v30  ;;  %v4068_v3 = vadd.f32 %v4067_v55, %v3978_v24  ;;  %v11995_v55 = vor.u32 %v14411_v1, %v11992_v57 }
 0x345   : > { %v3981_v46 = vpop.f32.mrf.mxu0 }
 0x346   : > { %v16315_v11 = vadd.f32 %v4068_v3, %v3615_v37  ;;  %v11990_v37 = vld [vmem:[#allocation3 + $0x120] sm:$0xf]  ;;  %v14373_v3 = vld [vmem:[#allocation2 + $0x134] sm:$0xf0] }
 0x348   : > { %4954 = vmatmul.bf16.gmra.mxu0 %v11983_v42  ;;  %12137 = vmatmul.msk.bf16.gmra.mxu2 %vm1458_vm3, %v11987_v27  ;;  %v11800_v42 = vld [vmem:[#allocation2 + $0x130] sm:$0xf]  ;;  %v11802_v27 = vld [vmem:[#allocation2 + $0x138] sm:$0xf0] }
 0x349   : > { %v3565_v0 = vpop.f32.mrf.mxu3  ;;  %v3479_v30 = vpop.f32.mrf.mxu1  ;;  %v11801_v44 = vor.u32 %v14373_v3, %v11800_v42  ;;  %v11810_v42 = vld [vmem:[#allocation2 + $0x148] sm:$0xf0] }
 0x34a   : > { %v3566_v47 = vadd.f32 %v3565_v0, %v3476_v51  ;;  %v11991_v51 = vor.u32 %v14412_v54, %v11990_v37  ;;  %v14413_v37 = vld [vmem:[#allocation3 + $0x134] sm:$0xf]  ;;  %v12000_v54 = vld [vmem:[#allocation3 + $0x138] sm:$0xf0] }
 0x34b   : > { %v4070_v34 = vpop.f32.mrf.mxu2 }
 0x34c   : > { %v3617_v50 = vadd.f32 %v3566_v47, %v16059_v58  ;;  %v4071_v52 = vadd.f32 %v4070_v34, %v3981_v46  ;;  %4452 = vmatmul.bf16.gmra.mxu1 %v11793_v49  ;;  %v14372_v46 = vld [vmem:[#allocation2 + $0x134] sm:$0xf]  ;;  %v11998_v34 = vld [vmem:[#allocation3 + $0x130] sm:$0xf] }
 0x34d   : > { %v3983_v43 = vpop.f32.mrf.mxu0  ;;  %v11805_v29 = vor.u32 %v14372_v46, %v11802_v27 }
 0x34e   : > { %v16319_v19 = vadd.f32 %v4071_v52, %v3616_v13  ;;  %11940 = vmatmul.msk.bf16.gmra.mxu3 %vm1458_vm3, %v11797_v60  ;;  %v14485_v60 = vld [vmem:[%s17884_s6 + $0x268] sm:$0xff] }
 0x34f   : > { %5450 = vmatpush.bf16.msra.mxu1 %v14485_v60 }
 0x351   : > { %v3568_v24 = vpop.f32.mrf.mxu3  ;;  %v3481_v48 = vpop.f32.mrf.mxu1 }
 0x352   : > { %v3569_v16 = vadd.f32 %v3568_v24, %v3479_v30 }
 0x353   : > { %v4072_v56 = vpop.f32.mrf.mxu2 }
 0x354   : > { %v3618_v18 = vadd.f32 %v3569_v16, %v16063_v26  ;;  %v4073_v21 = vadd.f32 %v4072_v56, %v3983_v43  ;;  %v12003_v56 = vor.u32 %v14413_v37, %v12000_v54 }
 0x355   : > { %v3986_v58 = vpop.f32.mrf.mxu0 }
 0x356   : > { %v16323_v13 = vadd.f32 %v4073_v21, %v3617_v50  ;;  %v14414_v50 = vld [vmem:[#allocation3 + $0x134] sm:$0xf0]  ;;  %v14375_v21 = vld [vmem:[#allocation2 + $0x144] sm:$0xf0] }
 0x358   : > { %4959 = vmatmul.bf16.gmra.mxu0 %v11991_v51  ;;  %12138 = vmatmul.msk.bf16.gmra.mxu2 %vm1458_vm3, %v11995_v55  ;;  %v14567_v51 = vld [vmem:[%s17884_s6 + $0x70] sm:$0xff]  ;;  %v14374_v55 = vld [vmem:[#allocation2 + $0x144] sm:$0xf] }
 0x359   : > { %v3570_v8 = vpop.f32.mrf.mxu3  ;;  %v3484_v35 = vpop.f32.mrf.mxu1  ;;  %6106 = vmatpush.bf16.msra.mxu0 %v14567_v51 }
 0x35a   : > { %v3571_v33 = vadd.f32 %v3570_v8, %v3481_v48  ;;  %v11999_v48 = vor.u32 %v14414_v50, %v11998_v34  ;;  %v14415_v34 = vld [vmem:[#allocation3 + $0x144] sm:$0xf]  ;;  %v12008_v50 = vld [vmem:[#allocation3 + $0x148] sm:$0xf0] }
 0x35b   : > { %v4075_v49 = vpop.f32.mrf.mxu2 }
 0x35c   : > { %v3619_v26 = vadd.f32 %v3571_v33, %v16073_v5  ;;  %v4076_v0 = vadd.f32 %v4075_v49, %v3986_v58  ;;  %4457 = vmatmul.bf16.gmra.mxu1 %v11801_v44  ;;  %v11813_v44 = vor.u32 %v14374_v55, %v11810_v42 }
 0x35d   : > { %v3988_v30 = vpop.f32.mrf.mxu0 }
 0x35e   : > { %v16327_v47 = vadd.f32 %v4076_v0, %v3618_v18  ;;  %11941 = vmatmul.msk.bf16.gmra.mxu3 %vm1458_vm3, %v11805_v29  ;;  %v11808_v18 = vld [vmem:[#allocation2 + $0x140] sm:$0xf]  ;;  %v14416_v0 = vld [vmem:[#allocation3 + $0x144] sm:$0xf0] }
 0x35f   : > { %v11809_v3 = vor.u32 %v14375_v21, %v11808_v18 }
 0x361   : > { %v3573_v52 = vpop.f32.mrf.mxu3  ;;  %v3486_v43 = vpop.f32.mrf.mxu1 }
 0x362   : > { %v3574_v24 = vadd.f32 %v3573_v52, %v3484_v35 }
 0x363   : > { %v4077_v5 = vpop.f32.mrf.mxu2 }
 0x364   : > { %v3620_v1 = vadd.f32 %v3574_v24, %v16077_v14  ;;  %v4078_v57 = vadd.f32 %v4077_v5, %v3988_v30  ;;  %v12011_v5 = vor.u32 %v14415_v34, %v12008_v50  ;;  %v679_v34 = vld [vmem:[%s16360_s24] sm:$0xff]  ;;  %v680_v50 = vld [vmem:[%s16360_s24 + $0x8] sm:$0xff] }
 0x365   : > { %v3991_v16 = vpop.f32.mrf.mxu0  ;;  %695 = vst.msk [vmem:[#allocation2 + $0x180] sm:$0xff] %vm15383_vm2, %v679_v34 }
 0x366   : > { %v16337_v58 = vadd.f32 %v4078_v57, %v3619_v26  ;;  %v12006_v26 = vld [vmem:[#allocation3 + $0x140] sm:$0xf]  ;;  %696 = vst.msk [vmem:[#allocation2 + $0x188] sm:$0xff] %vm15383_vm2, %v680_v50 }
 0x367   : > { %v12007_v37 = vor.u32 %v14416_v0, %v12006_v26  ;;  %v12016_v26 = vld [vmem:[#allocation3 + $0x158] sm:$0xf0] }
 0x368   : > { %4964 = vmatmul.bf16.gmra.mxu0 %v11999_v48  ;;  %12139 = vmatmul.msk.bf16.gmra.mxu2 %vm1458_vm3, %v12003_v56  ;;  %v11816_v48 = vld [vmem:[#allocation2 + $0x150] sm:$0xf]  ;;  %v11818_v56 = vld [vmem:[#allocation2 + $0x158] sm:$0xf0] }
 0x369   : > { %v3575_v14 = vpop.f32.mrf.mxu3  ;;  %v3489_v46 = vpop.f32.mrf.mxu1 }
 0x36a   : > { %v3576_v27 = vadd.f32 %v3575_v14, %v3486_v43 }
 0x36b   : > { %v4080_v8 = vpop.f32.mrf.mxu2 }
 0x36c   : > { %v3621_v35 = vadd.f32 %v3576_v27, %v16081_v41  ;;  %v4081_v33 = vadd.f32 %v4080_v8, %v3991_v16  ;;  %4462 = vmatmul.bf16.gmra.mxu1 %v11809_v3  ;;  %v14376_v16 = vld [vmem:[#allocation2 + $0x154] sm:$0xf]  ;;  %v12014_v8 = vld [vmem:[#allocation3 + $0x150] sm:$0xf] }
 0x36d   : > { %v3993_v29 = vpop.f32.mrf.mxu0  ;;  %v11821_v42 = vor.u32 %v14376_v16, %v11818_v56 }
 0x36e   : > { %v16342_v49 = vadd.f32 %v4081_v33, %v3620_v1  ;;  %11942 = vmatmul.msk.bf16.gmra.mxu3 %vm1458_vm3, %v11813_v44  ;;  %v14377_v1 = vld [vmem:[#allocation2 + $0x154] sm:$0xf0]  ;;  %v14484_v44 = vld [vmem:[%s17884_s6 + $0x260] sm:$0xff] }
 0x36f   : > { %v11817_v51 = vor.u32 %v14377_v1, %v11816_v48  ;;  %5451 = vmatpush.bf16.msra.mxu1 %v14484_v44  ;;  %v11826_v1 = vld [vmem:[#allocation2 + $0x168] sm:$0xf0]  ;;  %v872_v44 = vld [vmem:[%s16360_s24 + $0x18] sm:$0xff] }
 0x370   : > { %888 = vst.msk [vmem:[#allocation3 + $0x188] sm:$0xff] %vm15383_vm2, %v872_v44 }
 0x371   : > { %v3578_v30 = vpop.f32.mrf.mxu3  ;;  %v3491_v60 = vpop.f32.mrf.mxu1  ;;  %698 = vst.msk [vmem:[#allocation2 + $0x198] sm:$0xff] %vm15383_vm2, %v872_v44  ;;  %v14422_v44 = vld [vmem:[#allocation3 + $0x174] sm:$0xf0] }
 0x372   : > { %v3579_v52 = vadd.f32 %v3578_v30, %v3489_v46 }
 0x373   : > { %v4082_v43 = vpop.f32.mrf.mxu2 }
 0x374   : > { %v3622_v41 = vadd.f32 %v3579_v52, %v16085_v2  ;;  %v4083_v54 = vadd.f32 %v4082_v43, %v3993_v29  ;;  %v14417_v29 = vld [vmem:[#allocation3 + $0x154] sm:$0xf] }
 0x375   : > { %v3996_v24 = vpop.f32.mrf.mxu0 }
 0x376   : > { %v16346_v57 = vadd.f32 %v4083_v54, %v3621_v35  ;;  %v14418_v35 = vld [vmem:[#allocation3 + $0x154] sm:$0xf0]  ;;  %v14566_v54 = vld [vmem:[%s17884_s6 + $0x68] sm:$0xff] }
 0x377   : > { %6107 = vmatpush.bf16.msra.mxu0 %v14566_v54  ;;  %v14380_v54 = vld [vmem:[#allocation2 + $0x174] sm:$0xf] }
 0x378   : > { %4969 = vmatmul.bf16.gmra.mxu0 %v12007_v37  ;;  %12140 = vmatmul.msk.bf16.gmra.mxu2 %vm1458_vm3, %v12011_v5  ;;  %v14379_v5 = vld [vmem:[#allocation2 + $0x164] sm:$0xf0] }
 0x379   : > { %v3580_v18 = vpop.f32.mrf.mxu3  ;;  %v3494_v21 = vpop.f32.mrf.mxu1 }
 0x37a   : > { %v3581_v55 = vadd.f32 %v3580_v18, %v3491_v60  ;;  %v12015_v60 = vor.u32 %v14418_v35, %v12014_v8  ;;  %v12022_v8 = vld [vmem:[#allocation3 + $0x160] sm:$0xf]  ;;  %v14420_v35 = vld [vmem:[#allocation3 + $0x164] sm:$0xf0] }
 0x37b   : > { %v4085_v2 = vpop.f32.mrf.mxu2 }
 0x37c   : > { %v3623_v3 = vadd.f32 %v3581_v55, %v16101_v38  ;;  %v4086_v14 = vadd.f32 %v4085_v2, %v3996_v24  ;;  %4467 = vmatmul.bf16.gmra.mxu1 %v11817_v51  ;;  %v11824_v24 = vld [vmem:[#allocation2 + $0x160] sm:$0xf] }
 0x37d   : > { %v3998_v46 = vpop.f32.mrf.mxu0  ;;  %v11825_v16 = vor.u32 %v14379_v5, %v11824_v24  ;;  %v11834_v24 = vld [vmem:[#allocation2 + $0x178] sm:$0xf0] }
 0x37e   : > { %v16351_v27 = vadd.f32 %v4086_v14, %v3622_v41  ;;  %11943 = vmatmul.msk.bf16.gmra.mxu3 %vm1458_vm3, %v11821_v42  ;;  %v12019_v41 = vor.u32 %v14417_v29, %v12016_v26  ;;  %v14419_v29 = vld [vmem:[#allocation3 + $0x164] sm:$0xf]  ;;  %v12024_v26 = vld [vmem:[#allocation3 + $0x168] sm:$0xf0] }
 0x381   : > { %v3583_v38 = vpop.f32.mrf.mxu3  ;;  %v3496_v33 = vpop.f32.mrf.mxu1 }
 0x382   : > { %v3584_v0 = vadd.f32 %v3583_v38, %v3494_v21 }
 0x383   : > { %v4087_v30 = vpop.f32.mrf.mxu2 }
 0x384   : > { %v3624_v52 = vadd.f32 %v3584_v0, %v16105_v62  ;;  %v4088_v43 = vadd.f32 %v4087_v30, %v3998_v46  ;;  %v14378_v62 = vld [vmem:[#allocation2 + $0x164] sm:$0xf]  ;;  %v871_v46 = vld [vmem:[%s16360_s24 + $0x10] sm:$0xff]  ;;  %v12023_v30 = vor.u32 %v14420_v35, %v12022_v8 }
 0x385   : > { %v4001_v37 = vpop.f32.mrf.mxu0  ;;  %v11829_v21 = vor.u32 %v14378_v62, %v11826_v1  ;;  %887 = vst.msk [vmem:[#allocation3 + $0x180] sm:$0xff] %vm15383_vm2, %v871_v46  ;;  %v14421_v35 = vld [vmem:[#allocation3 + $0x174] sm:$0xf] }
 0x386   : > { %v16372_v48 = vadd.f32 %v4088_v43, %v3623_v3  ;;  %697 = vst.msk [vmem:[#allocation2 + $0x190] sm:$0xff] %vm15383_vm2, %v871_v46  ;;  %v11832_v43 = vld [vmem:[#allocation2 + $0x170] sm:$0xf] }
 0x387   : > { %v12030_v46 = vld [vmem:[#allocation3 + $0x170] sm:$0xf] }
 0x388   : > { %4974 = vmatmul.bf16.gmra.mxu0 %v12015_v60  ;;  %12141 = vmatmul.msk.bf16.gmra.mxu2 %vm1458_vm3, %v12019_v41 }
 0x389   : > { %v3585_v56 = vpop.f32.mrf.mxu3  ;;  %v3499_v51 = vpop.f32.mrf.mxu1 }
 0x38a   : > { %v3586_v18 = vadd.f32 %v3585_v56, %v3496_v33  ;;  %v11837_v56 = vor.u32 %v14380_v54, %v11834_v24  ;;  %v11842_v54 = vld [vmem:[#allocation2 + $0x188] sm:$0xf0] }
 0x38b   : > { %v4090_v55 = vpop.f32.mrf.mxu2 }
 0x38c   : > { %v3625_v42 = vadd.f32 %v3586_v18, %v16119_v36  ;;  %v4091_v2 = vadd.f32 %v4090_v55, %v4001_v37  ;;  %4472 = vmatmul.bf16.gmra.mxu1 %v11825_v16  ;;  %v14381_v37 = vld [vmem:[#allocation2 + $0x174] sm:$0xf0] }
 0x38d   : > { %v4003_v3 = vpop.f32.mrf.mxu0  ;;  %v11833_v5 = vor.u32 %v14381_v37, %v11832_v43  ;;  %v14382_v37 = vld [vmem:[#allocation2 + $0x184] sm:$0xf] }
 0x38e   : > { %v16376_v14 = vadd.f32 %v4091_v2, %v3624_v52  ;;  %11944 = vmatmul.msk.bf16.gmra.mxu3 %vm1458_vm3, %v11829_v21  ;;  %v12027_v52 = vor.u32 %v14419_v29, %v12024_v26  ;;  %v873_v2 = vld [vmem:[%s16360_s24 + $0x20] sm:$0xff]  ;;  %v12031_v26 = vor.u32 %v14422_v44, %v12030_v46 }
 0x38f   : > { %889 = vst.msk [vmem:[#allocation3 + $0x190] sm:$0xff] %vm15383_vm2, %v873_v2 }
 0x390   : > { %699 = vst.msk [vmem:[#allocation2 + $0x1a0] sm:$0xff] %vm15383_vm2, %v873_v2  ;;  %v12038_v2 = vld [vmem:[#allocation3 + $0x180] sm:$0xf] }
 0x391   : > { %v3588_v38 = vpop.f32.mrf.mxu3  ;;  %v3501_v33 = vpop.f32.mrf.mxu1 }
 0x392   : > { %v3589_v36 = vadd.f32 %v3588_v38, %v3499_v51  ;;  %v12032_v38 = vld [vmem:[#allocation3 + $0x178] sm:$0xf0] }
 0x393   : > { %v4092_v0 = vpop.f32.mrf.mxu2 }
 0x394   : > { %v3626_v60 = vadd.f32 %v3589_v36, %v16123_v31  ;;  %v4093_v34 = vadd.f32 %v4092_v0, %v4003_v3  ;;  %v874_v3 = vld [vmem:[%s16360_s24 + $0x28] sm:$0xff] }
 0x395   : > { %v4006_v50 = vpop.f32.mrf.mxu0  ;;  %890 = vst.msk [vmem:[#allocation3 + $0x198] sm:$0xff] %vm15383_vm2, %v874_v3 }
 0x396   : > { %v16390_v41 = vadd.f32 %v4093_v34, %v3625_v42  ;;  %v14483_v42 = vld [vmem:[%s17884_s6 + $0x258] sm:$0xff]  ;;  %700 = vst.msk [vmem:[#allocation2 + $0x1a8] sm:$0xff] %vm15383_vm2, %v874_v3  ;;  %v14565_v34 = vld [vmem:[%s17884_s6 + $0x60] sm:$0xff]  ;;  %v14424_v3 = vld [vmem:[#allocation3 + $0x184] sm:$0xf0] }
 0x397   : > { %5452 = vmatpush.bf16.msra.mxu1 %v14483_v42  ;;  %6108 = vmatpush.bf16.msra.mxu0 %v14565_v34  ;;  %v876_v42 = vld [vmem:[%s16360_s24 + $0x38] sm:$0xff]  ;;  %v14384_v34 = vld [vmem:[#allocation2 + $0x194] sm:$0xf] }
 0x398   : > { %4979 = vmatmul.bf16.gmra.mxu0 %v12023_v30  ;;  %12142 = vmatmul.msk.bf16.gmra.mxu2 %vm1458_vm3, %v12027_v52  ;;  %v14383_v52 = vld [vmem:[#allocation2 + $0x184] sm:$0xf0]  ;;  %892 = vst.msk [vmem:[#allocation3 + $0x1a8] sm:$0xff] %vm15383_vm2, %v876_v42 }
 0x399   : > { %v3590_v62 = vpop.f32.mrf.mxu3  ;;  %v3504_v1 = vpop.f32.mrf.mxu1  ;;  %702 = vst.msk [vmem:[#allocation2 + $0x1b8] sm:$0xff] %vm15383_vm2, %v876_v42 }
 0x39a   : > { %v3591_v16 = vadd.f32 %v3590_v62, %v3501_v33 }
 0x39b   : > { %v4095_v31 = vpop.f32.mrf.mxu2 }
 0x39c   : > { %v3627_v51 = vadd.f32 %v3591_v16, %v16143_v4  ;;  %v4096_v18 = vadd.f32 %v4095_v31, %v4006_v50  ;;  %4477 = vmatmul.bf16.gmra.mxu1 %v11833_v5  ;;  %v11840_v50 = vld [vmem:[#allocation2 + $0x180] sm:$0xf]  ;;  %v14426_v42 = vld [vmem:[#allocation3 + $0x194] sm:$0xf0] }
 0x39d   : > { %v4008_v21 = vpop.f32.mrf.mxu0 }
 0x39e   : > { %v16394_v55 = vadd.f32 %v4096_v18, %v3626_v60  ;;  %11945 = vmatmul.msk.bf16.gmra.mxu3 %vm1458_vm3, %v11837_v56  ;;  %v12035_v60 = vor.u32 %v14421_v35, %v12032_v38  ;;  %v12039_v38 = vor.u32 %v14424_v3, %v12038_v2  ;;  %v14425_v3 = vld [vmem:[#allocation3 + $0x194] sm:$0xf] }
 0x3a1   : > { %v3593_v4 = vpop.f32.mrf.mxu3  ;;  %v3506_v8 = vpop.f32.mrf.mxu1 }
 0x3a2   : > { %v3594_v33 = vadd.f32 %v3593_v4, %v3504_v1  ;;  %v11845_v1 = vor.u32 %v14382_v37, %v11842_v54  ;;  %v14423_v4 = vld [vmem:[#allocation3 + $0x184] sm:$0xf] }
 0x3a3   : > { %v4097_v29 = vpop.f32.mrf.mxu2 }
 0x3a4   : > { %v3628_v36 = vadd.f32 %v3594_v33, %v16147_v25  ;;  %v4098_v0 = vadd.f32 %v4097_v29, %v4008_v21  ;;  %v11841_v25 = vor.u32 %v14383_v52, %v11840_v50  ;;  %v875_v21 = vld [vmem:[%s16360_s24 + $0x30] sm:$0xff]  ;;  %v11850_v50 = vld [vmem:[#allocation2 + $0x198] sm:$0xf0] }
 0x3a5   : > { %v4011_v30 = vpop.f32.mrf.mxu0  ;;  %891 = vst.msk [vmem:[#allocation3 + $0x1a0] sm:$0xff] %vm15383_vm2, %v875_v21 }
 0x3a6   : > { %v16414_v43 = vadd.f32 %v4098_v0, %v3627_v51  ;;  %701 = vst.msk [vmem:[#allocation2 + $0x1b0] sm:$0xff] %vm15383_vm2, %v875_v21  ;;  %v11848_v0 = vld [vmem:[#allocation2 + $0x190] sm:$0xf] }
 0x3a7   : > { %v12046_v21 = vld [vmem:[#allocation3 + $0x190] sm:$0xf] }
 0x3a8   : > { %4984 = vmatmul.bf16.gmra.mxu0 %v12031_v26  ;;  %12143 = vmatmul.msk.bf16.gmra.mxu2 %vm1458_vm3, %v12035_v60 }
 0x3a9   : > { %v3595_v24 = vpop.f32.mrf.mxu3  ;;  %v4443_v5 = vpop.f32.mrf.mxu1 }
 0x3aa   : > { %v3596_v62 = vadd.f32 %v3595_v24, %v3506_v8  ;;  %v12040_v8 = vld [vmem:[#allocation3 + $0x188] sm:$0xf0]  ;;  %v11853_v24 = vor.u32 %v14384_v34, %v11850_v50 }
 0x3ab   : > { %v4100_v16 = vpop.f32.mrf.mxu2  ;;  %v11858_v34 = vld [vmem:[#allocation2 + $0x1a8] sm:$0xf0] }
 0x3ac   : > { %v3629_v56 = vadd.f32 %v3596_v62, %v16161_v40  ;;  %v4101_v31 = vadd.f32 %v4100_v16, %v4011_v30  ;;  %4482 = vmatmul.bf16.gmra.mxu1 %v11841_v25  ;;  %v14385_v30 = vld [vmem:[#allocation2 + $0x194] sm:$0xf0] }
 0x3ad   : > { %v4013_v51 = vpop.f32.mrf.mxu0  ;;  %v11849_v52 = vor.u32 %v14385_v30, %v11848_v0  ;;  %v14386_v30 = vld [vmem:[#allocation2 + $0x1a4] sm:$0xf] }
 0x3ae   : > { %v16418_v18 = vadd.f32 %v4101_v31, %v3628_v36  ;;  %11946 = vmatmul.msk.bf16.gmra.mxu3 %vm1458_vm3, %v11845_v1  ;;  %v12043_v36 = vor.u32 %v14423_v4, %v12040_v8  ;;  %v877_v31 = vld [vmem:[%s16360_s24 + $0x40] sm:$0xff]  ;;  %v12047_v8 = vor.u32 %v14426_v42, %v12046_v21 }
 0x3af   : > { %893 = vst.msk [vmem:[#allocation3 + $0x1b0] sm:$0xff] %vm15383_vm2, %v877_v31 }
 0x3b0   : > { %703 = vst.msk [vmem:[#allocation2 + $0x1c0] sm:$0xff] %vm15383_vm2, %v877_v31  ;;  %v12054_v31 = vld [vmem:[#allocation3 + $0x1a0] sm:$0xf] }
 0x3b1   : > { %v4532_v46 = vpop.f32.mrf.mxu3  ;;  %v4445_v44 = vpop.f32.mrf.mxu1 }
 0x3b2   : > { %v4533_v40 = vadd.f32 %v4532_v46, %v4443_v5  ;;  %v12048_v46 = vld [vmem:[#allocation3 + $0x198] sm:$0xf0] }
 0x3b3   : > { %v4102_v35 = vpop.f32.mrf.mxu2 }
 0x3b4   : > { %v4612_v33 = vadd.f32 %v4533_v40, %v16166_v22  ;;  %v4103_v29 = vadd.f32 %v4102_v35, %v4013_v51  ;;  %v878_v51 = vld [vmem:[%s16360_s24 + $0x48] sm:$0xff] }
 0x3b5   : > { %v4950_v26 = vpop.f32.mrf.mxu0  ;;  %894 = vst.msk [vmem:[#allocation3 + $0x1b8] sm:$0xff] %vm15383_vm2, %v878_v51 }
 0x3b6   : > { %v16432_v60 = vadd.f32 %v4103_v29, %v3629_v56  ;;  %v14482_v56 = vld [vmem:[%s17884_s6 + $0x250] sm:$0xff]  ;;  %704 = vst.msk [vmem:[#allocation2 + $0x1c8] sm:$0xff] %vm15383_vm2, %v878_v51  ;;  %v14564_v29 = vld [vmem:[%s17884_s6 + $0x58] sm:$0xff]  ;;  %v14428_v51 = vld [vmem:[#allocation3 + $0x1a4] sm:$0xf0] }
 0x3b7   : > { %5453 = vmatpush.bf16.msra.mxu1 %v14482_v56  ;;  %6109 = vmatpush.bf16.msra.mxu0 %v14564_v29  ;;  %v880_v56 = vld [vmem:[%s16360_s24 + $0x58] sm:$0xff]  ;;  %v14388_v29 = vld [vmem:[#allocation2 + $0x1b4] sm:$0xf] }
 0x3b8   : > { %4989 = vmatmul.bf16.gmra.mxu0 %v12039_v38  ;;  %12144 = vmatmul.msk.bf16.gmra.mxu2 %vm1458_vm3, %v12043_v36  ;;  %v14387_v36 = vld [vmem:[#allocation2 + $0x1a4] sm:$0xf0]  ;;  %896 = vst.msk [vmem:[#allocation3 + $0x1c8] sm:$0xff] %vm15383_vm2, %v880_v56 }
 0x3b9   : > { %v4534_v37 = vpop.f32.mrf.mxu3  ;;  %v4448_v54 = vpop.f32.mrf.mxu1  ;;  %706 = vst.msk [vmem:[#allocation2 + $0x1d8] sm:$0xff] %vm15383_vm2, %v880_v56 }
 0x3ba   : > { %v4535_v25 = vadd.f32 %v4534_v37, %v4445_v44 }
 0x3bb   : > { %v5039_v22 = vpop.f32.mrf.mxu2 }
 0x3bc   : > { %v4613_v5 = vadd.f32 %v4535_v25, %v16185_v10  ;;  %4487 = vmatmul.bf16.gmra.mxu1 %v11849_v52  ;;  %v5040_v62 = vadd.f32 %v5039_v22, %v4950_v26  ;;  %v11856_v26 = vld [vmem:[#allocation2 + $0x1a0] sm:$0xf]  ;;  %v14430_v56 = vld [vmem:[#allocation3 + $0x1b4] sm:$0xf0] }
 0x3bd   : > { %v4952_v1 = vpop.f32.mrf.mxu0 }
 0x3be   : > { %11947 = vmatmul.msk.bf16.gmra.mxu3 %vm1458_vm3, %v11853_v24  ;;  %v16437_v16 = vadd.f32 %v5040_v62, %v4612_v33  ;;  %v12051_v33 = vor.u32 %v14425_v3, %v12048_v46  ;;  %v12055_v46 = vor.u32 %v14428_v51, %v12054_v31  ;;  %v14429_v51 = vld [vmem:[#allocation3 + $0x1b4] sm:$0xf] }
 0x3c1   : > { %v4537_v10 = vpop.f32.mrf.mxu3  ;;  %v4450_v2 = vpop.f32.mrf.mxu1 }
 0x3c2   : > { %v4538_v44 = vadd.f32 %v4537_v10, %v4448_v54  ;;  %v11861_v54 = vor.u32 %v14386_v30, %v11858_v34  ;;  %v14427_v10 = vld [vmem:[#allocation3 + $0x1a4] sm:$0xf] }
 0x3c3   : > { %v5041_v4 = vpop.f32.mrf.mxu2 }
 0x3c4   : > { %v4614_v40 = vadd.f32 %v4538_v44, %v16190_v32  ;;  %v5042_v35 = vadd.f32 %v5041_v4, %v4952_v1  ;;  %v11857_v32 = vor.u32 %v14387_v36, %v11856_v26  ;;  %v879_v1 = vld [vmem:[%s16360_s24 + $0x50] sm:$0xff]  ;;  %v11866_v26 = vld [vmem:[#allocation2 + $0x1b8] sm:$0xf0] }
 0x3c5   : > { %v4955_v38 = vpop.f32.mrf.mxu0  ;;  %895 = vst.msk [vmem:[#allocation3 + $0x1c0] sm:$0xff] %vm15383_vm2, %v879_v1 }
 0x3c6   : > { %v16456_v0 = vadd.f32 %v5042_v35, %v4613_v5  ;;  %705 = vst.msk [vmem:[#allocation2 + $0x1d0] sm:$0xff] %vm15383_vm2, %v879_v1  ;;  %v11864_v35 = vld [vmem:[#allocation2 + $0x1b0] sm:$0xf] }
 0x3c7   : > { %v12062_v1 = vld [vmem:[#allocation3 + $0x1b0] sm:$0xf] }
 0x3c8   : > { %4994 = vmatmul.bf16.gmra.mxu0 %v12047_v8  ;;  %12145 = vmatmul.msk.bf16.gmra.mxu2 %vm1458_vm3, %v12051_v33 }
 0x3c9   : > { %v4539_v50 = vpop.f32.mrf.mxu3  ;;  %v4453_v52 = vpop.f32.mrf.mxu1 }
 0x3ca   : > { %v4540_v37 = vadd.f32 %v4539_v50, %v4450_v2  ;;  %v12056_v2 = vld [vmem:[#allocation3 + $0x1a8] sm:$0xf0]  ;;  %v11869_v50 = vor.u32 %v14388_v29, %v11866_v26 }
 0x3cb   : > { %v5044_v25 = vpop.f32.mrf.mxu2  ;;  %v11874_v29 = vld [vmem:[#allocation2 + $0x1c8] sm:$0xf0] }
 0x3cc   : > { %v4615_v24 = vadd.f32 %v4540_v37, %v16203_v23  ;;  %4492 = vmatmul.bf16.gmra.mxu1 %v11857_v32  ;;  %v5045_v22 = vadd.f32 %v5044_v25, %v4955_v38  ;;  %v14389_v38 = vld [vmem:[#allocation2 + $0x1b4] sm:$0xf0] }
 0x3cd   : > { %v4957_v5 = vpop.f32.mrf.mxu0  ;;  %v11865_v36 = vor.u32 %v14389_v38, %v11864_v35  ;;  %v14390_v38 = vld [vmem:[#allocation2 + $0x1c4] sm:$0xf] }
 0x3ce   : > { %11948 = vmatmul.msk.bf16.gmra.mxu3 %vm1458_vm3, %v11861_v54  ;;  %v16461_v62 = vadd.f32 %v5045_v22, %v4614_v40  ;;  %v12059_v40 = vor.u32 %v14427_v10, %v12056_v2  ;;  %v881_v22 = vld [vmem:[%s16360_s24 + $0x60] sm:$0xff]  ;;  %v12063_v2 = vor.u32 %v14430_v56, %v12062_v1 }
 0x3cf   : > { %897 = vst.msk [vmem:[#allocation3 + $0x1d0] sm:$0xff] %vm15383_vm2, %v881_v22 }
 0x3d0   : > { %707 = vst.msk [vmem:[#allocation2 + $0x1e0] sm:$0xff] %vm15383_vm2, %v881_v22  ;;  %v12070_v22 = vld [vmem:[#allocation3 + $0x1c0] sm:$0xf] }
 0x3d1   : > { %v4542_v21 = vpop.f32.mrf.mxu3  ;;  %v4455_v42 = vpop.f32.mrf.mxu1 }
 0x3d2   : > { %v4543_v23 = vadd.f32 %v4542_v21, %v4453_v52  ;;  %v12064_v21 = vld [vmem:[#allocation3 + $0x1b8] sm:$0xf0] }
 0x3d3   : > { %v5046_v3 = vpop.f32.mrf.mxu2 }
 0x3d4   : > { %v4616_v44 = vadd.f32 %v4543_v23, %v16208_v6  ;;  %v5047_v4 = vadd.f32 %v5046_v3, %v4957_v5  ;;  %v882_v5 = vld [vmem:[%s16360_s24 + $0x68] sm:$0xff] }
 0x3d5   : > { %v4960_v8 = vpop.f32.mrf.mxu0  ;;  %898 = vst.msk [vmem:[#allocation3 + $0x1d8] sm:$0xff] %vm15383_vm2, %v882_v5 }
 0x3d6   : > { %v16474_v33 = vadd.f32 %v5047_v4, %v4615_v24  ;;  %v14481_v24 = vld [vmem:[%s17884_s6 + $0x248] sm:$0xff]  ;;  %708 = vst.msk [vmem:[#allocation2 + $0x1e8] sm:$0xff] %vm15383_vm2, %v882_v5  ;;  %v14563_v4 = vld [vmem:[%s17884_s6 + $0x50] sm:$0xff] }
 0x3d7   : > { %5454 = vmatpush.bf16.msra.mxu1 %v14481_v24  ;;  %6110 = vmatpush.bf16.msra.mxu0 %v14563_v4  ;;  %v884_v24 = vld [vmem:[%s16360_s24 + $0x78] sm:$0xff]  ;;  %v14432_v5 = vld [vmem:[#allocation3 + $0x1c4] sm:$0xf0]  ;;  %v14392_v4 = vld [vmem:[#allocation2 + $0x1d4] sm:$0xf] }
 0x3d8   : > { %4999 = vmatmul.bf16.gmra.mxu0 %v12055_v46  ;;  %12146 = vmatmul.msk.bf16.gmra.mxu2 %vm1458_vm3, %v12059_v40  ;;  %v14391_v40 = vld [vmem:[#allocation2 + $0x1c4] sm:$0xf0]  ;;  %900 = vst.msk [vmem:[#allocation3 + $0x1e8] sm:$0xff] %vm15383_vm2, %v884_v24 }
 0x3d9   : > { %v4544_v30 = vpop.f32.mrf.mxu3  ;;  %v4458_v34 = vpop.f32.mrf.mxu1  ;;  %710 = vst.msk [vmem:[#allocation2 + $0x1f8] sm:$0xff] %vm15383_vm2, %v884_v24 }
 0x3da   : > { %v4545_v32 = vadd.f32 %v4544_v30, %v4455_v42 }
 0x3db   : > { %v5049_v6 = vpop.f32.mrf.mxu2 }
 0x3dc   : > { %v4617_v52 = vadd.f32 %v4545_v32, %v16227_v17  ;;  %4497 = vmatmul.bf16.gmra.mxu1 %v11865_v36  ;;  %v5050_v37 = vadd.f32 %v5049_v6, %v4960_v8  ;;  %v11872_v8 = vld [vmem:[#allocation2 + $0x1c0] sm:$0xf]  ;;  %v14434_v24 = vld [vmem:[#allocation3 + $0x1d4] sm:$0xf0] }
 0x3dd   : > { %v4962_v54 = vpop.f32.mrf.mxu0 }
 0x3de   : > { %11949 = vmatmul.msk.bf16.gmra.mxu3 %vm1458_vm3, %v11869_v50  ;;  %v16479_v25 = vadd.f32 %v5050_v37, %v4616_v44  ;;  %v12067_v44 = vor.u32 %v14429_v51, %v12064_v21  ;;  %v12071_v21 = vor.u32 %v14432_v5, %v12070_v22  ;;  %v14433_v5 = vld [vmem:[#allocation3 + $0x1d4] sm:$0xf] }
 0x3e1   : > { %v4547_v17 = vpop.f32.mrf.mxu3  ;;  %v4460_v31 = vpop.f32.mrf.mxu1 }
 0x3e2   : > { %v4548_v42 = vadd.f32 %v4547_v17, %v4458_v34  ;;  %v11877_v34 = vor.u32 %v14390_v38, %v11874_v29  ;;  %v14431_v17 = vld [vmem:[#allocation3 + $0x1c4] sm:$0xf] }
 0x3e3   : > { %v5051_v10 = vpop.f32.mrf.mxu2 }
 0x3e4   : > { %v4618_v23 = vadd.f32 %v4548_v42, %v16232_v28  ;;  %v5052_v3 = vadd.f32 %v5051_v10, %v4962_v54  ;;  %v11873_v28 = vor.u32 %v14391_v40, %v11872_v8  ;;  %v883_v54 = vld [vmem:[%s16360_s24 + $0x70] sm:$0xff]  ;;  %v11882_v8 = vld [vmem:[#allocation2 + $0x1d8] sm:$0xf0] }
 0x3e5   : > { %v4965_v46 = vpop.f32.mrf.mxu0  ;;  %899 = vst.msk [vmem:[#allocation3 + $0x1e0] sm:$0xff] %vm15383_vm2, %v883_v54 }
 0x3e6   : > { %v16498_v35 = vadd.f32 %v5052_v3, %v4617_v52  ;;  %709 = vst.msk [vmem:[#allocation2 + $0x1f0] sm:$0xff] %vm15383_vm2, %v883_v54  ;;  %v11880_v3 = vld [vmem:[#allocation2 + $0x1d0] sm:$0xf] }
 0x3e7   : > { %v12078_v54 = vld [vmem:[#allocation3 + $0x1d0] sm:$0xf] }
 0x3e8   : > { %5004 = vmatmul.bf16.gmra.mxu0 %v12063_v2  ;;  %12147 = vmatmul.msk.bf16.gmra.mxu2 %vm1458_vm3, %v12067_v44 }
 0x3e9   : > { %v4549_v26 = vpop.f32.mrf.mxu3  ;;  %v4463_v36 = vpop.f32.mrf.mxu1 }
 0x3ea   : > { %v4550_v30 = vadd.f32 %v4549_v26, %v4460_v31  ;;  %v12072_v31 = vld [vmem:[#allocation3 + $0x1c8] sm:$0xf0]  ;;  %v11885_v26 = vor.u32 %v14392_v4, %v11882_v8 }
 0x3eb   : > { %v5054_v32 = vpop.f32.mrf.mxu2  ;;  %v11890_v4 = vld [vmem:[#allocation2 + $0x1e8] sm:$0xf0] }
 0x3ec   : > { %v4619_v50 = vadd.f32 %v4550_v30, %v16245_v12  ;;  %4502 = vmatmul.bf16.gmra.mxu1 %v11873_v28  ;;  %v5055_v6 = vadd.f32 %v5054_v32, %v4965_v46  ;;  %v14393_v46 = vld [vmem:[#allocation2 + $0x1d4] sm:$0xf0] }
 0x3ed   : > { %v4967_v52 = vpop.f32.mrf.mxu0  ;;  %v11881_v40 = vor.u32 %v14393_v46, %v11880_v3  ;;  %v14394_v46 = vld [vmem:[#allocation2 + $0x1e4] sm:$0xf] }
 0x3ee   : > { %11950 = vmatmul.msk.bf16.gmra.mxu3 %vm1458_vm3, %v11877_v34  ;;  %v16503_v37 = vadd.f32 %v5055_v6, %v4618_v23  ;;  %v12075_v23 = vor.u32 %v14431_v17, %v12072_v31  ;;  %v885_v6 = vld [vmem:[%s16360_s24 + $0x80] sm:$0xff]  ;;  %v12079_v31 = vor.u32 %v14434_v24, %v12078_v54  ;;  %v12088_v24 = vld [vmem:[#allocation3 + $0x1e8] sm:$0xf0] }
 0x3ef   : > { %901 = vst.msk [vmem:[#allocation3 + $0x1f0] sm:$0xff] %vm15383_vm2, %v885_v6  ;;  %v14435_v54 = vld [vmem:[#allocation3 + $0x1e4] sm:$0xf] }
 0x3f1   : > { %v4552_v1 = vpop.f32.mrf.mxu3  ;;  %v4465_v56 = vpop.f32.mrf.mxu1 }
 0x3f2   : > { %v4553_v12 = vadd.f32 %v4552_v1, %v4463_v36  ;;  %v12080_v1 = vld [vmem:[#allocation3 + $0x1d8] sm:$0xf0] }
 0x3f3   : > { %v5056_v51 = vpop.f32.mrf.mxu2 }
 0x3f4   : > { %v4620_v42 = vadd.f32 %v4553_v12, %v16250_v15  ;;  %v5057_v10 = vadd.f32 %v5056_v51, %v4967_v52  ;;  %v886_v52 = vld [vmem:[%s16360_s24 + $0x88] sm:$0xff] }
 0x3f5   : > { %v4970_v2 = vpop.f32.mrf.mxu0  ;;  %902 = vst.msk [vmem:[#allocation3 + $0x1f8] sm:$0xff] %vm15383_vm2, %v886_v52 }
 0x3f6   : > { %v16516_v44 = vadd.f32 %v5057_v10, %v4619_v50  ;;  %v14480_v50 = vld [vmem:[%s17884_s6 + $0x240] sm:$0xff]  ;;  %v14562_v10 = vld [vmem:[%s17884_s6 + $0x48] sm:$0xff] }
 0x3f7   : > { %5455 = vmatpush.bf16.msra.mxu1 %v14480_v50  ;;  %6111 = vmatpush.bf16.msra.mxu0 %v14562_v10  ;;  %v14436_v50 = vld [vmem:[#allocation3 + $0x1e4] sm:$0xf0] }
 0x3f8   : > { %5009 = vmatmul.bf16.gmra.mxu0 %v12071_v21  ;;  %12148 = vmatmul.msk.bf16.gmra.mxu2 %vm1458_vm3, %v12075_v23  ;;  %v14395_v23 = vld [vmem:[#allocation2 + $0x1e4] sm:$0xf0] }
 0x3f9   : > { %v4554_v38 = vpop.f32.mrf.mxu3  ;;  %v4468_v29 = vpop.f32.mrf.mxu1 }
 0x3fa   : > { %v4555_v28 = vadd.f32 %v4554_v38, %v4465_v56 }
 0x3fb   : > { %v5059_v15 = vpop.f32.mrf.mxu2 }
 0x3fc   : > { %v4621_v36 = vadd.f32 %v4555_v28, %v16265_v45  ;;  %4507 = vmatmul.bf16.gmra.mxu1 %v11881_v40  ;;  %v5060_v30 = vadd.f32 %v5059_v15, %v4970_v2  ;;  %v11888_v2 = vld [vmem:[#allocation2 + $0x1e0] sm:$0xf] }
 0x3fd   : > { %v4972_v34 = vpop.f32.mrf.mxu0  ;;  %v11889_v8 = vor.u32 %v14395_v23, %v11888_v2 }
 0x3fe   : > { %11951 = vmatmul.msk.bf16.gmra.mxu3 %vm1458_vm3, %v11885_v26  ;;  %v16521_v32 = vadd.f32 %v5060_v30, %v4620_v42  ;;  %v12083_v42 = vor.u32 %v14433_v5, %v12080_v1 }
 0x401   : > { %v4557_v45 = vpop.f32.mrf.mxu3  ;;  %v4470_v22 = vpop.f32.mrf.mxu1 }
 0x402   : > { %v4558_v56 = vadd.f32 %v4557_v45, %v4468_v29  ;;  %v11893_v29 = vor.u32 %v14394_v46, %v11890_v4 }
 0x403   : > { %v5061_v17 = vpop.f32.mrf.mxu2 }
 0x404   : > { %v4622_v12 = vadd.f32 %v4558_v56, %v16270_v63  ;;  %v5062_v51 = vadd.f32 %v5061_v17, %v4972_v34  ;;  %v12086_v34 = vld [vmem:[#allocation3 + $0x1e0] sm:$0xf]  ;;  %v12091_v17 = vor.u32 %v14435_v54, %v12088_v24 }
 0x405   : > { %v4975_v21 = vpop.f32.mrf.mxu0 }
 0x406   : > { %v16536_v3 = vadd.f32 %v5062_v51, %v4621_v36  ;;  %v14397_v51 = vld [vmem:[#allocation2 + $0x1f4] sm:$0xf0] }
 0x408   : > { %5014 = vmatmul.bf16.gmra.mxu0 %v12079_v31  ;;  %12149 = vmatmul.msk.bf16.gmra.mxu2 %vm1458_vm3, %v12083_v42  ;;  %v11896_v31 = vld [vmem:[#allocation2 + $0x1f0] sm:$0xf]  ;;  %v11898_v42 = vld [vmem:[#allocation2 + $0x1f8] sm:$0xf0] }
 0x409   : > { %v4559_v40 = vpop.f32.mrf.mxu3  ;;  %v4473_v63 = vpop.f32.mrf.mxu1  ;;  %v11897_v10 = vor.u32 %v14397_v51, %v11896_v31  ;;  %v14448_v51 = vld [vmem:[#allocation4 + $0x104] sm:$0xf] }
 0x40a   : > { %v4560_v38 = vadd.f32 %v4559_v40, %v4470_v22  ;;  %v12087_v22 = vor.u32 %v14436_v50, %v12086_v34  ;;  %v14437_v50 = vld [vmem:[#allocation3 + $0x1f4] sm:$0xf] }
 0x40b   : > { %v5064_v28 = vpop.f32.mrf.mxu2 }
 0x40c   : > { %v4623_v26 = vadd.f32 %v4560_v38, %v16273_v53  ;;  %4512 = vmatmul.bf16.gmra.mxu1 %v11889_v8  ;;  %v5065_v15 = vadd.f32 %v5064_v28, %v4975_v21  ;;  %v14529_v38 = vld [vmem:[%s17884_s6 + $0x40] sm:$0xff] }
 0x40d   : > { %v4977_v30 = vpop.f32.mrf.mxu0  ;;  %6624 = vmatpush.bf16.msrb.mxu3 %v14529_v38  ;;  %v14531_v38 = vld [vmem:[#allocation3 + $0x104] sm:$0xf0] }
 0x40e   : > { %11952 = vmatmul.msk.bf16.gmra.mxu3 %vm1458_vm3, %v11893_v29  ;;  %v16541_v36 = vadd.f32 %v5065_v15, %v4622_v12  ;;  %v14396_v12 = vld [vmem:[#allocation2 + $0x1f4] sm:$0xf]  ;;  %v14438_v15 = vld [vmem:[#allocation3 + $0x1f4] sm:$0xf0] }
 0x40f   : > { %v11901_v4 = vor.u32 %v14396_v12, %v11898_v42  ;;  %v14611_v29 = vld [vmem:[%s17884_s6 + $0xd0] sm:$0xff]  ;;  %v12174_v12 = vld [vmem:[#allocation4 + $0x108] sm:$0xf0] }
 0x410   : > { %7098 = vmatpush.bf16.msrb.mxu2 %v14611_v29 }
 0x411   : > { %v4562_v6 = vpop.f32.mrf.mxu3  ;;  %v4475_v52 = vpop.f32.mrf.mxu1 }
 0x412   : > { %v4563_v45 = vadd.f32 %v4562_v6, %v4473_v63  ;;  %v12096_v6 = vld [vmem:[#allocation3 + $0x1f8] sm:$0xf0] }
 0x413   : > { %v5066_v5 = vpop.f32.mrf.mxu2 }
 0x414   : > { %v4624_v1 = vadd.f32 %v4563_v45, %v16284_v7  ;;  %v5067_v56 = vadd.f32 %v5066_v5, %v4977_v30 }
 0x415   : > { %v4980_v53 = vpop.f32.mrf.mxu0 }
 0x416   : > { %v16544_v21 = vadd.f32 %v5067_v56, %v4623_v26  ;;  %v12094_v26 = vld [vmem:[#allocation3 + $0x1f0] sm:$0xf]  ;;  %v14610_v56 = vld [vmem:[%s17884_s6 + $0xc8] sm:$0xff] }
 0x417   : > { %v12095_v24 = vor.u32 %v14438_v15, %v12094_v26  ;;  %7002 = vmatpush.bf16.msrb.mxu0 %v14610_v56  ;;  %v14530_v26 = vld [vmem:[#allocation3 + $0x104] sm:$0xf]  ;;  %v12372_v15 = vld [vmem:[#allocation3 + $0x108] sm:$0xf0] }
 0x418   : > { %5019 = vmatmul.bf16.gmra.mxu0 %v12087_v22  ;;  %12150 = vmatmul.msk.bf16.gmra.mxu2 %vm1458_vm3, %v12091_v17  ;;  %v14449_v17 = vld [vmem:[#allocation4 + $0x104] sm:$0xf0] }
 0x419   : > { %v4564_v2 = vpop.f32.mrf.mxu3  ;;  %v4478_v23 = vpop.f32.mrf.mxu1 }
 0x41a   : > { %v4565_v46 = vadd.f32 %v4564_v2, %v4475_v52 }
 0x41b   : > { %v5069_v8 = vpop.f32.mrf.mxu2 }
 0x41c   : > { %v4625_v7 = vadd.f32 %v4565_v46, %v16293_v20  ;;  %4517 = vmatmul.bf16.gmra.mxu1 %v11897_v10  ;;  %v5070_v40 = vadd.f32 %v5069_v8, %v4980_v53  ;;  %v14528_v20 = vld [vmem:[%s17884_s6 + $0x38] sm:$0xff]  ;;  %v12172_v53 = vld [vmem:[#allocation4 + $0x100] sm:$0xf] }
 0x41d   : > { %v4982_v63 = vpop.f32.mrf.mxu0  ;;  %6528 = vmatpush.bf16.msrb.mxu1 %v14528_v20  ;;  %v12173_v42 = vor.u32 %v14449_v17, %v12172_v53 }
 0x41e   : > { %11953 = vmatmul.msk.bf16.gmra.mxu3 %vm1458_vm3, %v11901_v4  ;;  %v16555_v28 = vadd.f32 %v5070_v40, %v4624_v1  ;;  %v12099_v1 = vor.u32 %v14437_v50, %v12096_v6 }
 0x421   : > { %v4567_v30 = vpop.f32.mrf.mxu3  ;;  %v4480_v34 = vpop.f32.mrf.mxu1 }
 0x422   : > { %v4568_v52 = vadd.f32 %v4567_v30, %v4478_v23  ;;  %v12177_v23 = vor.u32 %v14448_v51, %v12174_v12 }
 0x423   : > { %v5071_v54 = vpop.f32.mrf.mxu2 }
 0x424   : > { %v4626_v45 = vadd.f32 %v4568_v52, %v16297_v61  ;;  %v5072_v5 = vadd.f32 %v5071_v54, %v4982_v63  ;;  %v12375_v54 = vor.u32 %v14530_v26, %v12372_v15 }
 0x425   : > { %v4985_v22 = vpop.f32.mrf.mxu0 }
 0x426   : > { %v16564_v31 = vadd.f32 %v5072_v5, %v4625_v7  ;;  %v12370_v7 = vld [vmem:[#allocation3 + $0x100] sm:$0xf]  ;;  %v14451_v5 = vld [vmem:[#allocation4 + $0x114] sm:$0xf0] }
 0x428   : > { %5024 = vmatmul.bf16.gmra.mxu0 %v12095_v24  ;;  %12151 = vmatmul.msk.bf16.gmra.mxu2 %vm1458_vm3, %v12099_v1  ;;  %v12180_v24 = vld [vmem:[#allocation4 + $0x110] sm:$0xf]  ;;  %v12182_v1 = vld [vmem:[#allocation4 + $0x118] sm:$0xf0] }
 0x429   : > { %v4569_v10 = vpop.f32.mrf.mxu3  ;;  %v4483_v61 = vpop.f32.mrf.mxu1  ;;  %v12181_v56 = vor.u32 %v14451_v5, %v12180_v24  ;;  %v12190_v24 = vld [vmem:[#allocation4 + $0x128] sm:$0xf0] }
 0x42a   : > { %v4570_v2 = vadd.f32 %v4569_v10, %v4480_v34  ;;  %v12371_v34 = vor.u32 %v14531_v38, %v12370_v7  ;;  %v14532_v7 = vld [vmem:[#allocation3 + $0x114] sm:$0xf]  ;;  %v12380_v38 = vld [vmem:[#allocation3 + $0x118] sm:$0xf0] }
 0x42b   : > { %v5074_v46 = vpop.f32.mrf.mxu2 }
 0x42c   : > { %v4627_v4 = vadd.f32 %v4570_v2, %v16301_v39  ;;  %v5075_v8 = vadd.f32 %v5074_v46, %v4985_v22  ;;  %5456 = vmatmul.bf16.vlgmr.msra.gmra.mxu1 %v12173_v42  ;;  %v14450_v22 = vld [vmem:[#allocation4 + $0x114] sm:$0xf]  ;;  %v12378_v46 = vld [vmem:[#allocation3 + $0x110] sm:$0xf] }
 0x42d   : > { %v4987_v40 = vpop.f32.mrf.mxu0  ;;  %v12185_v12 = vor.u32 %v14450_v22, %v12182_v1 }
 0x42e   : > { %v16568_v63 = vadd.f32 %v5075_v8, %v4626_v45  ;;  %12334 = vmatmul.msk.bf16.vlgmr.msra.gmra.mxu3 %vm1458_vm3, %v12177_v23  ;;  %v14527_v23 = vld [vmem:[%s17884_s6 + $0x30] sm:$0xff] }
 0x42f   : > { %6529 = vmatpush.bf16.msrb.mxu1 %v14527_v23 }
 0x431   : > { %v4572_v29 = vpop.f32.mrf.mxu3  ;;  %v4485_v20 = vpop.f32.mrf.mxu1 }
 0x432   : > { %v4573_v30 = vadd.f32 %v4572_v29, %v4483_v61 }
 0x433   : > { %v5076_v50 = vpop.f32.mrf.mxu2 }
 0x434   : > { %v4628_v6 = vadd.f32 %v4573_v30, %v16305_v59  ;;  %v5077_v52 = vadd.f32 %v5076_v50, %v4987_v40  ;;  %v12383_v50 = vor.u32 %v14532_v7, %v12380_v38 }
 0x435   : > { %v4990_v39 = vpop.f32.mrf.mxu0 }
 0x436   : > { %v16572_v45 = vadd.f32 %v5077_v52, %v4627_v4  ;;  %v14533_v4 = vld [vmem:[#allocation3 + $0x114] sm:$0xf0]  ;;  %v14453_v52 = vld [vmem:[#allocation4 + $0x124] sm:$0xf0] }
 0x438   : > { %6112 = vmatmul.bf16.vlgmr.msra.gmra.mxu0 %v12371_v34  ;;  %12532 = vmatmul.msk.bf16.vlgmr.msra.gmra.mxu2 %vm1458_vm3, %v12375_v54  ;;  %v14609_v34 = vld [vmem:[%s17884_s6 + $0xc0] sm:$0xff] }
 0x439   : > { %v4574_v53 = vpop.f32.mrf.mxu3  ;;  %v4488_v17 = vpop.f32.mrf.mxu1  ;;  %7003 = vmatpush.bf16.msrb.mxu0 %v14609_v34  ;;  %v14452_v54 = vld [vmem:[#allocation4 + $0x124] sm:$0xf] }
 0x43a   : > { %v4575_v51 = vadd.f32 %v4574_v53, %v4485_v20  ;;  %v12379_v20 = vor.u32 %v14533_v4, %v12378_v46  ;;  %v14534_v46 = vld [vmem:[#allocation3 + $0x124] sm:$0xf]  ;;  %v12388_v4 = vld [vmem:[#allocation3 + $0x128] sm:$0xf0] }
 0x43b   : > { %v5079_v42 = vpop.f32.mrf.mxu2 }
 0x43c   : > { %v4629_v59 = vadd.f32 %v4575_v51, %v16315_v11  ;;  %v5080_v10 = vadd.f32 %v5079_v42, %v4990_v39  ;;  %5461 = vmatmul.bf16.gmra.mxu1 %v12181_v56  ;;  %v12193_v56 = vor.u32 %v14452_v54, %v12190_v24 }
 0x43d   : > { %v4992_v61 = vpop.f32.mrf.mxu0 }
 0x43e   : > { %v16576_v2 = vadd.f32 %v5080_v10, %v4628_v6  ;;  %12335 = vmatmul.msk.bf16.gmra.mxu3 %vm1458_vm3, %v12185_v12  ;;  %v12188_v6 = vld [vmem:[#allocation4 + $0x120] sm:$0xf]  ;;  %v14535_v10 = vld [vmem:[#allocation3 + $0x124] sm:$0xf0] }
 0x43f   : > { %v12189_v5 = vor.u32 %v14453_v52, %v12188_v6 }
 0x441   : > { %v4577_v8 = vpop.f32.mrf.mxu3  ;;  %v4490_v40 = vpop.f32.mrf.mxu1 }
 0x442   : > { %v4578_v29 = vadd.f32 %v4577_v8, %v4488_v17 }
 0x443   : > { %v5081_v11 = vpop.f32.mrf.mxu2 }
 0x444   : > { %v4630_v26 = vadd.f32 %v4578_v29, %v16319_v19  ;;  %v5082_v15 = vadd.f32 %v5081_v11, %v4992_v61  ;;  %v12391_v11 = vor.u32 %v14534_v46, %v12388_v4 }
 0x445   : > { %v4995_v30 = vpop.f32.mrf.mxu0 }
 0x446   : > { %v16586_v39 = vadd.f32 %v5082_v15, %v4629_v59  ;;  %v12386_v59 = vld [vmem:[#allocation3 + $0x120] sm:$0xf]  ;;  %v14455_v15 = vld [vmem:[#allocation4 + $0x134] sm:$0xf0] }
 0x448   : > { %6117 = vmatmul.bf16.gmra.mxu0 %v12379_v20  ;;  %12533 = vmatmul.msk.bf16.gmra.mxu2 %vm1458_vm3, %v12383_v50  ;;  %v12196_v20 = vld [vmem:[#allocation4 + $0x130] sm:$0xf]  ;;  %v12198_v50 = vld [vmem:[#allocation4 + $0x138] sm:$0xf0] }
 0x449   : > { %v4579_v22 = vpop.f32.mrf.mxu3  ;;  %v4493_v19 = vpop.f32.mrf.mxu1  ;;  %v12197_v34 = vor.u32 %v14455_v15, %v12196_v20  ;;  %v12206_v20 = vld [vmem:[#allocation4 + $0x148] sm:$0xf0] }
 0x44a   : > { %v4580_v1 = vadd.f32 %v4579_v22, %v4490_v40  ;;  %v12387_v40 = vor.u32 %v14535_v10, %v12386_v59  ;;  %v14536_v59 = vld [vmem:[#allocation3 + $0x134] sm:$0xf]  ;;  %v12396_v10 = vld [vmem:[#allocation3 + $0x138] sm:$0xf0] }
 0x44b   : > { %v5084_v53 = vpop.f32.mrf.mxu2 }
 0x44c   : > { %v4631_v17 = vadd.f32 %v4580_v1, %v16323_v13  ;;  %v5085_v51 = vadd.f32 %v5084_v53, %v4995_v30  ;;  %5466 = vmatmul.bf16.gmra.mxu1 %v12189_v5  ;;  %v14454_v30 = vld [vmem:[#allocation4 + $0x134] sm:$0xf]  ;;  %v12394_v53 = vld [vmem:[#allocation3 + $0x130] sm:$0xf] }
 0x44d   : > { %v4997_v12 = vpop.f32.mrf.mxu0  ;;  %v12201_v24 = vor.u32 %v14454_v30, %v12198_v50 }
 0x44e   : > { %v16590_v42 = vadd.f32 %v5085_v51, %v4630_v26  ;;  %12336 = vmatmul.msk.bf16.gmra.mxu3 %vm1458_vm3, %v12193_v56  ;;  %v14526_v56 = vld [vmem:[%s17884_s6 + $0x28] sm:$0xff] }
 0x44f   : > { %6530 = vmatpush.bf16.msrb.mxu1 %v14526_v56 }
 0x451   : > { %v4582_v61 = vpop.f32.mrf.mxu3  ;;  %v4495_v23 = vpop.f32.mrf.mxu1 }
 0x452   : > { %v4583_v8 = vadd.f32 %v4582_v61, %v4493_v19 }
 0x453   : > { %v5086_v7 = vpop.f32.mrf.mxu2 }
 0x454   : > { %v4632_v38 = vadd.f32 %v4583_v8, %v16327_v47  ;;  %v5087_v29 = vadd.f32 %v5086_v7, %v4997_v12  ;;  %v12399_v7 = vor.u32 %v14536_v59, %v12396_v10 }
 0x455   : > { %v5000_v13 = vpop.f32.mrf.mxu0 }
 0x456   : > { %v16594_v26 = vadd.f32 %v5087_v29, %v4631_v17  ;;  %v14537_v17 = vld [vmem:[#allocation3 + $0x134] sm:$0xf0]  ;;  %v14457_v29 = vld [vmem:[#allocation4 + $0x144] sm:$0xf0] }
 0x458   : > { %6122 = vmatmul.bf16.gmra.mxu0 %v12387_v40  ;;  %12534 = vmatmul.msk.bf16.gmra.mxu2 %vm1458_vm3, %v12391_v11  ;;  %v14608_v40 = vld [vmem:[%s17884_s6 + $0xb8] sm:$0xff]  ;;  %v14456_v11 = vld [vmem:[#allocation4 + $0x144] sm:$0xf] }
 0x459   : > { %v4584_v6 = vpop.f32.mrf.mxu3  ;;  %v4498_v52 = vpop.f32.mrf.mxu1  ;;  %7004 = vmatpush.bf16.msrb.mxu0 %v14608_v40 }
 0x45a   : > { %v4585_v54 = vadd.f32 %v4584_v6, %v4495_v23  ;;  %v12395_v23 = vor.u32 %v14537_v17, %v12394_v53  ;;  %v14538_v53 = vld [vmem:[#allocation3 + $0x144] sm:$0xf]  ;;  %v12404_v17 = vld [vmem:[#allocation3 + $0x148] sm:$0xf0] }
 0x45b   : > { %v5089_v5 = vpop.f32.mrf.mxu2 }
 0x45c   : > { %v4633_v47 = vadd.f32 %v4585_v54, %v16337_v58  ;;  %v5090_v22 = vadd.f32 %v5089_v5, %v5000_v13  ;;  %5471 = vmatmul.bf16.gmra.mxu1 %v12197_v34  ;;  %v12209_v34 = vor.u32 %v14456_v11, %v12206_v20 }
 0x45d   : > { %v5002_v19 = vpop.f32.mrf.mxu0 }
 0x45e   : > { %v16598_v1 = vadd.f32 %v5090_v22, %v4632_v38  ;;  %12337 = vmatmul.msk.bf16.gmra.mxu3 %vm1458_vm3, %v12201_v24  ;;  %v12204_v38 = vld [vmem:[#allocation4 + $0x140] sm:$0xf]  ;;  %v14539_v22 = vld [vmem:[#allocation3 + $0x144] sm:$0xf0] }
 0x45f   : > { %v12205_v15 = vor.u32 %v14457_v29, %v12204_v38 }
 0x461   : > { %v4587_v51 = vpop.f32.mrf.mxu3  ;;  %v4500_v12 = vpop.f32.mrf.mxu1 }
 0x462   : > { %v4588_v61 = vadd.f32 %v4587_v51, %v4498_v52 }
 0x463   : > { %v5091_v58 = vpop.f32.mrf.mxu2 }
 0x464   : > { %v4634_v46 = vadd.f32 %v4588_v61, %v16342_v49  ;;  %v5092_v4 = vadd.f32 %v5091_v58, %v5002_v19  ;;  %v12407_v58 = vor.u32 %v14538_v53, %v12404_v17  ;;  %v1063_v53 = vld [vmem:[%s16360_s24 + $0x20] sm:$0xff]  ;;  %v1064_v17 = vld [vmem:[%s16360_s24 + $0x28] sm:$0xff] }
 0x465   : > { %v5005_v8 = vpop.f32.mrf.mxu0  ;;  %1079 = vst.msk [vmem:[#allocation4 + $0x180] sm:$0xff] %vm15383_vm2, %v1063_v53 }
 0x466   : > { %v16608_v13 = vadd.f32 %v5092_v4, %v4633_v47  ;;  %v12402_v47 = vld [vmem:[#allocation3 + $0x140] sm:$0xf]  ;;  %v14459_v4 = vld [vmem:[#allocation4 + $0x154] sm:$0xf0]  ;;  %1080 = vst.msk [vmem:[#allocation4 + $0x188] sm:$0xff] %vm15383_vm2, %v1064_v17 }
 0x468   : > { %6127 = vmatmul.bf16.gmra.mxu0 %v12395_v23  ;;  %12535 = vmatmul.msk.bf16.gmra.mxu2 %vm1458_vm3, %v12399_v7  ;;  %v12212_v23 = vld [vmem:[#allocation4 + $0x150] sm:$0xf]  ;;  %v12214_v7 = vld [vmem:[#allocation4 + $0x158] sm:$0xf0] }
 0x469   : > { %v4589_v30 = vpop.f32.mrf.mxu3  ;;  %v4503_v49 = vpop.f32.mrf.mxu1  ;;  %v12213_v40 = vor.u32 %v14459_v4, %v12212_v23  ;;  %v12222_v4 = vld [vmem:[#allocation4 + $0x168] sm:$0xf0] }
 0x46a   : > { %v4590_v50 = vadd.f32 %v4589_v30, %v4500_v12  ;;  %v12403_v12 = vor.u32 %v14539_v22, %v12402_v47  ;;  %v14540_v47 = vld [vmem:[#allocation3 + $0x154] sm:$0xf] }
 0x46b   : > { %v5094_v6 = vpop.f32.mrf.mxu2 }
 0x46c   : > { %v4635_v52 = vadd.f32 %v4590_v50, %v16346_v57  ;;  %v5095_v54 = vadd.f32 %v5094_v6, %v5005_v8  ;;  %5476 = vmatmul.bf16.gmra.mxu1 %v12205_v15  ;;  %v14458_v8 = vld [vmem:[#allocation4 + $0x154] sm:$0xf]  ;;  %v12410_v6 = vld [vmem:[#allocation3 + $0x150] sm:$0xf] }
 0x46d   : > { %v5007_v24 = vpop.f32.mrf.mxu0  ;;  %v12217_v20 = vor.u32 %v14458_v8, %v12214_v7 }
 0x46e   : > { %v16612_v5 = vadd.f32 %v5095_v54, %v4634_v46  ;;  %12338 = vmatmul.msk.bf16.gmra.mxu3 %vm1458_vm3, %v12209_v34  ;;  %v14525_v34 = vld [vmem:[%s17884_s6 + $0x20] sm:$0xff] }
 0x46f   : > { %6531 = vmatpush.bf16.msrb.mxu1 %v14525_v34  ;;  %v14543_v34 = vld [vmem:[#allocation3 + $0x164] sm:$0xf0] }
 0x471   : > { %v4592_v19 = vpop.f32.mrf.mxu3  ;;  %v4505_v56 = vpop.f32.mrf.mxu1 }
 0x472   : > { %v4593_v51 = vadd.f32 %v4592_v19, %v4503_v49 }
 0x473   : > { %v5096_v59 = vpop.f32.mrf.mxu2 }
 0x474   : > { %v4636_v10 = vadd.f32 %v4593_v51, %v16351_v27  ;;  %v5097_v61 = vadd.f32 %v5096_v59, %v5007_v24 }
 0x475   : > { %v5010_v57 = vpop.f32.mrf.mxu0 }
 0x476   : > { %v16616_v46 = vadd.f32 %v5097_v61, %v4635_v52  ;;  %v14541_v52 = vld [vmem:[#allocation3 + $0x154] sm:$0xf0]  ;;  %v14607_v61 = vld [vmem:[%s17884_s6 + $0xb0] sm:$0xff] }
 0x477   : > { %7005 = vmatpush.bf16.msrb.mxu0 %v14607_v61  ;;  %v14462_v61 = vld [vmem:[#allocation4 + $0x174] sm:$0xf] }
 0x478   : > { %6132 = vmatmul.bf16.gmra.mxu0 %v12403_v12  ;;  %12536 = vmatmul.msk.bf16.gmra.mxu2 %vm1458_vm3, %v12407_v58  ;;  %v14461_v58 = vld [vmem:[#allocation4 + $0x164] sm:$0xf0] }
 0x479   : > { %v4594_v38 = vpop.f32.mrf.mxu3  ;;  %v4508_v29 = vpop.f32.mrf.mxu1 }
 0x47a   : > { %v4595_v11 = vadd.f32 %v4594_v38, %v4505_v56  ;;  %v12411_v56 = vor.u32 %v14541_v52, %v12410_v6 }
 0x47b   : > { %v5099_v15 = vpop.f32.mrf.mxu2 }
 0x47c   : > { %v4637_v27 = vadd.f32 %v4595_v11, %v16372_v48  ;;  %v5100_v30 = vadd.f32 %v5099_v15, %v5010_v57  ;;  %5481 = vmatmul.bf16.gmra.mxu1 %v12213_v40  ;;  %v12412_v48 = vld [vmem:[#allocation3 + $0x158] sm:$0xf0]  ;;  %v12220_v57 = vld [vmem:[#allocation4 + $0x160] sm:$0xf] }
 0x47d   : > { %v5012_v49 = vpop.f32.mrf.mxu0  ;;  %v12221_v8 = vor.u32 %v14461_v58, %v12220_v57  ;;  %v12230_v57 = vld [vmem:[#allocation4 + $0x178] sm:$0xf0] }
 0x47e   : > { %v16620_v50 = vadd.f32 %v5100_v30, %v4636_v10  ;;  %12339 = vmatmul.msk.bf16.gmra.mxu3 %vm1458_vm3, %v12217_v20  ;;  %v12415_v10 = vor.u32 %v14540_v47, %v12412_v48  ;;  %v12420_v47 = vld [vmem:[#allocation3 + $0x168] sm:$0xf0] }
 0x481   : > { %v4597_v54 = vpop.f32.mrf.mxu3  ;;  %v4510_v24 = vpop.f32.mrf.mxu1 }
 0x482   : > { %v4598_v22 = vadd.f32 %v4597_v54, %v4508_v29  ;;  %v14542_v54 = vld [vmem:[#allocation3 + $0x164] sm:$0xf] }
 0x483   : > { %v5101_v19 = vpop.f32.mrf.mxu2 }
 0x484   : > { %v4638_v51 = vadd.f32 %v4598_v22, %v16376_v14  ;;  %v5102_v59 = vadd.f32 %v5101_v19, %v5012_v49  ;;  %v14460_v14 = vld [vmem:[#allocation4 + $0x164] sm:$0xf]  ;;  %v12418_v49 = vld [vmem:[#allocation3 + $0x160] sm:$0xf]  ;;  %v1065_v19 = vld [vmem:[%s16360_s24 + $0x30] sm:$0xff] }
 0x485   : > { %v5015_v12 = vpop.f32.mrf.mxu0  ;;  %v12225_v29 = vor.u32 %v14460_v14, %v12222_v4  ;;  %v12419_v22 = vor.u32 %v14543_v34, %v12418_v49  ;;  %1081 = vst.msk [vmem:[#allocation4 + $0x190] sm:$0xff] %vm15383_vm2, %v1065_v19  ;;  %v14544_v34 = vld [vmem:[#allocation3 + $0x174] sm:$0xf] }
 0x486   : > { %v16636_v23 = vadd.f32 %v5102_v59, %v4637_v27  ;;  %v12423_v59 = vor.u32 %v14542_v54, %v12420_v47 }
 0x488   : > { %6137 = vmatmul.bf16.gmra.mxu0 %v12411_v56  ;;  %12537 = vmatmul.msk.bf16.gmra.mxu2 %vm1458_vm3, %v12415_v10  ;;  %v1066_v56 = vld [vmem:[%s16360_s24 + $0x38] sm:$0xff] }
 0x489   : > { %v4599_v7 = vpop.f32.mrf.mxu3  ;;  %v4513_v40 = vpop.f32.mrf.mxu1  ;;  %1082 = vst.msk [vmem:[#allocation4 + $0x198] sm:$0xff] %vm15383_vm2, %v1066_v56 }
 0x48a   : > { %v4600_v38 = vadd.f32 %v4599_v7, %v4510_v24 }
 0x48b   : > { %v5104_v11 = vpop.f32.mrf.mxu2 }
 0x48c   : > { %v4639_v20 = vadd.f32 %v4600_v38, %v16390_v41  ;;  %v5105_v15 = vadd.f32 %v5104_v11, %v5015_v12  ;;  %5486 = vmatmul.bf16.gmra.mxu1 %v12221_v8  ;;  %v14463_v12 = vld [vmem:[#allocation4 + $0x174] sm:$0xf0]  ;;  %v12233_v8 = vor.u32 %v14462_v61, %v12230_v57 }
 0x48d   : > { %v5017_v27 = vpop.f32.mrf.mxu0 }
 0x48e   : > { %v16640_v30 = vadd.f32 %v5105_v15, %v4638_v51  ;;  %12340 = vmatmul.msk.bf16.gmra.mxu3 %vm1458_vm3, %v12225_v29  ;;  %v12228_v51 = vld [vmem:[#allocation4 + $0x170] sm:$0xf]  ;;  %v14545_v15 = vld [vmem:[#allocation3 + $0x174] sm:$0xf0] }
 0x48f   : > { %v12229_v58 = vor.u32 %v14463_v12, %v12228_v51  ;;  %v14606_v51 = vld [vmem:[%s17884_s6 + $0xa8] sm:$0xff] }
 0x490   : > { %v12238_v12 = vld [vmem:[#allocation4 + $0x188] sm:$0xf0]  ;;  %7006 = vmatpush.bf16.msrb.mxu0 %v14606_v51 }
 0x491   : > { %v4602_v6 = vpop.f32.mrf.mxu3  ;;  %v4515_v52 = vpop.f32.mrf.mxu1 }
 0x492   : > { %v4603_v24 = vadd.f32 %v4602_v6, %v4513_v40  ;;  %v12428_v6 = vld [vmem:[#allocation3 + $0x178] sm:$0xf0] }
 0x493   : > { %v5106_v48 = vpop.f32.mrf.mxu2 }
 0x494   : > { %v4640_v41 = vadd.f32 %v4603_v24, %v16394_v55  ;;  %v5107_v53 = vadd.f32 %v5106_v48, %v5017_v27  ;;  %v1067_v24 = vld [vmem:[%s16360_s24 + $0x40] sm:$0xff]  ;;  %v1068_v48 = vld [vmem:[%s16360_s24 + $0x48] sm:$0xff] }
 0x495   : > { %v5020_v17 = vpop.f32.mrf.mxu0  ;;  %1083 = vst.msk [vmem:[#allocation4 + $0x1a0] sm:$0xff] %vm15383_vm2, %v1067_v24 }
 0x496   : > { %v16650_v10 = vadd.f32 %v5107_v53, %v4639_v20  ;;  %v12426_v20 = vld [vmem:[#allocation3 + $0x170] sm:$0xf]  ;;  %v12236_v53 = vld [vmem:[#allocation4 + $0x180] sm:$0xf]  ;;  %1084 = vst.msk [vmem:[#allocation4 + $0x1a8] sm:$0xff] %vm15383_vm2, %v1068_v48 }
 0x497   : > { %v12427_v47 = vor.u32 %v14545_v15, %v12426_v20  ;;  %v14547_v20 = vld [vmem:[#allocation3 + $0x184] sm:$0xf0]  ;;  %v12244_v48 = vld [vmem:[#allocation4 + $0x190] sm:$0xf] }
 0x498   : > { %6142 = vmatmul.bf16.gmra.mxu0 %v12419_v22  ;;  %12538 = vmatmul.msk.bf16.gmra.mxu2 %vm1458_vm3, %v12423_v59 }
 0x499   : > { %v4604_v55 = vpop.f32.mrf.mxu3  ;;  %v4518_v14 = vpop.f32.mrf.mxu1 }
 0x49a   : > { %v4605_v4 = vadd.f32 %v4604_v55, %v4515_v52 }
 0x49b   : > { %v5109_v7 = vpop.f32.mrf.mxu2 }
 0x49c   : > { %v4641_v40 = vadd.f32 %v4605_v4, %v16414_v43  ;;  %v5110_v38 = vadd.f32 %v5109_v7, %v5020_v17  ;;  %5491 = vmatmul.bf16.gmra.mxu1 %v12229_v58  ;;  %v14524_v43 = vld [vmem:[%s17884_s6 + $0x18] sm:$0xff]  ;;  %v14465_v17 = vld [vmem:[#allocation4 + $0x184] sm:$0xf0] }
 0x49d   : > { %v5022_v29 = vpop.f32.mrf.mxu0  ;;  %6532 = vmatpush.bf16.msrb.mxu1 %v14524_v43  ;;  %v12237_v61 = vor.u32 %v14465_v17, %v12236_v53  ;;  %v1069_v43 = vld [vmem:[%s16360_s24 + $0x50] sm:$0xff]  ;;  %v12246_v53 = vld [vmem:[#allocation4 + $0x198] sm:$0xf0] }
 0x49e   : > { %v16654_v11 = vadd.f32 %v5110_v38, %v4640_v41  ;;  %12341 = vmatmul.msk.bf16.gmra.mxu3 %vm1458_vm3, %v12233_v8  ;;  %v12431_v41 = vor.u32 %v14544_v34, %v12428_v6  ;;  %v14546_v34 = vld [vmem:[#allocation3 + $0x184] sm:$0xf]  ;;  %v12436_v6 = vld [vmem:[#allocation3 + $0x188] sm:$0xf0]  ;;  %1085 = vst.msk [vmem:[#allocation4 + $0x1b0] sm:$0xff] %vm15383_vm2, %v1069_v43 }
 0x49f   : > { %v12439_v24 = vor.u32 %v14546_v34, %v12436_v6  ;;  %v14548_v34 = vld [vmem:[#allocation3 + $0x194] sm:$0xf]  ;;  %v12444_v6 = vld [vmem:[#allocation3 + $0x198] sm:$0xf0]  ;;  %v1071_v43 = vld [vmem:[%s16360_s24 + $0x60] sm:$0xff] }
 0x4a0   : > { %1087 = vst.msk [vmem:[#allocation4 + $0x1c0] sm:$0xff] %vm15383_vm2, %v1071_v43  ;;  %v1074_v43 = vld [vmem:[%s16360_s24 + $0x78] sm:$0xff] }
 0x4a1   : > { %v4607_v27 = vpop.f32.mrf.mxu3  ;;  %v4520_v49 = vpop.f32.mrf.mxu1  ;;  %1090 = vst.msk [vmem:[#allocation4 + $0x1d8] sm:$0xff] %vm15383_vm2, %v1074_v43 }
 0x4a2   : > { %v4608_v52 = vadd.f32 %v4607_v27, %v4518_v14 }
 0x4a3   : > { %v5111_v54 = vpop.f32.mrf.mxu2 }
 0x4a4   : > { %v4642_v22 = vadd.f32 %v4608_v52, %v16418_v18  ;;  %v5112_v19 = vadd.f32 %v5111_v54, %v5022_v29  ;;  %v14464_v18 = vld [vmem:[#allocation4 + $0x184] sm:$0xf]  ;;  %v12434_v29 = vld [vmem:[#allocation3 + $0x180] sm:$0xf]  ;;  %v1070_v54 = vld [vmem:[%s16360_s24 + $0x58] sm:$0xff] }
 0x4a5   : > { %v5025_v56 = vpop.f32.mrf.mxu0  ;;  %v12241_v14 = vor.u32 %v14464_v18, %v12238_v12  ;;  %v12435_v52 = vor.u32 %v14547_v20, %v12434_v29  ;;  %1086 = vst.msk [vmem:[#allocation4 + $0x1b8] sm:$0xff] %vm15383_vm2, %v1070_v54  ;;  %v12442_v29 = vld [vmem:[#allocation3 + $0x190] sm:$0xf]  ;;  %v14549_v20 = vld [vmem:[#allocation3 + $0x194] sm:$0xf0]  ;;  %v1072_v54 = vld [vmem:[%s16360_s24 + $0x68] sm:$0xff] }
 0x4a6   : > { %v16667_v59 = vadd.f32 %v5112_v19, %v4641_v40  ;;  %1088 = vst.msk [vmem:[#allocation4 + $0x1c8] sm:$0xff] %vm15383_vm2, %v1072_v54 }
 0x4a8   : > { %6147 = vmatmul.bf16.gmra.mxu0 %v12427_v47  ;;  %12539 = vmatmul.msk.bf16.gmra.mxu2 %vm1458_vm3, %v12431_v41  ;;  %v14466_v41 = vld [vmem:[#allocation4 + $0x194] sm:$0xf] }
 0x4a9   : > { %v4609_v57 = vpop.f32.mrf.mxu3  ;;  %v5457_v58 = vpop.f32.mrf.mxu1 }
 0x4aa   : > { %v4610_v55 = vadd.f32 %v4609_v57, %v4520_v49 }
 0x4ab   : > { %v5114_v4 = vpop.f32.mrf.mxu2 }
 0x4ac   : > { %v4643_v8 = vadd.f32 %v4610_v55, %v16432_v60  ;;  %v5115_v7 = vadd.f32 %v5114_v4, %v5025_v56  ;;  %5496 = vmatmul.bf16.gmra.mxu1 %v12237_v61  ;;  %v16691_v61 = vld [vmem:[%s17885_s7] ss:$0 sm:$0xff] }
 0x4ad   : > { %v5027_v40 = vpop.f32.mrf.mxu0 }
 0x4ae   : > { %v16674_v38 = vadd.f32 %v5115_v7, %v4642_v22  ;;  %12342 = vmatmul.msk.bf16.gmra.mxu3 %vm1458_vm3, %v12241_v14  ;;  %v14467_v22 = vld [vmem:[#allocation4 + $0x194] sm:$0xf0] }
 0x4af   : > { %v12245_v17 = vor.u32 %v14467_v22, %v12244_v48  ;;  %v12252_v48 = vld [vmem:[#allocation4 + $0x1a0] sm:$0xf]  ;;  %v14469_v22 = vld [vmem:[#allocation4 + $0x1a4] sm:$0xf0] }
 0x4b1   : > { %v5546_v15 = vpop.f32.mrf.mxu3  ;;  %v5459_v27 = vpop.f32.mrf.mxu1 }
 0x4b2   : > { %v5547_v19 = vadd.f32 %v5546_v15, %v5457_v58  ;;  %v12249_v58 = vor.u32 %v14466_v41, %v12246_v53  ;;  %v14605_v41 = vld [vmem:[%s17884_s6 + $0xa0] sm:$0xff] }
 0x4b3   : > { %v5116_v49 = vpop.f32.mrf.mxu2  ;;  %v14468_v53 = vld [vmem:[#allocation4 + $0x1a4] sm:$0xf]  ;;  %7007 = vmatpush.bf16.msrb.mxu0 %v14605_v41  ;;  %v14470_v41 = vld [vmem:[#allocation4 + $0x1b4] sm:$0xf] }
 0x4b4   : > { %v5117_v47 = vadd.f32 %v5116_v49, %v5027_v40  ;;  %v5626_v12 = vadd.f32 %v5547_v19, %v16437_v16 }
 0x4b5   : > { %v6113_v60 = vpop.f32.mrf.mxu0 }
 0x4b6   : > { %v16683_v56 = vadd.f32 %v5117_v47, %v4643_v8  ;;  %v5662_v7 = vadd.f32 %v16691_v61, %v5626_v12 }
 0x4b8   : > { %6152 = vmatmul.bf16.gmra.mxu0 %v12435_v52  ;;  %12540 = vmatmul.msk.bf16.gmra.mxu2 %vm1458_vm3, %v12439_v24  ;;  %v12443_v52 = vor.u32 %v14549_v20, %v12442_v29  ;;  %v12447_v24 = vor.u32 %v14548_v34, %v12444_v6  ;;  %v14550_v6 = vld [vmem:[#allocation3 + $0x1a4] sm:$0xf] }
 0x4b9   : > { %v5548_v51 = vpop.f32.mrf.mxu3  ;;  %v5462_v18 = vpop.f32.mrf.mxu1 }
 0x4ba   : > { %v5549_v57 = vadd.f32 %v5548_v51, %v5459_v27  ;;  %v12253_v51 = vor.u32 %v14469_v22, %v12252_v48  ;;  %v12260_v48 = vld [vmem:[#allocation4 + $0x1b0] sm:$0xf]  ;;  %v14471_v22 = vld [vmem:[#allocation4 + $0x1b4] sm:$0xf0] }
 0x4bb   : > { %v6202_v55 = vpop.f32.mrf.mxu2 }
 0x4bc   : > { %v5627_v14 = vadd.f32 %v5549_v57, %v16456_v0  ;;  %5501 = vmatmul.bf16.gmra.mxu1 %v12245_v17  ;;  %v16696_v4 = vadd.f32 %v6202_v55, %v6113_v60  ;;  %v14523_v0 = vld [vmem:[%s17884_s6 + $0x10] sm:$0xff]  ;;  %v12254_v17 = vld [vmem:[#allocation4 + $0x1a8] sm:$0xf0] }
 0x4bd   : > { %v6115_v8 = vpop.f32.mrf.mxu0  ;;  %6533 = vmatpush.bf16.msrb.mxu1 %v14523_v0  ;;  %v12452_v0 = vld [vmem:[#allocation3 + $0x1a8] sm:$0xf0] }
 0x4be   : > { %v5663_v16 = vadd.f32 %v16691_v61, %v5627_v14  ;;  %12343 = vmatmul.msk.bf16.gmra.mxu3 %vm1458_vm3, %v12249_v58  ;;  %v12257_v14 = vor.u32 %v14468_v53, %v12254_v17  ;;  %v12262_v53 = vld [vmem:[#allocation4 + $0x1b8] sm:$0xf0]  ;;  %v12261_v17 = vor.u32 %v14471_v22, %v12260_v48  ;;  %v12268_v48 = vld [vmem:[#allocation4 + $0x1c0] sm:$0xf]  ;;  %v14473_v22 = vld [vmem:[#allocation4 + $0x1c4] sm:$0xf0] }
 0x4c0   : > { %v14861_v40 = vpack.c.bf16 %v5663_v16, %v5662_v7 }
 0x4c1   : > { %v5551_v15 = vpop.f32.mrf.mxu3  ;;  %v5464_v27 = vpop.f32.mrf.mxu1 }
 0x4c2   : > { %14862 = vst [vmem:[%s16701_s20] sm:$0xff] %v14861_v40   ;;  %v5552_v19 = vadd.f32 %v5551_v15, %v5462_v18  ;;  %v14551_v15 = vld [vmem:[#allocation3 + $0x1a4] sm:$0xf0] }
 0x4c3   : > { %v6204_v49 = vpop.f32.mrf.mxu2 }
 0x4c4   : > { %v16709_v47 = vadd.f32 %v6204_v49, %v6115_v8  ;;  %v5628_v58 = vadd.f32 %v5552_v19, %v16461_v62  ;;  %v12450_v62 = vld [vmem:[#allocation3 + $0x1a0] sm:$0xf] }
 0x4c5   : > { %v6118_v60 = vpop.f32.mrf.mxu0  ;;  %v12451_v49 = vor.u32 %v14551_v15, %v12450_v62  ;;  %v14553_v62 = vld [vmem:[#allocation3 + $0x1b4] sm:$0xf0] }
 0x4c6   : > { %v5664_v40 = vadd.f32 %v16691_v61, %v5628_v58 }
 0x4c8   : > { %6157 = vmatmul.bf16.gmra.mxu0 %v12443_v52  ;;  %12541 = vmatmul.msk.bf16.gmra.mxu2 %vm1458_vm3, %v12447_v24  ;;  %v1073_v52 = vld [vmem:[%s16360_s24 + $0x70] sm:$0xff]  ;;  %v12455_v24 = vor.u32 %v14550_v6, %v12452_v0  ;;  %v12460_v6 = vld [vmem:[#allocation3 + $0x1b8] sm:$0xf0] }
 0x4c9   : > { %v5553_v12 = vpop.f32.mrf.mxu3  ;;  %v5467_v57 = vpop.f32.mrf.mxu1  ;;  %1089 = vst.msk [vmem:[#allocation4 + $0x1d0] sm:$0xff] %vm15383_vm2, %v1073_v52  ;;  %v1076_v52 = vld [vmem:[%s16360_s24 + $0x88] sm:$0xff] }
 0x4ca   : > { %v5554_v55 = vadd.f32 %v5553_v12, %v5464_v27  ;;  %1092 = vst.msk [vmem:[#allocation4 + $0x1e8] sm:$0xff] %vm15383_vm2, %v1076_v52 }
 0x4cb   : > { %v6207_v8 = vpop.f32.mrf.mxu2 }
 0x4cc   : > { %v5629_v18 = vadd.f32 %v5554_v55, %v16474_v33  ;;  %5506 = vmatmul.bf16.gmra.mxu1 %v12253_v51  ;;  %v16721_v7 = vadd.f32 %v6207_v8, %v6118_v60 }
 0x4cd   : > { %v6120_v16 = vpop.f32.mrf.mxu0 }
 0x4ce   : > { %v5665_v29 = vadd.f32 %v16691_v61, %v5629_v18  ;;  %12344 = vmatmul.msk.bf16.gmra.mxu3 %vm1458_vm3, %v12257_v14  ;;  %v12265_v14 = vor.u32 %v14470_v41, %v12262_v53  ;;  %v14604_v41 = vld [vmem:[%s17884_s6 + $0x98] sm:$0xff]  ;;  %v14472_v53 = vld [vmem:[#allocation4 + $0x1c4] sm:$0xf] }
 0x4cf   : > { %7008 = vmatpush.bf16.msrb.mxu0 %v14604_v41 }
 0x4d0   : > { %v14866_v20 = vpack.c.bf16 %v5665_v29, %v5664_v40  ;;  %v14474_v41 = vld [vmem:[#allocation4 + $0x1d4] sm:$0xf] }
 0x4d1   : > { %v5556_v27 = vpop.f32.mrf.mxu3  ;;  %v5469_v34 = vpop.f32.mrf.mxu1 }
 0x4d2   : > { %15018 = vst [vmem:[%s16701_s20 + $0x8] sm:$0xff] %v14866_v20   ;;  %v5557_v19 = vadd.f32 %v5556_v27, %v5467_v57 }
 0x4d3   : > { %v6209_v33 = vpop.f32.mrf.mxu2 }
 0x4d4   : > { %v16729_v54 = vadd.f32 %v6209_v33, %v6120_v16  ;;  %v5630_v58 = vadd.f32 %v5557_v19, %v16479_v25  ;;  %v12458_v25 = vld [vmem:[#allocation3 + $0x1b0] sm:$0xf] }
 0x4d5   : > { %v6123_v60 = vpop.f32.mrf.mxu0  ;;  %v12459_v33 = vor.u32 %v14553_v62, %v12458_v25 }
 0x4d6   : > { %v5666_v40 = vadd.f32 %v16691_v61, %v5630_v58 }
 0x4d8   : > { %6162 = vmatmul.bf16.gmra.mxu0 %v12451_v49  ;;  %12542 = vmatmul.msk.bf16.gmra.mxu2 %vm1458_vm3, %v12455_v24  ;;  %v1075_v49 = vld [vmem:[%s16360_s24 + $0x80] sm:$0xff] }
 0x4d9   : > { %v5558_v51 = vpop.f32.mrf.mxu3  ;;  %v5472_v12 = vpop.f32.mrf.mxu1  ;;  %1091 = vst.msk [vmem:[#allocation4 + $0x1e0] sm:$0xff] %vm15383_vm2, %v1075_v49  ;;  %v1078_v49 = vld [vmem:[%s16360_s24 + $0x98] sm:$0xff] }
 0x4da   : > { %v5559_v55 = vadd.f32 %v5558_v51, %v5469_v34  ;;  %v14552_v34 = vld [vmem:[#allocation3 + $0x1b4] sm:$0xf]  ;;  %v12269_v51 = vor.u32 %v14473_v22, %v12268_v48  ;;  %v12276_v48 = vld [vmem:[#allocation4 + $0x1d0] sm:$0xf]  ;;  %v14475_v22 = vld [vmem:[#allocation4 + $0x1d4] sm:$0xf0] }
 0x4db   : > { %v6212_v8 = vpop.f32.mrf.mxu2  ;;  %v12463_v24 = vor.u32 %v14552_v34, %v12460_v6  ;;  %v14554_v6 = vld [vmem:[#allocation3 + $0x1c4] sm:$0xf]  ;;  %1094 = vst.msk [vmem:[#allocation4 + $0x1f8] sm:$0xff] %vm15383_vm2, %v1078_v49 }
 0x4dc   : > { %v5631_v18 = vadd.f32 %v5559_v55, %v16498_v35  ;;  %5511 = vmatmul.bf16.gmra.mxu1 %v12261_v17  ;;  %v16738_v16 = vadd.f32 %v6212_v8, %v6123_v60  ;;  %v14522_v35 = vld [vmem:[%s17884_s6 + $0x8] sm:$0xff] }
 0x4dd   : > { %v6125_v57 = vpop.f32.mrf.mxu0  ;;  %6534 = vmatpush.bf16.msrb.mxu1 %v14522_v35  ;;  %v12270_v17 = vld [vmem:[#allocation4 + $0x1c8] sm:$0xf0] }
 0x4de   : > { %v5667_v29 = vadd.f32 %v16691_v61, %v5631_v18  ;;  %12345 = vmatmul.msk.bf16.gmra.mxu3 %vm1458_vm3, %v12265_v14  ;;  %v12273_v18 = vor.u32 %v14472_v53, %v12270_v17  ;;  %v12468_v35 = vld [vmem:[#allocation3 + $0x1c8] sm:$0xf0]  ;;  %v12278_v53 = vld [vmem:[#allocation4 + $0x1d8] sm:$0xf0]  ;;  %v12277_v17 = vor.u32 %v14475_v22, %v12276_v48  ;;  %v14603_v22 = vld [vmem:[%s17884_s6 + $0x90] sm:$0xff] }
 0x4df   : > { %7009 = vmatpush.bf16.msrb.mxu0 %v14603_v22 }
 0x4e0   : > { %v14871_v20 = vpack.c.bf16 %v5667_v29, %v5666_v40 }
 0x4e1   : > { %v5561_v15 = vpop.f32.mrf.mxu3  ;;  %v5474_v27 = vpop.f32.mrf.mxu1 }
 0x4e2   : > { %15019 = vst [vmem:[%s16701_s20 + $0x10] sm:$0xff] %v14871_v20   ;;  %v5562_v19 = vadd.f32 %v5561_v15, %v5472_v12  ;;  %v14555_v15 = vld [vmem:[#allocation3 + $0x1c4] sm:$0xf0] }
 0x4e3   : > { %v6214_v0 = vpop.f32.mrf.mxu2 }
 0x4e4   : > { %v16749_v43 = vadd.f32 %v6214_v0, %v6125_v57  ;;  %v5632_v14 = vadd.f32 %v5562_v19, %v16503_v37  ;;  %v12466_v37 = vld [vmem:[#allocation3 + $0x1c0] sm:$0xf] }
 0x4e5   : > { %v6128_v60 = vpop.f32.mrf.mxu0  ;;  %v12467_v0 = vor.u32 %v14555_v15, %v12466_v37  ;;  %v12474_v37 = vld [vmem:[#allocation3 + $0x1d0] sm:$0xf]  ;;  %v14557_v15 = vld [vmem:[#allocation3 + $0x1d4] sm:$0xf0] }
 0x4e6   : > { %v5668_v20 = vadd.f32 %v16691_v61, %v5632_v14 }
 0x4e8   : > { %6167 = vmatmul.bf16.gmra.mxu0 %v12459_v33  ;;  %12543 = vmatmul.msk.bf16.gmra.mxu2 %vm1458_vm3, %v12463_v24  ;;  %v1077_v33 = vld [vmem:[%s16360_s24 + $0x90] sm:$0xff]  ;;  %v12471_v24 = vor.u32 %v14554_v6, %v12468_v35  ;;  %v12476_v6 = vld [vmem:[#allocation3 + $0x1d8] sm:$0xf0] }
 0x4e9   : > { %v5563_v58 = vpop.f32.mrf.mxu3  ;;  %v5477_v55 = vpop.f32.mrf.mxu1  ;;  %1093 = vst.msk [vmem:[#allocation4 + $0x1f0] sm:$0xff] %vm15383_vm2, %v1077_v33 }
 0x4ea   : > { %v5564_v8 = vadd.f32 %v5563_v58, %v5474_v27 }
 0x4eb   : > { %v6217_v57 = vpop.f32.mrf.mxu2 }
 0x4ec   : > { %v5633_v12 = vadd.f32 %v5564_v8, %v16516_v44  ;;  %5516 = vmatmul.bf16.gmra.mxu1 %v12269_v51  ;;  %v16761_v40 = vadd.f32 %v6217_v57, %v6128_v60 }
 0x4ed   : > { %v6130_v29 = vpop.f32.mrf.mxu0 }
 0x4ee   : > { %v5669_v25 = vadd.f32 %v16691_v61, %v5633_v12  ;;  %12346 = vmatmul.msk.bf16.gmra.mxu3 %vm1458_vm3, %v12273_v18  ;;  %v12281_v18 = vor.u32 %v14474_v41, %v12278_v53  ;;  %v12286_v41 = vld [vmem:[#allocation4 + $0x1e8] sm:$0xf0] }
 0x4f0   : > { %v14876_v62 = vpack.c.bf16 %v5669_v25, %v5668_v20 }
 0x4f1   : > { %v5566_v27 = vpop.f32.mrf.mxu3  ;;  %v5479_v34 = vpop.f32.mrf.mxu1 }
 0x4f2   : > { %15020 = vst [vmem:[%s16701_s20 + $0x18] sm:$0xff] %v14876_v62   ;;  %v5567_v19 = vadd.f32 %v5566_v27, %v5477_v55 }
 0x4f3   : > { %v6219_v44 = vpop.f32.mrf.mxu2 }
 0x4f4   : > { %v16769_v52 = vadd.f32 %v6219_v44, %v6130_v29  ;;  %v5634_v14 = vadd.f32 %v5567_v19, %v16521_v32  ;;  %v12475_v44 = vor.u32 %v14557_v15, %v12474_v37  ;;  %v14476_v19 = vld [vmem:[#allocation4 + $0x1e4] sm:$0xf]  ;;  %v12482_v37 = vld [vmem:[#allocation3 + $0x1e0] sm:$0xf]  ;;  %v14559_v15 = vld [vmem:[#allocation3 + $0x1e4] sm:$0xf0] }
 0x4f5   : > { %v6133_v60 = vpop.f32.mrf.mxu0 }
 0x4f6   : > { %v5670_v20 = vadd.f32 %v16691_v61, %v5634_v14 }
 0x4f8   : > { %6172 = vmatmul.bf16.gmra.mxu0 %v12467_v0  ;;  %12544 = vmatmul.msk.bf16.gmra.mxu2 %vm1458_vm3, %v12471_v24  ;;  %v14477_v24 = vld [vmem:[#allocation4 + $0x1e4] sm:$0xf0] }
 0x4f9   : > { %v5568_v51 = vpop.f32.mrf.mxu3  ;;  %v5482_v58 = vpop.f32.mrf.mxu1 }
 0x4fa   : > { %v5569_v8 = vadd.f32 %v5568_v51, %v5479_v34  ;;  %v14556_v34 = vld [vmem:[#allocation3 + $0x1d4] sm:$0xf] }
 0x4fb   : > { %v6222_v57 = vpop.f32.mrf.mxu2  ;;  %v12479_v49 = vor.u32 %v14556_v34, %v12476_v6  ;;  %v12484_v34 = vld [vmem:[#allocation3 + $0x1e8] sm:$0xf0] }
 0x4fc   : > { %v5635_v12 = vadd.f32 %v5569_v8, %v16536_v3  ;;  %5521 = vmatmul.bf16.gmra.mxu1 %v12277_v17  ;;  %v16778_v29 = vadd.f32 %v6222_v57, %v6133_v60  ;;  %v14521_v3 = vld [vmem:[%s17884_s6] sm:$0xff] }
 0x4fd   : > { %v6135_v55 = vpop.f32.mrf.mxu0  ;;  %6535 = vmatpush.bf16.msrb.mxu1 %v14521_v3  ;;  %v12284_v60 = vld [vmem:[#allocation4 + $0x1e0] sm:$0xf] }
 0x4fe   : > { %v5671_v25 = vadd.f32 %v16691_v61, %v5635_v12  ;;  %12347 = vmatmul.msk.bf16.gmra.mxu3 %vm1458_vm3, %v12281_v18  ;;  %v12285_v53 = vor.u32 %v14477_v24, %v12284_v60  ;;  %v12289_v18 = vor.u32 %v14476_v19, %v12286_v41  ;;  %v14478_v24 = vld [vmem:[#allocation4 + $0x1f4] sm:$0xf] }
 0x500   : > { %v14881_v62 = vpack.c.bf16 %v5671_v25, %v5670_v20 }
 0x501   : > { %v5571_v32 = vpop.f32.mrf.mxu3  ;;  %v5484_v27 = vpop.f32.mrf.mxu1 }
 0x502   : > { %15021 = vst [vmem:[%s16701_s20 + $0x20] sm:$0xff] %v14881_v62   ;;  %v5572_v48 = vadd.f32 %v5571_v32, %v5482_v58 }
 0x503   : > { %v6224_v35 = vpop.f32.mrf.mxu2 }
 0x504   : > { %v16787_v0 = vadd.f32 %v6224_v35, %v6135_v55  ;;  %v5636_v14 = vadd.f32 %v5572_v48, %v16541_v36  ;;  %v12294_v48 = vld [vmem:[#allocation4 + $0x1f8] sm:$0xf0] }
 0x505   : > { %v6138_v33 = vpop.f32.mrf.mxu0 }
 0x506   : > { %v5672_v20 = vadd.f32 %v16691_v61, %v5636_v14  ;;  %v12297_v14 = vor.u32 %v14478_v24, %v12294_v48  ;;  %v14692_v24 = vld [vmem:[%s17884_s6 + $0x158] sm:$0xff]  ;;  %v14489_v48 = vld [vmem:[#allocation2 + $0x104] sm:$0xf] }
 0x507   : > { %8014 = vmatpush.bf16.msra.mxu0 %v14692_v24 }
 0x508   : > { %6177 = vmatmul.bf16.gmra.mxu0 %v12475_v44  ;;  %12545 = vmatmul.msk.bf16.gmra.mxu2 %vm1458_vm3, %v12479_v49  ;;  %v14479_v49 = vld [vmem:[#allocation4 + $0x1f4] sm:$0xf0] }
 0x509   : > { %v5573_v17 = vpop.f32.mrf.mxu3  ;;  %v5487_v51 = vpop.f32.mrf.mxu1 }
 0x50a   : > { %v5574_v8 = vadd.f32 %v5573_v17, %v5484_v27  ;;  %v14558_v27 = vld [vmem:[#allocation3 + $0x1e4] sm:$0xf] }
 0x50b   : > { %v6227_v57 = vpop.f32.mrf.mxu2  ;;  %v12487_v44 = vor.u32 %v14558_v27, %v12484_v34  ;;  %v14651_v27 = vld [vmem:[%s17884_s6 + $0x110] sm:$0xff] }
 0x50c   : > { %v5637_v58 = vadd.f32 %v5574_v8, %v16544_v21  ;;  %5526 = vmatmul.bf16.gmra.mxu1 %v12285_v53  ;;  %v16795_v12 = vadd.f32 %v6227_v57, %v6138_v33  ;;  %v12483_v21 = vor.u32 %v14559_v15, %v12482_v37  ;;  %v12292_v33 = vld [vmem:[#allocation4 + $0x1f0] sm:$0xf]  ;;  %v14560_v15 = vld [vmem:[#allocation3 + $0x1f4] sm:$0xf] }
 0x50d   : > { %v6140_v55 = vpop.f32.mrf.mxu0  ;;  %v12293_v22 = vor.u32 %v14479_v49, %v12292_v33  ;;  %v12550_v33 = vld [vmem:[#allocation2 + $0x100] sm:$0xf]  ;;  %v14490_v49 = vld [vmem:[#allocation2 + $0x104] sm:$0xf0]  ;;  %7508 = vmatpush.bf16.msra.mxu1 %v14651_v27 }
 0x50e   : > { %v5673_v25 = vadd.f32 %v16691_v61, %v5637_v58  ;;  %12348 = vmatmul.msk.bf16.gmra.mxu3 %vm1458_vm3, %v12289_v18 }
 0x510   : > { %v14886_v62 = vpack.c.bf16 %v5673_v25, %v5672_v20  ;;  %v12490_v25 = vld [vmem:[#allocation3 + $0x1f0] sm:$0xf] }
 0x511   : > { %v5576_v36 = vpop.f32.mrf.mxu3  ;;  %v5489_v32 = vpop.f32.mrf.mxu1 }
 0x512   : > { %15022 = vst [vmem:[%s16701_s20 + $0x28] sm:$0xff] %v14886_v62   ;;  %v5577_v60 = vadd.f32 %v5576_v36, %v5487_v51  ;;  %v14561_v62 = vld [vmem:[#allocation3 + $0x1f4] sm:$0xf0]  ;;  %v12492_v36 = vld [vmem:[#allocation3 + $0x1f8] sm:$0xf0] }
 0x513   : > { %v6229_v6 = vpop.f32.mrf.mxu2 }
 0x514   : > { %v16801_v3 = vadd.f32 %v6229_v6, %v6140_v55  ;;  %v5638_v53 = vadd.f32 %v5577_v60, %v16555_v28  ;;  %v12491_v6 = vor.u32 %v14561_v62, %v12490_v25 }
 0x515   : > { %v6143_v35 = vpop.f32.mrf.mxu0 }
 0x516   : > { %v5674_v58 = vadd.f32 %v16691_v61, %v5638_v53 }
 0x518   : > { %6182 = vmatmul.bf16.gmra.mxu0 %v12483_v21  ;;  %12546 = vmatmul.msk.bf16.gmra.mxu2 %vm1458_vm3, %v12487_v44  ;;  %v12495_v44 = vor.u32 %v14560_v15, %v12492_v36  ;;  %v14572_v15 = vld [vmem:[#allocation4 + $0x104] sm:$0xf0]  ;;  %v14571_v36 = vld [vmem:[#allocation4 + $0x104] sm:$0xf] }
 0x519   : > { %v5578_v19 = vpop.f32.mrf.mxu3  ;;  %v5492_v41 = vpop.f32.mrf.mxu1 }
 0x51a   : > { %v5579_v17 = vadd.f32 %v5578_v19, %v5489_v32  ;;  %v14693_v32 = vld [vmem:[%s17884_s6 + $0x160] sm:$0xff]  ;;  %v12551_v19 = vor.u32 %v14490_v49, %v12550_v33  ;;  %v14491_v49 = vld [vmem:[#allocation2 + $0x114] sm:$0xf] }
 0x51b   : > { %v6232_v8 = vpop.f32.mrf.mxu2  ;;  %8110 = vmatpush.bf16.msra.mxu2 %v14693_v32 }
 0x51c   : > { %v5639_v18 = vadd.f32 %v5579_v17, %v16564_v31  ;;  %5531 = vmatmul.bf16.gmra.mxu1 %v12293_v22  ;;  %v16806_v57 = vadd.f32 %v6232_v8, %v6143_v35  ;;  %v14652_v31 = vld [vmem:[%s17884_s6 + $0x118] sm:$0xff]  ;;  %v12552_v22 = vld [vmem:[#allocation2 + $0x108] sm:$0xf0] }
 0x51d   : > { %v6145_v51 = vpop.f32.mrf.mxu0  ;;  %7604 = vmatpush.bf16.msra.mxu3 %v14652_v31  ;;  %v12750_v31 = vld [vmem:[#allocation4 + $0x108] sm:$0xf0] }
 0x51e   : > { %v5675_v55 = vadd.f32 %v16691_v61, %v5639_v18  ;;  %12349 = vmatmul.msk.bf16.gmra.mxu3 %vm1458_vm3, %v12297_v14  ;;  %v12555_v18 = vor.u32 %v14489_v48, %v12552_v22 }
 0x520   : > { %v14891_v20 = vpack.c.bf16 %v5675_v55, %v5674_v58 }
 0x521   : > { %v5581_v28 = vpop.f32.mrf.mxu3  ;;  %v5494_v37 = vpop.f32.mrf.mxu1 }
 0x522   : > { %15023 = vst [vmem:[%s16701_s20 + $0x30] sm:$0xff] %v14891_v20   ;;  %v5582_v60 = vadd.f32 %v5581_v28, %v5492_v41  ;;  %v12748_v28 = vld [vmem:[#allocation4 + $0x100] sm:$0xf] }
 0x523   : > { %v6234_v34 = vpop.f32.mrf.mxu2 }
 0x524   : > { %v16821_v21 = vadd.f32 %v6234_v34, %v6145_v51  ;;  %v5640_v14 = vadd.f32 %v5582_v60, %v16568_v63  ;;  %v12560_v60 = vld [vmem:[#allocation2 + $0x118] sm:$0xf0] }
 0x525   : > { %v6148_v35 = vpop.f32.mrf.mxu0 }
 0x526   : > { %v5676_v20 = vadd.f32 %v16691_v61, %v5640_v14  ;;  %v12563_v14 = vor.u32 %v14491_v49, %v12560_v60  ;;  %v12568_v49 = vld [vmem:[#allocation2 + $0x128] sm:$0xf0] }
 0x528   : > { %6187 = vmatmul.bf16.gmra.mxu0 %v12491_v6  ;;  %12547 = vmatmul.msk.bf16.gmra.mxu2 %vm1458_vm3, %v12495_v44  ;;  %v12753_v6 = vor.u32 %v14571_v36, %v12750_v31  ;;  %v14492_v44 = vld [vmem:[#allocation2 + $0x114] sm:$0xf0] }
 0x529   : > { %v5583_v53 = vpop.f32.mrf.mxu3  ;;  %v5497_v17 = vpop.f32.mrf.mxu1 }
 0x52a   : > { %v5584_v8 = vadd.f32 %v5583_v53, %v5494_v37 }
 0x52b   : > { %v6237_v51 = vpop.f32.mrf.mxu2 }
 0x52c   : > { %v5641_v41 = vadd.f32 %v5584_v8, %v16572_v45  ;;  %v16829_v58 = vadd.f32 %v6237_v51, %v6148_v35  ;;  %6536 = vmatmul.bf16.vlgmr.msrb.gmra.mxu1 %v12551_v19  ;;  %v12749_v45 = vor.u32 %v14572_v15, %v12748_v28  ;;  %v12558_v35 = vld [vmem:[#allocation2 + $0x110] sm:$0xf]  ;;  %v14573_v15 = vld [vmem:[#allocation4 + $0x114] sm:$0xf] }
 0x52d   : > { %v6150_v55 = vpop.f32.mrf.mxu0  ;;  %v12559_v24 = vor.u32 %v14492_v44, %v12558_v35  ;;  %v14691_v44 = vld [vmem:[%s17884_s6 + $0x150] sm:$0xff] }
 0x52e   : > { %v5677_v25 = vadd.f32 %v16691_v61, %v5641_v41  ;;  %12712 = vmatmul.msk.bf16.vlgmr.msrb.gmra.mxu3 %vm1458_vm3, %v12555_v18  ;;  %8015 = vmatpush.bf16.msra.mxu0 %v14691_v44 }
 0x530   : > { %v14896_v62 = vpack.c.bf16 %v5677_v25, %v5676_v20  ;;  %v12756_v25 = vld [vmem:[#allocation4 + $0x110] sm:$0xf] }
 0x531   : > { %v5586_v63 = vpop.f32.mrf.mxu3  ;;  %v5499_v37 = vpop.f32.mrf.mxu1 }
 0x532   : > { %15024 = vst [vmem:[%s16701_s20 + $0x38] sm:$0xff] %v14896_v62   ;;  %v5587_v33 = vadd.f32 %v5586_v63, %v5497_v17  ;;  %v14574_v62 = vld [vmem:[#allocation4 + $0x114] sm:$0xf0]  ;;  %v12758_v63 = vld [vmem:[#allocation4 + $0x118] sm:$0xf0] }
 0x533   : > { %v6239_v32 = vpop.f32.mrf.mxu2  ;;  %v12757_v36 = vor.u32 %v14574_v62, %v12756_v25  ;;  %v12764_v25 = vld [vmem:[#allocation4 + $0x120] sm:$0xf]  ;;  %v14576_v62 = vld [vmem:[#allocation4 + $0x124] sm:$0xf0] }
 0x534   : > { %v16835_v27 = vadd.f32 %v6239_v32, %v6150_v55  ;;  %v5642_v19 = vadd.f32 %v5587_v33, %v16576_v2  ;;  %v14493_v33 = vld [vmem:[#allocation2 + $0x124] sm:$0xf] }
 0x535   : > { %v6153_v34 = vpop.f32.mrf.mxu0 }
 0x536   : > { %v5678_v41 = vadd.f32 %v16691_v61, %v5642_v19 }
 0x538   : > { %7010 = vmatmul.bf16.vlgmr.msrb.gmra.mxu0 %v12749_v45  ;;  %12910 = vmatmul.msk.bf16.vlgmr.msrb.gmra.mxu2 %vm1458_vm3, %v12753_v6  ;;  %v12761_v45 = vor.u32 %v14573_v15, %v12758_v63  ;;  %v14494_v6 = vld [vmem:[#allocation2 + $0x124] sm:$0xf0]  ;;  %v12766_v15 = vld [vmem:[#allocation4 + $0x128] sm:$0xf0] }
 0x539   : > { %v5588_v48 = vpop.f32.mrf.mxu3  ;;  %v5502_v22 = vpop.f32.mrf.mxu1 }
 0x53a   : > { %v5589_v53 = vadd.f32 %v5588_v48, %v5499_v37 }
 0x53b   : > { %v6242_v8 = vpop.f32.mrf.mxu2 }
 0x53c   : > { %v5643_v18 = vadd.f32 %v5589_v53, %v16586_v39  ;;  %v16840_v51 = vadd.f32 %v6242_v8, %v6153_v34  ;;  %6541 = vmatmul.bf16.gmra.mxu1 %v12559_v24  ;;  %v14650_v39 = vld [vmem:[%s17884_s6 + $0x108] sm:$0xff]  ;;  %v12566_v34 = vld [vmem:[#allocation2 + $0x120] sm:$0xf] }
 0x53d   : > { %v6155_v17 = vpop.f32.mrf.mxu0  ;;  %7509 = vmatpush.bf16.msra.mxu1 %v14650_v39  ;;  %v12567_v60 = vor.u32 %v14494_v6, %v12566_v34  ;;  %v14495_v6 = vld [vmem:[#allocation2 + $0x134] sm:$0xf] }
 0x53e   : > { %v5679_v55 = vadd.f32 %v16691_v61, %v5643_v18  ;;  %12713 = vmatmul.msk.bf16.gmra.mxu3 %vm1458_vm3, %v12563_v14  ;;  %v12571_v14 = vor.u32 %v14493_v33, %v12568_v49 }
 0x540   : > { %v14901_v20 = vpack.c.bf16 %v5679_v55, %v5678_v41 }
 0x541   : > { %v5591_v2 = vpop.f32.mrf.mxu3  ;;  %v5504_v28 = vpop.f32.mrf.mxu1 }
 0x542   : > { %15025 = vst [vmem:[%s16701_s20 + $0x40] sm:$0xff] %v14901_v20   ;;  %v5592_v35 = vadd.f32 %v5591_v2, %v5502_v22 }
 0x543   : > { %v6244_v37 = vpop.f32.mrf.mxu2 }
 0x544   : > { %v16849_v31 = vadd.f32 %v6244_v37, %v6155_v17  ;;  %v5644_v19 = vadd.f32 %v5592_v35, %v16590_v42  ;;  %v12576_v35 = vld [vmem:[#allocation2 + $0x138] sm:$0xf0] }
 0x545   : > { %v6158_v32 = vpop.f32.mrf.mxu0 }
 0x546   : > { %v5680_v41 = vadd.f32 %v16691_v61, %v5644_v19  ;;  %v12579_v19 = vor.u32 %v14495_v6, %v12576_v35  ;;  %v12584_v6 = vld [vmem:[#allocation2 + $0x148] sm:$0xf0] }
 0x548   : > { %7015 = vmatmul.bf16.gmra.mxu0 %v12757_v36  ;;  %12911 = vmatmul.msk.bf16.gmra.mxu2 %vm1458_vm3, %v12761_v45  ;;  %v14496_v45 = vld [vmem:[#allocation2 + $0x134] sm:$0xf0] }
 0x549   : > { %v5593_v24 = vpop.f32.mrf.mxu3  ;;  %v5507_v48 = vpop.f32.mrf.mxu1 }
 0x54a   : > { %v5594_v53 = vadd.f32 %v5593_v24, %v5504_v28  ;;  %v14575_v28 = vld [vmem:[#allocation4 + $0x124] sm:$0xf] }
 0x54b   : > { %v6247_v8 = vpop.f32.mrf.mxu2  ;;  %v12769_v36 = vor.u32 %v14575_v28, %v12766_v15 }
 0x54c   : > { %v5645_v22 = vadd.f32 %v5594_v53, %v16594_v26  ;;  %v16857_v18 = vadd.f32 %v6247_v8, %v6158_v32  ;;  %6546 = vmatmul.bf16.gmra.mxu1 %v12567_v60  ;;  %v12765_v26 = vor.u32 %v14576_v62, %v12764_v25  ;;  %v12574_v32 = vld [vmem:[#allocation2 + $0x130] sm:$0xf]  ;;  %v14577_v62 = vld [vmem:[#allocation4 + $0x134] sm:$0xf] }
 0x54d   : > { %v6160_v17 = vpop.f32.mrf.mxu0  ;;  %v12575_v44 = vor.u32 %v14496_v45, %v12574_v32  ;;  %v14690_v45 = vld [vmem:[%s17884_s6 + $0x148] sm:$0xff] }
 0x54e   : > { %v5681_v55 = vadd.f32 %v16691_v61, %v5645_v22  ;;  %12714 = vmatmul.msk.bf16.gmra.mxu3 %vm1458_vm3, %v12571_v14  ;;  %8016 = vmatpush.bf16.msra.mxu0 %v14690_v45 }
 0x550   : > { %v14906_v20 = vpack.c.bf16 %v5681_v55, %v5680_v41  ;;  %v12772_v55 = vld [vmem:[#allocation4 + $0x130] sm:$0xf] }
 0x551   : > { %v5596_v42 = vpop.f32.mrf.mxu3  ;;  %v5509_v2 = vpop.f32.mrf.mxu1 }
 0x552   : > { %15026 = vst [vmem:[%s16701_s20 + $0x48] sm:$0xff] %v14906_v20   ;;  %v5597_v34 = vadd.f32 %v5596_v42, %v5507_v48  ;;  %v14578_v20 = vld [vmem:[#allocation4 + $0x134] sm:$0xf0]  ;;  %v12774_v42 = vld [vmem:[#allocation4 + $0x138] sm:$0xf0] }
 0x553   : > { %v6249_v63 = vpop.f32.mrf.mxu2  ;;  %v12773_v28 = vor.u32 %v14578_v20, %v12772_v55  ;;  %v12780_v55 = vld [vmem:[#allocation4 + $0x140] sm:$0xf]  ;;  %v14580_v20 = vld [vmem:[#allocation4 + $0x144] sm:$0xf0] }
 0x554   : > { %v16863_v39 = vadd.f32 %v6249_v63, %v6160_v17  ;;  %v5646_v60 = vadd.f32 %v5597_v34, %v16598_v1  ;;  %v14497_v34 = vld [vmem:[#allocation2 + $0x144] sm:$0xf] }
 0x555   : > { %v6163_v37 = vpop.f32.mrf.mxu0 }
 0x556   : > { %v5682_v22 = vadd.f32 %v16691_v61, %v5646_v60 }
 0x558   : > { %7020 = vmatmul.bf16.gmra.mxu0 %v12765_v26  ;;  %12912 = vmatmul.msk.bf16.gmra.mxu2 %vm1458_vm3, %v12769_v36  ;;  %v12777_v26 = vor.u32 %v14577_v62, %v12774_v42  ;;  %v14498_v36 = vld [vmem:[#allocation2 + $0x144] sm:$0xf0]  ;;  %v12782_v62 = vld [vmem:[#allocation4 + $0x148] sm:$0xf0] }
 0x559   : > { %v5598_v33 = vpop.f32.mrf.mxu3  ;;  %v5512_v49 = vpop.f32.mrf.mxu1 }
 0x55a   : > { %v5599_v24 = vadd.f32 %v5598_v33, %v5509_v2 }
 0x55b   : > { %v6252_v53 = vpop.f32.mrf.mxu2 }
 0x55c   : > { %v5647_v14 = vadd.f32 %v5599_v24, %v16608_v13  ;;  %v16868_v8 = vadd.f32 %v6252_v53, %v6163_v37  ;;  %6551 = vmatmul.bf16.gmra.mxu1 %v12575_v44  ;;  %v14649_v13 = vld [vmem:[%s17884_s6 + $0x100] sm:$0xff] }
 0x55d   : > { %v6165_v48 = vpop.f32.mrf.mxu0  ;;  %7510 = vmatpush.bf16.msra.mxu1 %v14649_v13  ;;  %v12582_v37 = vld [vmem:[#allocation2 + $0x140] sm:$0xf] }
 0x55e   : > { %v5683_v17 = vadd.f32 %v16691_v61, %v5647_v14  ;;  %12715 = vmatmul.msk.bf16.gmra.mxu3 %vm1458_vm3, %v12579_v19  ;;  %v12583_v35 = vor.u32 %v14498_v36, %v12582_v37  ;;  %v12587_v19 = vor.u32 %v14497_v34, %v12584_v6  ;;  %v14499_v36 = vld [vmem:[#allocation2 + $0x154] sm:$0xf] }
 0x560   : > { %v14911_v41 = vpack.c.bf16 %v5683_v17, %v5682_v22 }
 0x561   : > { %v5601_v1 = vpop.f32.mrf.mxu3  ;;  %v5514_v25 = vpop.f32.mrf.mxu1 }
 0x562   : > { %15027 = vst [vmem:[%s16701_s20 + $0x50] sm:$0xff] %v14911_v41   ;;  %v5602_v32 = vadd.f32 %v5601_v1, %v5512_v49 }
 0x563   : > { %v6254_v2 = vpop.f32.mrf.mxu2 }
 0x564   : > { %v16877_v15 = vadd.f32 %v6254_v2, %v6165_v48  ;;  %v5648_v60 = vadd.f32 %v5602_v32, %v16612_v5  ;;  %v12592_v32 = vld [vmem:[#allocation2 + $0x158] sm:$0xf0] }
 0x565   : > { %v6168_v63 = vpop.f32.mrf.mxu0 }
 0x566   : > { %v5684_v22 = vadd.f32 %v16691_v61, %v5648_v60  ;;  %v12595_v60 = vor.u32 %v14499_v36, %v12592_v32  ;;  %v12600_v36 = vld [vmem:[#allocation2 + $0x168] sm:$0xf0] }
 0x568   : > { %7025 = vmatmul.bf16.gmra.mxu0 %v12773_v28  ;;  %12913 = vmatmul.msk.bf16.gmra.mxu2 %vm1458_vm3, %v12777_v26  ;;  %v14500_v26 = vld [vmem:[#allocation2 + $0x154] sm:$0xf0] }
 0x569   : > { %v5603_v44 = vpop.f32.mrf.mxu3  ;;  %v5517_v33 = vpop.f32.mrf.mxu1 }
 0x56a   : > { %v5604_v24 = vadd.f32 %v5603_v44, %v5514_v25  ;;  %v14579_v25 = vld [vmem:[#allocation4 + $0x144] sm:$0xf] }
 0x56b   : > { %v6257_v53 = vpop.f32.mrf.mxu2  ;;  %v12785_v28 = vor.u32 %v14579_v25, %v12782_v62 }
 0x56c   : > { %v5649_v49 = vadd.f32 %v5604_v24, %v16616_v46  ;;  %v16885_v14 = vadd.f32 %v6257_v53, %v6168_v63  ;;  %6556 = vmatmul.bf16.gmra.mxu1 %v12583_v35  ;;  %v12781_v46 = vor.u32 %v14580_v20, %v12780_v55  ;;  %v12590_v63 = vld [vmem:[#allocation2 + $0x150] sm:$0xf]  ;;  %v14581_v20 = vld [vmem:[#allocation4 + $0x154] sm:$0xf] }
 0x56d   : > { %v6170_v48 = vpop.f32.mrf.mxu0  ;;  %v12591_v45 = vor.u32 %v14500_v26, %v12590_v63  ;;  %v14689_v26 = vld [vmem:[%s17884_s6 + $0x140] sm:$0xff] }
 0x56e   : > { %v5685_v17 = vadd.f32 %v16691_v61, %v5649_v49  ;;  %12716 = vmatmul.msk.bf16.gmra.mxu3 %vm1458_vm3, %v12587_v19  ;;  %8017 = vmatpush.bf16.msra.mxu0 %v14689_v26 }
 0x570   : > { %v14916_v41 = vpack.c.bf16 %v5685_v17, %v5684_v22  ;;  %v12788_v17 = vld [vmem:[#allocation4 + $0x150] sm:$0xf] }
 0x571   : > { %v5606_v5 = vpop.f32.mrf.mxu3  ;;  %v5519_v1 = vpop.f32.mrf.mxu1 }
 0x572   : > { %15028 = vst [vmem:[%s16701_s20 + $0x58] sm:$0xff] %v14916_v41   ;;  %v5607_v37 = vadd.f32 %v5606_v5, %v5517_v33  ;;  %v14582_v41 = vld [vmem:[#allocation4 + $0x154] sm:$0xf0]  ;;  %v12790_v5 = vld [vmem:[#allocation4 + $0x158] sm:$0xf0] }
 0x573   : > { %v6259_v42 = vpop.f32.mrf.mxu2  ;;  %v12789_v25 = vor.u32 %v14582_v41, %v12788_v17  ;;  %v12796_v17 = vld [vmem:[#allocation4 + $0x160] sm:$0xf]  ;;  %v14584_v41 = vld [vmem:[#allocation4 + $0x164] sm:$0xf0] }
 0x574   : > { %v16891_v13 = vadd.f32 %v6259_v42, %v6170_v48  ;;  %v5650_v35 = vadd.f32 %v5607_v37, %v16620_v50  ;;  %v14501_v37 = vld [vmem:[#allocation2 + $0x164] sm:$0xf] }
 0x575   : > { %v6173_v2 = vpop.f32.mrf.mxu0 }
 0x576   : > { %v5686_v49 = vadd.f32 %v16691_v61, %v5650_v35 }
 0x578   : > { %7030 = vmatmul.bf16.gmra.mxu0 %v12781_v46  ;;  %12914 = vmatmul.msk.bf16.gmra.mxu2 %vm1458_vm3, %v12785_v28  ;;  %v12793_v46 = vor.u32 %v14581_v20, %v12790_v5  ;;  %v14502_v28 = vld [vmem:[#allocation2 + $0x164] sm:$0xf0]  ;;  %v12798_v20 = vld [vmem:[#allocation4 + $0x168] sm:$0xf0] }
 0x579   : > { %v5608_v34 = vpop.f32.mrf.mxu3  ;;  %v5522_v6 = vpop.f32.mrf.mxu1 }
 0x57a   : > { %v5609_v44 = vadd.f32 %v5608_v34, %v5519_v1 }
 0x57b   : > { %v6262_v24 = vpop.f32.mrf.mxu2 }
 0x57c   : > { %v5651_v19 = vadd.f32 %v5609_v44, %v16636_v23  ;;  %v16896_v53 = vadd.f32 %v6262_v24, %v6173_v2  ;;  %6561 = vmatmul.bf16.gmra.mxu1 %v12591_v45  ;;  %v14648_v23 = vld [vmem:[%s17884_s6 + $0xf8] sm:$0xff]  ;;  %v12598_v2 = vld [vmem:[#allocation2 + $0x160] sm:$0xf] }
 0x57d   : > { %v6175_v33 = vpop.f32.mrf.mxu0  ;;  %7511 = vmatpush.bf16.msra.mxu1 %v14648_v23  ;;  %v12599_v32 = vor.u32 %v14502_v28, %v12598_v2  ;;  %v12608_v28 = vld [vmem:[#allocation2 + $0x178] sm:$0xf0] }
 0x57e   : > { %v5687_v48 = vadd.f32 %v16691_v61, %v5651_v19  ;;  %12717 = vmatmul.msk.bf16.gmra.mxu3 %vm1458_vm3, %v12595_v60  ;;  %v12603_v60 = vor.u32 %v14501_v37, %v12600_v36 }
 0x580   : > { %v14921_v22 = vpack.c.bf16 %v5687_v48, %v5686_v49 }
 0x581   : > { %v5611_v50 = vpop.f32.mrf.mxu3  ;;  %v5524_v55 = vpop.f32.mrf.mxu1 }
 0x582   : > { %15029 = vst [vmem:[%s16701_s20 + $0x60] sm:$0xff] %v14921_v22   ;;  %v5612_v63 = vadd.f32 %v5611_v50, %v5522_v6 }
 0x583   : > { %v6264_v1 = vpop.f32.mrf.mxu2 }
 0x584   : > { %v16905_v62 = vadd.f32 %v6264_v1, %v6175_v33  ;;  %v5652_v35 = vadd.f32 %v5612_v63, %v16640_v30 }
 0x585   : > { %v6178_v42 = vpop.f32.mrf.mxu0 }
 0x586   : > { %v5688_v49 = vadd.f32 %v16691_v61, %v5652_v35 }
 0x588   : > { %7035 = vmatmul.bf16.gmra.mxu0 %v12789_v25  ;;  %12915 = vmatmul.msk.bf16.gmra.mxu2 %vm1458_vm3, %v12793_v46  ;;  %v14504_v46 = vld [vmem:[#allocation2 + $0x174] sm:$0xf0] }
 0x589   : > { %v5613_v45 = vpop.f32.mrf.mxu3  ;;  %v5527_v34 = vpop.f32.mrf.mxu1 }
 0x58a   : > { %v5614_v44 = vadd.f32 %v5613_v45, %v5524_v55  ;;  %v14583_v55 = vld [vmem:[#allocation4 + $0x164] sm:$0xf] }
 0x58b   : > { %v6267_v24 = vpop.f32.mrf.mxu2  ;;  %v12801_v25 = vor.u32 %v14583_v55, %v12798_v20 }
 0x58c   : > { %v5653_v6 = vadd.f32 %v5614_v44, %v16650_v10  ;;  %v16913_v19 = vadd.f32 %v6267_v24, %v6178_v42  ;;  %6566 = vmatmul.bf16.gmra.mxu1 %v12599_v32  ;;  %v12797_v10 = vor.u32 %v14584_v41, %v12796_v17  ;;  %v12606_v42 = vld [vmem:[#allocation2 + $0x170] sm:$0xf]  ;;  %v15131_v24 = vld [vmem:[%s17885_s7] ss:$0 sm:$0xff]  ;;  %v14585_v41 = vld [vmem:[#allocation4 + $0x174] sm:$0xf] }
 0x58d   : > { %v6180_v33 = vpop.f32.mrf.mxu0  ;;  %v12607_v63 = vor.u32 %v14504_v46, %v12606_v42  ;;  %v14506_v42 = vld [vmem:[#allocation2 + $0x184] sm:$0xf0] }
 0x58e   : > { %v5689_v48 = vadd.f32 %v16691_v61, %v5653_v6  ;;  %12718 = vmatmul.msk.bf16.gmra.mxu3 %vm1458_vm3, %v12603_v60  ;;  %v14503_v61 = vld [vmem:[#allocation2 + $0x174] sm:$0xf] }
 0x58f   : > { %v12611_v45 = vor.u32 %v14503_v61, %v12608_v28  ;;  %v12616_v61 = vld [vmem:[#allocation2 + $0x188] sm:$0xf0] }
 0x590   : > { %v14926_v22 = vpack.c.bf16 %v5689_v48, %v5688_v49  ;;  %v12804_v48 = vld [vmem:[#allocation4 + $0x170] sm:$0xf] }
 0x591   : > { %v5616_v30 = vpop.f32.mrf.mxu3  ;;  %v5529_v50 = vpop.f32.mrf.mxu1 }
 0x592   : > { %15030 = vst [vmem:[%s16701_s20 + $0x68] sm:$0xff] %v14926_v22   ;;  %v5617_v2 = vadd.f32 %v5616_v30, %v5527_v34  ;;  %v12806_v30 = vld [vmem:[#allocation4 + $0x178] sm:$0xf0] }
 0x593   : > { %v6269_v5 = vpop.f32.mrf.mxu2 }
 0x594   : > { %v16919_v23 = vadd.f32 %v6269_v5, %v6180_v33  ;;  %v5654_v36 = vadd.f32 %v5617_v2, %v16654_v11  ;;  %v14647_v11 = vld [vmem:[%s17884_s6 + $0xf0] sm:$0xff]  ;;  %v14505_v2 = vld [vmem:[#allocation2 + $0x184] sm:$0xf] }
 0x595   : > { %v6183_v1 = vpop.f32.mrf.mxu0  ;;  %7512 = vmatpush.bf16.msra.mxu1 %v14647_v11 }
 0x596   : > { %v5690_v6 = vadd.f32 %v15131_v24, %v5654_v36 }
 0x598   : > { %7040 = vmatmul.bf16.gmra.mxu0 %v12797_v10  ;;  %12916 = vmatmul.msk.bf16.gmra.mxu2 %vm1458_vm3, %v12801_v25  ;;  %v12614_v25 = vld [vmem:[#allocation2 + $0x180] sm:$0xf] }
 0x599   : > { %v5618_v26 = vpop.f32.mrf.mxu3  ;;  %v5532_v37 = vpop.f32.mrf.mxu1  ;;  %v12615_v28 = vor.u32 %v14506_v42, %v12614_v25  ;;  %v14507_v25 = vld [vmem:[#allocation2 + $0x194] sm:$0xf]  ;;  %v12624_v42 = vld [vmem:[#allocation2 + $0x198] sm:$0xf0] }
 0x59a   : > { %v5619_v32 = vadd.f32 %v5618_v26, %v5529_v50  ;;  %v14688_v50 = vld [vmem:[%s17884_s6 + $0x138] sm:$0xff] }
 0x59b   : > { %v6272_v35 = vpop.f32.mrf.mxu2  ;;  %8018 = vmatpush.bf16.msra.mxu0 %v14688_v50 }
 0x59c   : > { %v5655_v44 = vadd.f32 %v5619_v32, %v16667_v59  ;;  %v16924_v60 = vadd.f32 %v6272_v35, %v6183_v1  ;;  %6571 = vmatmul.bf16.gmra.mxu1 %v12607_v63  ;;  %v14586_v59 = vld [vmem:[#allocation4 + $0x174] sm:$0xf0]  ;;  %v12809_v1 = vor.u32 %v14585_v41, %v12806_v30  ;;  %v12619_v35 = vor.u32 %v14505_v2, %v12616_v61 }
 0x59d   : > { %v6185_v34 = vpop.f32.mrf.mxu0  ;;  %v12805_v20 = vor.u32 %v14586_v59, %v12804_v48  ;;  %v12812_v48 = vld [vmem:[#allocation4 + $0x180] sm:$0xf]  ;;  %v14588_v59 = vld [vmem:[#allocation4 + $0x184] sm:$0xf0] }
 0x59e   : > { %v5691_v33 = vadd.f32 %v15131_v24, %v5655_v44  ;;  %12719 = vmatmul.msk.bf16.gmra.mxu3 %vm1458_vm3, %v12611_v45  ;;  %v12813_v50 = vor.u32 %v14588_v59, %v12812_v48  ;;  %v14687_v59 = vld [vmem:[%s17884_s6 + $0x130] sm:$0xff] }
 0x59f   : > { %8019 = vmatpush.bf16.msra.mxu0 %v14687_v59  ;;  %v12638_v59 = vld [vmem:[#allocation2 + $0x1b0] sm:$0xf] }
 0x5a0   : > { %v14931_v49 = vpack.c.bf16 %v5691_v33, %v5690_v6 }
 0x5a1   : > { %v5621_v22 = vpop.f32.mrf.mxu3  ;;  %v5534_v17 = vpop.f32.mrf.mxu1 }
 0x5a2   : > { %15031 = vst [vmem:[%s16701_s20 + $0x70] sm:$0xff] %v14931_v49   ;;  %v5622_v46 = vadd.f32 %v5621_v22, %v5532_v37 }
 0x5a3   : > { %v6274_v55 = vpop.f32.mrf.mxu2 }
 0x5a4   : > { %v16937_v5 = vadd.f32 %v6274_v55, %v6185_v34  ;;  %v5656_v36 = vadd.f32 %v5622_v46, %v16674_v38 }
 0x5a5   : > { %v6188_v10 = vpop.f32.mrf.mxu0 }
 0x5a6   : > { %v5692_v33 = vadd.f32 %v15131_v24, %v5656_v36 }
 0x5a8   : > { %7045 = vmatmul.bf16.gmra.mxu0 %v12805_v20  ;;  %12917 = vmatmul.msk.bf16.gmra.mxu2 %vm1458_vm3, %v12809_v1  ;;  %v14508_v1 = vld [vmem:[#allocation2 + $0x194] sm:$0xf0] }
 0x5a9   : > { %v5623_v63 = vpop.f32.mrf.mxu3  ;;  %v6537_v26 = vpop.f32.mrf.mxu1 }
 0x5aa   : > { %v5624_v32 = vadd.f32 %v5623_v63, %v5534_v17  ;;  %v6538_v45 = vadd.f32 %v6537_v26, %v16696_v4  ;;  %v14587_v17 = vld [vmem:[#allocation4 + $0x184] sm:$0xf]  ;;  %v12814_v4 = vld [vmem:[#allocation4 + $0x188] sm:$0xf0] }
 0x5ab   : > { %v6277_v44 = vpop.f32.mrf.mxu2 }
 0x5ac   : > { %v5657_v34 = vadd.f32 %v5624_v32, %v16683_v56  ;;  %v16943_v6 = vadd.f32 %v6277_v44, %v6188_v10  ;;  %6576 = vmatmul.bf16.gmra.mxu1 %v12615_v28  ;;  %v12817_v10 = vor.u32 %v14587_v17, %v12814_v4  ;;  %v12820_v44 = vld [vmem:[#allocation4 + $0x190] sm:$0xf] }
 0x5ad   : > { %v6190_v37 = vpop.f32.mrf.mxu0 }
 0x5ae   : > { %v5693_v11 = vadd.f32 %v15131_v24, %v5657_v34  ;;  %12720 = vmatmul.msk.bf16.gmra.mxu3 %vm1458_vm3, %v12619_v35  ;;  %v12622_v24 = vld [vmem:[#allocation2 + $0x190] sm:$0xf]  ;;  %v14646_v35 = vld [vmem:[%s17884_s6 + $0xe8] sm:$0xff]  ;;  %v14590_v34 = vld [vmem:[#allocation4 + $0x194] sm:$0xf0] }
 0x5af   : > { %v12623_v46 = vor.u32 %v14508_v1, %v12622_v24  ;;  %7513 = vmatpush.bf16.msra.mxu1 %v14646_v35  ;;  %v14591_v35 = vld [vmem:[#allocation4 + $0x1a4] sm:$0xf] }
 0x5b0   : > { %v14936_v49 = vpack.c.bf16 %v5693_v11, %v5692_v33  ;;  %v14589_v11 = vld [vmem:[#allocation4 + $0x194] sm:$0xf] }
 0x5b1   : > { %v6626_v38 = vpop.f32.mrf.mxu3  ;;  %v6539_v22 = vpop.f32.mrf.mxu1 }
 0x5b2   : > { %15032 = vst [vmem:[%s16701_s20 + $0x78] sm:$0xff] %v14936_v49   ;;  %v6627_v41 = vadd.f32 %v6626_v38, %v6538_v45  ;;  %v6540_v30 = vadd.f32 %v6539_v22, %v16709_v47  ;;  %v12627_v47 = vor.u32 %v14507_v25, %v12624_v42  ;;  %v12821_v22 = vor.u32 %v14590_v34, %v12820_v44  ;;  %v12830_v44 = vld [vmem:[#allocation4 + $0x1a8] sm:$0xf0] }
 0x5b3   : > { %v6279_v56 = vpop.f32.mrf.mxu2 }
 0x5b4   : > { %v16948_v55 = vadd.f32 %v6279_v56, %v6190_v37  ;;  %v14510_v56 = vld [vmem:[#allocation2 + $0x1a4] sm:$0xf0] }
 0x5b5   : > { %v7011_v20 = vpop.f32.mrf.mxu0 }
 0x5b8   : > { %7050 = vmatmul.bf16.gmra.mxu0 %v12813_v50  ;;  %12918 = vmatmul.msk.bf16.gmra.mxu2 %vm1458_vm3, %v12817_v10  ;;  %v12632_v10 = vld [vmem:[#allocation2 + $0x1a8] sm:$0xf0] }
 0x5b9   : > { %v6628_v2 = vpop.f32.mrf.mxu3  ;;  %v6542_v61 = vpop.f32.mrf.mxu1 }
 0x5ba   : > { %v6629_v28 = vadd.f32 %v6628_v2, %v6540_v30  ;;  %v6543_v63 = vadd.f32 %v6542_v61, %v16721_v7  ;;  %v12822_v7 = vld [vmem:[#allocation4 + $0x198] sm:$0xf0]  ;;  %v12630_v30 = vld [vmem:[#allocation2 + $0x1a0] sm:$0xf] }
 0x5bb   : > { %v7100_v26 = vpop.f32.mrf.mxu2 }
 0x5bc   : > { %6581 = vmatmul.bf16.gmra.mxu1 %v12623_v46  ;;  %v7101_v36 = vadd.f32 %v7100_v26, %v7011_v20  ;;  %v14509_v20 = vld [vmem:[#allocation2 + $0x1a4] sm:$0xf]  ;;  %v14592_v26 = vld [vmem:[#allocation4 + $0x1a4] sm:$0xf0] }
 0x5bd   : > { %v7013_v32 = vpop.f32.mrf.mxu0  ;;  %v12635_v46 = vor.u32 %v14509_v20, %v12632_v10 }
 0x5be   : > { %12721 = vmatmul.msk.bf16.gmra.mxu3 %vm1458_vm3, %v12627_v47  ;;  %v16953_v45 = vadd.f32 %v7101_v36, %v6627_v41  ;;  %v12825_v41 = vor.u32 %v14589_v11, %v12822_v7  ;;  %v12828_v47 = vld [vmem:[#allocation4 + $0x1a0] sm:$0xf] }
 0x5c1   : > { %v6631_v37 = vpop.f32.mrf.mxu3  ;;  %v6544_v33 = vpop.f32.mrf.mxu1 }
 0x5c2   : > { %v6632_v49 = vadd.f32 %v6631_v37, %v6543_v63  ;;  %v6545_v48 = vadd.f32 %v6544_v33, %v16729_v54  ;;  %v12631_v54 = vor.u32 %v14510_v56, %v12630_v30 }
 0x5c3   : > { %v7102_v38 = vpop.f32.mrf.mxu2 }
 0x5c4   : > { %v7103_v17 = vadd.f32 %v7102_v38, %v7013_v32  ;;  %v14512_v38 = vld [vmem:[#allocation2 + $0x1b4] sm:$0xf0] }
 0x5c5   : > { %v7016_v4 = vpop.f32.mrf.mxu0 }
 0x5c6   : > { %v16962_v50 = vadd.f32 %v7103_v17, %v6629_v28  ;;  %v12640_v17 = vld [vmem:[#allocation2 + $0x1b8] sm:$0xf0] }
 0x5c8   : > { %7055 = vmatmul.bf16.gmra.mxu0 %v12821_v22  ;;  %12919 = vmatmul.msk.bf16.gmra.mxu2 %vm1458_vm3, %v12825_v41 }
 0x5c9   : > { %v6633_v24 = vpop.f32.mrf.mxu3  ;;  %v6547_v1 = vpop.f32.mrf.mxu1 }
 0x5ca   : > { %v6634_v25 = vadd.f32 %v6633_v24, %v6545_v48  ;;  %v6548_v42 = vadd.f32 %v6547_v1, %v16738_v16  ;;  %v12829_v16 = vor.u32 %v14592_v26, %v12828_v47  ;;  %v12833_v48 = vor.u32 %v14591_v35, %v12830_v44 }
 0x5cb   : > { %v7105_v2 = vpop.f32.mrf.mxu2 }
 0x5cc   : > { %6586 = vmatmul.bf16.gmra.mxu1 %v12631_v54  ;;  %v7106_v61 = vadd.f32 %v7105_v2, %v7016_v4  ;;  %v12639_v4 = vor.u32 %v14512_v38, %v12638_v59 }
 0x5cd   : > { %v7018_v63 = vpop.f32.mrf.mxu0 }
 0x5ce   : > { %12722 = vmatmul.msk.bf16.gmra.mxu3 %vm1458_vm3, %v12635_v46  ;;  %v16967_v28 = vadd.f32 %v7106_v61, %v6632_v49  ;;  %v14511_v49 = vld [vmem:[#allocation2 + $0x1b4] sm:$0xf]  ;;  %v14594_v46 = vld [vmem:[#allocation4 + $0x1b4] sm:$0xf0] }
 0x5cf   : > { %v12643_v20 = vor.u32 %v14511_v49, %v12640_v17 }
 0x5d1   : > { %v6636_v36 = vpop.f32.mrf.mxu3  ;;  %v6549_v32 = vpop.f32.mrf.mxu1 }
 0x5d2   : > { %v6637_v34 = vadd.f32 %v6636_v36, %v6548_v42  ;;  %v6550_v37 = vadd.f32 %v6549_v32, %v16749_v43  ;;  %v12836_v42 = vld [vmem:[#allocation4 + $0x1b0] sm:$0xf]  ;;  %v14686_v36 = vld [vmem:[%s17884_s6 + $0x128] sm:$0xff] }
 0x5d3   : > { %v7107_v33 = vpop.f32.mrf.mxu2  ;;  %v12837_v35 = vor.u32 %v14594_v46, %v12836_v42  ;;  %8020 = vmatpush.bf16.msra.mxu0 %v14686_v36  ;;  %v12846_v42 = vld [vmem:[#allocation4 + $0x1c8] sm:$0xf0]  ;;  %v12654_v36 = vld [vmem:[#allocation2 + $0x1d0] sm:$0xf] }
 0x5d4   : > { %v7108_v11 = vadd.f32 %v7107_v33, %v7018_v63  ;;  %v14593_v63 = vld [vmem:[#allocation4 + $0x1b4] sm:$0xf]  ;;  %v12646_v33 = vld [vmem:[#allocation2 + $0x1c0] sm:$0xf] }
 0x5d5   : > { %v7021_v7 = vpop.f32.mrf.mxu0 }
 0x5d6   : > { %v16970_v22 = vadd.f32 %v7108_v11, %v6634_v25  ;;  %v14645_v25 = vld [vmem:[%s17884_s6 + $0xe0] sm:$0xff] }
 0x5d7   : > { %7514 = vmatpush.bf16.msra.mxu1 %v14645_v25  ;;  %v14595_v25 = vld [vmem:[#allocation4 + $0x1c4] sm:$0xf] }
 0x5d8   : > { %7060 = vmatmul.bf16.gmra.mxu0 %v12829_v16  ;;  %12920 = vmatmul.msk.bf16.gmra.mxu2 %vm1458_vm3, %v12833_v48  ;;  %v14514_v16 = vld [vmem:[#allocation2 + $0x1c4] sm:$0xf0]  ;;  %v12648_v48 = vld [vmem:[#allocation2 + $0x1c8] sm:$0xf0] }
 0x5d9   : > { %v6638_v41 = vpop.f32.mrf.mxu3  ;;  %v6552_v30 = vpop.f32.mrf.mxu1 }
 0x5da   : > { %v6639_v56 = vadd.f32 %v6638_v41, %v6550_v37  ;;  %v6553_v43 = vadd.f32 %v6552_v30, %v16761_v40  ;;  %v12838_v40 = vld [vmem:[#allocation4 + $0x1b8] sm:$0xf0] }
 0x5db   : > { %v7110_v10 = vpop.f32.mrf.mxu2  ;;  %v12841_v37 = vor.u32 %v14593_v63, %v12838_v40 }
 0x5dc   : > { %6591 = vmatmul.bf16.gmra.mxu1 %v12639_v4  ;;  %v7111_v54 = vadd.f32 %v7110_v10, %v7021_v7  ;;  %v14513_v7 = vld [vmem:[#allocation2 + $0x1c4] sm:$0xf]  ;;  %v14596_v10 = vld [vmem:[#allocation4 + $0x1c4] sm:$0xf0] }
 0x5dd   : > { %v7023_v24 = vpop.f32.mrf.mxu0  ;;  %v12651_v4 = vor.u32 %v14513_v7, %v12648_v48 }
 0x5de   : > { %12723 = vmatmul.msk.bf16.gmra.mxu3 %vm1458_vm3, %v12643_v20  ;;  %v16975_v1 = vadd.f32 %v7111_v54, %v6637_v34  ;;  %v12844_v20 = vld [vmem:[#allocation4 + $0x1c0] sm:$0xf] }
 0x5e1   : > { %v6641_v2 = vpop.f32.mrf.mxu3  ;;  %v6554_v61 = vpop.f32.mrf.mxu1 }
 0x5e2   : > { %v6642_v47 = vadd.f32 %v6641_v2, %v6553_v43  ;;  %v6555_v26 = vadd.f32 %v6554_v61, %v16769_v52  ;;  %v12647_v52 = vor.u32 %v14514_v16, %v12646_v33 }
 0x5e3   : > { %v7112_v32 = vpop.f32.mrf.mxu2 }
 0x5e4   : > { %v7113_v44 = vadd.f32 %v7112_v32, %v7023_v24  ;;  %v14516_v32 = vld [vmem:[#allocation2 + $0x1d4] sm:$0xf0] }
 0x5e5   : > { %v7026_v34 = vpop.f32.mrf.mxu0 }
 0x5e6   : > { %v16984_v11 = vadd.f32 %v7113_v44, %v6639_v56  ;;  %v12656_v44 = vld [vmem:[#allocation2 + $0x1d8] sm:$0xf0] }
 0x5e8   : > { %7065 = vmatmul.bf16.gmra.mxu0 %v12837_v35  ;;  %12921 = vmatmul.msk.bf16.gmra.mxu2 %vm1458_vm3, %v12841_v37 }
 0x5e9   : > { %v6643_v59 = vpop.f32.mrf.mxu3  ;;  %v6557_v38 = vpop.f32.mrf.mxu1 }
 0x5ea   : > { %v6644_v49 = vadd.f32 %v6643_v59, %v6555_v26  ;;  %v6558_v17 = vadd.f32 %v6557_v38, %v16778_v29  ;;  %v12845_v29 = vor.u32 %v14596_v10, %v12844_v20  ;;  %v12849_v26 = vor.u32 %v14595_v25, %v12846_v42 }
 0x5eb   : > { %v7115_v41 = vpop.f32.mrf.mxu2 }
 0x5ec   : > { %6596 = vmatmul.bf16.gmra.mxu1 %v12647_v52  ;;  %v7116_v30 = vadd.f32 %v7115_v41, %v7026_v34  ;;  %v12655_v34 = vor.u32 %v14516_v32, %v12654_v36 }
 0x5ed   : > { %v7028_v43 = vpop.f32.mrf.mxu0 }
 0x5ee   : > { %12724 = vmatmul.msk.bf16.gmra.mxu3 %vm1458_vm3, %v12651_v4  ;;  %v16989_v56 = vadd.f32 %v7116_v30, %v6642_v47  ;;  %v14515_v47 = vld [vmem:[#allocation2 + $0x1d4] sm:$0xf]  ;;  %v14598_v4 = vld [vmem:[#allocation4 + $0x1d4] sm:$0xf0] }
 0x5ef   : > { %v12659_v7 = vor.u32 %v14515_v47, %v12656_v44 }
 0x5f1   : > { %v6646_v54 = vpop.f32.mrf.mxu3  ;;  %v6559_v24 = vpop.f32.mrf.mxu1 }
 0x5f2   : > { %v6647_v46 = vadd.f32 %v6646_v54, %v6558_v17  ;;  %v6560_v2 = vadd.f32 %v6559_v24, %v16787_v0  ;;  %v12852_v17 = vld [vmem:[#allocation4 + $0x1d0] sm:$0xf]  ;;  %v14685_v54 = vld [vmem:[%s17884_s6 + $0x120] sm:$0xff] }
 0x5f3   : > { %v7117_v61 = vpop.f32.mrf.mxu2  ;;  %v12853_v25 = vor.u32 %v14598_v4, %v12852_v17  ;;  %8021 = vmatpush.bf16.msra.mxu0 %v14685_v54  ;;  %v12862_v17 = vld [vmem:[#allocation4 + $0x1e8] sm:$0xf0]  ;;  %v12670_v54 = vld [vmem:[#allocation2 + $0x1f0] sm:$0xf] }
 0x5f4   : > { %v7118_v63 = vadd.f32 %v7117_v61, %v7028_v43  ;;  %v14597_v43 = vld [vmem:[#allocation4 + $0x1d4] sm:$0xf]  ;;  %v12662_v61 = vld [vmem:[#allocation2 + $0x1e0] sm:$0xf] }
 0x5f5   : > { %v7031_v40 = vpop.f32.mrf.mxu0 }
 0x5f6   : > { %v16992_v35 = vadd.f32 %v7118_v63, %v6644_v49  ;;  %v14644_v49 = vld [vmem:[%s17884_s6 + $0xd8] sm:$0xff] }
 0x5f7   : > { %7515 = vmatpush.bf16.msra.mxu1 %v14644_v49  ;;  %v14599_v49 = vld [vmem:[#allocation4 + $0x1e4] sm:$0xf] }
 0x5f8   : > { %7070 = vmatmul.bf16.gmra.mxu0 %v12845_v29  ;;  %12922 = vmatmul.msk.bf16.gmra.mxu2 %vm1458_vm3, %v12849_v26  ;;  %v14518_v29 = vld [vmem:[#allocation2 + $0x1e4] sm:$0xf0]  ;;  %v12664_v26 = vld [vmem:[#allocation2 + $0x1e8] sm:$0xf0] }
 0x5f9   : > { %v6648_v37 = vpop.f32.mrf.mxu3  ;;  %v6562_v33 = vpop.f32.mrf.mxu1 }
 0x5fa   : > { %v6649_v16 = vadd.f32 %v6648_v37, %v6560_v2  ;;  %v6563_v0 = vadd.f32 %v6562_v33, %v16795_v12  ;;  %v12854_v12 = vld [vmem:[#allocation4 + $0x1d8] sm:$0xf0] }
 0x5fb   : > { %v7120_v48 = vpop.f32.mrf.mxu2  ;;  %v12857_v2 = vor.u32 %v14597_v43, %v12854_v12 }
 0x5fc   : > { %6601 = vmatmul.bf16.gmra.mxu1 %v12655_v34  ;;  %v7121_v52 = vadd.f32 %v7120_v48, %v7031_v40  ;;  %v14517_v40 = vld [vmem:[#allocation2 + $0x1e4] sm:$0xf]  ;;  %v14600_v48 = vld [vmem:[#allocation4 + $0x1e4] sm:$0xf0] }
 0x5fd   : > { %v7033_v59 = vpop.f32.mrf.mxu0  ;;  %v12667_v34 = vor.u32 %v14517_v40, %v12664_v26  ;;  %v14734_v26 = vld [vmem:[%s17884_s6 + $0x1a8] sm:$0xff] }
 0x5fe   : > { %12725 = vmatmul.msk.bf16.gmra.mxu3 %vm1458_vm3, %v12659_v7  ;;  %v16997_v38 = vadd.f32 %v7121_v52, %v6647_v46  ;;  %v12860_v7 = vld [vmem:[#allocation4 + $0x1e0] sm:$0xf] }
 0x5ff   : > { %8616 = vmatpush.bf16.msrb.mxu3 %v14734_v26 }
 0x601   : > { %v6651_v41 = vpop.f32.mrf.mxu3  ;;  %v6564_v30 = vpop.f32.mrf.mxu1 }
 0x602   : > { %v6652_v20 = vadd.f32 %v6651_v41, %v6563_v0  ;;  %v6565_v10 = vadd.f32 %v6564_v30, %v16801_v3  ;;  %v12663_v3 = vor.u32 %v14518_v29, %v12662_v61 }
 0x603   : > { %v7122_v24 = vpop.f32.mrf.mxu2 }
 0x604   : > { %v7123_v42 = vadd.f32 %v7122_v24, %v7033_v59  ;;  %v14520_v24 = vld [vmem:[#allocation2 + $0x1f4] sm:$0xf0] }
 0x605   : > { %v7036_v46 = vpop.f32.mrf.mxu0 }
 0x606   : > { %v17006_v63 = vadd.f32 %v7123_v42, %v6649_v16  ;;  %v12672_v42 = vld [vmem:[#allocation2 + $0x1f8] sm:$0xf0] }
 0x608   : > { %7075 = vmatmul.bf16.gmra.mxu0 %v12853_v25  ;;  %12923 = vmatmul.msk.bf16.gmra.mxu2 %vm1458_vm3, %v12857_v2 }
 0x609   : > { %v6653_v36 = vpop.f32.mrf.mxu3  ;;  %v6567_v32 = vpop.f32.mrf.mxu1 }
 0x60a   : > { %v6654_v47 = vadd.f32 %v6653_v36, %v6565_v10  ;;  %v6568_v44 = vadd.f32 %v6567_v32, %v16806_v57  ;;  %v12861_v57 = vor.u32 %v14600_v48, %v12860_v7  ;;  %v12865_v10 = vor.u32 %v14599_v49, %v12862_v17  ;;  %v14601_v7 = vld [vmem:[#allocation4 + $0x1f4] sm:$0xf]  ;;  %v12870_v48 = vld [vmem:[#allocation4 + $0x1f8] sm:$0xf0]  ;;  %v14774_v49 = vld [vmem:[%s17884_s6 + $0x1e8] sm:$0xff] }
 0x60b   : > { %v7125_v37 = vpop.f32.mrf.mxu2  ;;  %9026 = vmatpush.bf16.msrb.mxu0 %v14774_v49  ;;  %v12954_v49 = vld [vmem:[#allocation2 + $0x190] sm:$0xf] }
 0x60c   : > { %6606 = vmatmul.bf16.gmra.mxu1 %v12663_v3  ;;  %v7126_v33 = vadd.f32 %v7125_v37, %v7036_v46  ;;  %v12671_v46 = vor.u32 %v14520_v24, %v12670_v54  ;;  %v14775_v3 = vld [vmem:[%s17884_s6 + $0x1f0] sm:$0xff]  ;;  %v14602_v37 = vld [vmem:[#allocation4 + $0x1f4] sm:$0xf0]  ;;  %v14612_v54 = vld [vmem:[#allocation2 + $0x184] sm:$0xf] }
 0x60d   : > { %v7038_v0 = vpop.f32.mrf.mxu0  ;;  %9122 = vmatpush.bf16.msrb.mxu2 %v14775_v3  ;;  %v12948_v24 = vld [vmem:[#allocation2 + $0x188] sm:$0xf0] }
 0x60e   : > { %12726 = vmatmul.msk.bf16.gmra.mxu3 %vm1458_vm3, %v12667_v34  ;;  %v17011_v16 = vadd.f32 %v7126_v33, %v6652_v20  ;;  %v14519_v20 = vld [vmem:[#allocation2 + $0x1f4] sm:$0xf]  ;;  %v12868_v34 = vld [vmem:[#allocation4 + $0x1f0] sm:$0xf] }
 0x60f   : > { %v12675_v40 = vor.u32 %v14519_v20, %v12672_v42 }
 0x611   : > { %v6656_v52 = vpop.f32.mrf.mxu3  ;;  %v6569_v59 = vpop.f32.mrf.mxu1 }
 0x612   : > { %v6657_v4 = vadd.f32 %v6656_v52, %v6568_v44  ;;  %v6570_v41 = vadd.f32 %v6569_v59, %v16821_v21 }
 0x613   : > { %v7127_v30 = vpop.f32.mrf.mxu2 }
 0x614   : > { %v7128_v43 = vadd.f32 %v7127_v30, %v7038_v0 }
 0x615   : > { %v7041_v12 = vpop.f32.mrf.mxu0 }
 0x616   : > { %v17014_v25 = vadd.f32 %v7128_v43, %v6654_v47  ;;  %v12946_v43 = vld [vmem:[#allocation2 + $0x180] sm:$0xf] }
 0x618   : > { %7080 = vmatmul.bf16.gmra.mxu0 %v12861_v57  ;;  %12924 = vmatmul.msk.bf16.gmra.mxu2 %vm1458_vm3, %v12865_v10  ;;  %v12873_v57 = vor.u32 %v14601_v7, %v12870_v48 }
 0x619   : > { %v6658_v2 = vpop.f32.mrf.mxu3  ;;  %v6572_v61 = vpop.f32.mrf.mxu1 }
 0x61a   : > { %v6659_v29 = vadd.f32 %v6658_v2, %v6570_v41  ;;  %v6573_v21 = vadd.f32 %v6572_v61, %v16829_v58  ;;  %v14733_v58 = vld [vmem:[%s17884_s6 + $0x1a0] sm:$0xff]  ;;  %v12951_v61 = vor.u32 %v14612_v54, %v12948_v24 }
 0x61b   : > { %v7130_v36 = vpop.f32.mrf.mxu2  ;;  %8520 = vmatpush.bf16.msrb.mxu1 %v14733_v58  ;;  %v14653_v58 = vld [vmem:[#allocation3 + $0x184] sm:$0xf] }
 0x61c   : > { %6611 = vmatmul.bf16.gmra.mxu1 %v12671_v46  ;;  %v7131_v32 = vadd.f32 %v7130_v36, %v7041_v12  ;;  %v14613_v12 = vld [vmem:[#allocation2 + $0x184] sm:$0xf0] }
 0x61d   : > { %v7043_v47 = vpop.f32.mrf.mxu0  ;;  %v14654_v36 = vld [vmem:[#allocation3 + $0x184] sm:$0xf0] }
 0x61e   : > { %12727 = vmatmul.msk.bf16.gmra.mxu3 %vm1458_vm3, %v12675_v40  ;;  %v17025_v44 = vadd.f32 %v7131_v32, %v6657_v4  ;;  %v12869_v4 = vor.u32 %v14602_v37, %v12868_v34  ;;  %v13146_v34 = vld [vmem:[#allocation3 + $0x188] sm:$0xf0] }
 0x621   : > { %v6661_v33 = vpop.f32.mrf.mxu3  ;;  %v6574_v0 = vpop.f32.mrf.mxu1 }
 0x622   : > { %v6662_v52 = vadd.f32 %v6661_v33, %v6573_v21  ;;  %v6575_v59 = vadd.f32 %v6574_v0, %v16835_v27  ;;  %v12947_v27 = vor.u32 %v14613_v12, %v12946_v43 }
 0x623   : > { %v7132_v17 = vpop.f32.mrf.mxu2 }
 0x624   : > { %v7133_v41 = vadd.f32 %v7132_v17, %v7043_v47  ;;  %v14615_v17 = vld [vmem:[#allocation2 + $0x194] sm:$0xf0] }
 0x625   : > { %v7046_v30 = vpop.f32.mrf.mxu0 }
 0x626   : > { %v17034_v10 = vadd.f32 %v7133_v41, %v6659_v29  ;;  %v13144_v29 = vld [vmem:[#allocation3 + $0x180] sm:$0xf]  ;;  %v12956_v41 = vld [vmem:[#allocation2 + $0x198] sm:$0xf0] }
 0x628   : > { %7085 = vmatmul.bf16.gmra.mxu0 %v12869_v4  ;;  %12925 = vmatmul.msk.bf16.gmra.mxu2 %vm1458_vm3, %v12873_v57  ;;  %v14614_v4 = vld [vmem:[#allocation2 + $0x194] sm:$0xf] }
 0x629   : > { %v6663_v20 = vpop.f32.mrf.mxu3  ;;  %v6577_v42 = vpop.f32.mrf.mxu1  ;;  %v12959_v54 = vor.u32 %v14614_v4, %v12956_v41 }
 0x62a   : > { %v6664_v46 = vadd.f32 %v6663_v20, %v6575_v59  ;;  %v6578_v2 = vadd.f32 %v6577_v42, %v16840_v51  ;;  %v13145_v51 = vor.u32 %v14654_v36, %v13144_v29  ;;  %v13149_v59 = vor.u32 %v14653_v58, %v13146_v34 }
 0x62b   : > { %v7135_v21 = vpop.f32.mrf.mxu2 }
 0x62c   : > { %v7136_v40 = vadd.f32 %v7135_v21, %v7046_v30  ;;  %7516 = vmatmul.bf16.vlgmr.msra.gmra.mxu1 %v12947_v27  ;;  %v12955_v30 = vor.u32 %v14615_v17, %v12954_v49 }
 0x62d   : > { %v7048_v26 = vpop.f32.mrf.mxu0 }
 0x62e   : > { %v17038_v3 = vadd.f32 %v7136_v40, %v6662_v52  ;;  %13108 = vmatmul.msk.bf16.vlgmr.msra.gmra.mxu3 %vm1458_vm3, %v12951_v61  ;;  %v14656_v61 = vld [vmem:[#allocation3 + $0x194] sm:$0xf0] }
 0x631   : > { %v6666_v32 = vpop.f32.mrf.mxu3  ;;  %v6579_v47 = vpop.f32.mrf.mxu1 }
 0x632   : > { %v6667_v37 = vadd.f32 %v6666_v32, %v6578_v2  ;;  %v6580_v33 = vadd.f32 %v6579_v47, %v16849_v31  ;;  %v13152_v2 = vld [vmem:[#allocation3 + $0x190] sm:$0xf]  ;;  %v14773_v32 = vld [vmem:[%s17884_s6 + $0x1e0] sm:$0xff] }
 0x633   : > { %v7137_v0 = vpop.f32.mrf.mxu2  ;;  %v13153_v58 = vor.u32 %v14656_v61, %v13152_v2  ;;  %9027 = vmatpush.bf16.msrb.mxu0 %v14773_v32  ;;  %v13162_v2 = vld [vmem:[#allocation3 + $0x1a8] sm:$0xf0]  ;;  %v12970_v32 = vld [vmem:[#allocation2 + $0x1b0] sm:$0xf] }
 0x634   : > { %v7138_v7 = vadd.f32 %v7137_v0, %v7048_v26  ;;  %v14655_v26 = vld [vmem:[#allocation3 + $0x194] sm:$0xf]  ;;  %v12962_v0 = vld [vmem:[#allocation2 + $0x1a0] sm:$0xf] }
 0x635   : > { %v7051_v48 = vpop.f32.mrf.mxu0 }
 0x636   : > { %v17042_v52 = vadd.f32 %v7138_v7, %v6664_v46  ;;  %v14732_v46 = vld [vmem:[%s17884_s6 + $0x198] sm:$0xff] }
 0x637   : > { %8521 = vmatpush.bf16.msrb.mxu1 %v14732_v46  ;;  %v14657_v46 = vld [vmem:[#allocation3 + $0x1a4] sm:$0xf] }
 0x638   : > { %8022 = vmatmul.bf16.vlgmr.msra.gmra.mxu0 %v13145_v51  ;;  %13306 = vmatmul.msk.bf16.vlgmr.msra.gmra.mxu2 %vm1458_vm3, %v13149_v59  ;;  %v14617_v51 = vld [vmem:[#allocation2 + $0x1a4] sm:$0xf0]  ;;  %v12964_v59 = vld [vmem:[#allocation2 + $0x1a8] sm:$0xf0] }
 0x639   : > { %v6668_v57 = vpop.f32.mrf.mxu3  ;;  %v6582_v43 = vpop.f32.mrf.mxu1 }
 0x63a   : > { %v6669_v12 = vadd.f32 %v6668_v57, %v6580_v33  ;;  %v6583_v31 = vadd.f32 %v6582_v43, %v16857_v18  ;;  %v13154_v18 = vld [vmem:[#allocation3 + $0x198] sm:$0xf0] }
 0x63b   : > { %v7140_v24 = vpop.f32.mrf.mxu2  ;;  %v13157_v33 = vor.u32 %v14655_v26, %v13154_v18 }
 0x63c   : > { %v7141_v27 = vadd.f32 %v7140_v24, %v7051_v48  ;;  %7521 = vmatmul.bf16.gmra.mxu1 %v12955_v30  ;;  %v14616_v48 = vld [vmem:[#allocation2 + $0x1a4] sm:$0xf]  ;;  %v14658_v24 = vld [vmem:[#allocation3 + $0x1a4] sm:$0xf0] }
 0x63d   : > { %v7053_v20 = vpop.f32.mrf.mxu0  ;;  %v12967_v30 = vor.u32 %v14616_v48, %v12964_v59 }
 0x63e   : > { %v17046_v42 = vadd.f32 %v7141_v27, %v6667_v37  ;;  %13109 = vmatmul.msk.bf16.gmra.mxu3 %vm1458_vm3, %v12959_v54 }
 0x641   : > { %v6671_v21 = vpop.f32.mrf.mxu3  ;;  %v6584_v40 = vpop.f32.mrf.mxu1 }
 0x642   : > { %v6672_v29 = vadd.f32 %v6671_v21, %v6583_v31  ;;  %v6585_v36 = vadd.f32 %v6584_v40, %v16863_v39  ;;  %v12963_v39 = vor.u32 %v14617_v51, %v12962_v0 }
 0x643   : > { %v7142_v47 = vpop.f32.mrf.mxu2 }
 0x644   : > { %v7143_v34 = vadd.f32 %v7142_v47, %v7053_v20  ;;  %v14619_v47 = vld [vmem:[#allocation2 + $0x1b4] sm:$0xf0] }
 0x645   : > { %v7056_v37 = vpop.f32.mrf.mxu0 }
 0x646   : > { %v17056_v7 = vadd.f32 %v7143_v34, %v6669_v12  ;;  %v13160_v12 = vld [vmem:[#allocation3 + $0x1a0] sm:$0xf]  ;;  %v12972_v34 = vld [vmem:[#allocation2 + $0x1b8] sm:$0xf0] }
 0x648   : > { %8027 = vmatmul.bf16.gmra.mxu0 %v13153_v58  ;;  %13307 = vmatmul.msk.bf16.gmra.mxu2 %vm1458_vm3, %v13157_v33  ;;  %v14618_v58 = vld [vmem:[#allocation2 + $0x1b4] sm:$0xf] }
 0x649   : > { %v6673_v49 = vpop.f32.mrf.mxu3  ;;  %v6587_v17 = vpop.f32.mrf.mxu1  ;;  %v12975_v48 = vor.u32 %v14618_v58, %v12972_v34 }
 0x64a   : > { %v6674_v4 = vadd.f32 %v6673_v49, %v6585_v36  ;;  %v6588_v41 = vadd.f32 %v6587_v17, %v16868_v8  ;;  %v13161_v8 = vor.u32 %v14658_v24, %v13160_v12  ;;  %v13165_v36 = vor.u32 %v14657_v46, %v13162_v2 }
 0x64b   : > { %v7145_v57 = vpop.f32.mrf.mxu2 }
 0x64c   : > { %v7146_v43 = vadd.f32 %v7145_v57, %v7056_v37  ;;  %7526 = vmatmul.bf16.gmra.mxu1 %v12963_v39  ;;  %v12971_v37 = vor.u32 %v14619_v47, %v12970_v32 }
 0x64d   : > { %v7058_v31 = vpop.f32.mrf.mxu0 }
 0x64e   : > { %v17060_v54 = vadd.f32 %v7146_v43, %v6672_v29  ;;  %13110 = vmatmul.msk.bf16.gmra.mxu3 %vm1458_vm3, %v12967_v30  ;;  %v14660_v30 = vld [vmem:[#allocation3 + $0x1b4] sm:$0xf0] }
 0x651   : > { %v6676_v27 = vpop.f32.mrf.mxu3  ;;  %v6589_v20 = vpop.f32.mrf.mxu1 }
 0x652   : > { %v6677_v61 = vadd.f32 %v6676_v27, %v6588_v41  ;;  %v6590_v21 = vadd.f32 %v6589_v20, %v16877_v15  ;;  %v13168_v41 = vld [vmem:[#allocation3 + $0x1b0] sm:$0xf]  ;;  %v14772_v27 = vld [vmem:[%s17884_s6 + $0x1d8] sm:$0xff] }
 0x653   : > { %v7147_v40 = vpop.f32.mrf.mxu2  ;;  %v13169_v46 = vor.u32 %v14660_v30, %v13168_v41  ;;  %9028 = vmatpush.bf16.msrb.mxu0 %v14772_v27  ;;  %v13178_v41 = vld [vmem:[#allocation3 + $0x1c8] sm:$0xf0]  ;;  %v14623_v27 = vld [vmem:[#allocation2 + $0x1d4] sm:$0xf0] }
 0x654   : > { %v7148_v26 = vadd.f32 %v7147_v40, %v7058_v31  ;;  %v14659_v31 = vld [vmem:[#allocation3 + $0x1b4] sm:$0xf]  ;;  %v12978_v40 = vld [vmem:[#allocation2 + $0x1c0] sm:$0xf] }
 0x655   : > { %v7061_v18 = vpop.f32.mrf.mxu0 }
 0x656   : > { %v17064_v29 = vadd.f32 %v7148_v26, %v6674_v4  ;;  %v14731_v4 = vld [vmem:[%s17884_s6 + $0x190] sm:$0xff] }
 0x657   : > { %8522 = vmatpush.bf16.msrb.mxu1 %v14731_v4  ;;  %v14661_v4 = vld [vmem:[#allocation3 + $0x1c4] sm:$0xf] }
 0x658   : > { %8032 = vmatmul.bf16.gmra.mxu0 %v13161_v8  ;;  %13308 = vmatmul.msk.bf16.gmra.mxu2 %vm1458_vm3, %v13165_v36  ;;  %v14621_v8 = vld [vmem:[#allocation2 + $0x1c4] sm:$0xf0]  ;;  %v12980_v36 = vld [vmem:[#allocation2 + $0x1c8] sm:$0xf0] }
 0x659   : > { %v6678_v33 = vpop.f32.mrf.mxu3  ;;  %v6592_v0 = vpop.f32.mrf.mxu1 }
 0x65a   : > { %v6679_v51 = vadd.f32 %v6678_v33, %v6590_v21  ;;  %v6593_v15 = vadd.f32 %v6592_v0, %v16885_v14  ;;  %v13170_v14 = vld [vmem:[#allocation3 + $0x1b8] sm:$0xf0] }
 0x65b   : > { %v7150_v59 = vpop.f32.mrf.mxu2  ;;  %v13173_v21 = vor.u32 %v14659_v31, %v13170_v14 }
 0x65c   : > { %v7151_v39 = vadd.f32 %v7150_v59, %v7061_v18  ;;  %7531 = vmatmul.bf16.gmra.mxu1 %v12971_v37  ;;  %v14620_v18 = vld [vmem:[#allocation2 + $0x1c4] sm:$0xf]  ;;  %v14662_v59 = vld [vmem:[#allocation3 + $0x1c4] sm:$0xf0] }
 0x65d   : > { %v7063_v49 = vpop.f32.mrf.mxu0  ;;  %v12983_v37 = vor.u32 %v14620_v18, %v12980_v36 }
 0x65e   : > { %v17068_v17 = vadd.f32 %v7151_v39, %v6677_v61  ;;  %13111 = vmatmul.msk.bf16.gmra.mxu3 %vm1458_vm3, %v12975_v48 }
 0x661   : > { %v6681_v57 = vpop.f32.mrf.mxu3  ;;  %v6594_v43 = vpop.f32.mrf.mxu1 }
 0x662   : > { %v6682_v12 = vadd.f32 %v6681_v57, %v6593_v15  ;;  %v6595_v24 = vadd.f32 %v6594_v43, %v16891_v13  ;;  %v12979_v13 = vor.u32 %v14621_v8, %v12978_v40 }
 0x663   : > { %v7152_v20 = vpop.f32.mrf.mxu2 }
 0x664   : > { %v7153_v2 = vadd.f32 %v7152_v20, %v7063_v49 }
 0x665   : > { %v7066_v61 = vpop.f32.mrf.mxu0 }
 0x666   : > { %v17078_v26 = vadd.f32 %v7153_v2, %v6679_v51  ;;  %v13176_v51 = vld [vmem:[#allocation3 + $0x1c0] sm:$0xf]  ;;  %v12988_v2 = vld [vmem:[#allocation2 + $0x1d8] sm:$0xf0] }
 0x667   : > { %v13177_v43 = vor.u32 %v14662_v59, %v13176_v51 }
 0x668   : > { %8037 = vmatmul.bf16.gmra.mxu0 %v13169_v46  ;;  %13309 = vmatmul.msk.bf16.gmra.mxu2 %vm1458_vm3, %v13173_v21  ;;  %v14622_v46 = vld [vmem:[#allocation2 + $0x1d4] sm:$0xf] }
 0x669   : > { %v6683_v32 = vpop.f32.mrf.mxu3  ;;  %v6597_v47 = vpop.f32.mrf.mxu1  ;;  %v12991_v18 = vor.u32 %v14622_v46, %v12988_v2 }
 0x66a   : > { %v6684_v58 = vadd.f32 %v6683_v32, %v6595_v24  ;;  %v6598_v34 = vadd.f32 %v6597_v47, %v16896_v53  ;;  %v12986_v24 = vld [vmem:[#allocation2 + $0x1d0] sm:$0xf] }
 0x66b   : > { %v7155_v33 = vpop.f32.mrf.mxu2 }
 0x66c   : > { %v7156_v0 = vadd.f32 %v7155_v33, %v7066_v61  ;;  %7536 = vmatmul.bf16.gmra.mxu1 %v12979_v13  ;;  %v12987_v61 = vor.u32 %v14623_v27, %v12986_v24  ;;  %v12996_v24 = vld [vmem:[#allocation2 + $0x1e8] sm:$0xf0] }
 0x66d   : > { %v7068_v15 = vpop.f32.mrf.mxu0 }
 0x66e   : > { %v17083_v48 = vadd.f32 %v7156_v0, %v6682_v12  ;;  %13112 = vmatmul.msk.bf16.gmra.mxu3 %vm1458_vm3, %v12983_v37  ;;  %v13181_v12 = vor.u32 %v14661_v4, %v13178_v41  ;;  %v14664_v37 = vld [vmem:[#allocation3 + $0x1d4] sm:$0xf0]  ;;  %v14663_v0 = vld [vmem:[#allocation3 + $0x1d4] sm:$0xf]  ;;  %v711_v41 = vld [vmem:[%s17101_s16] sm:$0xff] }
 0x66f   : > { %727 = vst.msk [vmem:[#allocation2 + $0x200] sm:$0xff] %vm15383_vm2, %v711_v41  ;;  %v13002_v41 = vld [vmem:[#allocation2 + $0x1f0] sm:$0xf] }
 0x671   : > { %v6686_v39 = vpop.f32.mrf.mxu3  ;;  %v6599_v49 = vpop.f32.mrf.mxu1 }
 0x672   : > { %v6687_v30 = vadd.f32 %v6686_v39, %v6598_v34  ;;  %v6600_v53 = vadd.f32 %v6599_v49, %v16905_v62  ;;  %v13184_v34 = vld [vmem:[#allocation3 + $0x1d0] sm:$0xf] }
 0x673   : > { %v7157_v57 = vpop.f32.mrf.mxu2  ;;  %v14771_v39 = vld [vmem:[%s17884_s6 + $0x1d0] sm:$0xff]  ;;  %v13185_v4 = vor.u32 %v14664_v37, %v13184_v34  ;;  %v14666_v34 = vld [vmem:[#allocation3 + $0x1e4] sm:$0xf0] }
 0x674   : > { %v7158_v31 = vadd.f32 %v7157_v57, %v7068_v15  ;;  %v13186_v15 = vld [vmem:[#allocation3 + $0x1d8] sm:$0xf0]  ;;  %9029 = vmatpush.bf16.msrb.mxu0 %v14771_v39 }
 0x675   : > { %v7071_v14 = vpop.f32.mrf.mxu0 }
 0x676   : > { %v17087_v20 = vadd.f32 %v7158_v31, %v6684_v58  ;;  %v14730_v58 = vld [vmem:[%s17884_s6 + $0x188] sm:$0xff]  ;;  %v12994_v31 = vld [vmem:[#allocation2 + $0x1e0] sm:$0xf] }
 0x677   : > { %8523 = vmatpush.bf16.msrb.mxu1 %v14730_v58  ;;  %v13192_v58 = vld [vmem:[#allocation3 + $0x1e0] sm:$0xf] }
 0x678   : > { %8042 = vmatmul.bf16.gmra.mxu0 %v13177_v43  ;;  %13310 = vmatmul.msk.bf16.gmra.mxu2 %vm1458_vm3, %v13181_v12  ;;  %v13189_v43 = vor.u32 %v14663_v0, %v13186_v15  ;;  %v14624_v12 = vld [vmem:[#allocation2 + $0x1e4] sm:$0xf] }
 0x679   : > { %v6688_v21 = vpop.f32.mrf.mxu3  ;;  %v6602_v62 = vpop.f32.mrf.mxu1 }
 0x67a   : > { %v6689_v40 = vadd.f32 %v6688_v21, %v6600_v53  ;;  %v6603_v8 = vadd.f32 %v6602_v62, %v16913_v19  ;;  %v12999_v62 = vor.u32 %v14624_v12, %v12996_v24 }
 0x67b   : > { %v7160_v36 = vpop.f32.mrf.mxu2 }
 0x67c   : > { %v7161_v13 = vadd.f32 %v7160_v36, %v7071_v14  ;;  %7541 = vmatmul.bf16.gmra.mxu1 %v12987_v61  ;;  %v14625_v14 = vld [vmem:[#allocation2 + $0x1e4] sm:$0xf0] }
 0x67d   : > { %v7073_v32 = vpop.f32.mrf.mxu0  ;;  %v12995_v27 = vor.u32 %v14625_v14, %v12994_v31 }
 0x67e   : > { %v17092_v47 = vadd.f32 %v7161_v13, %v6687_v30  ;;  %13113 = vmatmul.msk.bf16.gmra.mxu3 %vm1458_vm3, %v12991_v18  ;;  %v712_v30 = vld [vmem:[%s17101_s16 + $0x8] sm:$0xff]  ;;  %v903_v13 = vld [vmem:[%s17101_s16 + $0x10] sm:$0xff] }
 0x67f   : > { %728 = vst.msk [vmem:[#allocation2 + $0x208] sm:$0xff] %vm15383_vm2, %v712_v30  ;;  %v14627_v30 = vld [vmem:[#allocation2 + $0x1f4] sm:$0xf0] }
 0x680   : > { %919 = vst.msk [vmem:[#allocation3 + $0x200] sm:$0xff] %vm15383_vm2, %v903_v13 }
 0x681   : > { %v6691_v19 = vpop.f32.mrf.mxu3  ;;  %v6604_v33 = vpop.f32.mrf.mxu1  ;;  %729 = vst.msk [vmem:[#allocation2 + $0x210] sm:$0xff] %vm15383_vm2, %v903_v13  ;;  %v14668_v13 = vld [vmem:[#allocation3 + $0x1f4] sm:$0xf0] }
 0x682   : > { %v6692_v51 = vadd.f32 %v6691_v19, %v6603_v8  ;;  %v6605_v59 = vadd.f32 %v6604_v33, %v16919_v23  ;;  %v14665_v33 = vld [vmem:[#allocation3 + $0x1e4] sm:$0xf] }
 0x683   : > { %v7162_v49 = vpop.f32.mrf.mxu2 }
 0x684   : > { %v7163_v53 = vadd.f32 %v7162_v49, %v7073_v32  ;;  %v904_v32 = vld [vmem:[%s17101_s16 + $0x18] sm:$0xff] }
 0x685   : > { %v7076_v57 = vpop.f32.mrf.mxu0  ;;  %920 = vst.msk [vmem:[#allocation3 + $0x208] sm:$0xff] %vm15383_vm2, %v904_v32 }
 0x686   : > { %v17113_v23 = vadd.f32 %v7163_v53, %v6689_v40  ;;  %730 = vst.msk [vmem:[#allocation2 + $0x218] sm:$0xff] %vm15383_vm2, %v904_v32 }
 0x688   : > { %8047 = vmatmul.bf16.gmra.mxu0 %v13185_v4  ;;  %13311 = vmatmul.msk.bf16.gmra.mxu2 %vm1458_vm3, %v13189_v43  ;;  %v13004_v43 = vld [vmem:[#allocation2 + $0x1f8] sm:$0xf0] }
 0x689   : > { %v6693_v46 = vpop.f32.mrf.mxu3  ;;  %v6607_v2 = vpop.f32.mrf.mxu1 }
 0x68a   : > { %v6694_v61 = vadd.f32 %v6693_v46, %v6605_v59  ;;  %v6608_v21 = vadd.f32 %v6607_v2, %v16924_v60  ;;  %v13194_v60 = vld [vmem:[#allocation3 + $0x1e8] sm:$0xf0]  ;;  %v13193_v59 = vor.u32 %v14666_v34, %v13192_v58  ;;  %v14667_v58 = vld [vmem:[#allocation3 + $0x1f4] sm:$0xf]  ;;  %v13202_v34 = vld [vmem:[#allocation3 + $0x1f8] sm:$0xf0] }
 0x68b   : > { %v7165_v8 = vpop.f32.mrf.mxu2  ;;  %v13197_v4 = vor.u32 %v14665_v33, %v13194_v60 }
 0x68c   : > { %v7166_v18 = vadd.f32 %v7165_v8, %v7076_v57  ;;  %7546 = vmatmul.bf16.gmra.mxu1 %v12995_v27  ;;  %v14626_v57 = vld [vmem:[#allocation2 + $0x1f4] sm:$0xf]  ;;  %v905_v8 = vld [vmem:[%s17101_s16 + $0x20] sm:$0xff] }
 0x68d   : > { %v7078_v36 = vpop.f32.mrf.mxu0  ;;  %v13007_v27 = vor.u32 %v14626_v57, %v13004_v43  ;;  %921 = vst.msk [vmem:[#allocation3 + $0x210] sm:$0xff] %vm15383_vm2, %v905_v8 }
 0x68e   : > { %v17117_v40 = vadd.f32 %v7166_v18, %v6692_v51  ;;  %13114 = vmatmul.msk.bf16.gmra.mxu3 %vm1458_vm3, %v12999_v62  ;;  %v14729_v62 = vld [vmem:[%s17884_s6 + $0x180] sm:$0xff]  ;;  %v906_v18 = vld [vmem:[%s17101_s16 + $0x28] sm:$0xff]  ;;  %731 = vst.msk [vmem:[#allocation2 + $0x220] sm:$0xff] %vm15383_vm2, %v905_v8 }
 0x68f   : > { %8524 = vmatpush.bf16.msrb.mxu1 %v14729_v62  ;;  %922 = vst.msk [vmem:[#allocation3 + $0x218] sm:$0xff] %vm15383_vm2, %v906_v18  ;;  %v14670_v62 = vld [vmem:[#allocation3 + $0x204] sm:$0xf0] }
 0x690   : > { %732 = vst.msk [vmem:[#allocation2 + $0x228] sm:$0xff] %vm15383_vm2, %v906_v18 }
 0x691   : > { %v6696_v37 = vpop.f32.mrf.mxu3  ;;  %v6609_v19 = vpop.f32.mrf.mxu1 }
 0x692   : > { %v6697_v0 = vadd.f32 %v6696_v37, %v6608_v21  ;;  %v6610_v15 = vadd.f32 %v6609_v19, %v16937_v5  ;;  %v13003_v5 = vor.u32 %v14627_v30, %v13002_v41  ;;  %v13012_v41 = vld [vmem:[#allocation2 + $0x208] sm:$0xf0] }
 0x693   : > { %v7167_v51 = vpop.f32.mrf.mxu2 }
 0x694   : > { %v7168_v39 = vadd.f32 %v7167_v51, %v7078_v36  ;;  %v13200_v36 = vld [vmem:[#allocation3 + $0x1f0] sm:$0xf]  ;;  %v13205_v51 = vor.u32 %v14667_v58, %v13202_v34 }
 0x695   : > { %v7081_v49 = vpop.f32.mrf.mxu0  ;;  %v13201_v60 = vor.u32 %v14668_v13, %v13200_v36  ;;  %v14669_v36 = vld [vmem:[#allocation3 + $0x204] sm:$0xf]  ;;  %v13210_v13 = vld [vmem:[#allocation3 + $0x208] sm:$0xf0] }
 0x696   : > { %v17131_v53 = vadd.f32 %v7168_v39, %v6694_v61  ;;  %v13010_v39 = vld [vmem:[#allocation2 + $0x200] sm:$0xf] }
 0x698   : > { %8052 = vmatmul.bf16.gmra.mxu0 %v13193_v59  ;;  %13312 = vmatmul.msk.bf16.gmra.mxu2 %vm1458_vm3, %v13197_v4  ;;  %v14770_v59 = vld [vmem:[%s17884_s6 + $0x1c8] sm:$0xff] }
 0x699   : > { %v6698_v31 = vpop.f32.mrf.mxu3  ;;  %v6612_v14 = vpop.f32.mrf.mxu1  ;;  %9030 = vmatpush.bf16.msrb.mxu0 %v14770_v59  ;;  %v13020_v59 = vld [vmem:[#allocation2 + $0x218] sm:$0xf0] }
 0x69a   : > { %v6699_v12 = vadd.f32 %v6698_v31, %v6610_v15  ;;  %v6613_v24 = vadd.f32 %v6612_v14, %v16943_v6 }
 0x69b   : > { %v7170_v46 = vpop.f32.mrf.mxu2 }
 0x69c   : > { %v7171_v2 = vadd.f32 %v7170_v46, %v7081_v49  ;;  %7551 = vmatmul.bf16.gmra.mxu1 %v13003_v5  ;;  %v14629_v49 = vld [vmem:[#allocation2 + $0x204] sm:$0xf0] }
 0x69d   : > { %v7083_v21 = vpop.f32.mrf.mxu0  ;;  %v13011_v30 = vor.u32 %v14629_v49, %v13010_v39 }
 0x69e   : > { %v17135_v61 = vadd.f32 %v7171_v2, %v6697_v0  ;;  %13115 = vmatmul.msk.bf16.gmra.mxu3 %vm1458_vm3, %v13007_v27  ;;  %v908_v2 = vld [vmem:[%s17101_s16 + $0x38] sm:$0xff] }
 0x69f   : > { %924 = vst.msk [vmem:[#allocation3 + $0x228] sm:$0xff] %vm15383_vm2, %v908_v2 }
 0x6a0   : > { %734 = vst.msk [vmem:[#allocation2 + $0x238] sm:$0xff] %vm15383_vm2, %v908_v2  ;;  %v14672_v2 = vld [vmem:[#allocation3 + $0x214] sm:$0xf0] }
 0x6a1   : > { %v6701_v6 = vpop.f32.mrf.mxu3  ;;  %v6614_v32 = vpop.f32.mrf.mxu1 }
 0x6a2   : > { %v6702_v37 = vadd.f32 %v6701_v6, %v6613_v24  ;;  %v6615_v19 = vadd.f32 %v6614_v32, %v16948_v55  ;;  %v14628_v55 = vld [vmem:[#allocation2 + $0x204] sm:$0xf] }
 0x6a3   : > { %v7172_v33 = vpop.f32.mrf.mxu2  ;;  %v13015_v31 = vor.u32 %v14628_v55, %v13012_v41 }
 0x6a4   : > { %v7173_v0 = vadd.f32 %v7172_v33, %v7083_v21  ;;  %v13208_v21 = vld [vmem:[#allocation3 + $0x200] sm:$0xf]  ;;  %v13213_v33 = vor.u32 %v14669_v36, %v13210_v13 }
 0x6a5   : > { %v7086_v15 = vpop.f32.mrf.mxu0  ;;  %v13209_v58 = vor.u32 %v14670_v62, %v13208_v21  ;;  %v14671_v62 = vld [vmem:[#allocation3 + $0x214] sm:$0xf] }
 0x6a6   : > { %v17155_v4 = vadd.f32 %v7173_v0, %v6699_v12  ;;  %v907_v12 = vld [vmem:[%s17101_s16 + $0x30] sm:$0xff]  ;;  %v14631_v0 = vld [vmem:[#allocation2 + $0x214] sm:$0xf0] }
 0x6a7   : > { %923 = vst.msk [vmem:[#allocation3 + $0x220] sm:$0xff] %vm15383_vm2, %v907_v12 }
 0x6a8   : > { %8057 = vmatmul.bf16.gmra.mxu0 %v13201_v60  ;;  %13313 = vmatmul.msk.bf16.gmra.mxu2 %vm1458_vm3, %v13205_v51  ;;  %733 = vst.msk [vmem:[#allocation2 + $0x230] sm:$0xff] %vm15383_vm2, %v907_v12  ;;  %v13018_v60 = vld [vmem:[#allocation2 + $0x210] sm:$0xf]  ;;  %v14630_v51 = vld [vmem:[#allocation2 + $0x214] sm:$0xf] }
 0x6a9   : > { %v6703_v57 = vpop.f32.mrf.mxu3  ;;  %v7517_v43 = vpop.f32.mrf.mxu1  ;;  %v13019_v39 = vor.u32 %v14631_v0, %v13018_v60  ;;  %v13216_v12 = vld [vmem:[#allocation3 + $0x210] sm:$0xf]  ;;  %v14632_v0 = vld [vmem:[#allocation2 + $0x224] sm:$0xf] }
 0x6aa   : > { %v6704_v5 = vadd.f32 %v6703_v57, %v6615_v19  ;;  %v13217_v13 = vor.u32 %v14672_v2, %v13216_v12 }
 0x6ab   : > { %v7175_v14 = vpop.f32.mrf.mxu2 }
 0x6ac   : > { %v7176_v24 = vadd.f32 %v7175_v14, %v7086_v15  ;;  %7556 = vmatmul.bf16.gmra.mxu1 %v13011_v30  ;;  %v13023_v30 = vor.u32 %v14630_v51, %v13020_v59  ;;  %v14728_v14 = vld [vmem:[%s17884_s6 + $0x178] sm:$0xff]  ;;  %v13028_v51 = vld [vmem:[#allocation2 + $0x228] sm:$0xf0] }
 0x6ad   : > { %v7088_v27 = vpop.f32.mrf.mxu0  ;;  %8525 = vmatpush.bf16.msrb.mxu1 %v14728_v14  ;;  %v912_v14 = vld [vmem:[%s17101_s16 + $0x58] sm:$0xff] }
 0x6ae   : > { %v17158_v46 = vadd.f32 %v7176_v24, %v6702_v37  ;;  %13116 = vmatmul.msk.bf16.gmra.mxu3 %vm1458_vm3, %v13015_v31  ;;  %v909_v24 = vld [vmem:[%s17101_s16 + $0x40] sm:$0xff]  ;;  %928 = vst.msk [vmem:[#allocation3 + $0x248] sm:$0xff] %vm15383_vm2, %v912_v14 }
 0x6af   : > { %925 = vst.msk [vmem:[#allocation3 + $0x230] sm:$0xff] %vm15383_vm2, %v909_v24 }
 0x6b0   : > { %735 = vst.msk [vmem:[#allocation2 + $0x240] sm:$0xff] %vm15383_vm2, %v909_v24  ;;  %v13224_v24 = vld [vmem:[#allocation3 + $0x220] sm:$0xf] }
 0x6b1   : > { %v7606_v8 = vpop.f32.mrf.mxu3  ;;  %v7519_v18 = vpop.f32.mrf.mxu1  ;;  %738 = vst.msk [vmem:[#allocation2 + $0x258] sm:$0xff] %vm15383_vm2, %v912_v14 }
 0x6b2   : > { %v7607_v6 = vadd.f32 %v7606_v8, %v7517_v43  ;;  %v13218_v8 = vld [vmem:[#allocation3 + $0x218] sm:$0xf0] }
 0x6b3   : > { %v7177_v32 = vpop.f32.mrf.mxu2 }
 0x6b4   : > { %v7686_v34 = vadd.f32 %v7607_v6, %v16953_v45  ;;  %v7178_v37 = vadd.f32 %v7177_v32, %v7088_v27  ;;  %v910_v27 = vld [vmem:[%s17101_s16 + $0x48] sm:$0xff] }
 0x6b5   : > { %v8023_v19 = vpop.f32.mrf.mxu0  ;;  %926 = vst.msk [vmem:[#allocation3 + $0x238] sm:$0xff] %vm15383_vm2, %v910_v27 }
 0x6b6   : > { %v17172_v15 = vadd.f32 %v7178_v37, %v6704_v5  ;;  %736 = vst.msk [vmem:[#allocation2 + $0x248] sm:$0xff] %vm15383_vm2, %v910_v27  ;;  %v14769_v37 = vld [vmem:[%s17884_s6 + $0x1c0] sm:$0xff]  ;;  %v14674_v27 = vld [vmem:[#allocation3 + $0x224] sm:$0xf0] }
 0x6b7   : > { %9031 = vmatpush.bf16.msrb.mxu0 %v14769_v37  ;;  %v14634_v37 = vld [vmem:[#allocation2 + $0x234] sm:$0xf] }
 0x6b8   : > { %8062 = vmatmul.bf16.gmra.mxu0 %v13209_v58  ;;  %13314 = vmatmul.msk.bf16.gmra.mxu2 %vm1458_vm3, %v13213_v33  ;;  %v14633_v33 = vld [vmem:[#allocation2 + $0x224] sm:$0xf0] }
 0x6b9   : > { %v7608_v49 = vpop.f32.mrf.mxu3  ;;  %v7522_v55 = vpop.f32.mrf.mxu1 }
 0x6ba   : > { %v7609_v41 = vadd.f32 %v7608_v49, %v7519_v18 }
 0x6bb   : > { %v8112_v45 = vpop.f32.mrf.mxu2 }
 0x6bc   : > { %v7687_v57 = vadd.f32 %v7609_v41, %v16962_v50  ;;  %v8113_v43 = vadd.f32 %v8112_v45, %v8023_v19  ;;  %7561 = vmatmul.bf16.gmra.mxu1 %v13019_v39  ;;  %v13026_v19 = vld [vmem:[#allocation2 + $0x220] sm:$0xf]  ;;  %v14676_v14 = vld [vmem:[#allocation3 + $0x234] sm:$0xf0] }
 0x6bd   : > { %v8025_v31 = vpop.f32.mrf.mxu0 }
 0x6be   : > { %13117 = vmatmul.msk.bf16.gmra.mxu3 %vm1458_vm3, %v13023_v30  ;;  %v17177_v5 = vadd.f32 %v8113_v43, %v7686_v34  ;;  %v13221_v34 = vor.u32 %v14671_v62, %v13218_v8  ;;  %v13225_v8 = vor.u32 %v14674_v27, %v13224_v24  ;;  %v14675_v27 = vld [vmem:[#allocation3 + $0x234] sm:$0xf] }
 0x6c1   : > { %v7611_v50 = vpop.f32.mrf.mxu3  ;;  %v7524_v21 = vpop.f32.mrf.mxu1 }
 0x6c2   : > { %v7612_v18 = vadd.f32 %v7611_v50, %v7522_v55  ;;  %v13031_v55 = vor.u32 %v14632_v0, %v13028_v51  ;;  %v14673_v50 = vld [vmem:[#allocation3 + $0x224] sm:$0xf] }
 0x6c3   : > { %v8114_v36 = vpop.f32.mrf.mxu2 }
 0x6c4   : > { %v7688_v6 = vadd.f32 %v7612_v18, %v16967_v28  ;;  %v8115_v32 = vadd.f32 %v8114_v36, %v8025_v31  ;;  %v13027_v28 = vor.u32 %v14633_v33, %v13026_v19  ;;  %v911_v31 = vld [vmem:[%s17101_s16 + $0x50] sm:$0xff]  ;;  %v13036_v19 = vld [vmem:[#allocation2 + $0x238] sm:$0xf0] }
 0x6c5   : > { %v8028_v58 = vpop.f32.mrf.mxu0  ;;  %927 = vst.msk [vmem:[#allocation3 + $0x240] sm:$0xff] %vm15383_vm2, %v911_v31 }
 0x6c6   : > { %v17196_v60 = vadd.f32 %v8115_v32, %v7687_v57  ;;  %737 = vst.msk [vmem:[#allocation2 + $0x250] sm:$0xff] %vm15383_vm2, %v911_v31  ;;  %v13034_v32 = vld [vmem:[#allocation2 + $0x230] sm:$0xf] }
 0x6c7   : > { %v13232_v31 = vld [vmem:[#allocation3 + $0x230] sm:$0xf] }
 0x6c8   : > { %8067 = vmatmul.bf16.gmra.mxu0 %v13217_v13  ;;  %13315 = vmatmul.msk.bf16.gmra.mxu2 %vm1458_vm3, %v13221_v34 }
 0x6c9   : > { %v7613_v59 = vpop.f32.mrf.mxu3  ;;  %v7527_v39 = vpop.f32.mrf.mxu1 }
 0x6ca   : > { %v7614_v49 = vadd.f32 %v7613_v59, %v7524_v21  ;;  %v13226_v21 = vld [vmem:[#allocation3 + $0x228] sm:$0xf0]  ;;  %v13039_v59 = vor.u32 %v14634_v37, %v13036_v19 }
 0x6cb   : > { %v8117_v41 = vpop.f32.mrf.mxu2  ;;  %v13044_v37 = vld [vmem:[#allocation2 + $0x248] sm:$0xf0] }
 0x6cc   : > { %v7689_v30 = vadd.f32 %v7614_v49, %v16970_v22  ;;  %v8118_v45 = vadd.f32 %v8117_v41, %v8028_v58  ;;  %7566 = vmatmul.bf16.gmra.mxu1 %v13027_v28  ;;  %v14635_v58 = vld [vmem:[#allocation2 + $0x234] sm:$0xf0] }
 0x6cd   : > { %v8030_v43 = vpop.f32.mrf.mxu0  ;;  %v13035_v33 = vor.u32 %v14635_v58, %v13034_v32  ;;  %v14636_v58 = vld [vmem:[#allocation2 + $0x244] sm:$0xf] }
 0x6ce   : > { %13118 = vmatmul.msk.bf16.gmra.mxu3 %vm1458_vm3, %v13031_v55  ;;  %v17201_v57 = vadd.f32 %v8118_v45, %v7688_v6  ;;  %v13229_v6 = vor.u32 %v14673_v50, %v13226_v21  ;;  %v913_v45 = vld [vmem:[%s17101_s16 + $0x60] sm:$0xff]  ;;  %v13233_v21 = vor.u32 %v14676_v14, %v13232_v31 }
 0x6cf   : > { %929 = vst.msk [vmem:[#allocation3 + $0x250] sm:$0xff] %vm15383_vm2, %v913_v45 }
 0x6d0   : > { %739 = vst.msk [vmem:[#allocation2 + $0x260] sm:$0xff] %vm15383_vm2, %v913_v45  ;;  %v13240_v45 = vld [vmem:[#allocation3 + $0x240] sm:$0xf] }
 0x6d1   : > { %v7616_v12 = vpop.f32.mrf.mxu3  ;;  %v7529_v2 = vpop.f32.mrf.mxu1 }
 0x6d2   : > { %v7617_v22 = vadd.f32 %v7616_v12, %v7527_v39  ;;  %v13234_v12 = vld [vmem:[#allocation3 + $0x238] sm:$0xf0] }
 0x6d3   : > { %v8119_v62 = vpop.f32.mrf.mxu2 }
 0x6d4   : > { %v7690_v18 = vadd.f32 %v7617_v22, %v16975_v1  ;;  %v8120_v36 = vadd.f32 %v8119_v62, %v8030_v43  ;;  %v914_v43 = vld [vmem:[%s17101_s16 + $0x68] sm:$0xff] }
 0x6d5   : > { %v8033_v13 = vpop.f32.mrf.mxu0  ;;  %930 = vst.msk [vmem:[#allocation3 + $0x258] sm:$0xff] %vm15383_vm2, %v914_v43 }
 0x6d6   : > { %v17214_v34 = vadd.f32 %v8120_v36, %v7689_v30  ;;  %v14727_v30 = vld [vmem:[%s17884_s6 + $0x170] sm:$0xff]  ;;  %740 = vst.msk [vmem:[#allocation2 + $0x268] sm:$0xff] %vm15383_vm2, %v914_v43  ;;  %v14768_v36 = vld [vmem:[%s17884_s6 + $0x1b8] sm:$0xff]  ;;  %v14678_v43 = vld [vmem:[#allocation3 + $0x244] sm:$0xf0] }
 0x6d7   : > { %8526 = vmatpush.bf16.msrb.mxu1 %v14727_v30  ;;  %9032 = vmatpush.bf16.msrb.mxu0 %v14768_v36  ;;  %v916_v30 = vld [vmem:[%s17101_s16 + $0x78] sm:$0xff]  ;;  %v14638_v36 = vld [vmem:[#allocation2 + $0x254] sm:$0xf] }
 0x6d8   : > { %8072 = vmatmul.bf16.gmra.mxu0 %v13225_v8  ;;  %13316 = vmatmul.msk.bf16.gmra.mxu2 %vm1458_vm3, %v13229_v6  ;;  %v14637_v6 = vld [vmem:[#allocation2 + $0x244] sm:$0xf0]  ;;  %932 = vst.msk [vmem:[#allocation3 + $0x268] sm:$0xff] %vm15383_vm2, %v916_v30 }
 0x6d9   : > { %v7618_v0 = vpop.f32.mrf.mxu3  ;;  %v7532_v51 = vpop.f32.mrf.mxu1  ;;  %742 = vst.msk [vmem:[#allocation2 + $0x278] sm:$0xff] %vm15383_vm2, %v916_v30 }
 0x6da   : > { %v7619_v28 = vadd.f32 %v7618_v0, %v7529_v2 }
 0x6db   : > { %v8122_v1 = vpop.f32.mrf.mxu2 }
 0x6dc   : > { %v7691_v39 = vadd.f32 %v7619_v28, %v16984_v11  ;;  %v8123_v49 = vadd.f32 %v8122_v1, %v8033_v13  ;;  %7571 = vmatmul.bf16.gmra.mxu1 %v13035_v33  ;;  %v13042_v13 = vld [vmem:[#allocation2 + $0x240] sm:$0xf]  ;;  %v14680_v30 = vld [vmem:[#allocation3 + $0x254] sm:$0xf0] }
 0x6dd   : > { %v8035_v55 = vpop.f32.mrf.mxu0 }
 0x6de   : > { %13119 = vmatmul.msk.bf16.gmra.mxu3 %vm1458_vm3, %v13039_v59  ;;  %v17219_v41 = vadd.f32 %v8123_v49, %v7690_v18  ;;  %v13237_v18 = vor.u32 %v14675_v27, %v13234_v12  ;;  %v13241_v12 = vor.u32 %v14678_v43, %v13240_v45  ;;  %v14679_v43 = vld [vmem:[#allocation3 + $0x254] sm:$0xf] }
 0x6e1   : > { %v7621_v11 = vpop.f32.mrf.mxu3  ;;  %v7534_v24 = vpop.f32.mrf.mxu1 }
 0x6e2   : > { %v7622_v2 = vadd.f32 %v7621_v11, %v7532_v51  ;;  %v13047_v51 = vor.u32 %v14636_v58, %v13044_v37  ;;  %v14677_v11 = vld [vmem:[#allocation3 + $0x244] sm:$0xf] }
 0x6e3   : > { %v8124_v50 = vpop.f32.mrf.mxu2 }
 0x6e4   : > { %v7692_v22 = vadd.f32 %v7622_v2, %v16989_v56  ;;  %v8125_v62 = vadd.f32 %v8124_v50, %v8035_v55  ;;  %v13043_v56 = vor.u32 %v14637_v6, %v13042_v13  ;;  %v915_v55 = vld [vmem:[%s17101_s16 + $0x70] sm:$0xff]  ;;  %v13052_v13 = vld [vmem:[#allocation2 + $0x258] sm:$0xf0] }
 0x6e5   : > { %v8038_v8 = vpop.f32.mrf.mxu0  ;;  %931 = vst.msk [vmem:[#allocation3 + $0x260] sm:$0xff] %vm15383_vm2, %v915_v55 }
 0x6e6   : > { %v17238_v32 = vadd.f32 %v8125_v62, %v7691_v39  ;;  %741 = vst.msk [vmem:[#allocation2 + $0x270] sm:$0xff] %vm15383_vm2, %v915_v55  ;;  %v13050_v62 = vld [vmem:[#allocation2 + $0x250] sm:$0xf] }
 0x6e7   : > { %v13248_v55 = vld [vmem:[#allocation3 + $0x250] sm:$0xf] }
 0x6e8   : > { %8077 = vmatmul.bf16.gmra.mxu0 %v13233_v21  ;;  %13317 = vmatmul.msk.bf16.gmra.mxu2 %vm1458_vm3, %v13237_v18 }
 0x6e9   : > { %v7623_v19 = vpop.f32.mrf.mxu3  ;;  %v7537_v33 = vpop.f32.mrf.mxu1 }
 0x6ea   : > { %v7624_v0 = vadd.f32 %v7623_v19, %v7534_v24  ;;  %v13242_v24 = vld [vmem:[#allocation3 + $0x248] sm:$0xf0]  ;;  %v13055_v19 = vor.u32 %v14638_v36, %v13052_v13 }
 0x6eb   : > { %v8127_v28 = vpop.f32.mrf.mxu2  ;;  %v13060_v36 = vld [vmem:[#allocation2 + $0x268] sm:$0xf0] }
 0x6ec   : > { %v7693_v59 = vadd.f32 %v7624_v0, %v16992_v35  ;;  %v8128_v1 = vadd.f32 %v8127_v28, %v8038_v8  ;;  %7576 = vmatmul.bf16.gmra.mxu1 %v13043_v56  ;;  %v14639_v8 = vld [vmem:[#allocation2 + $0x254] sm:$0xf0] }
 0x6ed   : > { %v8040_v49 = vpop.f32.mrf.mxu0  ;;  %v13051_v6 = vor.u32 %v14639_v8, %v13050_v62  ;;  %v14640_v8 = vld [vmem:[#allocation2 + $0x264] sm:$0xf] }
 0x6ee   : > { %13120 = vmatmul.msk.bf16.gmra.mxu3 %vm1458_vm3, %v13047_v51  ;;  %v17243_v39 = vadd.f32 %v8128_v1, %v7692_v22  ;;  %v13245_v22 = vor.u32 %v14677_v11, %v13242_v24  ;;  %v917_v1 = vld [vmem:[%s17101_s16 + $0x80] sm:$0xff]  ;;  %v13249_v24 = vor.u32 %v14680_v30, %v13248_v55  ;;  %v13258_v30 = vld [vmem:[#allocation3 + $0x268] sm:$0xf0] }
 0x6ef   : > { %933 = vst.msk [vmem:[#allocation3 + $0x270] sm:$0xff] %vm15383_vm2, %v917_v1  ;;  %v14681_v55 = vld [vmem:[#allocation3 + $0x264] sm:$0xf] }
 0x6f1   : > { %v7626_v31 = vpop.f32.mrf.mxu3  ;;  %v7539_v14 = vpop.f32.mrf.mxu1 }
 0x6f2   : > { %v7627_v35 = vadd.f32 %v7626_v31, %v7537_v33  ;;  %v13250_v31 = vld [vmem:[#allocation3 + $0x258] sm:$0xf0] }
 0x6f3   : > { %v8129_v27 = vpop.f32.mrf.mxu2 }
 0x6f4   : > { %v7694_v2 = vadd.f32 %v7627_v35, %v16997_v38  ;;  %v8130_v50 = vadd.f32 %v8129_v27, %v8040_v49  ;;  %v918_v49 = vld [vmem:[%s17101_s16 + $0x88] sm:$0xff] }
 0x6f5   : > { %v8043_v21 = vpop.f32.mrf.mxu0  ;;  %934 = vst.msk [vmem:[#allocation3 + $0x278] sm:$0xff] %vm15383_vm2, %v918_v49 }
 0x6f6   : > { %v17256_v18 = vadd.f32 %v8130_v50, %v7693_v59  ;;  %v14726_v59 = vld [vmem:[%s17884_s6 + $0x168] sm:$0xff]  ;;  %v14767_v50 = vld [vmem:[%s17884_s6 + $0x1b0] sm:$0xff] }
 0x6f7   : > { %8527 = vmatpush.bf16.msrb.mxu1 %v14726_v59  ;;  %9033 = vmatpush.bf16.msrb.mxu0 %v14767_v50  ;;  %v14682_v59 = vld [vmem:[#allocation3 + $0x264] sm:$0xf0] }
 0x6f8   : > { %8082 = vmatmul.bf16.gmra.mxu0 %v13241_v12  ;;  %13318 = vmatmul.msk.bf16.gmra.mxu2 %vm1458_vm3, %v13245_v22  ;;  %v14641_v22 = vld [vmem:[#allocation2 + $0x264] sm:$0xf0] }
 0x6f9   : > { %v7628_v58 = vpop.f32.mrf.mxu3  ;;  %v7542_v37 = vpop.f32.mrf.mxu1 }
 0x6fa   : > { %v7629_v56 = vadd.f32 %v7628_v58, %v7539_v14 }
 0x6fb   : > { %v8132_v38 = vpop.f32.mrf.mxu2 }
 0x6fc   : > { %v7695_v33 = vadd.f32 %v7629_v56, %v17006_v63  ;;  %v8133_v0 = vadd.f32 %v8132_v38, %v8043_v21  ;;  %7581 = vmatmul.bf16.gmra.mxu1 %v13051_v6  ;;  %v13058_v21 = vld [vmem:[#allocation2 + $0x260] sm:$0xf] }
 0x6fd   : > { %v8045_v51 = vpop.f32.mrf.mxu0  ;;  %v13059_v13 = vor.u32 %v14641_v22, %v13058_v21 }
 0x6fe   : > { %13121 = vmatmul.msk.bf16.gmra.mxu3 %vm1458_vm3, %v13055_v19  ;;  %v17261_v28 = vadd.f32 %v8133_v0, %v7694_v2  ;;  %v13253_v2 = vor.u32 %v14679_v43, %v13250_v31 }
 0x701   : > { %v7631_v63 = vpop.f32.mrf.mxu3  ;;  %v7544_v45 = vpop.f32.mrf.mxu1 }
 0x702   : > { %v7632_v14 = vadd.f32 %v7631_v63, %v7542_v37  ;;  %v13063_v37 = vor.u32 %v14640_v8, %v13060_v36 }
 0x703   : > { %v8134_v11 = vpop.f32.mrf.mxu2 }
 0x704   : > { %v7696_v35 = vadd.f32 %v7632_v14, %v17011_v16  ;;  %v8135_v27 = vadd.f32 %v8134_v11, %v8045_v51  ;;  %v13256_v51 = vld [vmem:[#allocation3 + $0x260] sm:$0xf]  ;;  %v13261_v11 = vor.u32 %v14681_v55, %v13258_v30 }
 0x705   : > { %v8048_v12 = vpop.f32.mrf.mxu0 }
 0x706   : > { %v17276_v62 = vadd.f32 %v8135_v27, %v7695_v33  ;;  %v14643_v27 = vld [vmem:[#allocation2 + $0x274] sm:$0xf0] }
 0x708   : > { %8087 = vmatmul.bf16.gmra.mxu0 %v13249_v24  ;;  %13319 = vmatmul.msk.bf16.gmra.mxu2 %vm1458_vm3, %v13253_v2  ;;  %v13066_v24 = vld [vmem:[#allocation2 + $0x270] sm:$0xf]  ;;  %v13068_v2 = vld [vmem:[#allocation2 + $0x278] sm:$0xf0] }
 0x709   : > { %v7633_v6 = vpop.f32.mrf.mxu3  ;;  %v7547_v16 = vpop.f32.mrf.mxu1  ;;  %v13067_v50 = vor.u32 %v14643_v27, %v13066_v24  ;;  %v14694_v27 = vld [vmem:[#allocation4 + $0x184] sm:$0xf] }
 0x70a   : > { %v7634_v58 = vadd.f32 %v7633_v6, %v7544_v45  ;;  %v13257_v45 = vor.u32 %v14682_v59, %v13256_v51  ;;  %v14683_v59 = vld [vmem:[#allocation3 + $0x274] sm:$0xf] }
 0x70b   : > { %v8137_v56 = vpop.f32.mrf.mxu2 }
 0x70c   : > { %v7697_v19 = vadd.f32 %v7634_v58, %v17014_v25  ;;  %v8138_v38 = vadd.f32 %v8137_v56, %v8048_v12  ;;  %7586 = vmatmul.bf16.gmra.mxu1 %v13059_v13  ;;  %v14816_v58 = vld [vmem:[%s17884_s6 + $0x238] sm:$0xff] }
 0x70d   : > { %v8050_v0 = vpop.f32.mrf.mxu0  ;;  %9628 = vmatpush.bf16.msra.mxu3 %v14816_v58  ;;  %v14736_v58 = vld [vmem:[#allocation2 + $0x204] sm:$0xf0] }
 0x70e   : > { %13122 = vmatmul.msk.bf16.gmra.mxu3 %vm1458_vm3, %v13063_v37  ;;  %v17281_v33 = vadd.f32 %v8138_v38, %v7696_v35  ;;  %v14642_v35 = vld [vmem:[#allocation2 + $0x274] sm:$0xf]  ;;  %v14857_v37 = vld [vmem:[%s17884_s6 + $0x280] sm:$0xff]  ;;  %v14684_v38 = vld [vmem:[#allocation3 + $0x274] sm:$0xf0] }
 0x70f   : > { %v13071_v36 = vor.u32 %v14642_v35, %v13068_v2  ;;  %10134 = vmatpush.bf16.msra.mxu2 %v14857_v37  ;;  %v13344_v35 = vld [vmem:[#allocation4 + $0x188] sm:$0xf0] }
 0x711   : > { %v7636_v1 = vpop.f32.mrf.mxu3  ;;  %v7549_v49 = vpop.f32.mrf.mxu1 }
 0x712   : > { %v7637_v63 = vadd.f32 %v7636_v1, %v7547_v16  ;;  %v13266_v1 = vld [vmem:[#allocation3 + $0x278] sm:$0xf0] }
 0x713   : > { %v8139_v43 = vpop.f32.mrf.mxu2 }
 0x714   : > { %v7698_v31 = vadd.f32 %v7637_v63, %v17025_v44  ;;  %v8140_v14 = vadd.f32 %v8139_v43, %v8050_v0 }
 0x715   : > { %v8053_v25 = vpop.f32.mrf.mxu0 }
 0x716   : > { %v17284_v12 = vadd.f32 %v8140_v14, %v7697_v19  ;;  %v13264_v19 = vld [vmem:[#allocation3 + $0x270] sm:$0xf]  ;;  %v14856_v14 = vld [vmem:[%s17884_s6 + $0x278] sm:$0xff] }
 0x717   : > { %v13265_v30 = vor.u32 %v14684_v38, %v13264_v19  ;;  %10038 = vmatpush.bf16.msra.mxu0 %v14856_v14  ;;  %v14735_v19 = vld [vmem:[#allocation2 + $0x204] sm:$0xf]  ;;  %v13542_v38 = vld [vmem:[#allocation2 + $0x208] sm:$0xf0] }
 0x718   : > { %8092 = vmatmul.bf16.gmra.mxu0 %v13257_v45  ;;  %13320 = vmatmul.msk.bf16.gmra.mxu2 %vm1458_vm3, %v13261_v11  ;;  %v14695_v11 = vld [vmem:[#allocation4 + $0x184] sm:$0xf0] }
 0x719   : > { %v7638_v21 = vpop.f32.mrf.mxu3  ;;  %v7552_v22 = vpop.f32.mrf.mxu1 }
 0x71a   : > { %v7639_v8 = vadd.f32 %v7638_v21, %v7549_v49 }
 0x71b   : > { %v8142_v13 = vpop.f32.mrf.mxu2 }
 0x71c   : > { %v7699_v44 = vadd.f32 %v7639_v8, %v17034_v10  ;;  %v8143_v6 = vadd.f32 %v8142_v13, %v8053_v25  ;;  %7591 = vmatmul.bf16.gmra.mxu1 %v13067_v50  ;;  %v14815_v10 = vld [vmem:[%s17884_s6 + $0x230] sm:$0xff]  ;;  %v13342_v25 = vld [vmem:[#allocation4 + $0x180] sm:$0xf] }
 0x71d   : > { %v8055_v16 = vpop.f32.mrf.mxu0  ;;  %9532 = vmatpush.bf16.msra.mxu1 %v14815_v10  ;;  %v13343_v2 = vor.u32 %v14695_v11, %v13342_v25 }
 0x71e   : > { %13123 = vmatmul.msk.bf16.gmra.mxu3 %vm1458_vm3, %v13071_v36  ;;  %v17295_v56 = vadd.f32 %v8143_v6, %v7698_v31  ;;  %v13269_v31 = vor.u32 %v14683_v59, %v13266_v1 }
 0x721   : > { %v7641_v0 = vpop.f32.mrf.mxu3  ;;  %v7554_v51 = vpop.f32.mrf.mxu1 }
 0x722   : > { %v7642_v49 = vadd.f32 %v7641_v0, %v7552_v22  ;;  %v13347_v22 = vor.u32 %v14694_v27, %v13344_v35 }
 0x723   : > { %v8144_v55 = vpop.f32.mrf.mxu2 }
 0x724   : > { %v7700_v63 = vadd.f32 %v7642_v49, %v17038_v3  ;;  %v8145_v43 = vadd.f32 %v8144_v55, %v8055_v16  ;;  %v13545_v55 = vor.u32 %v14735_v19, %v13542_v38 }
 0x725   : > { %v8058_v45 = vpop.f32.mrf.mxu0 }
 0x726   : > { %v17304_v24 = vadd.f32 %v8145_v43, %v7699_v44  ;;  %v13540_v44 = vld [vmem:[#allocation2 + $0x200] sm:$0xf]  ;;  %v14697_v43 = vld [vmem:[#allocation4 + $0x194] sm:$0xf0] }
 0x728   : > { %8097 = vmatmul.bf16.gmra.mxu0 %v13265_v30  ;;  %13321 = vmatmul.msk.bf16.gmra.mxu2 %vm1458_vm3, %v13269_v31  ;;  %v13350_v30 = vld [vmem:[#allocation4 + $0x190] sm:$0xf]  ;;  %v13352_v31 = vld [vmem:[#allocation4 + $0x198] sm:$0xf0] }
 0x729   : > { %v7643_v50 = vpop.f32.mrf.mxu3  ;;  %v7557_v3 = vpop.f32.mrf.mxu1  ;;  %v13351_v14 = vor.u32 %v14697_v43, %v13350_v30  ;;  %v13360_v30 = vld [vmem:[#allocation4 + $0x1a8] sm:$0xf0] }
 0x72a   : > { %v7644_v21 = vadd.f32 %v7643_v50, %v7554_v51  ;;  %v13541_v51 = vor.u32 %v14736_v58, %v13540_v44  ;;  %v14737_v44 = vld [vmem:[#allocation2 + $0x214] sm:$0xf]  ;;  %v13550_v58 = vld [vmem:[#allocation2 + $0x218] sm:$0xf0] }
 0x72b   : > { %v8147_v8 = vpop.f32.mrf.mxu2 }
 0x72c   : > { %v7701_v36 = vadd.f32 %v7644_v21, %v17042_v52  ;;  %v8148_v13 = vadd.f32 %v8147_v8, %v8058_v45  ;;  %8528 = vmatmul.bf16.vlgmr.msrb.gmra.mxu1 %v13343_v2  ;;  %v14696_v45 = vld [vmem:[#allocation4 + $0x194] sm:$0xf]  ;;  %v13548_v8 = vld [vmem:[#allocation2 + $0x210] sm:$0xf] }
 0x72d   : > { %v8060_v6 = vpop.f32.mrf.mxu0  ;;  %v13355_v35 = vor.u32 %v14696_v45, %v13352_v31 }
 0x72e   : > { %v17308_v16 = vadd.f32 %v8148_v13, %v7700_v63  ;;  %13504 = vmatmul.msk.bf16.vlgmr.msrb.gmra.mxu3 %vm1458_vm3, %v13347_v22  ;;  %v14814_v22 = vld [vmem:[%s17884_s6 + $0x228] sm:$0xff] }
 0x72f   : > { %9533 = vmatpush.bf16.msra.mxu1 %v14814_v22 }
 0x731   : > { %v7646_v37 = vpop.f32.mrf.mxu3  ;;  %v7559_v10 = vpop.f32.mrf.mxu1 }
 0x732   : > { %v7647_v0 = vadd.f32 %v7646_v37, %v7557_v3 }
 0x733   : > { %v8149_v59 = vpop.f32.mrf.mxu2 }
 0x734   : > { %v7702_v1 = vadd.f32 %v7647_v0, %v17046_v42  ;;  %v8150_v49 = vadd.f32 %v8149_v59, %v8060_v6  ;;  %v13553_v59 = vor.u32 %v14737_v44, %v13550_v58 }
 0x735   : > { %v8063_v52 = vpop.f32.mrf.mxu0 }
 0x736   : > { %v17312_v63 = vadd.f32 %v8150_v49, %v7701_v36  ;;  %v14738_v36 = vld [vmem:[#allocation2 + $0x214] sm:$0xf0]  ;;  %v14699_v49 = vld [vmem:[#allocation4 + $0x1a4] sm:$0xf0] }
 0x738   : > { %9034 = vmatmul.bf16.vlgmr.msrb.gmra.mxu0 %v13541_v51  ;;  %13702 = vmatmul.msk.bf16.vlgmr.msrb.gmra.mxu2 %vm1458_vm3, %v13545_v55  ;;  %v14855_v51 = vld [vmem:[%s17884_s6 + $0x270] sm:$0xff]  ;;  %v14698_v55 = vld [vmem:[#allocation4 + $0x1a4] sm:$0xf] }
 0x739   : > { %v7648_v25 = vpop.f32.mrf.mxu3  ;;  %v7562_v11 = vpop.f32.mrf.mxu1  ;;  %10039 = vmatpush.bf16.msra.mxu0 %v14855_v51 }
 0x73a   : > { %v7649_v27 = vadd.f32 %v7648_v25, %v7559_v10  ;;  %v13549_v10 = vor.u32 %v14738_v36, %v13548_v8  ;;  %v14739_v8 = vld [vmem:[#allocation2 + $0x224] sm:$0xf]  ;;  %v13558_v36 = vld [vmem:[#allocation2 + $0x228] sm:$0xf0] }
 0x73b   : > { %v8152_v2 = vpop.f32.mrf.mxu2 }
 0x73c   : > { %v7703_v42 = vadd.f32 %v7649_v27, %v17056_v7  ;;  %v8153_v50 = vadd.f32 %v8152_v2, %v8063_v52  ;;  %8533 = vmatmul.bf16.gmra.mxu1 %v13351_v14  ;;  %v13363_v14 = vor.u32 %v14698_v55, %v13360_v30 }
 0x73d   : > { %v8065_v3 = vpop.f32.mrf.mxu0 }
 0x73e   : > { %v17316_v21 = vadd.f32 %v8153_v50, %v7702_v1  ;;  %13505 = vmatmul.msk.bf16.gmra.mxu3 %vm1458_vm3, %v13355_v35  ;;  %v13358_v1 = vld [vmem:[#allocation4 + $0x1a0] sm:$0xf]  ;;  %v14740_v50 = vld [vmem:[#allocation2 + $0x224] sm:$0xf0] }
 0x73f   : > { %v13359_v43 = vor.u32 %v14699_v49, %v13358_v1 }
 0x741   : > { %v7651_v13 = vpop.f32.mrf.mxu3  ;;  %v7564_v6 = vpop.f32.mrf.mxu1 }
 0x742   : > { %v7652_v37 = vadd.f32 %v7651_v13, %v7562_v11 }
 0x743   : > { %v8154_v7 = vpop.f32.mrf.mxu2 }
 0x744   : > { %v7704_v19 = vadd.f32 %v7652_v37, %v17060_v54  ;;  %v8155_v38 = vadd.f32 %v8154_v7, %v8065_v3  ;;  %v13561_v7 = vor.u32 %v14739_v8, %v13558_v36 }
 0x745   : > { %v8068_v0 = vpop.f32.mrf.mxu0 }
 0x746   : > { %v17326_v52 = vadd.f32 %v8155_v38, %v7703_v42  ;;  %v13556_v42 = vld [vmem:[#allocation2 + $0x220] sm:$0xf]  ;;  %v14701_v38 = vld [vmem:[#allocation4 + $0x1b4] sm:$0xf0] }
 0x748   : > { %9039 = vmatmul.bf16.gmra.mxu0 %v13549_v10  ;;  %13703 = vmatmul.msk.bf16.gmra.mxu2 %vm1458_vm3, %v13553_v59  ;;  %v13366_v10 = vld [vmem:[#allocation4 + $0x1b0] sm:$0xf]  ;;  %v13368_v59 = vld [vmem:[#allocation4 + $0x1b8] sm:$0xf0] }
 0x749   : > { %v7653_v45 = vpop.f32.mrf.mxu3  ;;  %v7567_v54 = vpop.f32.mrf.mxu1  ;;  %v13367_v51 = vor.u32 %v14701_v38, %v13366_v10  ;;  %v13376_v10 = vld [vmem:[#allocation4 + $0x1c8] sm:$0xf0] }
 0x74a   : > { %v7654_v31 = vadd.f32 %v7653_v45, %v7564_v6  ;;  %v13557_v6 = vor.u32 %v14740_v50, %v13556_v42  ;;  %v14741_v42 = vld [vmem:[#allocation2 + $0x234] sm:$0xf]  ;;  %v13566_v50 = vld [vmem:[#allocation2 + $0x238] sm:$0xf0] }
 0x74b   : > { %v8157_v25 = vpop.f32.mrf.mxu2 }
 0x74c   : > { %v7705_v11 = vadd.f32 %v7654_v31, %v17064_v29  ;;  %v8158_v27 = vadd.f32 %v8157_v25, %v8068_v0  ;;  %8538 = vmatmul.bf16.gmra.mxu1 %v13359_v43  ;;  %v14700_v0 = vld [vmem:[#allocation4 + $0x1b4] sm:$0xf]  ;;  %v13564_v25 = vld [vmem:[#allocation2 + $0x230] sm:$0xf] }
 0x74d   : > { %v8070_v35 = vpop.f32.mrf.mxu0  ;;  %v13371_v30 = vor.u32 %v14700_v0, %v13368_v59 }
 0x74e   : > { %v17330_v2 = vadd.f32 %v8158_v27, %v7704_v19  ;;  %13506 = vmatmul.msk.bf16.gmra.mxu3 %vm1458_vm3, %v13363_v14  ;;  %v14813_v14 = vld [vmem:[%s17884_s6 + $0x220] sm:$0xff] }
 0x74f   : > { %9534 = vmatpush.bf16.msra.mxu1 %v14813_v14 }
 0x751   : > { %v7656_v3 = vpop.f32.mrf.mxu3  ;;  %v7569_v22 = vpop.f32.mrf.mxu1 }
 0x752   : > { %v7657_v13 = vadd.f32 %v7656_v3, %v7567_v54 }
 0x753   : > { %v8159_v44 = vpop.f32.mrf.mxu2 }
 0x754   : > { %v7706_v58 = vadd.f32 %v7657_v13, %v17068_v17  ;;  %v8160_v37 = vadd.f32 %v8159_v44, %v8070_v35  ;;  %v13569_v44 = vor.u32 %v14741_v42, %v13566_v50 }
 0x755   : > { %v8073_v29 = vpop.f32.mrf.mxu0 }
 0x756   : > { %v17334_v19 = vadd.f32 %v8160_v37, %v7705_v11  ;;  %v14742_v11 = vld [vmem:[#allocation2 + $0x234] sm:$0xf0]  ;;  %v14703_v37 = vld [vmem:[#allocation4 + $0x1c4] sm:$0xf0] }
 0x758   : > { %9044 = vmatmul.bf16.gmra.mxu0 %v13557_v6  ;;  %13704 = vmatmul.msk.bf16.gmra.mxu2 %vm1458_vm3, %v13561_v7  ;;  %v14854_v6 = vld [vmem:[%s17884_s6 + $0x268] sm:$0xff]  ;;  %v14702_v7 = vld [vmem:[#allocation4 + $0x1c4] sm:$0xf] }
 0x759   : > { %v7658_v1 = vpop.f32.mrf.mxu3  ;;  %v7572_v49 = vpop.f32.mrf.mxu1  ;;  %10040 = vmatpush.bf16.msra.mxu0 %v14854_v6 }
 0x75a   : > { %v7659_v55 = vadd.f32 %v7658_v1, %v7569_v22  ;;  %v13565_v22 = vor.u32 %v14742_v11, %v13564_v25  ;;  %v14743_v25 = vld [vmem:[#allocation2 + $0x244] sm:$0xf]  ;;  %v13574_v11 = vld [vmem:[#allocation2 + $0x248] sm:$0xf0] }
 0x75b   : > { %v8162_v43 = vpop.f32.mrf.mxu2 }
 0x75c   : > { %v7707_v17 = vadd.f32 %v7659_v55, %v17078_v26  ;;  %v8163_v45 = vadd.f32 %v8162_v43, %v8073_v29  ;;  %8543 = vmatmul.bf16.gmra.mxu1 %v13367_v51  ;;  %v13379_v51 = vor.u32 %v14702_v7, %v13376_v10 }
 0x75d   : > { %v8075_v54 = vpop.f32.mrf.mxu0 }
 0x75e   : > { %v17338_v31 = vadd.f32 %v8163_v45, %v7706_v58  ;;  %13507 = vmatmul.msk.bf16.gmra.mxu3 %vm1458_vm3, %v13371_v30  ;;  %v13374_v58 = vld [vmem:[#allocation4 + $0x1c0] sm:$0xf]  ;;  %v14744_v45 = vld [vmem:[#allocation2 + $0x244] sm:$0xf0] }
 0x75f   : > { %v13375_v38 = vor.u32 %v14703_v37, %v13374_v58 }
 0x761   : > { %v7661_v27 = vpop.f32.mrf.mxu3  ;;  %v7574_v35 = vpop.f32.mrf.mxu1 }
 0x762   : > { %v7662_v3 = vadd.f32 %v7661_v27, %v7572_v49 }
 0x763   : > { %v8164_v26 = vpop.f32.mrf.mxu2 }
 0x764   : > { %v7708_v8 = vadd.f32 %v7662_v3, %v17083_v48  ;;  %v8165_v36 = vadd.f32 %v8164_v26, %v8075_v54  ;;  %v13577_v26 = vor.u32 %v14743_v25, %v13574_v11  ;;  %v1095_v25 = vld [vmem:[%s17101_s16 + $0x20] sm:$0xff]  ;;  %v1096_v11 = vld [vmem:[%s17101_s16 + $0x28] sm:$0xff] }
 0x765   : > { %v8078_v13 = vpop.f32.mrf.mxu0  ;;  %1111 = vst.msk [vmem:[#allocation4 + $0x200] sm:$0xff] %vm15383_vm2, %v1095_v25  ;;  %v1098_v25 = vld [vmem:[%s17101_s16 + $0x38] sm:$0xff] }
 0x766   : > { %v17348_v29 = vadd.f32 %v8165_v36, %v7707_v17  ;;  %v13572_v17 = vld [vmem:[#allocation2 + $0x240] sm:$0xf]  ;;  %1112 = vst.msk [vmem:[#allocation4 + $0x208] sm:$0xff] %vm15383_vm2, %v1096_v11 }
 0x767   : > { %v13573_v42 = vor.u32 %v14744_v45, %v13572_v17  ;;  %v13582_v17 = vld [vmem:[#allocation2 + $0x258] sm:$0xf0]  ;;  %1114 = vst.msk [vmem:[#allocation4 + $0x218] sm:$0xff] %vm15383_vm2, %v1098_v25 }
 0x768   : > { %9049 = vmatmul.bf16.gmra.mxu0 %v13565_v22  ;;  %13705 = vmatmul.msk.bf16.gmra.mxu2 %vm1458_vm3, %v13569_v44  ;;  %v13382_v22 = vld [vmem:[#allocation4 + $0x1d0] sm:$0xf]  ;;  %v13384_v44 = vld [vmem:[#allocation4 + $0x1d8] sm:$0xf0] }
 0x769   : > { %v7663_v0 = vpop.f32.mrf.mxu3  ;;  %v7577_v48 = vpop.f32.mrf.mxu1 }
 0x76a   : > { %v7664_v59 = vadd.f32 %v7663_v0, %v7574_v35 }
 0x76b   : > { %v8167_v1 = vpop.f32.mrf.mxu2 }
 0x76c   : > { %v7709_v49 = vadd.f32 %v7664_v59, %v17087_v20  ;;  %v8168_v55 = vadd.f32 %v8167_v1, %v8078_v13  ;;  %8548 = vmatmul.bf16.gmra.mxu1 %v13375_v38  ;;  %v14704_v13 = vld [vmem:[#allocation4 + $0x1d4] sm:$0xf]  ;;  %v13580_v1 = vld [vmem:[#allocation2 + $0x250] sm:$0xf] }
 0x76d   : > { %v8080_v30 = vpop.f32.mrf.mxu0  ;;  %v13387_v10 = vor.u32 %v14704_v13, %v13384_v44 }
 0x76e   : > { %v17352_v43 = vadd.f32 %v8168_v55, %v7708_v8  ;;  %13508 = vmatmul.msk.bf16.gmra.mxu3 %vm1458_vm3, %v13379_v51  ;;  %v14705_v8 = vld [vmem:[#allocation4 + $0x1d4] sm:$0xf0] }
 0x76f   : > { %v13383_v6 = vor.u32 %v14705_v8, %v13382_v22  ;;  %v14812_v51 = vld [vmem:[%s17884_s6 + $0x218] sm:$0xff]  ;;  %v13392_v8 = vld [vmem:[#allocation4 + $0x1e8] sm:$0xf0] }
 0x770   : > { %9535 = vmatpush.bf16.msra.mxu1 %v14812_v51  ;;  %v744_v51 = vld [vmem:[%s17385_s11 + $0x8] sm:$0xff] }
 0x771   : > { %v7666_v54 = vpop.f32.mrf.mxu3  ;;  %v7579_v14 = vpop.f32.mrf.mxu1  ;;  %760 = vst.msk [vmem:[#allocation2 + $0x288] sm:$0xff] %vm15383_vm2, %v744_v51  ;;  %v746_v51 = vld [vmem:[%s17385_s11 + $0x18] sm:$0xff] }
 0x772   : > { %v7667_v27 = vadd.f32 %v7666_v54, %v7577_v48  ;;  %762 = vst.msk [vmem:[#allocation2 + $0x298] sm:$0xff] %vm15383_vm2, %v746_v51  ;;  %v748_v51 = vld [vmem:[%s17385_s11 + $0x28] sm:$0xff] }
 0x773   : > { %v8169_v35 = vpop.f32.mrf.mxu2  ;;  %764 = vst.msk [vmem:[#allocation2 + $0x2a8] sm:$0xff] %vm15383_vm2, %v748_v51  ;;  %v750_v51 = vld [vmem:[%s17385_s11 + $0x38] sm:$0xff] }
 0x774   : > { %v7710_v50 = vadd.f32 %v7667_v27, %v17092_v47  ;;  %v8170_v20 = vadd.f32 %v8169_v35, %v8080_v30  ;;  %766 = vst.msk [vmem:[#allocation2 + $0x2b8] sm:$0xff] %vm15383_vm2, %v750_v51  ;;  %v752_v51 = vld [vmem:[%s17385_s11 + $0x48] sm:$0xff] }
 0x775   : > { %v8083_v3 = vpop.f32.mrf.mxu0  ;;  %768 = vst.msk [vmem:[#allocation2 + $0x2c8] sm:$0xff] %vm15383_vm2, %v752_v51  ;;  %v754_v51 = vld [vmem:[%s17385_s11 + $0x58] sm:$0xff] }
 0x776   : > { %v17356_v36 = vadd.f32 %v8170_v20, %v7709_v49  ;;  %v14746_v49 = vld [vmem:[#allocation2 + $0x254] sm:$0xf0]  ;;  %v14853_v20 = vld [vmem:[%s17884_s6 + $0x260] sm:$0xff]  ;;  %770 = vst.msk [vmem:[#allocation2 + $0x2d8] sm:$0xff] %vm15383_vm2, %v754_v51  ;;  %v756_v51 = vld [vmem:[%s17385_s11 + $0x68] sm:$0xff] }
 0x777   : > { %10041 = vmatpush.bf16.msra.mxu0 %v14853_v20  ;;  %v14709_v20 = vld [vmem:[#allocation4 + $0x1f4] sm:$0xf0]  ;;  %772 = vst.msk [vmem:[#allocation2 + $0x2e8] sm:$0xff] %vm15383_vm2, %v756_v51 }
 0x778   : > { %9054 = vmatmul.bf16.gmra.mxu0 %v13573_v42  ;;  %13706 = vmatmul.msk.bf16.gmra.mxu2 %vm1458_vm3, %v13577_v26  ;;  %v14707_v26 = vld [vmem:[#allocation4 + $0x1e4] sm:$0xf0]  ;;  %v758_v51 = vld [vmem:[%s17385_s11 + $0x78] sm:$0xff] }
 0x779   : > { %v7668_v58 = vpop.f32.mrf.mxu3  ;;  %v7582_v37 = vpop.f32.mrf.mxu1  ;;  %774 = vst.msk [vmem:[#allocation2 + $0x2f8] sm:$0xff] %vm15383_vm2, %v758_v51 }
 0x77a   : > { %v7669_v7 = vadd.f32 %v7668_v58, %v7579_v14  ;;  %v13581_v14 = vor.u32 %v14746_v49, %v13580_v1  ;;  %v13588_v1 = vld [vmem:[#allocation2 + $0x260] sm:$0xf] }
 0x77b   : > { %v8172_v47 = vpop.f32.mrf.mxu2 }
 0x77c   : > { %v7711_v38 = vadd.f32 %v7669_v7, %v17113_v23  ;;  %v8173_v0 = vadd.f32 %v8172_v47, %v8083_v3  ;;  %8553 = vmatmul.bf16.gmra.mxu1 %v13383_v6  ;;  %v14745_v23 = vld [vmem:[#allocation2 + $0x254] sm:$0xf]  ;;  %v13390_v3 = vld [vmem:[#allocation4 + $0x1e0] sm:$0xf] }
 0x77d   : > { %v8085_v48 = vpop.f32.mrf.mxu0  ;;  %v13391_v13 = vor.u32 %v14707_v26, %v13390_v3  ;;  %v14708_v26 = vld [vmem:[#allocation4 + $0x1f4] sm:$0xf] }
 0x77e   : > { %v17361_v59 = vadd.f32 %v8173_v0, %v7710_v50  ;;  %13509 = vmatmul.msk.bf16.gmra.mxu3 %vm1458_vm3, %v13387_v10  ;;  %v13585_v50 = vor.u32 %v14745_v23, %v13582_v17  ;;  %v13590_v23 = vld [vmem:[#allocation2 + $0x268] sm:$0xf0] }
 0x781   : > { %v7671_v55 = vpop.f32.mrf.mxu3  ;;  %v7584_v30 = vpop.f32.mrf.mxu1 }
 0x782   : > { %v7672_v45 = vadd.f32 %v7671_v55, %v7582_v37 }
 0x783   : > { %v8174_v54 = vpop.f32.mrf.mxu2 }
 0x784   : > { %v7712_v27 = vadd.f32 %v7672_v45, %v17117_v40  ;;  %v8175_v35 = vadd.f32 %v8174_v54, %v8085_v48  ;;  %v14706_v40 = vld [vmem:[#allocation4 + $0x1e4] sm:$0xf] }
 0x785   : > { %v8088_v42 = vpop.f32.mrf.mxu0  ;;  %v13395_v37 = vor.u32 %v14706_v40, %v13392_v8  ;;  %v743_v48 = vld [vmem:[%s17385_s11] sm:$0xff]  ;;  %v13400_v40 = vld [vmem:[#allocation4 + $0x1f8] sm:$0xf0] }
 0x786   : > { %v17377_v22 = vadd.f32 %v8175_v35, %v7711_v38  ;;  %759 = vst.msk [vmem:[#allocation2 + $0x280] sm:$0xff] %vm15383_vm2, %v743_v48  ;;  %v745_v48 = vld [vmem:[%s17385_s11 + $0x10] sm:$0xff] }
 0x787   : > { %761 = vst.msk [vmem:[#allocation2 + $0x290] sm:$0xff] %vm15383_vm2, %v745_v48  ;;  %v747_v48 = vld [vmem:[%s17385_s11 + $0x20] sm:$0xff] }
 0x788   : > { %9059 = vmatmul.bf16.gmra.mxu0 %v13581_v14  ;;  %13707 = vmatmul.msk.bf16.gmra.mxu2 %vm1458_vm3, %v13585_v50  ;;  %v1097_v14 = vld [vmem:[%s17101_s16 + $0x30] sm:$0xff]  ;;  %763 = vst.msk [vmem:[#allocation2 + $0x2a0] sm:$0xff] %vm15383_vm2, %v747_v48 }
 0x789   : > { %v7673_v44 = vpop.f32.mrf.mxu3  ;;  %v7587_v6 = vpop.f32.mrf.mxu1  ;;  %1113 = vst.msk [vmem:[#allocation4 + $0x210] sm:$0xff] %vm15383_vm2, %v1097_v14  ;;  %v13398_v50 = vld [vmem:[#allocation4 + $0x1f0] sm:$0xf]  ;;  %v1100_v14 = vld [vmem:[%s17101_s16 + $0x48] sm:$0xff] }
 0x78a   : > { %v7674_v58 = vadd.f32 %v7673_v44, %v7584_v30  ;;  %v14747_v30 = vld [vmem:[#allocation2 + $0x264] sm:$0xf]  ;;  %1116 = vst.msk [vmem:[#allocation4 + $0x228] sm:$0xff] %vm15383_vm2, %v1100_v14  ;;  %v749_v48 = vld [vmem:[%s17385_s11 + $0x30] sm:$0xff] }
 0x78b   : > { %v8177_v7 = vpop.f32.mrf.mxu2  ;;  %765 = vst.msk [vmem:[#allocation2 + $0x2b0] sm:$0xff] %vm15383_vm2, %v749_v48  ;;  %v751_v48 = vld [vmem:[%s17385_s11 + $0x40] sm:$0xff] }
 0x78c   : > { %v7713_v10 = vadd.f32 %v7674_v58, %v17131_v53  ;;  %v8178_v47 = vadd.f32 %v8177_v7, %v8088_v42  ;;  %8558 = vmatmul.bf16.gmra.mxu1 %v13391_v13  ;;  %v14748_v53 = vld [vmem:[#allocation2 + $0x264] sm:$0xf0]  ;;  %v13593_v42 = vor.u32 %v14747_v30, %v13590_v23  ;;  %v13598_v30 = vld [vmem:[#allocation2 + $0x278] sm:$0xf0]  ;;  %767 = vst.msk [vmem:[#allocation2 + $0x2c0] sm:$0xff] %vm15383_vm2, %v751_v48  ;;  %v753_v48 = vld [vmem:[%s17385_s11 + $0x50] sm:$0xff] }
 0x78d   : > { %v8090_v0 = vpop.f32.mrf.mxu0  ;;  %v13589_v54 = vor.u32 %v14748_v53, %v13588_v1  ;;  %v13596_v1 = vld [vmem:[#allocation2 + $0x270] sm:$0xf]  ;;  %v14750_v53 = vld [vmem:[#allocation2 + $0x274] sm:$0xf0]  ;;  %769 = vst.msk [vmem:[#allocation2 + $0x2d0] sm:$0xff] %vm15383_vm2, %v753_v48  ;;  %v755_v48 = vld [vmem:[%s17385_s11 + $0x60] sm:$0xff] }
 0x78e   : > { %v17387_v38 = vadd.f32 %v8178_v47, %v7712_v27  ;;  %13510 = vmatmul.msk.bf16.gmra.mxu3 %vm1458_vm3, %v13395_v37  ;;  %771 = vst.msk [vmem:[#allocation2 + $0x2e0] sm:$0xff] %vm15383_vm2, %v755_v48  ;;  %v757_v48 = vld [vmem:[%s17385_s11 + $0x70] sm:$0xff] }
 0x78f   : > { %773 = vst.msk [vmem:[#allocation2 + $0x2f0] sm:$0xff] %vm15383_vm2, %v757_v48 }
 0x791   : > { %v7676_v49 = vpop.f32.mrf.mxu3  ;;  %v7589_v55 = vpop.f32.mrf.mxu1 }
 0x792   : > { %v7677_v17 = vadd.f32 %v7676_v49, %v7587_v6  ;;  %v13403_v6 = vor.u32 %v14708_v26, %v13400_v40  ;;  %v13408_v40 = vld [vmem:[#allocation4 + $0x208] sm:$0xf0] }
 0x793   : > { %v8179_v45 = vpop.f32.mrf.mxu2 }
 0x794   : > { %v7714_v11 = vadd.f32 %v7677_v17, %v17135_v61  ;;  %v8180_v27 = vadd.f32 %v8179_v45, %v8090_v0  ;;  %v13399_v61 = vor.u32 %v14709_v20, %v13398_v50  ;;  %v14811_v0 = vld [vmem:[%s17884_s6 + $0x210] sm:$0xff]  ;;  %v13597_v45 = vor.u32 %v14750_v53, %v13596_v1  ;;  %v13406_v50 = vld [vmem:[#allocation4 + $0x200] sm:$0xf]  ;;  %v14711_v20 = vld [vmem:[#allocation4 + $0x204] sm:$0xf0] }
 0x795   : > { %v8093_v35 = vpop.f32.mrf.mxu0  ;;  %9536 = vmatpush.bf16.msra.mxu1 %v14811_v0  ;;  %v13604_v1 = vld [vmem:[#allocation2 + $0x280] sm:$0xf]  ;;  %v14752_v53 = vld [vmem:[#allocation2 + $0x284] sm:$0xf0] }
 0x796   : > { %v17403_v3 = vadd.f32 %v8180_v27, %v7713_v10 }
 0x798   : > { %9064 = vmatmul.bf16.gmra.mxu0 %v13589_v54  ;;  %13708 = vmatmul.msk.bf16.gmra.mxu2 %vm1458_vm3, %v13593_v42  ;;  %v1099_v54 = vld [vmem:[%s17101_s16 + $0x40] sm:$0xff]  ;;  %v14852_v42 = vld [vmem:[%s17884_s6 + $0x258] sm:$0xff] }
 0x799   : > { %v7678_v8 = vpop.f32.mrf.mxu3  ;;  %v7592_v13 = vpop.f32.mrf.mxu1  ;;  %1115 = vst.msk [vmem:[#allocation4 + $0x220] sm:$0xff] %vm15383_vm2, %v1099_v54  ;;  %10042 = vmatpush.bf16.msra.mxu0 %v14852_v42  ;;  %v1102_v54 = vld [vmem:[%s17101_s16 + $0x58] sm:$0xff] }
 0x79a   : > { %v7679_v44 = vadd.f32 %v7678_v8, %v7589_v55  ;;  %v14749_v55 = vld [vmem:[#allocation2 + $0x274] sm:$0xf]  ;;  %v14713_v42 = vld [vmem:[#allocation4 + $0x214] sm:$0xf0]  ;;  %1118 = vst.msk [vmem:[#allocation4 + $0x238] sm:$0xff] %vm15383_vm2, %v1102_v54 }
 0x79b   : > { %v8182_v58 = vpop.f32.mrf.mxu2 }
 0x79c   : > { %v7715_v37 = vadd.f32 %v7679_v44, %v17155_v4  ;;  %v8183_v7 = vadd.f32 %v8182_v58, %v8093_v35  ;;  %8563 = vmatmul.bf16.gmra.mxu1 %v13399_v61  ;;  %v13601_v35 = vor.u32 %v14749_v55, %v13598_v30  ;;  %v13407_v61 = vor.u32 %v14711_v20, %v13406_v50  ;;  %v14751_v55 = vld [vmem:[#allocation2 + $0x284] sm:$0xf]  ;;  %v14712_v20 = vld [vmem:[#allocation4 + $0x214] sm:$0xf] }
 0x79d   : > { %v8095_v47 = vpop.f32.mrf.mxu0 }
 0x79e   : > { %v17407_v10 = vadd.f32 %v8183_v7, %v7714_v11  ;;  %13511 = vmatmul.msk.bf16.gmra.mxu3 %vm1458_vm3, %v13403_v6 }
 0x7a1   : > { %v7681_v4 = vpop.f32.mrf.mxu3  ;;  %v7594_v49 = vpop.f32.mrf.mxu1 }
 0x7a2   : > { %v7682_v23 = vadd.f32 %v7681_v4, %v7592_v13 }
 0x7a3   : > { %v8184_v17 = vpop.f32.mrf.mxu2 }
 0x7a4   : > { %v7716_v25 = vadd.f32 %v7682_v23, %v17158_v46  ;;  %v8185_v11 = vadd.f32 %v8184_v17, %v8095_v47  ;;  %v14710_v46 = vld [vmem:[#allocation4 + $0x204] sm:$0xf]  ;;  %v13605_v17 = vor.u32 %v14752_v53, %v13604_v1  ;;  %v13612_v1 = vld [vmem:[#allocation2 + $0x290] sm:$0xf]  ;;  %v14754_v53 = vld [vmem:[#allocation2 + $0x294] sm:$0xf0] }
 0x7a5   : > { %v8098_v27 = vpop.f32.mrf.mxu0  ;;  %v13411_v6 = vor.u32 %v14710_v46, %v13408_v40  ;;  %v13416_v46 = vld [vmem:[#allocation4 + $0x218] sm:$0xf0] }
 0x7a6   : > { %v17429_v26 = vadd.f32 %v8185_v11, %v7715_v37 }
 0x7a8   : > { %9069 = vmatmul.bf16.gmra.mxu0 %v13597_v45  ;;  %13709 = vmatmul.msk.bf16.gmra.mxu2 %vm1458_vm3, %v13601_v35  ;;  %v1101_v45 = vld [vmem:[%s17101_s16 + $0x50] sm:$0xff] }
 0x7a9   : > { %v7683_v8 = vpop.f32.mrf.mxu3  ;;  %v8529_v13 = vpop.f32.mrf.mxu1  ;;  %1117 = vst.msk [vmem:[#allocation4 + $0x230] sm:$0xff] %vm15383_vm2, %v1101_v45  ;;  %v13414_v35 = vld [vmem:[#allocation4 + $0x210] sm:$0xf]  ;;  %v1104_v45 = vld [vmem:[%s17101_s16 + $0x68] sm:$0xff] }
 0x7aa   : > { %v7684_v44 = vadd.f32 %v7683_v8, %v7594_v49  ;;  %1120 = vst.msk [vmem:[#allocation4 + $0x248] sm:$0xff] %vm15383_vm2, %v1104_v45 }
 0x7ab   : > { %v8187_v58 = vpop.f32.mrf.mxu2 }
 0x7ac   : > { %v7717_v7 = vadd.f32 %v7684_v44, %v17172_v15  ;;  %v8188_v47 = vadd.f32 %v8187_v58, %v8098_v27  ;;  %8568 = vmatmul.bf16.gmra.mxu1 %v13407_v61  ;;  %v13606_v15 = vld [vmem:[#allocation2 + $0x288] sm:$0xf0] }
 0x7ad   : > { %v8100_v0 = vpop.f32.mrf.mxu0  ;;  %v13609_v27 = vor.u32 %v14751_v55, %v13606_v15  ;;  %v13614_v55 = vld [vmem:[#allocation2 + $0x298] sm:$0xf0] }
 0x7ae   : > { %v17433_v37 = vadd.f32 %v8188_v47, %v7716_v25  ;;  %13512 = vmatmul.msk.bf16.gmra.mxu3 %vm1458_vm3, %v13411_v6 }
 0x7b1   : > { %v8618_v4 = vpop.f32.mrf.mxu3  ;;  %v8531_v49 = vpop.f32.mrf.mxu1 }
 0x7b2   : > { %v8619_v30 = vadd.f32 %v8618_v4, %v8529_v13  ;;  %v13419_v13 = vor.u32 %v14712_v20, %v13416_v46  ;;  %v13424_v46 = vld [vmem:[#allocation4 + $0x228] sm:$0xf0] }
 0x7b3   : > { %v8189_v23 = vpop.f32.mrf.mxu2 }
 0x7b4   : > { %v8698_v14 = vadd.f32 %v8619_v30, %v17177_v5  ;;  %v8190_v25 = vadd.f32 %v8189_v23, %v8100_v0  ;;  %v13415_v5 = vor.u32 %v14713_v42, %v13414_v35  ;;  %v14810_v0 = vld [vmem:[%s17884_s6 + $0x208] sm:$0xff]  ;;  %v13613_v23 = vor.u32 %v14754_v53, %v13612_v1  ;;  %v13422_v35 = vld [vmem:[#allocation4 + $0x220] sm:$0xf] }
 0x7b5   : > { %v9035_v11 = vpop.f32.mrf.mxu0  ;;  %9537 = vmatpush.bf16.msra.mxu1 %v14810_v0  ;;  %v14715_v42 = vld [vmem:[#allocation4 + $0x224] sm:$0xf0]  ;;  %v13620_v1 = vld [vmem:[#allocation2 + $0x2a0] sm:$0xf] }
 0x7b6   : > { %v17449_v50 = vadd.f32 %v8190_v25, %v7717_v7  ;;  %v14756_v53 = vld [vmem:[#allocation2 + $0x2a4] sm:$0xf0] }
 0x7b8   : > { %9074 = vmatmul.bf16.gmra.mxu0 %v13605_v17  ;;  %13710 = vmatmul.msk.bf16.gmra.mxu2 %vm1458_vm3, %v13609_v27  ;;  %v1103_v17 = vld [vmem:[%s17101_s16 + $0x60] sm:$0xff]  ;;  %v14851_v27 = vld [vmem:[%s17884_s6 + $0x250] sm:$0xff] }
 0x7b9   : > { %v8620_v40 = vpop.f32.mrf.mxu3  ;;  %v8534_v61 = vpop.f32.mrf.mxu1  ;;  %1119 = vst.msk [vmem:[#allocation4 + $0x240] sm:$0xff] %vm15383_vm2, %v1103_v17  ;;  %10043 = vmatpush.bf16.msra.mxu0 %v14851_v27  ;;  %v1106_v17 = vld [vmem:[%s17101_s16 + $0x78] sm:$0xff] }
 0x7ba   : > { %v8621_v8 = vadd.f32 %v8620_v40, %v8531_v49  ;;  %v14753_v49 = vld [vmem:[#allocation2 + $0x294] sm:$0xf]  ;;  %v14717_v27 = vld [vmem:[#allocation4 + $0x234] sm:$0xf0]  ;;  %1122 = vst.msk [vmem:[#allocation4 + $0x258] sm:$0xff] %vm15383_vm2, %v1106_v17 }
 0x7bb   : > { %v9124_v44 = vpop.f32.mrf.mxu2 }
 0x7bc   : > { %v8699_v6 = vadd.f32 %v8621_v8, %v17196_v60  ;;  %v9125_v58 = vadd.f32 %v9124_v44, %v9035_v11  ;;  %8573 = vmatmul.bf16.gmra.mxu1 %v13415_v5  ;;  %v13617_v11 = vor.u32 %v14753_v49, %v13614_v55  ;;  %v13423_v5 = vor.u32 %v14715_v42, %v13422_v35  ;;  %v14755_v49 = vld [vmem:[#allocation2 + $0x2a4] sm:$0xf]  ;;  %v14716_v42 = vld [vmem:[#allocation4 + $0x234] sm:$0xf] }
 0x7bd   : > { %v9037_v47 = vpop.f32.mrf.mxu0 }
 0x7be   : > { %13513 = vmatmul.msk.bf16.gmra.mxu3 %vm1458_vm3, %v13419_v13  ;;  %v17454_v7 = vadd.f32 %v9125_v58, %v8698_v14 }
 0x7c1   : > { %v8623_v60 = vpop.f32.mrf.mxu3  ;;  %v8536_v4 = vpop.f32.mrf.mxu1 }
 0x7c2   : > { %v8624_v15 = vadd.f32 %v8623_v60, %v8534_v61 }
 0x7c3   : > { %v9126_v30 = vpop.f32.mrf.mxu2 }
 0x7c4   : > { %v8700_v54 = vadd.f32 %v8624_v15, %v17201_v57  ;;  %v9127_v14 = vadd.f32 %v9126_v30, %v9037_v47  ;;  %v14714_v57 = vld [vmem:[#allocation4 + $0x224] sm:$0xf]  ;;  %v13621_v30 = vor.u32 %v14756_v53, %v13620_v1  ;;  %v13628_v1 = vld [vmem:[#allocation2 + $0x2b0] sm:$0xf]  ;;  %v14758_v53 = vld [vmem:[#allocation2 + $0x2b4] sm:$0xf0] }
 0x7c5   : > { %v9040_v25 = vpop.f32.mrf.mxu0  ;;  %v13427_v13 = vor.u32 %v14714_v57, %v13424_v46  ;;  %v13432_v57 = vld [vmem:[#allocation4 + $0x238] sm:$0xf0] }
 0x7c6   : > { %v17475_v20 = vadd.f32 %v9127_v14, %v8699_v6 }
 0x7c8   : > { %9079 = vmatmul.bf16.gmra.mxu0 %v13613_v23  ;;  %13711 = vmatmul.msk.bf16.gmra.mxu2 %vm1458_vm3, %v13617_v11  ;;  %v1105_v23 = vld [vmem:[%s17101_s16 + $0x70] sm:$0xff] }
 0x7c9   : > { %v8625_v40 = vpop.f32.mrf.mxu3  ;;  %v8539_v61 = vpop.f32.mrf.mxu1  ;;  %1121 = vst.msk [vmem:[#allocation4 + $0x250] sm:$0xff] %vm15383_vm2, %v1105_v23  ;;  %v13430_v11 = vld [vmem:[#allocation4 + $0x230] sm:$0xf]  ;;  %v1108_v23 = vld [vmem:[%s17101_s16 + $0x88] sm:$0xff] }
 0x7ca   : > { %v8626_v8 = vadd.f32 %v8625_v40, %v8536_v4  ;;  %1124 = vst.msk [vmem:[#allocation4 + $0x268] sm:$0xff] %vm15383_vm2, %v1108_v23 }
 0x7cb   : > { %v9129_v44 = vpop.f32.mrf.mxu2 }
 0x7cc   : > { %v8701_v58 = vadd.f32 %v8626_v8, %v17214_v34  ;;  %v9130_v47 = vadd.f32 %v9129_v44, %v9040_v25  ;;  %8578 = vmatmul.bf16.gmra.mxu1 %v13423_v5  ;;  %v13622_v34 = vld [vmem:[#allocation2 + $0x2a8] sm:$0xf0] }
 0x7cd   : > { %v9042_v0 = vpop.f32.mrf.mxu0  ;;  %v13625_v25 = vor.u32 %v14755_v49, %v13622_v34  ;;  %v13630_v49 = vld [vmem:[#allocation2 + $0x2b8] sm:$0xf0] }
 0x7ce   : > { %13514 = vmatmul.msk.bf16.gmra.mxu3 %vm1458_vm3, %v13427_v13  ;;  %v17480_v6 = vadd.f32 %v9130_v47, %v8700_v54 }
 0x7d1   : > { %v8628_v60 = vpop.f32.mrf.mxu3  ;;  %v8541_v4 = vpop.f32.mrf.mxu1 }
 0x7d2   : > { %v8629_v55 = vadd.f32 %v8628_v60, %v8539_v61  ;;  %v13435_v61 = vor.u32 %v14716_v42, %v13432_v57  ;;  %v13440_v57 = vld [vmem:[#allocation4 + $0x248] sm:$0xf0] }
 0x7d3   : > { %v9131_v15 = vpop.f32.mrf.mxu2 }
 0x7d4   : > { %v8702_v45 = vadd.f32 %v8629_v55, %v17219_v41  ;;  %v9132_v54 = vadd.f32 %v9131_v15, %v9042_v0  ;;  %v13431_v41 = vor.u32 %v14717_v27, %v13430_v11  ;;  %v14809_v0 = vld [vmem:[%s17884_s6 + $0x200] sm:$0xff]  ;;  %v13629_v15 = vor.u32 %v14758_v53, %v13628_v1  ;;  %v14719_v27 = vld [vmem:[#allocation4 + $0x244] sm:$0xf0] }
 0x7d5   : > { %v9045_v14 = vpop.f32.mrf.mxu0  ;;  %9538 = vmatpush.bf16.msra.mxu1 %v14809_v0  ;;  %v13438_v11 = vld [vmem:[#allocation4 + $0x240] sm:$0xf]  ;;  %v14760_v53 = vld [vmem:[#allocation2 + $0x2c4] sm:$0xf0] }
 0x7d6   : > { %v17495_v35 = vadd.f32 %v9132_v54, %v8701_v58  ;;  %v13636_v1 = vld [vmem:[#allocation2 + $0x2c0] sm:$0xf] }
 0x7d8   : > { %9084 = vmatmul.bf16.gmra.mxu0 %v13621_v30  ;;  %13712 = vmatmul.msk.bf16.gmra.mxu2 %vm1458_vm3, %v13625_v25  ;;  %v1107_v30 = vld [vmem:[%s17101_s16 + $0x80] sm:$0xff]  ;;  %v14850_v25 = vld [vmem:[%s17884_s6 + $0x248] sm:$0xff] }
 0x7d9   : > { %v8630_v46 = vpop.f32.mrf.mxu3  ;;  %v8544_v5 = vpop.f32.mrf.mxu1  ;;  %1123 = vst.msk [vmem:[#allocation4 + $0x260] sm:$0xff] %vm15383_vm2, %v1107_v30  ;;  %10044 = vmatpush.bf16.msra.mxu0 %v14850_v25  ;;  %v1110_v30 = vld [vmem:[%s17101_s16 + $0x98] sm:$0xff] }
 0x7da   : > { %v8631_v40 = vadd.f32 %v8630_v46, %v8541_v4  ;;  %v14757_v4 = vld [vmem:[#allocation2 + $0x2b4] sm:$0xf]  ;;  %v14721_v25 = vld [vmem:[#allocation4 + $0x254] sm:$0xf0]  ;;  %1126 = vst.msk [vmem:[#allocation4 + $0x278] sm:$0xff] %vm15383_vm2, %v1110_v30 }
 0x7db   : > { %v9134_v8 = vpop.f32.mrf.mxu2 }
 0x7dc   : > { %v8703_v13 = vadd.f32 %v8631_v40, %v17238_v32  ;;  %v9135_v44 = vadd.f32 %v9134_v8, %v9045_v14  ;;  %8583 = vmatmul.bf16.gmra.mxu1 %v13431_v41  ;;  %v13633_v14 = vor.u32 %v14757_v4, %v13630_v49  ;;  %v13439_v41 = vor.u32 %v14719_v27, %v13438_v11  ;;  %v14759_v4 = vld [vmem:[#allocation2 + $0x2c4] sm:$0xf]  ;;  %v14720_v27 = vld [vmem:[#allocation4 + $0x254] sm:$0xf] }
 0x7dd   : > { %v9047_v47 = vpop.f32.mrf.mxu0 }
 0x7de   : > { %13515 = vmatmul.msk.bf16.gmra.mxu3 %vm1458_vm3, %v13435_v61  ;;  %v17500_v58 = vadd.f32 %v9135_v44, %v8702_v45 }
 0x7e1   : > { %v8633_v32 = vpop.f32.mrf.mxu3  ;;  %v8546_v60 = vpop.f32.mrf.mxu1 }
 0x7e2   : > { %v8634_v34 = vadd.f32 %v8633_v32, %v8544_v5 }
 0x7e3   : > { %v9136_v55 = vpop.f32.mrf.mxu2 }
 0x7e4   : > { %v8704_v17 = vadd.f32 %v8634_v34, %v17243_v39  ;;  %v9137_v45 = vadd.f32 %v9136_v55, %v9047_v47  ;;  %v14718_v39 = vld [vmem:[#allocation4 + $0x244] sm:$0xf]  ;;  %v13637_v55 = vor.u32 %v14760_v53, %v13636_v1  ;;  %v13644_v1 = vld [vmem:[#allocation2 + $0x2d0] sm:$0xf]  ;;  %v14762_v53 = vld [vmem:[#allocation2 + $0x2d4] sm:$0xf0] }
 0x7e5   : > { %v9050_v54 = vpop.f32.mrf.mxu0  ;;  %v13443_v61 = vor.u32 %v14718_v39, %v13440_v57  ;;  %v13448_v39 = vld [vmem:[#allocation4 + $0x258] sm:$0xf0] }
 0x7e6   : > { %v17521_v42 = vadd.f32 %v9137_v45, %v8703_v13 }
 0x7e8   : > { %9089 = vmatmul.bf16.gmra.mxu0 %v13629_v15  ;;  %13713 = vmatmul.msk.bf16.gmra.mxu2 %vm1458_vm3, %v13633_v14  ;;  %v1109_v15 = vld [vmem:[%s17101_s16 + $0x90] sm:$0xff] }
 0x7e9   : > { %v8635_v46 = vpop.f32.mrf.mxu3  ;;  %v8549_v5 = vpop.f32.mrf.mxu1  ;;  %1125 = vst.msk [vmem:[#allocation4 + $0x270] sm:$0xff] %vm15383_vm2, %v1109_v15  ;;  %v13446_v14 = vld [vmem:[#allocation4 + $0x250] sm:$0xf] }
 0x7ea   : > { %v8636_v40 = vadd.f32 %v8635_v46, %v8546_v60 }
 0x7eb   : > { %v9139_v8 = vpop.f32.mrf.mxu2 }
 0x7ec   : > { %v8705_v44 = vadd.f32 %v8636_v40, %v17256_v18  ;;  %v9140_v47 = vadd.f32 %v9139_v8, %v9050_v54  ;;  %8588 = vmatmul.bf16.gmra.mxu1 %v13439_v41  ;;  %v13638_v18 = vld [vmem:[#allocation2 + $0x2c8] sm:$0xf0] }
 0x7ed   : > { %v9052_v0 = vpop.f32.mrf.mxu0  ;;  %v13641_v54 = vor.u32 %v14759_v4, %v13638_v18  ;;  %v13646_v4 = vld [vmem:[#allocation2 + $0x2d8] sm:$0xf0] }
 0x7ee   : > { %13516 = vmatmul.msk.bf16.gmra.mxu3 %vm1458_vm3, %v13443_v61  ;;  %v17526_v13 = vadd.f32 %v9140_v47, %v8704_v17 }
 0x7f1   : > { %v8638_v32 = vpop.f32.mrf.mxu3  ;;  %v8551_v60 = vpop.f32.mrf.mxu1 }
 0x7f2   : > { %v8639_v49 = vadd.f32 %v8638_v32, %v8549_v5  ;;  %v13451_v5 = vor.u32 %v14720_v27, %v13448_v39  ;;  %v13456_v27 = vld [vmem:[#allocation4 + $0x268] sm:$0xf0] }
 0x7f3   : > { %v9141_v34 = vpop.f32.mrf.mxu2 }
 0x7f4   : > { %v8706_v23 = vadd.f32 %v8639_v49, %v17261_v28  ;;  %v9142_v17 = vadd.f32 %v9141_v34, %v9052_v0  ;;  %v13447_v28 = vor.u32 %v14721_v25, %v13446_v14  ;;  %v14808_v0 = vld [vmem:[%s17884_s6 + $0x1f8] sm:$0xff]  ;;  %v13645_v34 = vor.u32 %v14762_v53, %v13644_v1  ;;  %v14722_v25 = vld [vmem:[#allocation4 + $0x264] sm:$0xf]  ;;  %v13654_v53 = vld [vmem:[#allocation2 + $0x2e8] sm:$0xf0] }
 0x7f5   : > { %v9055_v45 = vpop.f32.mrf.mxu0  ;;  %9539 = vmatpush.bf16.msra.mxu1 %v14808_v0  ;;  %v14764_v0 = vld [vmem:[#allocation2 + $0x2e4] sm:$0xf0]  ;;  %v14763_v1 = vld [vmem:[#allocation2 + $0x2e4] sm:$0xf] }
 0x7f6   : > { %v17541_v11 = vadd.f32 %v9142_v17, %v8705_v44  ;;  %v14849_v17 = vld [vmem:[%s17884_s6 + $0x240] sm:$0xff] }
 0x7f7   : > { %10045 = vmatpush.bf16.msra.mxu0 %v14849_v17 }
 0x7f8   : > { %9094 = vmatmul.bf16.gmra.mxu0 %v13637_v55  ;;  %13714 = vmatmul.msk.bf16.gmra.mxu2 %vm1458_vm3, %v13641_v54  ;;  %v14723_v54 = vld [vmem:[#allocation4 + $0x264] sm:$0xf0] }
 0x7f9   : > { %v8640_v57 = vpop.f32.mrf.mxu3  ;;  %v8554_v41 = vpop.f32.mrf.mxu1 }
 0x7fa   : > { %v8641_v46 = vadd.f32 %v8640_v57, %v8551_v60  ;;  %v14761_v60 = vld [vmem:[#allocation2 + $0x2d4] sm:$0xf] }
 0x7fb   : > { %v9144_v40 = vpop.f32.mrf.mxu2 }
 0x7fc   : > { %v8707_v61 = vadd.f32 %v8641_v46, %v17276_v62  ;;  %v9145_v8 = vadd.f32 %v9144_v40, %v9055_v45  ;;  %8593 = vmatmul.bf16.gmra.mxu1 %v13447_v28  ;;  %v13454_v45 = vld [vmem:[#allocation4 + $0x260] sm:$0xf] }
 0x7fd   : > { %v9057_v47 = vpop.f32.mrf.mxu0  ;;  %v13455_v39 = vor.u32 %v14723_v54, %v13454_v45 }
 0x7fe   : > { %13517 = vmatmul.msk.bf16.gmra.mxu3 %vm1458_vm3, %v13451_v5  ;;  %v17546_v44 = vadd.f32 %v9145_v8, %v8706_v23  ;;  %v13649_v23 = vor.u32 %v14761_v60, %v13646_v4 }
 0x801   : > { %v8643_v62 = vpop.f32.mrf.mxu3  ;;  %v8556_v32 = vpop.f32.mrf.mxu1 }
 0x802   : > { %v8644_v18 = vadd.f32 %v8643_v62, %v8554_v41  ;;  %v13459_v41 = vor.u32 %v14722_v25, %v13456_v27 }
 0x803   : > { %v9146_v49 = vpop.f32.mrf.mxu2 }
 0x804   : > { %v8708_v55 = vadd.f32 %v8644_v18, %v17281_v33  ;;  %v9147_v15 = vadd.f32 %v9146_v49, %v9057_v47  ;;  %v13652_v47 = vld [vmem:[#allocation2 + $0x2e0] sm:$0xf]  ;;  %v13657_v49 = vor.u32 %v14763_v1, %v13654_v53 }
 0x805   : > { %v9060_v30 = vpop.f32.mrf.mxu0 }
 0x806   : > { %v17561_v14 = vadd.f32 %v9147_v15, %v8707_v61  ;;  %v14725_v15 = vld [vmem:[#allocation4 + $0x274] sm:$0xf0] }
 0x808   : > { %9099 = vmatmul.bf16.gmra.mxu0 %v13645_v34  ;;  %13715 = vmatmul.msk.bf16.gmra.mxu2 %vm1458_vm3, %v13649_v23  ;;  %v13462_v34 = vld [vmem:[#allocation4 + $0x270] sm:$0xf]  ;;  %v13464_v23 = vld [vmem:[#allocation4 + $0x278] sm:$0xf0] }
 0x809   : > { %v8645_v28 = vpop.f32.mrf.mxu3  ;;  %v8559_v33 = vpop.f32.mrf.mxu1  ;;  %v13463_v17 = vor.u32 %v14725_v15, %v13462_v34 }
 0x80a   : > { %v8646_v57 = vadd.f32 %v8645_v28, %v8556_v32  ;;  %v13653_v32 = vor.u32 %v14764_v0, %v13652_v47  ;;  %v13662_v47 = vld [vmem:[#allocation2 + $0x2f8] sm:$0xf0] }
 0x80b   : > { %v9149_v46 = vpop.f32.mrf.mxu2 }
 0x80c   : > { %v8709_v5 = vadd.f32 %v8646_v57, %v17284_v12  ;;  %v9150_v40 = vadd.f32 %v9149_v46, %v9060_v30  ;;  %8598 = vmatmul.bf16.gmra.mxu1 %v13455_v39  ;;  %v14766_v46 = vld [vmem:[#allocation2 + $0x2f4] sm:$0xf0] }
 0x80d   : > { %v9062_v8 = vpop.f32.mrf.mxu0 }
 0x80e   : > { %13518 = vmatmul.msk.bf16.gmra.mxu3 %vm1458_vm3, %v13459_v41  ;;  %v17566_v61 = vadd.f32 %v9150_v40, %v8708_v55  ;;  %v14724_v55 = vld [vmem:[#allocation4 + $0x274] sm:$0xf]  ;;  %v13660_v41 = vld [vmem:[#allocation2 + $0x2f0] sm:$0xf] }
 0x80f   : > { %v13467_v27 = vor.u32 %v14724_v55, %v13464_v23 }
 0x811   : > { %v8648_v48 = vpop.f32.mrf.mxu3  ;;  %v8561_v51 = vpop.f32.mrf.mxu1 }
 0x812   : > { %v8649_v62 = vadd.f32 %v8648_v48, %v8559_v33 }
 0x813   : > { %v9151_v60 = vpop.f32.mrf.mxu2 }
 0x814   : > { %v8710_v4 = vadd.f32 %v8649_v62, %v17295_v56  ;;  %v9152_v18 = vadd.f32 %v9151_v60, %v9062_v8  ;;  %v14765_v8 = vld [vmem:[#allocation2 + $0x2f4] sm:$0xf]  ;;  %v13738_v60 = vld [vmem:[#allocation3 + $0x200] sm:$0xf] }
 0x815   : > { %v9065_v12 = vpop.f32.mrf.mxu0  ;;  %v13665_v62 = vor.u32 %v14765_v8, %v13662_v47 }
 0x816   : > { %v17569_v30 = vadd.f32 %v9152_v18, %v8709_v5 }
 0x818   : > { %9104 = vmatmul.bf16.gmra.mxu0 %v13653_v32  ;;  %13716 = vmatmul.msk.bf16.gmra.mxu2 %vm1458_vm3, %v13657_v49  ;;  %v14777_v32 = vld [vmem:[#allocation3 + $0x204] sm:$0xf0] }
 0x819   : > { %v8650_v45 = vpop.f32.mrf.mxu3  ;;  %v8564_v54 = vpop.f32.mrf.mxu1  ;;  %v13739_v49 = vor.u32 %v14777_v32, %v13738_v60 }
 0x81a   : > { %v8651_v25 = vadd.f32 %v8650_v45, %v8561_v51  ;;  %v13661_v51 = vor.u32 %v14766_v46, %v13660_v41  ;;  %v13938_v41 = vld [vmem:[#allocation4 + $0x208] sm:$0xf0] }
 0x81b   : > { %v9154_v39 = vpop.f32.mrf.mxu2 }
 0x81c   : > { %v8711_v56 = vadd.f32 %v8651_v25, %v17304_v24  ;;  %v9155_v28 = vadd.f32 %v9154_v39, %v9065_v12  ;;  %8603 = vmatmul.bf16.gmra.mxu1 %v13463_v17  ;;  %v13740_v12 = vld [vmem:[#allocation3 + $0x208] sm:$0xf0]  ;;  %v14818_v39 = vld [vmem:[#allocation4 + $0x204] sm:$0xf0] }
 0x81d   : > { %v9067_v33 = vpop.f32.mrf.mxu0 }
 0x81e   : > { %13519 = vmatmul.msk.bf16.gmra.mxu3 %vm1458_vm3, %v13467_v27  ;;  %v17574_v57 = vadd.f32 %v9155_v28, %v8710_v4  ;;  %v14776_v4 = vld [vmem:[#allocation3 + $0x204] sm:$0xf]  ;;  %v13936_v27 = vld [vmem:[#allocation4 + $0x200] sm:$0xf] }
 0x81f   : > { %v13743_v23 = vor.u32 %v14776_v4, %v13740_v12 }
 0x821   : > { %v8653_v5 = vpop.f32.mrf.mxu3  ;;  %v8566_v40 = vpop.f32.mrf.mxu1 }
 0x822   : > { %v8654_v0 = vadd.f32 %v8653_v5, %v8564_v54 }
 0x823   : > { %v9156_v48 = vpop.f32.mrf.mxu2 }
 0x824   : > { %v8712_v1 = vadd.f32 %v8654_v0, %v17308_v16  ;;  %v9157_v53 = vadd.f32 %v9156_v48, %v9067_v33  ;;  %v14817_v33 = vld [vmem:[#allocation4 + $0x204] sm:$0xf]  ;;  %v13746_v48 = vld [vmem:[#allocation3 + $0x210] sm:$0xf] }
 0x825   : > { %v9070_v24 = vpop.f32.mrf.mxu0  ;;  %v13941_v0 = vor.u32 %v14817_v33, %v13938_v41 }
 0x826   : > { %v17577_v18 = vadd.f32 %v9157_v53, %v8711_v56  ;;  %v14778_v53 = vld [vmem:[#allocation3 + $0x214] sm:$0xf] }
 0x828   : > { %9109 = vmatmul.bf16.gmra.mxu0 %v13661_v51  ;;  %13717 = vmatmul.msk.bf16.gmra.mxu2 %vm1458_vm3, %v13665_v62  ;;  %v14779_v51 = vld [vmem:[#allocation3 + $0x214] sm:$0xf0] }
 0x829   : > { %v8655_v34 = vpop.f32.mrf.mxu3  ;;  %v8569_v15 = vpop.f32.mrf.mxu1  ;;  %v13747_v62 = vor.u32 %v14779_v51, %v13746_v48 }
 0x82a   : > { %v8656_v55 = vadd.f32 %v8655_v34, %v8566_v40  ;;  %v13937_v40 = vor.u32 %v14818_v39, %v13936_v27  ;;  %v13946_v27 = vld [vmem:[#allocation4 + $0x218] sm:$0xf0] }
 0x82b   : > { %v9159_v17 = vpop.f32.mrf.mxu2 }
 0x82c   : > { %v8713_v16 = vadd.f32 %v8656_v55, %v17312_v63  ;;  %v9160_v45 = vadd.f32 %v9159_v17, %v9070_v24  ;;  %9540 = vmatmul.bf16.vlgmr.msra.gmra.mxu1 %v13739_v49  ;;  %v13748_v24 = vld [vmem:[#allocation3 + $0x218] sm:$0xf0]  ;;  %v14820_v17 = vld [vmem:[#allocation4 + $0x214] sm:$0xf0] }
 0x82d   : > { %v9072_v54 = vpop.f32.mrf.mxu0  ;;  %v13751_v12 = vor.u32 %v14778_v53, %v13748_v24 }
 0x82e   : > { %v17581_v25 = vadd.f32 %v9160_v45, %v8712_v1  ;;  %13900 = vmatmul.msk.bf16.vlgmr.msra.gmra.mxu3 %vm1458_vm3, %v13743_v23  ;;  %v13944_v23 = vld [vmem:[#allocation4 + $0x210] sm:$0xf] }
 0x831   : > { %v8658_v56 = vpop.f32.mrf.mxu3  ;;  %v8571_v28 = vpop.f32.mrf.mxu1 }
 0x832   : > { %v8659_v46 = vadd.f32 %v8658_v56, %v8569_v15 }
 0x833   : > { %v9161_v5 = vpop.f32.mrf.mxu2 }
 0x834   : > { %v8714_v8 = vadd.f32 %v8659_v46, %v17316_v21  ;;  %v9162_v47 = vadd.f32 %v9161_v5, %v9072_v54  ;;  %v14819_v54 = vld [vmem:[#allocation4 + $0x214] sm:$0xf]  ;;  %v13754_v5 = vld [vmem:[#allocation3 + $0x220] sm:$0xf] }
 0x835   : > { %v9075_v63 = vpop.f32.mrf.mxu0  ;;  %v13949_v46 = vor.u32 %v14819_v54, %v13946_v27 }
 0x836   : > { %v17585_v1 = vadd.f32 %v9162_v47, %v8713_v16  ;;  %v14780_v47 = vld [vmem:[#allocation3 + $0x224] sm:$0xf] }
 0x838   : > { %10046 = vmatmul.bf16.vlgmr.msra.gmra.mxu0 %v13937_v40  ;;  %14098 = vmatmul.msk.bf16.vlgmr.msra.gmra.mxu2 %vm1458_vm3, %v13941_v0  ;;  %v14781_v40 = vld [vmem:[#allocation3 + $0x224] sm:$0xf0] }
 0x839   : > { %v8660_v60 = vpop.f32.mrf.mxu3  ;;  %v8574_v32 = vpop.f32.mrf.mxu1  ;;  %v13755_v0 = vor.u32 %v14781_v40, %v13754_v5 }
 0x83a   : > { %v8661_v4 = vadd.f32 %v8660_v60, %v8571_v28  ;;  %v13945_v28 = vor.u32 %v14820_v17, %v13944_v23  ;;  %v13954_v23 = vld [vmem:[#allocation4 + $0x228] sm:$0xf0] }
 0x83b   : > { %v9164_v49 = vpop.f32.mrf.mxu2 }
 0x83c   : > { %v8715_v21 = vadd.f32 %v8661_v4, %v17326_v52  ;;  %v9165_v34 = vadd.f32 %v9164_v49, %v9075_v63  ;;  %9545 = vmatmul.bf16.gmra.mxu1 %v13747_v62  ;;  %v13756_v63 = vld [vmem:[#allocation3 + $0x228] sm:$0xf0]  ;;  %v14822_v49 = vld [vmem:[#allocation4 + $0x224] sm:$0xf0] }
 0x83d   : > { %v9077_v15 = vpop.f32.mrf.mxu0  ;;  %v13759_v24 = vor.u32 %v14780_v47, %v13756_v63 }
 0x83e   : > { %v17589_v55 = vadd.f32 %v9165_v34, %v8714_v8  ;;  %13901 = vmatmul.msk.bf16.gmra.mxu3 %vm1458_vm3, %v13751_v12  ;;  %v13952_v12 = vld [vmem:[#allocation4 + $0x220] sm:$0xf] }
 0x841   : > { %v8663_v16 = vpop.f32.mrf.mxu3  ;;  %v8576_v45 = vpop.f32.mrf.mxu1 }
 0x842   : > { %v8664_v39 = vadd.f32 %v8663_v16, %v8574_v32 }
 0x843   : > { %v9166_v56 = vpop.f32.mrf.mxu2 }
 0x844   : > { %v8716_v33 = vadd.f32 %v8664_v39, %v17330_v2  ;;  %v9167_v41 = vadd.f32 %v9166_v56, %v9077_v15  ;;  %v14821_v15 = vld [vmem:[#allocation4 + $0x224] sm:$0xf]  ;;  %v13762_v56 = vld [vmem:[#allocation3 + $0x230] sm:$0xf] }
 0x845   : > { %v9080_v52 = vpop.f32.mrf.mxu0  ;;  %v13957_v39 = vor.u32 %v14821_v15, %v13954_v23 }
 0x846   : > { %v17593_v8 = vadd.f32 %v9167_v41, %v8715_v21  ;;  %v14782_v41 = vld [vmem:[#allocation3 + $0x234] sm:$0xf] }
 0x848   : > { %10051 = vmatmul.bf16.gmra.mxu0 %v13945_v28  ;;  %14099 = vmatmul.msk.bf16.gmra.mxu2 %vm1458_vm3, %v13949_v46  ;;  %v14783_v28 = vld [vmem:[#allocation3 + $0x234] sm:$0xf0] }
 0x849   : > { %v8665_v48 = vpop.f32.mrf.mxu3  ;;  %v8579_v51 = vpop.f32.mrf.mxu1  ;;  %v13763_v46 = vor.u32 %v14783_v28, %v13762_v56 }
 0x84a   : > { %v8666_v53 = vadd.f32 %v8665_v48, %v8576_v45  ;;  %v13953_v45 = vor.u32 %v14822_v49, %v13952_v12  ;;  %v13962_v12 = vld [vmem:[#allocation4 + $0x238] sm:$0xf0] }
 0x84b   : > { %v9169_v62 = vpop.f32.mrf.mxu2 }
 0x84c   : > { %v8717_v2 = vadd.f32 %v8666_v53, %v17334_v19  ;;  %v9170_v60 = vadd.f32 %v9169_v62, %v9080_v52  ;;  %9550 = vmatmul.bf16.gmra.mxu1 %v13755_v0  ;;  %v13764_v52 = vld [vmem:[#allocation3 + $0x238] sm:$0xf0]  ;;  %v14824_v62 = vld [vmem:[#allocation4 + $0x234] sm:$0xf0] }
 0x84d   : > { %v9082_v32 = vpop.f32.mrf.mxu0  ;;  %v13767_v63 = vor.u32 %v14782_v41, %v13764_v52 }
 0x84e   : > { %v17597_v4 = vadd.f32 %v9170_v60, %v8716_v33  ;;  %13902 = vmatmul.msk.bf16.gmra.mxu3 %vm1458_vm3, %v13759_v24  ;;  %v13960_v24 = vld [vmem:[#allocation4 + $0x230] sm:$0xf] }
 0x851   : > { %v8668_v21 = vpop.f32.mrf.mxu3  ;;  %v8581_v34 = vpop.f32.mrf.mxu1 }
 0x852   : > { %v8669_v17 = vadd.f32 %v8668_v21, %v8579_v51 }
 0x853   : > { %v9171_v16 = vpop.f32.mrf.mxu2 }
 0x854   : > { %v8718_v54 = vadd.f32 %v8669_v17, %v17338_v31  ;;  %v9172_v27 = vadd.f32 %v9171_v16, %v9082_v32  ;;  %v14823_v32 = vld [vmem:[#allocation4 + $0x234] sm:$0xf]  ;;  %v13770_v16 = vld [vmem:[#allocation3 + $0x240] sm:$0xf] }
 0x855   : > { %v9085_v19 = vpop.f32.mrf.mxu0  ;;  %v13965_v17 = vor.u32 %v14823_v32, %v13962_v12 }
 0x856   : > { %v17601_v33 = vadd.f32 %v9172_v27, %v8717_v2  ;;  %v14784_v27 = vld [vmem:[#allocation3 + $0x244] sm:$0xf] }
 0x858   : > { %10056 = vmatmul.bf16.gmra.mxu0 %v13953_v45  ;;  %14100 = vmatmul.msk.bf16.gmra.mxu2 %vm1458_vm3, %v13957_v39  ;;  %v14785_v45 = vld [vmem:[#allocation3 + $0x244] sm:$0xf0] }
 0x859   : > { %v8670_v5 = vpop.f32.mrf.mxu3  ;;  %v8584_v40 = vpop.f32.mrf.mxu1  ;;  %v13771_v39 = vor.u32 %v14785_v45, %v13770_v16 }
 0x85a   : > { %v8671_v47 = vadd.f32 %v8670_v5, %v8581_v34  ;;  %v13961_v34 = vor.u32 %v14824_v62, %v13960_v24  ;;  %v13970_v24 = vld [vmem:[#allocation4 + $0x248] sm:$0xf0] }
 0x85b   : > { %v9174_v0 = vpop.f32.mrf.mxu2 }
 0x85c   : > { %v8719_v31 = vadd.f32 %v8671_v47, %v17348_v29  ;;  %v9175_v48 = vadd.f32 %v9174_v0, %v9085_v19  ;;  %9555 = vmatmul.bf16.gmra.mxu1 %v13763_v46  ;;  %v13772_v19 = vld [vmem:[#allocation3 + $0x248] sm:$0xf0]  ;;  %v14826_v0 = vld [vmem:[#allocation4 + $0x244] sm:$0xf0] }
 0x85d   : > { %v9087_v51 = vpop.f32.mrf.mxu0  ;;  %v13775_v52 = vor.u32 %v14784_v27, %v13772_v19 }
 0x85e   : > { %v17605_v53 = vadd.f32 %v9175_v48, %v8718_v54  ;;  %13903 = vmatmul.msk.bf16.gmra.mxu3 %vm1458_vm3, %v13767_v63  ;;  %v13968_v63 = vld [vmem:[#allocation4 + $0x240] sm:$0xf] }
 0x861   : > { %v8673_v2 = vpop.f32.mrf.mxu3  ;;  %v8586_v60 = vpop.f32.mrf.mxu1 }
 0x862   : > { %v8674_v49 = vadd.f32 %v8673_v2, %v8584_v40 }
 0x863   : > { %v9176_v21 = vpop.f32.mrf.mxu2 }
 0x864   : > { %v8720_v15 = vadd.f32 %v8674_v49, %v17352_v43  ;;  %v9177_v23 = vadd.f32 %v9176_v21, %v9087_v51  ;;  %v14825_v51 = vld [vmem:[#allocation4 + $0x244] sm:$0xf]  ;;  %v13778_v21 = vld [vmem:[#allocation3 + $0x250] sm:$0xf] }
 0x865   : > { %v9090_v29 = vpop.f32.mrf.mxu0  ;;  %v13973_v49 = vor.u32 %v14825_v51, %v13970_v24  ;;  %v935_v51 = vld [vmem:[%s17385_s11 + $0x10] sm:$0xff]  ;;  %v936_v24 = vld [vmem:[%s17385_s11 + $0x18] sm:$0xff] }
 0x866   : > { %v17609_v54 = vadd.f32 %v9177_v23, %v8719_v31  ;;  %v14786_v23 = vld [vmem:[#allocation3 + $0x254] sm:$0xf]  ;;  %951 = vst.msk [vmem:[#allocation3 + $0x280] sm:$0xff] %vm15383_vm2, %v935_v51 }
 0x867   : > { %952 = vst.msk [vmem:[#allocation3 + $0x288] sm:$0xff] %vm15383_vm2, %v936_v24 }
 0x868   : > { %10061 = vmatmul.bf16.gmra.mxu0 %v13961_v34  ;;  %14101 = vmatmul.msk.bf16.gmra.mxu2 %vm1458_vm3, %v13965_v17  ;;  %v14787_v34 = vld [vmem:[#allocation3 + $0x254] sm:$0xf0] }
 0x869   : > { %v8675_v56 = vpop.f32.mrf.mxu3  ;;  %v8589_v28 = vpop.f32.mrf.mxu1  ;;  %v13779_v17 = vor.u32 %v14787_v34, %v13778_v21  ;;  %v13788_v21 = vld [vmem:[#allocation3 + $0x268] sm:$0xf0] }
 0x86a   : > { %v8676_v41 = vadd.f32 %v8675_v56, %v8586_v60  ;;  %v13969_v60 = vor.u32 %v14826_v0, %v13968_v63  ;;  %v13978_v63 = vld [vmem:[#allocation4 + $0x258] sm:$0xf0] }
 0x86b   : > { %v9179_v46 = vpop.f32.mrf.mxu2 }
 0x86c   : > { %v8721_v43 = vadd.f32 %v8676_v41, %v17356_v36  ;;  %v9180_v5 = vadd.f32 %v9179_v46, %v9090_v29  ;;  %9560 = vmatmul.bf16.gmra.mxu1 %v13771_v39  ;;  %v13780_v29 = vld [vmem:[#allocation3 + $0x258] sm:$0xf0]  ;;  %v14828_v46 = vld [vmem:[#allocation4 + $0x254] sm:$0xf0] }
 0x86d   : > { %v9092_v40 = vpop.f32.mrf.mxu0  ;;  %v13783_v19 = vor.u32 %v14786_v23, %v13780_v29 }
 0x86e   : > { %v17613_v47 = vadd.f32 %v9180_v5, %v8720_v15  ;;  %13904 = vmatmul.msk.bf16.gmra.mxu3 %vm1458_vm3, %v13775_v52  ;;  %v13976_v52 = vld [vmem:[#allocation4 + $0x250] sm:$0xf] }
 0x871   : > { %v8678_v31 = vpop.f32.mrf.mxu3  ;;  %v8591_v48 = vpop.f32.mrf.mxu1 }
 0x872   : > { %v8679_v62 = vadd.f32 %v8678_v31, %v8589_v28 }
 0x873   : > { %v9181_v2 = vpop.f32.mrf.mxu2 }
 0x874   : > { %v8722_v32 = vadd.f32 %v8679_v62, %v17361_v59  ;;  %v9182_v12 = vadd.f32 %v9181_v2, %v9092_v40  ;;  %v14827_v40 = vld [vmem:[#allocation4 + $0x254] sm:$0xf] }
 0x875   : > { %v9095_v36 = vpop.f32.mrf.mxu0 }
 0x876   : > { %v17617_v15 = vadd.f32 %v9182_v12, %v8721_v43  ;;  %v14789_v12 = vld [vmem:[#allocation3 + $0x264] sm:$0xf0] }
 0x878   : > { %10066 = vmatmul.bf16.gmra.mxu0 %v13969_v60  ;;  %14102 = vmatmul.msk.bf16.gmra.mxu2 %vm1458_vm3, %v13973_v49  ;;  %v13981_v60 = vor.u32 %v14827_v40, %v13978_v63  ;;  %v14788_v49 = vld [vmem:[#allocation3 + $0x264] sm:$0xf]  ;;  %v13986_v40 = vld [vmem:[#allocation4 + $0x268] sm:$0xf0] }
 0x879   : > { %v8680_v16 = vpop.f32.mrf.mxu3  ;;  %v8594_v45 = vpop.f32.mrf.mxu1 }
 0x87a   : > { %v8681_v27 = vadd.f32 %v8680_v16, %v8591_v48  ;;  %v13977_v48 = vor.u32 %v14828_v46, %v13976_v52  ;;  %v14830_v52 = vld [vmem:[#allocation4 + $0x264] sm:$0xf0] }
 0x87b   : > { %v9184_v39 = vpop.f32.mrf.mxu2 }
 0x87c   : > { %v8723_v59 = vadd.f32 %v8681_v27, %v17377_v22  ;;  %v9185_v56 = vadd.f32 %v9184_v39, %v9095_v36  ;;  %9565 = vmatmul.bf16.gmra.mxu1 %v13779_v17  ;;  %v13791_v17 = vor.u32 %v14788_v49, %v13788_v21 }
 0x87d   : > { %v9097_v28 = vpop.f32.mrf.mxu0 }
 0x87e   : > { %v17621_v41 = vadd.f32 %v9185_v56, %v8722_v32  ;;  %13905 = vmatmul.msk.bf16.gmra.mxu3 %vm1458_vm3, %v13783_v19  ;;  %v13786_v32 = vld [vmem:[#allocation3 + $0x260] sm:$0xf]  ;;  %v1128_v56 = vld [vmem:[%s17385_s11 + $0x28] sm:$0xff] }
 0x87f   : > { %1144 = vst.msk [vmem:[#allocation4 + $0x288] sm:$0xff] %vm15383_vm2, %v1128_v56 }
 0x880   : > { %954 = vst.msk [vmem:[#allocation3 + $0x298] sm:$0xff] %vm15383_vm2, %v1128_v56 }
 0x881   : > { %v8683_v43 = vpop.f32.mrf.mxu3  ;;  %v8596_v5 = vpop.f32.mrf.mxu1 }
 0x882   : > { %v8684_v0 = vadd.f32 %v8683_v43, %v8594_v45 }
 0x883   : > { %v9186_v31 = vpop.f32.mrf.mxu2 }
 0x884   : > { %v8724_v22 = vadd.f32 %v8684_v0, %v17387_v38  ;;  %v9187_v62 = vadd.f32 %v9186_v31, %v9097_v28  ;;  %v13787_v38 = vor.u32 %v14789_v12, %v13786_v32  ;;  %v13984_v28 = vld [vmem:[#allocation4 + $0x260] sm:$0xf]  ;;  %v13796_v32 = vld [vmem:[#allocation3 + $0x278] sm:$0xf0] }
 0x885   : > { %v9100_v2 = vpop.f32.mrf.mxu0  ;;  %v13985_v0 = vor.u32 %v14830_v52, %v13984_v28  ;;  %v14831_v52 = vld [vmem:[#allocation4 + $0x274] sm:$0xf] }
 0x886   : > { %v17631_v36 = vadd.f32 %v9187_v62, %v8723_v59  ;;  %v1127_v59 = vld [vmem:[%s17385_s11 + $0x20] sm:$0xff]  ;;  %v14791_v62 = vld [vmem:[#allocation3 + $0x274] sm:$0xf0] }
 0x887   : > { %1143 = vst.msk [vmem:[#allocation4 + $0x280] sm:$0xff] %vm15383_vm2, %v1127_v59 }
 0x888   : > { %10071 = vmatmul.bf16.gmra.mxu0 %v13977_v48  ;;  %14103 = vmatmul.msk.bf16.gmra.mxu2 %vm1458_vm3, %v13981_v60  ;;  %953 = vst.msk [vmem:[#allocation3 + $0x290] sm:$0xff] %vm15383_vm2, %v1127_v59  ;;  %v14790_v60 = vld [vmem:[#allocation3 + $0x274] sm:$0xf]  ;;  %v14832_v59 = vld [vmem:[#allocation4 + $0x274] sm:$0xf0] }
 0x889   : > { %v8685_v34 = vpop.f32.mrf.mxu3  ;;  %v8599_v23 = vpop.f32.mrf.mxu1 }
 0x88a   : > { %v8686_v29 = vadd.f32 %v8685_v34, %v8596_v5  ;;  %v14829_v5 = vld [vmem:[#allocation4 + $0x264] sm:$0xf]  ;;  %v13799_v34 = vor.u32 %v14790_v60, %v13796_v32 }
 0x88b   : > { %v9189_v16 = vpop.f32.mrf.mxu2  ;;  %v13989_v24 = vor.u32 %v14829_v5, %v13986_v40 }
 0x88c   : > { %v8725_v45 = vadd.f32 %v8686_v29, %v17403_v3  ;;  %v9190_v27 = vadd.f32 %v9189_v16, %v9100_v2  ;;  %9570 = vmatmul.bf16.gmra.mxu1 %v13787_v38 }
 0x88d   : > { %v9102_v19 = vpop.f32.mrf.mxu0 }
 0x88e   : > { %v17635_v39 = vadd.f32 %v9190_v27, %v8724_v22  ;;  %13906 = vmatmul.msk.bf16.gmra.mxu3 %vm1458_vm3, %v13791_v17  ;;  %v13794_v22 = vld [vmem:[#allocation3 + $0x270] sm:$0xf]  ;;  %v1130_v27 = vld [vmem:[%s17385_s11 + $0x38] sm:$0xff] }
 0x88f   : > { %v13795_v12 = vor.u32 %v14791_v62, %v13794_v22  ;;  %1146 = vst.msk [vmem:[#allocation4 + $0x298] sm:$0xff] %vm15383_vm2, %v1130_v27  ;;  %v13804_v22 = vld [vmem:[#allocation3 + $0x288] sm:$0xf0] }
 0x890   : > { %956 = vst.msk [vmem:[#allocation3 + $0x2a8] sm:$0xff] %vm15383_vm2, %v1130_v27 }
 0x891   : > { %v8688_v46 = vpop.f32.mrf.mxu3  ;;  %v8601_v43 = vpop.f32.mrf.mxu1 }
 0x892   : > { %v8689_v3 = vadd.f32 %v8688_v46, %v8599_v23  ;;  %v13994_v46 = vld [vmem:[#allocation4 + $0x278] sm:$0xf0] }
 0x893   : > { %v9191_v63 = vpop.f32.mrf.mxu2 }
 0x894   : > { %v8726_v31 = vadd.f32 %v8689_v3, %v17407_v10  ;;  %v9192_v48 = vadd.f32 %v9191_v63, %v9102_v19  ;;  %v13992_v19 = vld [vmem:[#allocation4 + $0x270] sm:$0xf] }
 0x895   : > { %v9105_v51 = vpop.f32.mrf.mxu0  ;;  %v13993_v5 = vor.u32 %v14832_v59, %v13992_v19  ;;  %v14833_v59 = vld [vmem:[#allocation4 + $0x284] sm:$0xf] }
 0x896   : > { %v17649_v2 = vadd.f32 %v9192_v48, %v8725_v45  ;;  %v1129_v45 = vld [vmem:[%s17385_s11 + $0x30] sm:$0xff]  ;;  %v14793_v48 = vld [vmem:[#allocation3 + $0x284] sm:$0xf0] }
 0x897   : > { %1145 = vst.msk [vmem:[#allocation4 + $0x290] sm:$0xff] %vm15383_vm2, %v1129_v45 }
 0x898   : > { %10076 = vmatmul.bf16.gmra.mxu0 %v13985_v0  ;;  %14104 = vmatmul.msk.bf16.gmra.mxu2 %vm1458_vm3, %v13989_v24  ;;  %955 = vst.msk [vmem:[#allocation3 + $0x2a0] sm:$0xff] %vm15383_vm2, %v1129_v45  ;;  %v13997_v0 = vor.u32 %v14831_v52, %v13994_v46  ;;  %v14792_v24 = vld [vmem:[#allocation3 + $0x284] sm:$0xf]  ;;  %v14834_v45 = vld [vmem:[#allocation4 + $0x284] sm:$0xf0] }
 0x899   : > { %v8690_v49 = vpop.f32.mrf.mxu3  ;;  %v8604_v21 = vpop.f32.mrf.mxu1 }
 0x89a   : > { %v8691_v38 = vadd.f32 %v8690_v49, %v8601_v43  ;;  %v13807_v49 = vor.u32 %v14792_v24, %v13804_v22 }
 0x89b   : > { %v9194_v10 = vpop.f32.mrf.mxu2 }
 0x89c   : > { %v8727_v23 = vadd.f32 %v8691_v38, %v17429_v26  ;;  %v9195_v29 = vadd.f32 %v9194_v10, %v9105_v51  ;;  %9575 = vmatmul.bf16.gmra.mxu1 %v13795_v12 }
 0x89d   : > { %v9107_v17 = vpop.f32.mrf.mxu0 }
 0x89e   : > { %v17653_v16 = vadd.f32 %v9195_v29, %v8726_v31  ;;  %13907 = vmatmul.msk.bf16.gmra.mxu3 %vm1458_vm3, %v13799_v34  ;;  %v13802_v31 = vld [vmem:[#allocation3 + $0x280] sm:$0xf]  ;;  %v1132_v29 = vld [vmem:[%s17385_s11 + $0x48] sm:$0xff] }
 0x89f   : > { %v13803_v62 = vor.u32 %v14793_v48, %v13802_v31  ;;  %1148 = vst.msk [vmem:[#allocation4 + $0x2a8] sm:$0xff] %vm15383_vm2, %v1132_v29 }
 0x8a0   : > { %958 = vst.msk [vmem:[#allocation3 + $0x2b8] sm:$0xff] %vm15383_vm2, %v1132_v29 }
 0x8a1   : > { %v8693_v56 = vpop.f32.mrf.mxu3  ;;  %v8606_v28 = vpop.f32.mrf.mxu1 }
 0x8a2   : > { %v8694_v26 = vadd.f32 %v8693_v56, %v8604_v21  ;;  %v14002_v56 = vld [vmem:[#allocation4 + $0x288] sm:$0xf0] }
 0x8a3   : > { %v9196_v43 = vpop.f32.mrf.mxu2 }
 0x8a4   : > { %v8728_v40 = vadd.f32 %v8694_v26, %v17433_v37  ;;  %v9197_v3 = vadd.f32 %v9196_v43, %v9107_v17  ;;  %v14000_v17 = vld [vmem:[#allocation4 + $0x280] sm:$0xf]  ;;  %v14005_v26 = vor.u32 %v14833_v59, %v14002_v56  ;;  %v13810_v43 = vld [vmem:[#allocation3 + $0x290] sm:$0xf] }
 0x8a5   : > { %v9110_v63 = vpop.f32.mrf.mxu0 }
 0x8a6   : > { %v17667_v51 = vadd.f32 %v9197_v3, %v8727_v23  ;;  %v1131_v23 = vld [vmem:[%s17385_s11 + $0x40] sm:$0xff]  ;;  %v14794_v3 = vld [vmem:[#allocation3 + $0x294] sm:$0xf] }
 0x8a7   : > { %1147 = vst.msk [vmem:[#allocation4 + $0x2a0] sm:$0xff] %vm15383_vm2, %v1131_v23 }
 0x8a8   : > { %10081 = vmatmul.bf16.gmra.mxu0 %v13993_v5  ;;  %14105 = vmatmul.msk.bf16.gmra.mxu2 %vm1458_vm3, %v13997_v0  ;;  %957 = vst.msk [vmem:[#allocation3 + $0x2b0] sm:$0xff] %vm15383_vm2, %v1131_v23  ;;  %v14795_v5 = vld [vmem:[#allocation3 + $0x294] sm:$0xf0] }
 0x8a9   : > { %v8695_v60 = vpop.f32.mrf.mxu3  ;;  %v9541_v32 = vpop.f32.mrf.mxu1  ;;  %v13811_v0 = vor.u32 %v14795_v5, %v13810_v43  ;;  %v14796_v5 = vld [vmem:[#allocation3 + $0x2a4] sm:$0xf] }
 0x8aa   : > { %v8696_v12 = vadd.f32 %v8695_v60, %v8606_v28  ;;  %v14001_v28 = vor.u32 %v14834_v45, %v14000_v17  ;;  %v14835_v17 = vld [vmem:[#allocation4 + $0x294] sm:$0xf]  ;;  %v14010_v45 = vld [vmem:[#allocation4 + $0x298] sm:$0xf0] }
 0x8ab   : > { %v9199_v37 = vpop.f32.mrf.mxu2 }
 0x8ac   : > { %v8729_v21 = vadd.f32 %v8696_v12, %v17449_v50  ;;  %v9200_v38 = vadd.f32 %v9199_v37, %v9110_v63  ;;  %9580 = vmatmul.bf16.gmra.mxu1 %v13803_v62  ;;  %v13812_v63 = vld [vmem:[#allocation3 + $0x298] sm:$0xf0]  ;;  %v1133_v12 = vld [vmem:[%s17385_s11 + $0x50] sm:$0xff] }
 0x8ad   : > { %v9112_v34 = vpop.f32.mrf.mxu0  ;;  %v13815_v24 = vor.u32 %v14794_v3, %v13812_v63  ;;  %1149 = vst.msk [vmem:[#allocation4 + $0x2b0] sm:$0xff] %vm15383_vm2, %v1133_v12  ;;  %v13820_v3 = vld [vmem:[#allocation3 + $0x2a8] sm:$0xf0] }
 0x8ae   : > { %v17671_v10 = vadd.f32 %v9200_v38, %v8728_v40  ;;  %13908 = vmatmul.msk.bf16.gmra.mxu3 %vm1458_vm3, %v13807_v49  ;;  %v1134_v49 = vld [vmem:[%s17385_s11 + $0x58] sm:$0xff]  ;;  %v14008_v38 = vld [vmem:[#allocation4 + $0x290] sm:$0xf]  ;;  %959 = vst.msk [vmem:[#allocation3 + $0x2c0] sm:$0xff] %vm15383_vm2, %v1133_v12 }
 0x8af   : > { %1150 = vst.msk [vmem:[#allocation4 + $0x2b8] sm:$0xff] %vm15383_vm2, %v1134_v49 }
 0x8b0   : > { %960 = vst.msk [vmem:[#allocation3 + $0x2c8] sm:$0xff] %vm15383_vm2, %v1134_v49 }
 0x8b1   : > { %v9630_v27 = vpop.f32.mrf.mxu3  ;;  %v9543_v19 = vpop.f32.mrf.mxu1 }
 0x8b2   : > { %v9631_v60 = vadd.f32 %v9630_v27, %v9541_v32 }
 0x8b3   : > { %v9201_v50 = vpop.f32.mrf.mxu2 }
 0x8b4   : > { %v9202_v52 = vadd.f32 %v9201_v50, %v9112_v34  ;;  %v14836_v34 = vld [vmem:[#allocation4 + $0x294] sm:$0xf0]  ;;  %v9710_v32 = vadd.f32 %v9631_v60, %v17454_v7  ;;  %v17703_v50 = vld [vmem:[%s17885_s7] ss:$0 sm:$0xff] }
 0x8b5   : > { %v10047_v46 = vpop.f32.mrf.mxu0  ;;  %v13818_v7 = vld [vmem:[#allocation3 + $0x2a0] sm:$0xf] }
 0x8b6   : > { %v17684_v40 = vadd.f32 %v9202_v52, %v8729_v21 }
 0x8b8   : > { %10086 = vmatmul.bf16.gmra.mxu0 %v14001_v28  ;;  %14106 = vmatmul.msk.bf16.gmra.mxu2 %vm1458_vm3, %v14005_v26  ;;  %v14797_v26 = vld [vmem:[#allocation3 + $0x2a4] sm:$0xf0] }
 0x8b9   : > { %v9632_v31 = vpop.f32.mrf.mxu3  ;;  %v9546_v48 = vpop.f32.mrf.mxu1 }
 0x8ba   : > { %v9633_v37 = vadd.f32 %v9632_v31, %v9543_v19  ;;  %v14009_v19 = vor.u32 %v14836_v34, %v14008_v38 }
 0x8bb   : > { %v10136_v22 = vpop.f32.mrf.mxu2 }
 0x8bc   : > { %9585 = vmatmul.bf16.gmra.mxu1 %v13811_v0  ;;  %v10137_v21 = vadd.f32 %v10136_v22, %v10047_v46  ;;  %v9711_v59 = vadd.f32 %v9633_v37, %v17475_v20  ;;  %v14013_v46 = vor.u32 %v14835_v17, %v14010_v45  ;;  %v13819_v0 = vor.u32 %v14797_v26, %v13818_v7  ;;  %v1135_v37 = vld [vmem:[%s17385_s11 + $0x60] sm:$0xff]  ;;  %v14838_v45 = vld [vmem:[#allocation4 + $0x2a4] sm:$0xf0]  ;;  %v13826_v26 = vld [vmem:[#allocation3 + $0x2b0] sm:$0xf] }
 0x8bd   : > { %v10049_v62 = vpop.f32.mrf.mxu0  ;;  %v14016_v17 = vld [vmem:[#allocation4 + $0x2a0] sm:$0xf]  ;;  %1151 = vst.msk [vmem:[#allocation4 + $0x2c0] sm:$0xff] %vm15383_vm2, %v1135_v37 }
 0x8be   : > { %13909 = vmatmul.msk.bf16.gmra.mxu3 %vm1458_vm3, %v13815_v24  ;;  %v10216_v56 = vadd.f32 %v10137_v21, %v9710_v32  ;;  %v1136_v21 = vld [vmem:[%s17385_s11 + $0x68] sm:$0xff]  ;;  %961 = vst.msk [vmem:[#allocation3 + $0x2d0] sm:$0xff] %vm15383_vm2, %v1135_v37  ;;  %v1137_v37 = vld [vmem:[%s17385_s11 + $0x70] sm:$0xff] }
 0x8bf   : > { %1152 = vst.msk [vmem:[#allocation4 + $0x2c8] sm:$0xff] %vm15383_vm2, %v1136_v21 }
 0x8c0   : > { %v10252_v20 = vadd.f32 %v17703_v50, %v10216_v56  ;;  %962 = vst.msk [vmem:[#allocation3 + $0x2d8] sm:$0xff] %vm15383_vm2, %v1136_v21  ;;  %v1138_v21 = vld [vmem:[%s17385_s11 + $0x78] sm:$0xff] }
 0x8c1   : > { %v9635_v23 = vpop.f32.mrf.mxu3  ;;  %v9548_v29 = vpop.f32.mrf.mxu1  ;;  %1153 = vst.msk [vmem:[#allocation4 + $0x2d0] sm:$0xff] %vm15383_vm2, %v1137_v37 }
 0x8c2   : > { %v9636_v49 = vadd.f32 %v9635_v23, %v9546_v48  ;;  %1154 = vst.msk [vmem:[#allocation4 + $0x2d8] sm:$0xff] %vm15383_vm2, %v1138_v21 }
 0x8c3   : > { %v10138_v27 = vpop.f32.mrf.mxu2  ;;  %963 = vst.msk [vmem:[#allocation3 + $0x2e0] sm:$0xff] %vm15383_vm2, %v1137_v37 }
 0x8c4   : > { %v10139_v28 = vadd.f32 %v10138_v27, %v10049_v62  ;;  %v13823_v62 = vor.u32 %v14796_v5, %v13820_v3  ;;  %v9712_v48 = vadd.f32 %v9636_v49, %v17480_v6  ;;  %v14798_v6 = vld [vmem:[#allocation3 + $0x2b4] sm:$0xf]  ;;  %v13828_v3 = vld [vmem:[#allocation3 + $0x2b8] sm:$0xf0]  ;;  %964 = vst.msk [vmem:[#allocation3 + $0x2e8] sm:$0xff] %vm15383_vm2, %v1138_v21 }
 0x8c5   : > { %v10052_v52 = vpop.f32.mrf.mxu0 }
 0x8c6   : > { %v10217_v43 = vadd.f32 %v10139_v28, %v9711_v59  ;;  %v14018_v59 = vld [vmem:[#allocation4 + $0x2a8] sm:$0xf0] }
 0x8c8   : > { %10091 = vmatmul.bf16.gmra.mxu0 %v14009_v19  ;;  %v10253_v63 = vadd.f32 %v17703_v50, %v10217_v43  ;;  %14107 = vmatmul.msk.bf16.gmra.mxu2 %vm1458_vm3, %v14013_v46  ;;  %v14837_v19 = vld [vmem:[#allocation4 + $0x2a4] sm:$0xf]  ;;  %v14799_v43 = vld [vmem:[#allocation3 + $0x2b4] sm:$0xf0] }
 0x8c9   : > { %v9637_v31 = vpop.f32.mrf.mxu3  ;;  %v9551_v24 = vpop.f32.mrf.mxu1  ;;  %v14021_v7 = vor.u32 %v14837_v19, %v14018_v59 }
 0x8ca   : > { %v14941_v22 = vpack.c.bf16 %v10253_v63, %v10252_v20  ;;  %v9638_v38 = vadd.f32 %v9637_v31, %v9548_v29  ;;  %v14017_v29 = vor.u32 %v14838_v45, %v14016_v17  ;;  %v14024_v17 = vld [vmem:[#allocation4 + $0x2b0] sm:$0xf]  ;;  %v14840_v45 = vld [vmem:[#allocation4 + $0x2b4] sm:$0xf0] }
 0x8cb   : > { %v10141_v60 = vpop.f32.mrf.mxu2 }
 0x8cc   : > { %15033 = vst [vmem:[%s16701_s20 + $0x80] sm:$0xff] %v14941_v22   ;;  %9590 = vmatmul.bf16.gmra.mxu1 %v13819_v0  ;;  %v10142_v34 = vadd.f32 %v10141_v60, %v10052_v52  ;;  %v9713_v56 = vadd.f32 %v9638_v38, %v17495_v35  ;;  %v13827_v35 = vor.u32 %v14799_v43, %v13826_v26  ;;  %v14801_v26 = vld [vmem:[#allocation3 + $0x2c4] sm:$0xf0] }
 0x8cd   : > { %v10054_v12 = vpop.f32.mrf.mxu0 }
 0x8ce   : > { %13910 = vmatmul.msk.bf16.gmra.mxu3 %vm1458_vm3, %v13823_v62  ;;  %v10218_v28 = vadd.f32 %v10142_v34, %v9712_v48  ;;  %v13831_v62 = vor.u32 %v14798_v6, %v13828_v3  ;;  %v14839_v48 = vld [vmem:[#allocation4 + $0x2b4] sm:$0xf] }
 0x8d0   : > { %v10254_v20 = vadd.f32 %v17703_v50, %v10218_v28 }
 0x8d1   : > { %v9640_v32 = vpop.f32.mrf.mxu3  ;;  %v9553_v27 = vpop.f32.mrf.mxu1 }
 0x8d2   : > { %v9641_v49 = vadd.f32 %v9640_v32, %v9551_v24 }
 0x8d3   : > { %v10143_v23 = vpop.f32.mrf.mxu2 }
 0x8d4   : > { %v10144_v52 = vadd.f32 %v10143_v23, %v10054_v12  ;;  %v14026_v23 = vld [vmem:[#allocation4 + $0x2b8] sm:$0xf0]  ;;  %v9714_v24 = vadd.f32 %v9641_v49, %v17500_v58  ;;  %v14800_v58 = vld [vmem:[#allocation3 + $0x2c4] sm:$0xf]  ;;  %v1140_v49 = vld [vmem:[%s17385_s11 + $0x88] sm:$0xff] }
 0x8d5   : > { %v10057_v46 = vpop.f32.mrf.mxu0  ;;  %1156 = vst.msk [vmem:[#allocation4 + $0x2e8] sm:$0xff] %vm15383_vm2, %v1140_v49 }
 0x8d6   : > { %v10219_v5 = vadd.f32 %v10144_v52, %v9713_v56  ;;  %966 = vst.msk [vmem:[#allocation3 + $0x2f8] sm:$0xff] %vm15383_vm2, %v1140_v49  ;;  %v14844_v49 = vld [vmem:[#allocation4 + $0x2d4] sm:$0xf0] }
 0x8d8   : > { %10096 = vmatmul.bf16.gmra.mxu0 %v14017_v29  ;;  %v10255_v63 = vadd.f32 %v17703_v50, %v10219_v5  ;;  %14108 = vmatmul.msk.bf16.gmra.mxu2 %vm1458_vm3, %v14021_v7  ;;  %v13834_v7 = vld [vmem:[#allocation3 + $0x2c0] sm:$0xf]  ;;  %v13836_v5 = vld [vmem:[#allocation3 + $0x2c8] sm:$0xf0] }
 0x8d9   : > { %v9642_v0 = vpop.f32.mrf.mxu3  ;;  %v9556_v31 = vpop.f32.mrf.mxu1 }
 0x8da   : > { %v14946_v22 = vpack.c.bf16 %v10255_v63, %v10254_v20  ;;  %v9643_v38 = vadd.f32 %v9642_v0, %v9553_v27  ;;  %v14025_v27 = vor.u32 %v14840_v45, %v14024_v17  ;;  %v13839_v0 = vor.u32 %v14800_v58, %v13836_v5 }
 0x8db   : > { %v10146_v60 = vpop.f32.mrf.mxu2 }
 0x8dc   : > { %15034 = vst [vmem:[%s16701_s20 + $0x88] sm:$0xff] %v14946_v22   ;;  %9595 = vmatmul.bf16.gmra.mxu1 %v13827_v35  ;;  %v10147_v34 = vadd.f32 %v10146_v60, %v10057_v46  ;;  %v9715_v29 = vadd.f32 %v9643_v38, %v17521_v42  ;;  %v14029_v46 = vor.u32 %v14839_v48, %v14026_v23  ;;  %v14032_v38 = vld [vmem:[#allocation4 + $0x2c0] sm:$0xf]  ;;  %v14841_v48 = vld [vmem:[#allocation4 + $0x2c4] sm:$0xf] }
 0x8dd   : > { %v10059_v12 = vpop.f32.mrf.mxu0  ;;  %v13835_v42 = vor.u32 %v14801_v26, %v13834_v7  ;;  %v14034_v23 = vld [vmem:[#allocation4 + $0x2c8] sm:$0xf0]  ;;  %v13844_v7 = vld [vmem:[#allocation3 + $0x2d8] sm:$0xf0] }
 0x8de   : > { %13911 = vmatmul.msk.bf16.gmra.mxu3 %vm1458_vm3, %v13831_v62  ;;  %v10220_v56 = vadd.f32 %v10147_v34, %v9714_v24  ;;  %v14842_v34 = vld [vmem:[#allocation4 + $0x2c4] sm:$0xf0] }
 0x8e0   : > { %v10256_v6 = vadd.f32 %v17703_v50, %v10220_v56  ;;  %v14037_v56 = vor.u32 %v14841_v48, %v14034_v23 }
 0x8e1   : > { %v9645_v19 = vpop.f32.mrf.mxu3  ;;  %v9558_v59 = vpop.f32.mrf.mxu1 }
 0x8e2   : > { %v9646_v60 = vadd.f32 %v9645_v19, %v9556_v31 }
 0x8e3   : > { %v10148_v32 = vpop.f32.mrf.mxu2 }
 0x8e4   : > { %v10149_v28 = vadd.f32 %v10148_v32, %v10059_v12  ;;  %v1139_v12 = vld [vmem:[%s17385_s11 + $0x80] sm:$0xff]  ;;  %v9716_v31 = vadd.f32 %v9646_v60, %v17526_v13  ;;  %v14802_v13 = vld [vmem:[#allocation3 + $0x2d4] sm:$0xf] }
 0x8e5   : > { %v10062_v52 = vpop.f32.mrf.mxu0  ;;  %1155 = vst.msk [vmem:[#allocation4 + $0x2e0] sm:$0xff] %vm15383_vm2, %v1139_v12 }
 0x8e6   : > { %v10221_v43 = vadd.f32 %v10149_v28, %v9715_v29  ;;  %965 = vst.msk [vmem:[#allocation3 + $0x2f0] sm:$0xff] %vm15383_vm2, %v1139_v12  ;;  %v13842_v28 = vld [vmem:[#allocation3 + $0x2d0] sm:$0xf] }
 0x8e7   : > { %v14040_v12 = vld [vmem:[#allocation4 + $0x2d0] sm:$0xf] }
 0x8e8   : > { %10101 = vmatmul.bf16.gmra.mxu0 %v14025_v27  ;;  %v10257_v3 = vadd.f32 %v17703_v50, %v10221_v43  ;;  %14109 = vmatmul.msk.bf16.gmra.mxu2 %vm1458_vm3, %v14029_v46  ;;  %v14041_v48 = vor.u32 %v14844_v49, %v14040_v12 }
 0x8e9   : > { %v9647_v20 = vpop.f32.mrf.mxu3  ;;  %v9561_v63 = vpop.f32.mrf.mxu1 }
 0x8ea   : > { %v14951_v35 = vpack.c.bf16 %v10257_v3, %v10256_v6  ;;  %v9648_v37 = vadd.f32 %v9647_v20, %v9558_v59  ;;  %v14033_v59 = vor.u32 %v14842_v34, %v14032_v38  ;;  %v13847_v3 = vor.u32 %v14802_v13, %v13844_v7  ;;  %v14843_v38 = vld [vmem:[#allocation4 + $0x2d4] sm:$0xf]  ;;  %v14042_v34 = vld [vmem:[#allocation4 + $0x2d8] sm:$0xf0] }
 0x8eb   : > { %v10151_v22 = vpop.f32.mrf.mxu2 }
 0x8ec   : > { %15035 = vst [vmem:[%s16701_s20 + $0x90] sm:$0xff] %v14951_v35   ;;  %9600 = vmatmul.bf16.gmra.mxu1 %v13835_v42  ;;  %v10152_v21 = vadd.f32 %v10151_v22, %v10062_v52  ;;  %v9717_v24 = vadd.f32 %v9648_v37, %v17541_v11  ;;  %v14803_v52 = vld [vmem:[#allocation3 + $0x2d4] sm:$0xf0] }
 0x8ed   : > { %v10064_v62 = vpop.f32.mrf.mxu0  ;;  %v13843_v11 = vor.u32 %v14803_v52, %v13842_v28  ;;  %v1142_v22 = vld [vmem:[%s17385_s11 + $0x98] sm:$0xff] }
 0x8ee   : > { %13912 = vmatmul.msk.bf16.gmra.mxu3 %vm1458_vm3, %v13839_v0  ;;  %v10222_v32 = vadd.f32 %v10152_v21, %v9716_v31  ;;  %v1141_v0 = vld [vmem:[%s17385_s11 + $0x90] sm:$0xff]  ;;  %1158 = vst.msk [vmem:[#allocation4 + $0x2f8] sm:$0xff] %vm15383_vm2, %v1142_v22  ;;  %s14115_s11 = sshll.u32 %s15210_s30, 6 }
 0x8ef   : > { %1157 = vst.msk [vmem:[#allocation4 + $0x2f0] sm:$0xff] %vm15383_vm2, %v1141_v0  ;;  %v14050_v0 = vld [vmem:[#allocation4 + $0x2e8] sm:$0xf0]  ;;  %s10360_s14 = sadd.s32 %s14116_s13, %s14115_s11  ;;  %s15152_s13 = scalar_lea.hbm %s17886_s8, 1024 }
 0x8f0   : > { %v10258_v26 = vadd.f32 %v17703_v50, %v10222_v32  ;;  %v14805_v32 = vld [vmem:[#allocation3 + $0x2e4] sm:$0xf0]  ;;  %s14117_s15 = sshll.u32 %s10360_s14, 2 }
 0x8f1   : > { %v9650_v17 = vpop.f32.mrf.mxu3  ;;  %v9563_v45 = vpop.f32.mrf.mxu1  ;;  %s10362_s30 = scalar_lea.hbm %s17886_s8, %s14117_s15 }
 0x8f2   : > { %v9651_v35 = vadd.f32 %v9650_v17, %v9561_v63  ;;  %s10365_s24 = sshll.u32 %s10362_s30, 4  ;;  %s10366_s24 = int_to_ptr.hbm [resolvable:$true] %s10365_s24 }
 0x8f3   : > { %v10153_v19 = vpop.f32.mrf.mxu2  ;;  %s15146_s22 = sshra.s32 %s10366_s24, 4  ;;  %s15147_s22 = int_to_ptr.hbm [resolvable:$true] %s15146_s22 }
 0x8f4   : > { %v10154_v27 = vadd.f32 %v10153_v19, %v10064_v62  ;;  %v9718_v63 = vadd.f32 %v9651_v35, %v17546_v44  ;;  %v14845_v35 = vld [vmem:[#allocation4 + $0x2e4] sm:$0xf]  ;;  %s15148_s17 = scalar_lea.hbm %s15147_s22, 256  ;;  %p15153_p10 = scmp.lt.s32.totalorder %s15147_s22, %s17886_s8 }
 0x8f5   : > { %v10067_v29 = vpop.f32.mrf.mxu0  ;;  %p15149_p6 = scmp.ne.s32.totalorder %s15147_s22, %s15148_s17  ;;  %p15154_p11 = scmp.lt.s32.totalorder %s15152_s13, %s15148_s17 }
 0x8f6   : > { %v10223_v46 = vadd.f32 %v10154_v27, %v9717_v24  ;;  %v13850_v24 = vld [vmem:[#allocation3 + $0x2e0] sm:$0xf] }
 0x8f7   : > { %v13851_v44 = vor.u32 %v14805_v32, %v13850_v24  ;;  %p15150_p7 = pnand %p15149_p6, %p15326_p3  ;;  %p15155_p12 = por %p15154_p11, %p15153_p10 }
 0x8f8   : > { %10106 = vmatmul.bf16.gmra.mxu0 %v14033_v59  ;;  %v10259_v43 = vadd.f32 %v17703_v50, %v10223_v46  ;;  %14110 = vmatmul.msk.bf16.gmra.mxu2 %vm1458_vm3, %v14037_v56  ;;  %v14045_v59 = vor.u32 %v14843_v38, %v14042_v34  ;;  %v13852_v56 = vld [vmem:[#allocation3 + $0x2e8] sm:$0xf0] }
 0x8f9   : > { %v9652_v58 = vpop.f32.mrf.mxu3  ;;  %v9566_v5 = vpop.f32.mrf.mxu1  ;;  %p15151_p9 = pneg %p15150_p7 }
 0x8fa   : > { %v14956_v6 = vpack.c.bf16 %v10259_v43, %v10258_v26  ;;  %v9653_v62 = vadd.f32 %v9652_v58, %v9563_v45 }
 0x8fb   : > { %v10156_v42 = vpop.f32.mrf.mxu2  ;;  %p15156_p13 = pnand %p15155_p12, %p15151_p9 }
 0x8fc   : > { %15036 = vst [vmem:[%s16701_s20 + $0x98] sm:$0xff] %v14956_v6   ;;  %9605 = vmatmul.bf16.gmra.mxu1 %v13843_v11  ;;  %v10157_v60 = vadd.f32 %v10156_v42, %v10067_v29  ;;  %v9719_v23 = vadd.f32 %v9653_v62, %v17561_v14  ;;  %v14804_v29 = vld [vmem:[#allocation3 + $0x2e4] sm:$0xf]  ;;  %v14048_v6 = vld [vmem:[#allocation4 + $0x2e0] sm:$0xf] }
 0x8fd   : > { %v10069_v20 = vpop.f32.mrf.mxu0  ;;  %v13855_v13 = vor.u32 %v14804_v29, %v13852_v56 }
 0x8fe   : > { %13913 = vmatmul.msk.bf16.gmra.mxu3 %vm1458_vm3, %v13847_v3  ;;  %v10224_v45 = vadd.f32 %v10157_v60, %v9718_v63  ;;  %v14846_v3 = vld [vmem:[#allocation4 + $0x2e4] sm:$0xf0] }
 0x8ff   : > { %v14049_v60 = vor.u32 %v14846_v3, %v14048_v6 }
 0x900   : > { %v10260_v9 = vadd.f32 %v17703_v50, %v10224_v45 }
 0x901   : > { %v9655_v37 = vpop.f32.mrf.mxu3  ;;  %v9568_v21 = vpop.f32.mrf.mxu1 }
 0x902   : > { %v9656_v43 = vadd.f32 %v9655_v37, %v9566_v5  ;;  %v14053_v5 = vor.u32 %v14845_v35, %v14050_v0  ;;  %v13858_v37 = vld [vmem:[#allocation3 + $0x2f0] sm:$0xf] }
 0x903   : > { %v10158_v17 = vpop.f32.mrf.mxu2 }
 0x904   : > { %v10159_v31 = vadd.f32 %v10158_v17, %v10069_v20  ;;  %v9720_v22 = vadd.f32 %v9656_v43, %v17566_v61  ;;  %v14806_v17 = vld [vmem:[#allocation3 + $0x2f4] sm:$0xf] }
 0x905   : > { %v10072_v19 = vpop.f32.mrf.mxu0 }
 0x906   : > { %v10225_v27 = vadd.f32 %v10159_v31, %v9719_v23 }
 0x908   : > { %10111 = vmatmul.bf16.gmra.mxu0 %v14041_v48  ;;  %v10261_v28 = vadd.f32 %v17703_v50, %v10225_v27  ;;  %14111 = vmatmul.msk.bf16.gmra.mxu2 %vm1458_vm3, %v14045_v59  ;;  %v13860_v48 = vld [vmem:[#allocation3 + $0x2f8] sm:$0xf0] }
 0x909   : > { %v9657_v52 = vpop.f32.mrf.mxu3  ;;  %v9571_v14 = vpop.f32.mrf.mxu1  ;;  %v13863_v59 = vor.u32 %v14806_v17, %v13860_v48 }
 0x90a   : > { %v14961_v46 = vpack.c.bf16 %v10261_v28, %v10260_v9  ;;  %v9658_v11 = vadd.f32 %v9657_v52, %v9568_v21  ;;  %v14807_v21 = vld [vmem:[#allocation3 + $0x2f4] sm:$0xf0]  ;;  %v14056_v9 = vld [vmem:[#allocation4 + $0x2f0] sm:$0xf] }
 0x90b   : > { %v10161_v7 = vpop.f32.mrf.mxu2  ;;  %v13859_v61 = vor.u32 %v14807_v21, %v13858_v37  ;;  %v14848_v28 = vld [vmem:[#allocation4 + $0x2f4] sm:$0xf0] }
 0x90c   : > { %15037 = vst [vmem:[%s16701_s20 + $0xa0] sm:$0xff] %v14961_v46   ;;  %9610 = vmatmul.bf16.gmra.mxu1 %v13851_v44  ;;  %v10162_v58 = vadd.f32 %v10161_v7, %v10072_v19  ;;  %v9721_v12 = vadd.f32 %v9658_v11, %v17569_v30  ;;  %v14847_v46 = vld [vmem:[#allocation4 + $0x2f4] sm:$0xf]  ;;  %v14057_v43 = vor.u32 %v14848_v28, %v14056_v9 }
 0x90d   : > { %v10074_v26 = vpop.f32.mrf.mxu0 }
 0x90e   : > { %13914 = vmatmul.msk.bf16.gmra.mxu3 %vm1458_vm3, %v13855_v13  ;;  %v10226_v49 = vadd.f32 %v10162_v58, %v9720_v22  ;;  %v14058_v13 = vld [vmem:[#allocation4 + $0x2f8] sm:$0xf0] }
 0x90f   : > { %v14061_v3 = vor.u32 %v14847_v46, %v14058_v13 }
 0x910   : > { %v10262_v23 = vadd.f32 %v17703_v50, %v10226_v49 }
 0x911   : > { %v9660_v42 = vpop.f32.mrf.mxu3  ;;  %v9573_v20 = vpop.f32.mrf.mxu1 }
 0x912   : > { %v9661_v27 = vadd.f32 %v9660_v42, %v9571_v14 }
 0x913   : > { %v10163_v62 = vpop.f32.mrf.mxu2 }
 0x914   : > { %v10164_v38 = vadd.f32 %v10163_v62, %v10074_v26  ;;  %v9722_v7 = vadd.f32 %v9661_v27, %v17574_v57 }
 0x915   : > { %v10077_v34 = vpop.f32.mrf.mxu0 }
 0x916   : > { %v10227_v63 = vadd.f32 %v10164_v38, %v9721_v12 }
 0x918   : > { %10116 = vmatmul.bf16.gmra.mxu0 %v14049_v60  ;;  %v10263_v45 = vadd.f32 %v17703_v50, %v10227_v63  ;;  %14112 = vmatmul.msk.bf16.gmra.mxu2 %vm1458_vm3, %v14053_v5 }
 0x919   : > { %v9662_v31 = vpop.f32.mrf.mxu3  ;;  %v9576_v30 = vpop.f32.mrf.mxu1 }
 0x91a   : > { %v14966_v19 = vpack.c.bf16 %v10263_v45, %v10262_v23  ;;  %v9663_v29 = vadd.f32 %v9662_v31, %v9573_v20 }
 0x91b   : > { %v10166_v24 = vpop.f32.mrf.mxu2 }
 0x91c   : > { %15038 = vst [vmem:[%s16701_s20 + $0xa8] sm:$0xff] %v14966_v19   ;;  %9615 = vmatmul.bf16.gmra.mxu1 %v13859_v61  ;;  %v10167_v56 = vadd.f32 %v10166_v24, %v10077_v34  ;;  %v9723_v11 = vadd.f32 %v9663_v29, %v17577_v18 }
 0x91d   : > { %v10079_v32 = vpop.f32.mrf.mxu0 }
 0x91e   : > { %13915 = vmatmul.msk.bf16.gmra.mxu3 %vm1458_vm3, %v13863_v59  ;;  %v10228_v58 = vadd.f32 %v10167_v56, %v9722_v7 }
 0x920   : > { %v10264_v20 = vadd.f32 %v17703_v50, %v10228_v58 }
 0x921   : > { %v9665_v44 = vpop.f32.mrf.mxu3  ;;  %v9578_v52 = vpop.f32.mrf.mxu1 }
 0x922   : > { %v9666_v12 = vadd.f32 %v9665_v44, %v9576_v30 }
 0x923   : > { %v10168_v26 = vpop.f32.mrf.mxu2 }
 0x924   : > { %v10169_v6 = vadd.f32 %v10168_v26, %v10079_v32  ;;  %v9724_v5 = vadd.f32 %v9666_v12, %v17581_v25 }
 0x925   : > { %v10082_v14 = vpop.f32.mrf.mxu0 }
 0x926   : > { %v10229_v42 = vadd.f32 %v10169_v6, %v9723_v11 }
 0x928   : > { %10121 = vmatmul.bf16.gmra.mxu0 %v14057_v43  ;;  %v10265_v35 = vadd.f32 %v17703_v50, %v10229_v42  ;;  %14113 = vmatmul.msk.bf16.gmra.mxu2 %vm1458_vm3, %v14061_v3 }
 0x929   : > { %v9667_v0 = vpop.f32.mrf.mxu3  ;;  %v9581_v22 = vpop.f32.mrf.mxu1 }
 0x92a   : > { %v14971_v57 = vpack.c.bf16 %v10265_v35, %v10264_v20  ;;  %v9668_v18 = vadd.f32 %v9667_v0, %v9578_v52 }
 0x92b   : > { %v10171_v62 = vpop.f32.mrf.mxu2 }
 0x92c   : > { %15039 = vst [vmem:[%s16701_s20 + $0xb0] sm:$0xff] %v14971_v57   ;;  %v10172_v49 = vadd.f32 %v10171_v62, %v10082_v14  ;;  %v9725_v21 = vadd.f32 %v9668_v18, %v17585_v1 }
 0x92d   : > { %v10084_v60 = vpop.f32.mrf.mxu0 }
 0x92e   : > { %v10230_v63 = vadd.f32 %v10172_v49, %v9724_v5 }
 0x930   : > { %v10266_v45 = vadd.f32 %v17703_v50, %v10230_v63 }
 0x931   : > { %v9670_v38 = vpop.f32.mrf.mxu3  ;;  %v9583_v34 = vpop.f32.mrf.mxu1 }
 0x932   : > { %v9671_v32 = vadd.f32 %v9670_v38, %v9581_v22 }
 0x933   : > { %v10173_v37 = vpop.f32.mrf.mxu2 }
 0x934   : > { %v10174_v17 = vadd.f32 %v10173_v37, %v10084_v60  ;;  %v9726_v56 = vadd.f32 %v9671_v32, %v17589_v55 }
 0x935   : > { %v10087_v48 = vpop.f32.mrf.mxu0 }
 0x936   : > { %v10231_v23 = vadd.f32 %v10174_v17, %v9725_v21 }
 0x938   : > { %v10267_v61 = vadd.f32 %v17703_v50, %v10231_v23 }
 0x939   : > { %v9672_v31 = vpop.f32.mrf.mxu3  ;;  %v9586_v30 = vpop.f32.mrf.mxu1 }
 0x93a   : > { %v14976_v19 = vpack.c.bf16 %v10267_v61, %v10266_v45  ;;  %v9673_v27 = vadd.f32 %v9672_v31, %v9583_v34 }
 0x93b   : > { %v10176_v59 = vpop.f32.mrf.mxu2 }
 0x93c   : > { %15040 = vst [vmem:[%s16701_s20 + $0xb8] sm:$0xff] %v14976_v19   ;;  %v10177_v25 = vadd.f32 %v10176_v59, %v10087_v48  ;;  %v9727_v28 = vadd.f32 %v9673_v27, %v17593_v8 }
 0x93d   : > { %v10089_v24 = vpop.f32.mrf.mxu0 }
 0x93e   : > { %v10232_v44 = vadd.f32 %v10177_v25, %v9726_v56 }
 0x940   : > { %v10268_v7 = vadd.f32 %v17703_v50, %v10232_v44 }
 0x941   : > { %v9675_v29 = vpop.f32.mrf.mxu3  ;;  %v9588_v1 = vpop.f32.mrf.mxu1 }
 0x942   : > { %v9676_v3 = vadd.f32 %v9675_v29, %v9586_v30 }
 0x943   : > { %v10178_v9 = vpop.f32.mrf.mxu2 }
 0x944   : > { %v10179_v52 = vadd.f32 %v10178_v9, %v10089_v24  ;;  %v9728_v35 = vadd.f32 %v9676_v3, %v17597_v4 }
 0x945   : > { %v10092_v46 = vpop.f32.mrf.mxu0 }
 0x946   : > { %v10233_v13 = vadd.f32 %v10179_v52, %v9727_v28 }
 0x948   : > { %v10269_v26 = vadd.f32 %v17703_v50, %v10233_v13 }
 0x949   : > { %v9677_v43 = vpop.f32.mrf.mxu3  ;;  %v9591_v11 = vpop.f32.mrf.mxu1 }
 0x94a   : > { %v14981_v58 = vpack.c.bf16 %v10269_v26, %v10268_v7  ;;  %v9678_v42 = vadd.f32 %v9677_v43, %v9588_v1 }
 0x94b   : > { %v10181_v6 = vpop.f32.mrf.mxu2 }
 0x94c   : > { %15041 = vst [vmem:[%s16701_s20 + $0xc0] sm:$0xff] %v14981_v58   ;;  %v10182_v55 = vadd.f32 %v10181_v6, %v10092_v46  ;;  %v9729_v22 = vadd.f32 %v9678_v42, %v17601_v33 }
 0x94d   : > { %v10094_v14 = vpop.f32.mrf.mxu0 }
 0x94e   : > { %v10234_v57 = vadd.f32 %v10182_v55, %v9728_v35 }
 0x950   : > { %v10270_v18 = vadd.f32 %v17703_v50, %v10234_v57 }
 0x951   : > { %v9680_v20 = vpop.f32.mrf.mxu3  ;;  %v9593_v8 = vpop.f32.mrf.mxu1 }
 0x952   : > { %v9681_v63 = vadd.f32 %v9680_v20, %v9591_v11 }
 0x953   : > { %v10183_v0 = vpop.f32.mrf.mxu2 }
 0x954   : > { %v10184_v62 = vadd.f32 %v10183_v0, %v10094_v14  ;;  %v9730_v23 = vadd.f32 %v9681_v63, %v17605_v53 }
 0x955   : > { %v10097_v60 = vpop.f32.mrf.mxu0 }
 0x956   : > { %v10235_v12 = vadd.f32 %v10184_v62, %v9729_v22 }
 0x958   : > { %v10271_v49 = vadd.f32 %v17703_v50, %v10235_v12 }
 0x959   : > { %v9682_v38 = vpop.f32.mrf.mxu3  ;;  %v9596_v34 = vpop.f32.mrf.mxu1 }
 0x95a   : > { %v14986_v5 = vpack.c.bf16 %v10271_v49, %v10270_v18  ;;  %v9683_v17 = vadd.f32 %v9682_v38, %v9593_v8 }
 0x95b   : > { %v10186_v37 = vpop.f32.mrf.mxu2 }
 0x95c   : > { %15042 = vst [vmem:[%s16701_s20 + $0xc8] sm:$0xff] %v14986_v5   ;;  %v10187_v4 = vadd.f32 %v10186_v37, %v10097_v60  ;;  %v9731_v61 = vadd.f32 %v9683_v17, %v17609_v54 }
 0x95d   : > { %v10099_v21 = vpop.f32.mrf.mxu0 }
 0x95e   : > { %v10236_v31 = vadd.f32 %v10187_v4, %v9730_v23 }
 0x960   : > { %v10272_v24 = vadd.f32 %v17703_v50, %v10236_v31 }
 0x961   : > { %v9685_v48 = vpop.f32.mrf.mxu3  ;;  %v9598_v33 = vpop.f32.mrf.mxu1 }
 0x962   : > { %v9686_v9 = vadd.f32 %v9685_v48, %v9596_v34 }
 0x963   : > { %v10188_v45 = vpop.f32.mrf.mxu2 }
 0x964   : > { %v10189_v30 = vadd.f32 %v10188_v45, %v10099_v21  ;;  %v9732_v52 = vadd.f32 %v9686_v9, %v17613_v47 }
 0x965   : > { %v10102_v19 = vpop.f32.mrf.mxu0 }
 0x966   : > { %v10237_v59 = vadd.f32 %v10189_v30, %v9731_v61 }
 0x968   : > { %v10273_v32 = vadd.f32 %v17703_v50, %v10237_v59 }
 0x969   : > { %v9687_v27 = vpop.f32.mrf.mxu3  ;;  %v9601_v25 = vpop.f32.mrf.mxu1 }
 0x96a   : > { %v14991_v29 = vpack.c.bf16 %v10273_v32, %v10272_v24  ;;  %v9688_v28 = vadd.f32 %v9687_v27, %v9598_v33 }
 0x96b   : > { %v10191_v1 = vpop.f32.mrf.mxu2 }
 0x96c   : > { %15043 = vst [vmem:[%s16701_s20 + $0xd0] sm:$0xff] %v14991_v29   ;;  %v10192_v53 = vadd.f32 %v10191_v1, %v10102_v19  ;;  %v9733_v13 = vadd.f32 %v9688_v28, %v17617_v15 }
 0x96d   : > { %v10104_v56 = vpop.f32.mrf.mxu0 }
 0x96e   : > { %v10238_v7 = vadd.f32 %v10192_v53, %v9732_v52 }
 0x970   : > { %v10274_v58 = vadd.f32 %v17703_v50, %v10238_v7 }
 0x971   : > { %v9690_v44 = vpop.f32.mrf.mxu3  ;;  %v9603_v54 = vpop.f32.mrf.mxu1 }
 0x972   : > { %v9691_v8 = vadd.f32 %v9690_v44, %v9601_v25 }
 0x973   : > { %v10193_v46 = vpop.f32.mrf.mxu2 }
 0x974   : > { %v10194_v26 = vadd.f32 %v10193_v46, %v10104_v56  ;;  %v9734_v15 = vadd.f32 %v9691_v8, %v17621_v41 }
 0x975   : > { %v10107_v43 = vpop.f32.mrf.mxu0 }
 0x976   : > { %v10239_v11 = vadd.f32 %v10194_v26, %v9733_v13 }
 0x978   : > { %v10275_v6 = vadd.f32 %v17703_v50, %v10239_v11 }
 0x979   : > { %v9692_v14 = vpop.f32.mrf.mxu3  ;;  %v9606_v42 = vpop.f32.mrf.mxu1 }
 0x97a   : > { %v14996_v3 = vpack.c.bf16 %v10275_v6, %v10274_v58  ;;  %v9693_v35 = vadd.f32 %v9692_v14, %v9603_v54 }
 0x97b   : > { %v10196_v55 = vpop.f32.mrf.mxu2 }
 0x97c   : > { %15044 = vst [vmem:[%s16701_s20 + $0xd8] sm:$0xff] %v14996_v3   ;;  %v10197_v47 = vadd.f32 %v10196_v55, %v10107_v43  ;;  %v9735_v57 = vadd.f32 %v9693_v35, %v17631_v36 }
 0x97d   : > { %v10109_v20 = vpop.f32.mrf.mxu0 }
 0x97e   : > { %v10240_v62 = vadd.f32 %v10197_v47, %v9734_v15 }
 0x980   : > { %v10276_v38 = vadd.f32 %v17703_v50, %v10240_v62 }
 0x981   : > { %v9695_v0 = vpop.f32.mrf.mxu3  ;;  %v9608_v18 = vpop.f32.mrf.mxu1 }
 0x982   : > { %v9696_v17 = vadd.f32 %v9695_v0, %v9606_v42 }
 0x983   : > { %v10198_v22 = vpop.f32.mrf.mxu2 }
 0x984   : > { %v10199_v60 = vadd.f32 %v10198_v22, %v10109_v20  ;;  %v9736_v33 = vadd.f32 %v9696_v17, %v17635_v39 }
 0x985   : > { %v10112_v12 = vpop.f32.mrf.mxu0 }
 0x986   : > { %v10241_v49 = vadd.f32 %v10199_v60, %v9735_v57 }
 0x988   : > { %v10277_v34 = vadd.f32 %v17703_v50, %v10241_v49 }
 0x989   : > { %v9697_v5 = vpop.f32.mrf.mxu3  ;;  %v9611_v4 = vpop.f32.mrf.mxu1 }
 0x98a   : > { %v15001_v37 = vpack.c.bf16 %v10277_v34, %v10276_v38  ;;  %v9698_v41 = vadd.f32 %v9697_v5, %v9608_v18 }
 0x98b   : > { %v10201_v21 = vpop.f32.mrf.mxu2 }
 0x98c   : > { %15045 = vst [vmem:[%s16701_s20 + $0xe0] sm:$0xff] %v15001_v37   ;;  %v10202_v48 = vadd.f32 %v10201_v21, %v10112_v12  ;;  %v9737_v45 = vadd.f32 %v9698_v41, %v17649_v2 }
 0x98d   : > { %v10114_v63 = vpop.f32.mrf.mxu0 }
 0x98e   : > { %v10242_v61 = vadd.f32 %v10202_v48, %v9736_v33 }
 0x990   : > { %v10278_v59 = vadd.f32 %v17703_v50, %v10242_v61 }
 0x991   : > { %v9700_v36 = vpop.f32.mrf.mxu3  ;;  %v9613_v32 = vpop.f32.mrf.mxu1 }
 0x992   : > { %v9701_v1 = vadd.f32 %v9700_v36, %v9611_v4 }
 0x993   : > { %v10203_v23 = vpop.f32.mrf.mxu2 }
 0x994   : > { %v10204_v31 = vadd.f32 %v10203_v23, %v10114_v63  ;;  %v9738_v2 = vadd.f32 %v9701_v1, %v17653_v16 }
 0x995   : > { %v10117_v30 = vpop.f32.mrf.mxu0 }
 0x996   : > { %v10243_v19 = vadd.f32 %v10204_v31, %v9737_v45 }
 0x998   : > { %v10279_v24 = vadd.f32 %v17703_v50, %v10243_v19 }
 0x999   : > { %v9702_v27 = vpop.f32.mrf.mxu3  ;;  %v9616_v28 = vpop.f32.mrf.mxu1 }
 0x99a   : > { %v15006_v25 = vpack.c.bf16 %v10279_v24, %v10278_v59  ;;  %v9703_v39 = vadd.f32 %v9702_v27, %v9613_v32 }
 0x99b   : > { %v10206_v29 = vpop.f32.mrf.mxu2 }
 0x99c   : > { %15046 = vst [vmem:[%s16701_s20 + $0xe8] sm:$0xff] %v15006_v25   ;;  %v10207_v9 = vadd.f32 %v10206_v29, %v10117_v30  ;;  %v9739_v54 = vadd.f32 %v9703_v39, %v17667_v51 }
 0x99d   : > { %v10119_v56 = vpop.f32.mrf.mxu0 }
 0x99e   : > { %v10244_v52 = vadd.f32 %v10207_v9, %v9738_v2 }
 0x9a0   : > { %v10280_v7 = vadd.f32 %v17703_v50, %v10244_v52 }
 0x9a1   : > { %v9705_v53 = vpop.f32.mrf.mxu3  ;;  %v9618_v16 = vpop.f32.mrf.mxu1 }
 0x9a2   : > { %v9706_v14 = vadd.f32 %v9705_v53, %v9616_v28 }
 0x9a3   : > { %v10208_v44 = vpop.f32.mrf.mxu2 }
 0x9a4   : > { %v10209_v46 = vadd.f32 %v10208_v44, %v10119_v56  ;;  %v9740_v42 = vadd.f32 %v9706_v14, %v17671_v10 }
 0x9a5   : > { %v10122_v43 = vpop.f32.mrf.mxu0 }
 0x9a6   : > { %v10245_v13 = vadd.f32 %v10209_v46, %v9739_v54 }
 0x9a8   : > { %v10281_v26 = vadd.f32 %v17703_v50, %v10245_v13 }
 0x9a9   : > { %v9707_v6 = vpop.f32.mrf.mxu3 }
 0x9aa   : > { %v15011_v11 = vpack.c.bf16 %v10281_v26, %v10280_v7  ;;  %v9708_v3 = vadd.f32 %v9707_v6, %v9618_v16 }
 0x9ab   : > { %v10211_v58 = vpop.f32.mrf.mxu2 }
 0x9ac   : > { %15047 = vst [vmem:[%s16701_s20 + $0xf0] sm:$0xff] %v15011_v11   ;;  %v10212_v51 = vadd.f32 %v10211_v58, %v10122_v43  ;;  %v9741_v8 = vadd.f32 %v9708_v3, %v17684_v40 }
 0x9ad   : > { %v10124_v55 = vpop.f32.mrf.mxu0 }
 0x9ae   : > { %v10246_v35 = vadd.f32 %v10212_v51, %v9740_v42 }
 0x9b0   : > { %v10282_v15 = vadd.f32 %v17703_v50, %v10246_v35 }
 0x9b3   : > { %v10213_v20 = vpop.f32.mrf.mxu2 }
 0x9b4   : > { %v10214_v47 = vadd.f32 %v10213_v20, %v10124_v55 }
 0x9b6   : > { %v10247_v0 = vadd.f32 %v10214_v47, %v9741_v8 }
 0x9b8   : > { %v10283_v22 = vadd.f32 %v17703_v50, %v10247_v0 }
 0x9ba   : > { %v15016_v10 = vpack.c.bf16 %v10283_v22, %v10282_v15 }
 0x9bc   : > { %15048 = vst [vmem:[%s16701_s20 + $0xf8] sm:$0xff] %v15016_v10  }
 0x9bd   : > { %15159 = shalt.err (!%p15156_p13)
}
 0x9be   : > { %s15228_s26 = smov 64   ;;  %s15229_s20 = smov 4  }
 0x9bf   : > { %15056 = dma.vmem_to_hbm [thread:$0]  (%p15326_p3), %s10364_s9, 4096, %s10366_s24, %s10349_s21, %s15228_s26, %s15228_s26, %s15229_s20  }
 0x9c0 PF: > { %p15062_p0 = scmp.ge.s32.totalorder %s15226_s12, 2  ;;  %s10380_s25 = sand.u32 1, %s15198_s27  }
 0x9c1   : > { %s10381_s16 = scalar_lea.sflag [#allocation6], %s10380_s25 }
 0x9c2   : > { %p15059_p1 = pnand %p15062_p0, %p15335_p8 }
 0x9c4   : > { %p15060_p2 = pneg %p15059_p1 }
 0x9c6   : > { %15193 = dma.done.wait (%p15060_p2), %s10381_s16, 4096  }
 0x9c7   : > { %15195 = vsyncadd (%p15060_p2), %s10381_s16, 4294963200  ;;  %s21_s12 = sadd.s32 1, %s15226_s12   ;;  %s17899_s30 = sld [smem:[#allocation8_spill]] }
 0x9c8   : > { %p18_p4 = scmp.ge.s32.totalorder %s21_s12, 6   ;;  %s17900_s9 = sld [smem:[#allocation9_spill]] }
 0x9c9   : > { %s17901_s10 = sld [smem:[#allocation10_spill]]  ;;  %s17903_s27 = smov %s15202_s28 }
 0x9ca   : > { %s17902_s11 = sld [smem:[#allocation11_spill]]  ;;  %s17904_s28 = smov %s15206_s29 }
 0x9cb   : > { %s17905_s29 = smov %s15344_s23  ;;  %20 = sbr.rel (!%p18_p4) target bundleno = 5 (0x5), region = 110 }
 0x9d0   :  { %10387 = vsyncpa [#allocation6], 1 }
 0x9d1   :  { %10389 = vsyncpa [#allocation6 + $0x1], 1 }

</bundles_post_ra>
